<compile_context>
chip_gen: v7x
topology: tpu7x:2x2x1
jax: 0.10.0
libtpu: 0.0.40
codegen_flags: <defaults>
</compile_context>

<pallas_src>
import jax
import jax.numpy as jnp
from jax import lax
from jax.experimental import pallas as pl
from jax.experimental.pallas import tpu as pltpu

BOARD = 8
HW = BOARD * BOARD          # 64 squares per board
CP = 128                    # padded channel width (lane-dense)
NPOL = 1968                 # real policy width
NPAD = 2048                 # lane-dense padded policy width
NB = 8                      # policy-N blocks (parallel grid axis)
OFFS = tuple((dy, dx) for dy in (-1, 0, 1) for dx in (-1, 0, 1))


# -----------------------------------------------------------------------------
# Kernel 1: fused conv trunk (3x 3x3 conv + folded BN + ReLU) + fused 1x1
# policy/value head convs.  Everything register/VMEM resident; activations in
# (rows, 128-channel-lanes) layout; shifts via pltpu.roll; f32 accumulation.
# -----------------------------------------------------------------------------
def _trunk_kernel(x_ref, convw_ref, convb_ref, headw_ref, headb_ref, out_ref):
    RT = x_ref.shape[0]                       # rows in this tile (whole boards)

    # Square index within its board.  All tap-validity masks derive from it
    # with 1-2 integer compares recomputed per tap (no long-lived mask arrays).
    rows = lax.broadcasted_iota(jnp.int32, (RT, CP), 0)
    pr = rows % HW                            # 0..63: board row = pr//8, col = pr&7

    # Invariant (load-bearing): a tap (dy, dx) passes its mask iff its source
    # row r + dy*8 + dx lies inside the SAME 64-row board as r.  Tiles contain
    # whole boards, so a masked-in tap never crosses a board/tile boundary and
    # every wrap-around row produced by pltpu.roll is multiplied by zero.
    h = x_ref[...]                            # (RT, CP) f32

    for layer in range(3):
        acc = None                            # register accumulator (f32)
        for k, (dy, dx) in enumerate(OFFS):
            s = dy * BOARD + dx               # row shift for this tap
            tap = h if s == 0 else pltpu.roll(h, shift=(-s) % RT, axis=0)

            cond = None                       # per-tap validity (<= 2 compares)
            if dy == -1:
                cond = pr >= BOARD            # source board-row >= 0
            elif dy == 1:
                cond = pr < (HW - BOARD)      # source board-row <= 7
            if dx == -1:
                c = (pr & (BOARD - 1)) >= 1   # source board-col >= 0
                cond = c if cond is None else (cond & c)
            elif dx == 1:
                c = (pr & (BOARD - 1)) < (BOARD - 1)   # source board-col <= 7
                cond = c if cond is None else (cond & c)
            if cond is not None:
                tap = jnp.where(cond, tap, 0.0)

            p = jnp.dot(tap.astype(jnp.bfloat16), convw_ref[layer, k],
                        preferred_element_type=jnp.float32)
            acc = p if acc is None else acc + p

        h = jnp.maximum(acc + convb_ref[layer], 0.0)      # folded BN bias + ReLU

    # Fused 1x1 head convs: lanes 0..31 policy, 32..63 value, rest stay zero.
    head = jnp.dot(h.astype(jnp.bfloat16), headw_ref[...],
                   preferred_element_type=jnp.float32)
    out_ref[...] = jnp.maximum(head + headb_ref[...], 0.0).astype(jnp.bfloat16)


# -----------------------------------------------------------------------------
# Kernel 2: policy_fc (N split over a parallel grid, bf16 weights, f32 accum)
# + the whole value head (fc1 + ReLU + fc2 + tanh) fused into the same body.
# The value head is negligible work, so each grid block recomputes it and
# writes its own output slab (no output block revisited across the parallel
# axis); the wrapper keeps block 0.
# -----------------------------------------------------------------------------
def _heads_kernel(ph_ref, vh_ref, wp_ref, bp_ref, wv1_ref, bv1_ref,
                  wv2_ref, bv2_ref, logits_ref, value_ref):
    # Policy block: bf16 operands, f32 accumulation, lane-dense padded output.
    logits = jnp.dot(ph_ref[...], wp_ref[...],
                     preferred_element_type=jnp.float32)
    logits_ref[...] = logits + bp_ref[...]

    # Value head.
    v1 = jnp.dot(vh_ref[...], wv1_ref[...],
                 preferred_element_type=jnp.float32)
    v1 = jnp.maximum(v1 + bv1_ref[...], 0.0)
    v = jnp.dot(v1, wv2_ref[...], preferred_element_type=jnp.float32)
    value_ref[0] = jnp.tanh(v + bv2_ref[...])


# -----------------------------------------------------------------------------
# Parameter folding / packing / padding (plain JAX, done once, outside the jit).
# -----------------------------------------------------------------------------
def fold_bn(conv_w, conv_b, gamma, beta, mean, var, eps=1e-5):
    """Fold eval-mode BatchNorm into the preceding conv's weight / bias."""
    scale = gamma / jnp.sqrt(var + eps)
    w = conv_w * scale.reshape(-1, *([1] * (conv_w.ndim - 1)))
    b = (conv_b - mean) * scale + beta
    return w, b


def permute_fc_w(W, C, HW_):
    """Torch Linear weight (out, C*HW) whose columns are NCHW-flattened
    (c*HW + hw) -> (C*HW, out) matrix whose ROWS are HW-major (hw*C + c),
    matching the spatial-major flatten this kernel uses for its activations."""
    out = W.shape[0]
    return W.reshape(out, C, HW_).transpose(2, 1, 0).reshape(C * HW_, out)


def pack_params(params):
    """Fold BN, reorder, zero-pad to lane-dense shapes, cast weights to bf16."""
    packed = {}

    # --- conv trunk: (3, 9, 128, 128) bf16 weights (tap-major), (3, 1, 128) f32 biases.
    cw, cb = [], []
    for ci, bi in (("conv1", "bn1"), ("conv2", "bn2"), ("conv3", "bn3")):
        w, b = fold_bn(params[ci]["w"], params[ci]["b"], **params[bi])
        cout, cin = w.shape[0], w.shape[1]
        wm = w.transpose(2, 3, 1, 0).reshape(9, cin, cout)      # tap, Cin, Cout
        cw.append(jnp.pad(wm, ((0, 0), (0, CP - cin), (0, CP - cout))))
        cb.append(jnp.pad(b, (0, CP - cout)).reshape(1, CP))
    packed["conv_w"] = jnp.stack(cw).astype(jnp.bfloat16)
    packed["conv_b"] = jnp.stack(cb)                            # f32

    # --- fused policy||value 1x1 head convs: (128, 128) bf16 weight, (1, 128) f32 bias.
    wp, bp = fold_bn(params["policy_conv"]["w"], params["policy_conv"]["b"],
                     **params["policy_bn"])
    wv, bv = fold_bn(params["value_conv"]["w"], params["value_conv"]["b"],
                     **params["value_bn"])
    C = wp.shape[1]
    head_w = jnp.zeros((CP, CP), jnp.float32)
    head_w = head_w.at[:C, :32].set(wp.reshape(32, C).T)
    head_w = head_w.at[:C, 32:64].set(wv.reshape(32, C).T)
    head_b = jnp.zeros((1, CP), jnp.float32)
    head_b = head_b.at[0, :32].set(bp).at[0, 32:64].set(bv)
    packed["head_w"], packed["head_b"] = head_w.astype(jnp.bfloat16), head_b

    # --- policy_fc: (2048, 2048) bf16 (N padded 1968 -> 2048).
    Wp = permute_fc_w(params["policy_fc"]["w"], 32, HW)          # (2048, 1968)
    packed["wp"] = jnp.pad(Wp, ((0, 0), (0, NPAD - NPOL))).astype(jnp.bfloat16)
    packed["bp"] = jnp.pad(params["policy_fc"]["b"],
                           (0, NPAD - NPOL)).reshape(1, NPAD)

    # --- value_fc1: (2048, 128) bf16 (N padded 64 -> 128).
    Wv1 = permute_fc_w(params["value_fc1"]["w"], 32, HW)         # (2048, 64)
    packed["wv1"] = jnp.pad(Wv1, ((0, 0), (0, 128 - 64))).astype(jnp.bfloat16)
    packed["bv1"] = jnp.pad(params["value_fc1"]["b"], (0, 128 - 64)).reshape(1, 128)

    # --- value_fc2: (128, 128) f32, real weight in rows 0..63 of column 0.
    Wv2 = jnp.zeros((128, 128), jnp.float32)
    Wv2 = Wv2.at[:64, 0].set(params["value_fc2"]["w"][0])
    bv2 = jnp.zeros((1, 128), jnp.float32).at[0, 0].set(params["value_fc2"]["b"][0])
    packed["wv2"], packed["bv2"] = Wv2, bv2
    return packed


# -----------------------------------------------------------------------------
# Forward pass: two pallas_calls + minimal layout glue.
# -----------------------------------------------------------------------------
def forward_pallas(packed, x):
    B = x.shape[0]
    R = B * HW
    cin0 = x.shape[1]

    # NCHW input -> (B*HW, 128): rows = (board, square), lanes = channels (0-padded).
    x_rows = x.transpose(0, 2, 3, 1).reshape(R, cin0)
    x_rows = jnp.pad(x_rows, ((0, 0), (0, CP - cin0)))

    # Row tiles are whole boards: 2 boards (128 rows) per grid step when B is
    # even, else 1.  Keeps the activation and accumulator register-resident
    # while providing a parallel grid axis and a pipelined activation stream.
    bt = 2 if (B % 2 == 0 and B >= 2) else 1
    RT = bt * HW
    grid1 = (R // RT,)

    # ---- kernel 1: conv trunk + fused 1x1 head convs -------------------------
    H = pl.pallas_call(
        _trunk_kernel,
        out_shape=jax.ShapeDtypeStruct((R, CP), jnp.bfloat16),
        grid=grid1,
        in_specs=[
            pl.BlockSpec((RT, CP), lambda i: (i, 0)),
            pl.BlockSpec((3, 9, CP, CP), lambda i: (0, 0, 0, 0)),
            pl.BlockSpec((3, 1, CP), lambda i: (0, 0, 0)),
            pl.BlockSpec((CP, CP), lambda i: (0, 0)),
            pl.BlockSpec((1, CP), lambda i: (0, 0)),
        ],
        out_specs=pl.BlockSpec((RT, CP), lambda i: (i, 0)),
        compiler_params=pltpu.CompilerParams(
            dimension_semantics=("parallel",)),
    )(x_rows, packed["conv_w"], packed["conv_b"],
      packed["head_w"], packed["head_b"])

    # Spatial-major flatten (hw*32 + c) matching the pre-permuted FC weights.
    Ph = H[:, :32].reshape(B, HW * 32)
    Vh = H[:, 32:64].reshape(B, HW * 32)

    K = HW * 32
    NBLK = NPAD // NB

    # ---- kernel 2: policy_fc (parallel over N blocks) + value head -----------
    logits_pad, value_blocks = pl.pallas_call(
        _heads_kernel,
        out_shape=(jax.ShapeDtypeStruct((B, NPAD), jnp.float32),
                   jax.ShapeDtypeStruct((NB, B, 128), jnp.float32)),
        grid=(NB,),
        in_specs=[
            pl.BlockSpec((B, K), lambda j: (0, 0)),
            pl.BlockSpec((B, K), lambda j: (0, 0)),
            pl.BlockSpec((K, NBLK), lambda j: (0, j)),
            pl.BlockSpec((1, NBLK), lambda j: (0, j)),
            pl.BlockSpec((K, 128), lambda j: (0, 0)),
            pl.BlockSpec((1, 128), lambda j: (0, 0)),
            pl.BlockSpec((128, 128), lambda j: (0, 0)),
            pl.BlockSpec((1, 128), lambda j: (0, 0)),
        ],
        out_specs=(pl.BlockSpec((B, NBLK), lambda j: (0, j)),
                   pl.BlockSpec((1, B, 128), lambda j: (j, 0, 0))),
        compiler_params=pltpu.CompilerParams(
            dimension_semantics=("parallel",)),
    )(Ph, Vh, packed["wp"], packed["bp"], packed["wv1"], packed["bv1"],
      packed["wv2"], packed["bv2"])

    policy_logits = logits_pad[:, :NPOL]
    value = value_blocks[0, :, :1]
    return policy_logits, value


# -----------------------------------------------------------------------------
# Deterministic synthetic parameters (shapes from ChessNet.__init__).
# -----------------------------------------------------------------------------
def init_params(key, num_channels=64):
    keys = iter(jax.random.split(key, 64))

    def nrm(shape, scale):
        return scale * jax.random.normal(next(keys), shape, dtype=jnp.float32)

    def conv(cin, cout, k):
        fan = cin * k * k
        return {"w": nrm((cout, cin, k, k), fan ** -0.5), "b": nrm((cout,), 0.05)}

    def bn(c):
        return {"gamma": 1.0 + 0.1 * jax.random.normal(next(keys), (c,)),
                "beta": 0.1 * jax.random.normal(next(keys), (c,)),
                "mean": 0.1 * jax.random.normal(next(keys), (c,)),
                "var": 1.0 + 0.1 * jnp.abs(jax.random.normal(next(keys), (c,)))}

    def lin(cin, cout):
        return {"w": nrm((cout, cin), cin ** -0.5), "b": nrm((cout,), 0.05)}

    p = {}
    p["conv1"], p["bn1"] = conv(16, num_channels, 3), bn(num_channels)
    p["conv2"], p["bn2"] = conv(num_channels, num_channels, 3), bn(num_channels)
    p["conv3"], p["bn3"] = conv(num_channels, num_channels, 3), bn(num_channels)
    p["policy_conv"], p["policy_bn"] = conv(num_channels, 32, 1), bn(32)
    p["policy_fc"] = lin(32 * HW, 1968)
    p["value_conv"], p["value_bn"] = conv(num_channels, 32, 1), bn(32)
    p["value_fc1"] = lin(32 * HW, 64)
    p["value_fc2"] = lin(64, 1)
    return p


# -----------------------------------------------------------------------------
# Pure-JAX reference with exact PyTorch (NCHW / channel-major flatten) semantics.
# -----------------------------------------------------------------------------
def forward_reference(params, x):
    hi = jax.lax.Precision.HIGHEST

    def conv(h, pw, pb, pad):
        y = jax.lax.conv_general_dilated(
            h, pw, window_strides=(1, 1),
            padding=((pad, pad), (pad, pad)),
            dimension_numbers=("NCHW", "OIHW", "NCHW"),
            precision=hi)
        return y + pb[None, :, None, None]

    def bn(h, bnp, eps=1e-5):
        g, b_, m, v = bnp["gamma"], bnp["beta"], bnp["mean"], bnp["var"]
        return (h - m[None, :, None, None]) / jnp.sqrt(
            v[None, :, None, None] + eps) * g[None, :, None, None] \
            + b_[None, :, None, None]

    relu = lambda t: jnp.maximum(t, 0.0)
    B = x.shape[0]
    h = relu(bn(conv(x, params["conv1"]["w"], params["conv1"]["b"], 1), params["bn1"]))
    h = relu(bn(conv(h, params["conv2"]["w"], params["conv2"]["b"], 1), params["bn2"]))
    h = relu(bn(conv(h, params["conv3"]["w"], params["conv3"]["b"], 1), params["bn3"]))

    pol = relu(bn(conv(h, params["policy_conv"]["w"], params["policy_conv"]["b"], 0),
                  params["policy_bn"])).reshape(B, -1)
    logits = jnp.dot(pol, params["policy_fc"]["w"].T, precision=hi) \
        + params["policy_fc"]["b"]

    val = relu(bn(conv(h, params["value_conv"]["w"], params["value_conv"]["b"], 0),
                  params["value_bn"])).reshape(B, -1)
    val = relu(jnp.dot(val, params["value_fc1"]["w"].T, precision=hi)
               + params["value_fc1"]["b"])
    val = jnp.tanh(jnp.dot(val, params["value_fc2"]["w"].T, precision=hi)
                   + params["value_fc2"]["b"])
    return logits, val


if __name__ == "__main__":
    key = jax.random.PRNGKey(0)
    kp, kx = jax.random.split(key)
    params = init_params(kp, num_channels=64)
    x = jax.random.normal(kx, (2, 16, 8, 8), dtype=jnp.float32)  # (B, 16, 8, 8)

    packed = pack_params(params)                 # done once, outside the jit
    logits, value = jax.jit(forward_pallas)(packed, x)
    jax.block_until_ready((logits, value))

    ref_logits, ref_value = jax.jit(forward_reference)(params, x)
    assert logits.shape == (2, 1968) and value.shape == (2, 1)
    # bf16 trunk + FC weights (f32 accumulation) shift numerics slightly vs the
    # f32 HIGHEST reference; structural errors would be O(0.1-1), so 3e-2 still
    # cleanly separates correct from broken results.
    assert jnp.allclose(logits, ref_logits, rtol=3e-2, atol=3e-2), "policy mismatch"
    assert jnp.allclose(value, ref_value, rtol=3e-2, atol=3e-2), "value mismatch"

    print("KERNEL_OK")
</pallas_src>

<mosaic_0001>
module attributes {stable_mosaic.version = 11 : i64} {
  func.func @_trunk_kernel(%arg0: i32, %arg1: memref<128x128xf32, #tpu.memory_space<vmem>>, %arg2: memref<3x9x128x128xbf16, #tpu.memory_space<vmem>>, %arg3: memref<3x1x128xf32, #tpu.memory_space<vmem>>, %arg4: memref<128x128xbf16, #tpu.memory_space<vmem>>, %arg5: memref<1x128xf32, #tpu.memory_space<vmem>>, %arg6: memref<128x128xbf16, #tpu.memory_space<vmem>>) attributes {dimension_semantics = [#tpu.dimension_semantics<parallel>], iteration_bounds = array<i64: 1>, scalar_prefetch = 0 : i64, scratch_operands = 0 : i64, tpu.core_type = #tpu.core_type<tc>, window_params = [{transform_indices = @transform_0, window_bounds = array<i64: 128, 128>}, {pipeline_mode = #tpu.pipeline_mode<synchronous>, transform_indices = @transform_1, window_bounds = array<i64: 3, 9, 128, 128>}, {pipeline_mode = #tpu.pipeline_mode<synchronous>, transform_indices = @transform_2, window_bounds = array<i64: 3, 1, 128>}, {pipeline_mode = #tpu.pipeline_mode<synchronous>, transform_indices = @transform_3, window_bounds = array<i64: 128, 128>}, {pipeline_mode = #tpu.pipeline_mode<synchronous>, transform_indices = @transform_4, window_bounds = array<i64: 1, 128>}, {transform_indices = @transform_5, window_bounds = array<i64: 128, 128>}]} {
    %0 = tpu.iota {dimensions = array<i32: 0>} : vector<128x128xi32>
    %c64_i32 = arith.constant 64 : i32
    %c0_i32 = arith.constant 0 : i32
    %1 = arith.cmpi eq, %c64_i32, %c0_i32 : i32
    %c1_i32 = arith.constant 1 : i32
    %2 = arith.select %1, %c1_i32, %c64_i32 : i32
    %3 = vector.broadcast %2 : i32 to vector<128x128xi32>
    %4 = arith.remsi %0, %3 : vector<128x128xi32>
    %c0_i32_0 = arith.constant 0 : i32
    %5 = vector.broadcast %c0_i32_0 : i32 to vector<128x128xi32>
    %6 = arith.cmpi ne, %4, %5 : vector<128x128xi32>
    %c0_i32_1 = arith.constant 0 : i32
    %7 = vector.broadcast %c0_i32_1 : i32 to vector<128x128xi32>
    %8 = arith.cmpi slt, %4, %7 : vector<128x128xi32>
    %c0_i32_2 = arith.constant 0 : i32
    %9 = arith.cmpi slt, %2, %c0_i32_2 : i32
    %10 = vector.broadcast %9 : i1 to vector<128x128xi1>
    %11 = vector.broadcast %10 : vector<128x128xi1> to vector<128x128xi1>
    %12 = arith.xori %8, %11 : vector<128x128xi1>
    %13 = arith.andi %12, %6 : vector<128x128xi1>
    %14 = vector.broadcast %2 : i32 to vector<128x128xi32>
    %15 = arith.addi %4, %14 : vector<128x128xi32>
    %16 = arith.select %13, %15, %4 : vector<128x128xi1>, vector<128x128xi32>
    %c0 = arith.constant 0 : index
    %c0_3 = arith.constant 0 : index
    %17 = vector.load %arg1[%c0, %c0_3] : memref<128x128xf32, #tpu.memory_space<vmem>>, vector<128x128xf32>
    %c9_i32 = arith.constant 9 : i32
    %18 = tpu.dynamic_rotate %17 by %c9_i32 dim 0 : vector<128x128xf32>, i32 -> vector<128x128xf32>
    %c8_i32 = arith.constant 8 : i32
    %19 = vector.broadcast %c8_i32 : i32 to vector<128x128xi32>
    %20 = arith.cmpi sge, %16, %19 : vector<128x128xi32>
    %c7_i32 = arith.constant 7 : i32
    %21 = vector.broadcast %c7_i32 : i32 to vector<128x128xi32>
    %22 = arith.andi %16, %21 : vector<128x128xi32>
    %c1_i32_4 = arith.constant 1 : i32
    %23 = vector.broadcast %c1_i32_4 : i32 to vector<128x128xi32>
    %24 = arith.cmpi sge, %22, %23 : vector<128x128xi32>
    %25 = arith.andi %20, %24 : vector<128x128xi1>
    %cst = arith.constant 0.000000e+00 : f32
    %26 = vector.broadcast %cst : f32 to vector<128x128xf32>
    %27 = arith.select %25, %18, %26 : vector<128x128xi1>, vector<128x128xf32>
    %28 = arith.truncf %27 : vector<128x128xf32> to vector<128x128xbf16>
    %c0_5 = arith.constant 0 : index
    %c0_6 = arith.constant 0 : index
    %c0_7 = arith.constant 0 : index
    %c0_8 = arith.constant 0 : index
    %29 = vector.load %arg2[%c0_5, %c0_6, %c0_7, %c0_8] : memref<3x9x128x128xbf16, #tpu.memory_space<vmem>>, vector<1x1x128x128xbf16>
    %30 = vector.shape_cast %29 : vector<1x1x128x128xbf16> to vector<128x128xbf16>
    %cst_9 = arith.constant dense<0.000000e+00> : vector<128x128xf32>
    %31 = tpu.matmul %28, %30, %cst_9 {dimension_numbers = #tpu.dot_dimension_numbers<[1], [0], [0], [1], [0, 0, 1, 1], [], []>} : vector<128x128xbf16>, vector<128x128xbf16>, vector<128x128xf32> -> vector<128x128xf32>
    %c8_i32_10 = arith.constant 8 : i32
    %32 = tpu.dynamic_rotate %17 by %c8_i32_10 dim 0 : vector<128x128xf32>, i32 -> vector<128x128xf32>
    %c8_i32_11 = arith.constant 8 : i32
    %33 = vector.broadcast %c8_i32_11 : i32 to vector<128x128xi32>
    %34 = arith.cmpi sge, %16, %33 : vector<128x128xi32>
    %cst_12 = arith.constant 0.000000e+00 : f32
    %35 = vector.broadcast %cst_12 : f32 to vector<128x128xf32>
    %36 = arith.select %34, %32, %35 : vector<128x128xi1>, vector<128x128xf32>
    %37 = arith.truncf %36 : vector<128x128xf32> to vector<128x128xbf16>
    %c0_13 = arith.constant 0 : index
    %c1 = arith.constant 1 : index
    %c0_14 = arith.constant 0 : index
    %c0_15 = arith.constant 0 : index
    %38 = vector.load %arg2[%c0_13, %c1, %c0_14, %c0_15] : memref<3x9x128x128xbf16, #tpu.memory_space<vmem>>, vector<1x1x128x128xbf16>
    %39 = vector.shape_cast %38 : vector<1x1x128x128xbf16> to vector<128x128xbf16>
    %cst_16 = arith.constant dense<0.000000e+00> : vector<128x128xf32>
    %40 = tpu.matmul %37, %39, %cst_16 {dimension_numbers = #tpu.dot_dimension_numbers<[1], [0], [0], [1], [0, 0, 1, 1], [], []>} : vector<128x128xbf16>, vector<128x128xbf16>, vector<128x128xf32> -> vector<128x128xf32>
    %41 = arith.addf %31, %40 : vector<128x128xf32>
    %c7_i32_17 = arith.constant 7 : i32
    %42 = tpu.dynamic_rotate %17 by %c7_i32_17 dim 0 : vector<128x128xf32>, i32 -> vector<128x128xf32>
    %c8_i32_18 = arith.constant 8 : i32
    %43 = vector.broadcast %c8_i32_18 : i32 to vector<128x128xi32>
    %44 = arith.cmpi sge, %16, %43 : vector<128x128xi32>
    %c7_i32_19 = arith.constant 7 : i32
    %45 = vector.broadcast %c7_i32_19 : i32 to vector<128x128xi32>
    %46 = arith.andi %16, %45 : vector<128x128xi32>
    %c7_i32_20 = arith.constant 7 : i32
    %47 = vector.broadcast %c7_i32_20 : i32 to vector<128x128xi32>
    %48 = arith.cmpi slt, %46, %47 : vector<128x128xi32>
    %49 = arith.andi %44, %48 : vector<128x128xi1>
    %cst_21 = arith.constant 0.000000e+00 : f32
    %50 = vector.broadcast %cst_21 : f32 to vector<128x128xf32>
    %51 = arith.select %49, %42, %50 : vector<128x128xi1>, vector<128x128xf32>
    %52 = arith.truncf %51 : vector<128x128xf32> to vector<128x128xbf16>
    %c0_22 = arith.constant 0 : index
    %c2 = arith.constant 2 : index
    %c0_23 = arith.constant 0 : index
    %c0_24 = arith.constant 0 : index
    %53 = vector.load %arg2[%c0_22, %c2, %c0_23, %c0_24] : memref<3x9x128x128xbf16, #tpu.memory_space<vmem>>, vector<1x1x128x128xbf16>
    %54 = vector.shape_cast %53 : vector<1x1x128x128xbf16> to vector<128x128xbf16>
    %cst_25 = arith.constant dense<0.000000e+00> : vector<128x128xf32>
    %55 = tpu.matmul %52, %54, %cst_25 {dimension_numbers = #tpu.dot_dimension_numbers<[1], [0], [0], [1], [0, 0, 1, 1], [], []>} : vector<128x128xbf16>, vector<128x128xbf16>, vector<128x128xf32> -> vector<128x128xf32>
    %56 = arith.addf %41, %55 : vector<128x128xf32>
    %c1_i32_26 = arith.constant 1 : i32
    %57 = tpu.dynamic_rotate %17 by %c1_i32_26 dim 0 : vector<128x128xf32>, i32 -> vector<128x128xf32>
    %c7_i32_27 = arith.constant 7 : i32
    %58 = vector.broadcast %c7_i32_27 : i32 to vector<128x128xi32>
    %59 = arith.andi %16, %58 : vector<128x128xi32>
    %c1_i32_28 = arith.constant 1 : i32
    %60 = vector.broadcast %c1_i32_28 : i32 to vector<128x128xi32>
    %61 = arith.cmpi sge, %59, %60 : vector<128x128xi32>
    %cst_29 = arith.constant 0.000000e+00 : f32
    %62 = vector.broadcast %cst_29 : f32 to vector<128x128xf32>
    %63 = arith.select %61, %57, %62 : vector<128x128xi1>, vector<128x128xf32>
    %64 = arith.truncf %63 : vector<128x128xf32> to vector<128x128xbf16>
    %c0_30 = arith.constant 0 : index
    %c3 = arith.constant 3 : index
    %c0_31 = arith.constant 0 : index
    %c0_32 = arith.constant 0 : index
    %65 = vector.load %arg2[%c0_30, %c3, %c0_31, %c0_32] : memref<3x9x128x128xbf16, #tpu.memory_space<vmem>>, vector<1x1x128x128xbf16>
    %66 = vector.shape_cast %65 : vector<1x1x128x128xbf16> to vector<128x128xbf16>
    %cst_33 = arith.constant dense<0.000000e+00> : vector<128x128xf32>
    %67 = tpu.matmul %64, %66, %cst_33 {dimension_numbers = #tpu.dot_dimension_numbers<[1], [0], [0], [1], [0, 0, 1, 1], [], []>} : vector<128x128xbf16>, vector<128x128xbf16>, vector<128x128xf32> -> vector<128x128xf32>
    %68 = arith.addf %56, %67 : vector<128x128xf32>
    %69 = arith.truncf %17 : vector<128x128xf32> to vector<128x128xbf16>
    %c0_34 = arith.constant 0 : index
    %c4 = arith.constant 4 : index
    %c0_35 = arith.constant 0 : index
    %c0_36 = arith.constant 0 : index
    %70 = vector.load %arg2[%c0_34, %c4, %c0_35, %c0_36] : memref<3x9x128x128xbf16, #tpu.memory_space<vmem>>, vector<1x1x128x128xbf16>
    %71 = vector.shape_cast %70 : vector<1x1x128x128xbf16> to vector<128x128xbf16>
    %cst_37 = arith.constant dense<0.000000e+00> : vector<128x128xf32>
    %72 = tpu.matmul %69, %71, %cst_37 {dimension_numbers = #tpu.dot_dimension_numbers<[1], [0], [0], [1], [0, 0, 1, 1], [], []>} : vector<128x128xbf16>, vector<128x128xbf16>, vector<128x128xf32> -> vector<128x128xf32>
    %73 = arith.addf %68, %72 : vector<128x128xf32>
    %c127_i32 = arith.constant 127 : i32
    %74 = tpu.dynamic_rotate %17 by %c127_i32 dim 0 : vector<128x128xf32>, i32 -> vector<128x128xf32>
    %c7_i32_38 = arith.constant 7 : i32
    %75 = vector.broadcast %c7_i32_38 : i32 to vector<128x128xi32>
    %76 = arith.andi %16, %75 : vector<128x128xi32>
    %c7_i32_39 = arith.constant 7 : i32
    %77 = vector.broadcast %c7_i32_39 : i32 to vector<128x128xi32>
    %78 = arith.cmpi slt, %76, %77 : vector<128x128xi32>
    %cst_40 = arith.constant 0.000000e+00 : f32
    %79 = vector.broadcast %cst_40 : f32 to vector<128x128xf32>
    %80 = arith.select %78, %74, %79 : vector<128x128xi1>, vector<128x128xf32>
    %81 = arith.truncf %80 : vector<128x128xf32> to vector<128x128xbf16>
    %c0_41 = arith.constant 0 : index
    %c5 = arith.constant 5 : index
    %c0_42 = arith.constant 0 : index
    %c0_43 = arith.constant 0 : index
    %82 = vector.load %arg2[%c0_41, %c5, %c0_42, %c0_43] : memref<3x9x128x128xbf16, #tpu.memory_space<vmem>>, vector<1x1x128x128xbf16>
    %83 = vector.shape_cast %82 : vector<1x1x128x128xbf16> to vector<128x128xbf16>
    %cst_44 = arith.constant dense<0.000000e+00> : vector<128x128xf32>
    %84 = tpu.matmul %81, %83, %cst_44 {dimension_numbers = #tpu.dot_dimension_numbers<[1], [0], [0], [1], [0, 0, 1, 1], [], []>} : vector<128x128xbf16>, vector<128x128xbf16>, vector<128x128xf32> -> vector<128x128xf32>
    %85 = arith.addf %73, %84 : vector<128x128xf32>
    %c121_i32 = arith.constant 121 : i32
    %86 = tpu.dynamic_rotate %17 by %c121_i32 dim 0 : vector<128x128xf32>, i32 -> vector<128x128xf32>
    %c56_i32 = arith.constant 56 : i32
    %87 = vector.broadcast %c56_i32 : i32 to vector<128x128xi32>
    %88 = arith.cmpi slt, %16, %87 : vector<128x128xi32>
    %c7_i32_45 = arith.constant 7 : i32
    %89 = vector.broadcast %c7_i32_45 : i32 to vector<128x128xi32>
    %90 = arith.andi %16, %89 : vector<128x128xi32>
    %c1_i32_46 = arith.constant 1 : i32
    %91 = vector.broadcast %c1_i32_46 : i32 to vector<128x128xi32>
    %92 = arith.cmpi sge, %90, %91 : vector<128x128xi32>
    %93 = arith.andi %88, %92 : vector<128x128xi1>
    %cst_47 = arith.constant 0.000000e+00 : f32
    %94 = vector.broadcast %cst_47 : f32 to vector<128x128xf32>
    %95 = arith.select %93, %86, %94 : vector<128x128xi1>, vector<128x128xf32>
    %96 = arith.truncf %95 : vector<128x128xf32> to vector<128x128xbf16>
    %c0_48 = arith.constant 0 : index
    %c6 = arith.constant 6 : index
    %c0_49 = arith.constant 0 : index
    %c0_50 = arith.constant 0 : index
    %97 = vector.load %arg2[%c0_48, %c6, %c0_49, %c0_50] : memref<3x9x128x128xbf16, #tpu.memory_space<vmem>>, vector<1x1x128x128xbf16>
    %98 = vector.shape_cast %97 : vector<1x1x128x128xbf16> to vector<128x128xbf16>
    %cst_51 = arith.constant dense<0.000000e+00> : vector<128x128xf32>
    %99 = tpu.matmul %96, %98, %cst_51 {dimension_numbers = #tpu.dot_dimension_numbers<[1], [0], [0], [1], [0, 0, 1, 1], [], []>} : vector<128x128xbf16>, vector<128x128xbf16>, vector<128x128xf32> -> vector<128x128xf32>
    %100 = arith.addf %85, %99 : vector<128x128xf32>
    %c120_i32 = arith.constant 120 : i32
    %101 = tpu.dynamic_rotate %17 by %c120_i32 dim 0 : vector<128x128xf32>, i32 -> vector<128x128xf32>
    %c56_i32_52 = arith.constant 56 : i32
    %102 = vector.broadcast %c56_i32_52 : i32 to vector<128x128xi32>
    %103 = arith.cmpi slt, %16, %102 : vector<128x128xi32>
    %cst_53 = arith.constant 0.000000e+00 : f32
    %104 = vector.broadcast %cst_53 : f32 to vector<128x128xf32>
    %105 = arith.select %103, %101, %104 : vector<128x128xi1>, vector<128x128xf32>
    %106 = arith.truncf %105 : vector<128x128xf32> to vector<128x128xbf16>
    %c0_54 = arith.constant 0 : index
    %c7 = arith.constant 7 : index
    %c0_55 = arith.constant 0 : index
    %c0_56 = arith.constant 0 : index
    %107 = vector.load %arg2[%c0_54, %c7, %c0_55, %c0_56] : memref<3x9x128x128xbf16, #tpu.memory_space<vmem>>, vector<1x1x128x128xbf16>
    %108 = vector.shape_cast %107 : vector<1x1x128x128xbf16> to vector<128x128xbf16>
    %cst_57 = arith.constant dense<0.000000e+00> : vector<128x128xf32>
    %109 = tpu.matmul %106, %108, %cst_57 {dimension_numbers = #tpu.dot_dimension_numbers<[1], [0], [0], [1], [0, 0, 1, 1], [], []>} : vector<128x128xbf16>, vector<128x128xbf16>, vector<128x128xf32> -> vector<128x128xf32>
    %110 = arith.addf %100, %109 : vector<128x128xf32>
    %c119_i32 = arith.constant 119 : i32
    %111 = tpu.dynamic_rotate %17 by %c119_i32 dim 0 : vector<128x128xf32>, i32 -> vector<128x128xf32>
    %c56_i32_58 = arith.constant 56 : i32
    %112 = vector.broadcast %c56_i32_58 : i32 to vector<128x128xi32>
    %113 = arith.cmpi slt, %16, %112 : vector<128x128xi32>
    %c7_i32_59 = arith.constant 7 : i32
    %114 = vector.broadcast %c7_i32_59 : i32 to vector<128x128xi32>
    %115 = arith.andi %16, %114 : vector<128x128xi32>
    %c7_i32_60 = arith.constant 7 : i32
    %116 = vector.broadcast %c7_i32_60 : i32 to vector<128x128xi32>
    %117 = arith.cmpi slt, %115, %116 : vector<128x128xi32>
    %118 = arith.andi %113, %117 : vector<128x128xi1>
    %cst_61 = arith.constant 0.000000e+00 : f32
    %119 = vector.broadcast %cst_61 : f32 to vector<128x128xf32>
    %120 = arith.select %118, %111, %119 : vector<128x128xi1>, vector<128x128xf32>
    %121 = arith.truncf %120 : vector<128x128xf32> to vector<128x128xbf16>
    %c0_62 = arith.constant 0 : index
    %c8 = arith.constant 8 : index
    %c0_63 = arith.constant 0 : index
    %c0_64 = arith.constant 0 : index
    %122 = vector.load %arg2[%c0_62, %c8, %c0_63, %c0_64] : memref<3x9x128x128xbf16, #tpu.memory_space<vmem>>, vector<1x1x128x128xbf16>
    %123 = vector.shape_cast %122 : vector<1x1x128x128xbf16> to vector<128x128xbf16>
    %cst_65 = arith.constant dense<0.000000e+00> : vector<128x128xf32>
    %124 = tpu.matmul %121, %123, %cst_65 {dimension_numbers = #tpu.dot_dimension_numbers<[1], [0], [0], [1], [0, 0, 1, 1], [], []>} : vector<128x128xbf16>, vector<128x128xbf16>, vector<128x128xf32> -> vector<128x128xf32>
    %125 = arith.addf %110, %124 : vector<128x128xf32>
    %c0_66 = arith.constant 0 : index
    %c0_67 = arith.constant 0 : index
    %c0_68 = arith.constant 0 : index
    %126 = vector.load %arg3[%c0_66, %c0_67, %c0_68] : memref<3x1x128xf32, #tpu.memory_space<vmem>>, vector<1x1x128xf32>
    %127 = vector.shape_cast %126 : vector<1x1x128xf32> to vector<1x128xf32>
    %128 = vector.broadcast %127 : vector<1x128xf32> to vector<128x128xf32>
    %129 = arith.addf %125, %128 : vector<128x128xf32>
    %cst_69 = arith.constant 0.000000e+00 : f32
    %130 = vector.broadcast %cst_69 : f32 to vector<128x128xf32>
    %131 = arith.maximumf %129, %130 : vector<128x128xf32>
    %c9_i32_70 = arith.constant 9 : i32
    %132 = tpu.dynamic_rotate %131 by %c9_i32_70 dim 0 : vector<128x128xf32>, i32 -> vector<128x128xf32>
    %c8_i32_71 = arith.constant 8 : i32
    %133 = vector.broadcast %c8_i32_71 : i32 to vector<128x128xi32>
    %134 = arith.cmpi sge, %16, %133 : vector<128x128xi32>
    %c7_i32_72 = arith.constant 7 : i32
    %135 = vector.broadcast %c7_i32_72 : i32 to vector<128x128xi32>
    %136 = arith.andi %16, %135 : vector<128x128xi32>
    %c1_i32_73 = arith.constant 1 : i32
    %137 = vector.broadcast %c1_i32_73 : i32 to vector<128x128xi32>
    %138 = arith.cmpi sge, %136, %137 : vector<128x128xi32>
    %139 = arith.andi %134, %138 : vector<128x128xi1>
    %cst_74 = arith.constant 0.000000e+00 : f32
    %140 = vector.broadcast %cst_74 : f32 to vector<128x128xf32>
    %141 = arith.select %139, %132, %140 : vector<128x128xi1>, vector<128x128xf32>
    %142 = arith.truncf %141 : vector<128x128xf32> to vector<128x128xbf16>
    %c1_75 = arith.constant 1 : index
    %c0_76 = arith.constant 0 : index
    %c0_77 = arith.constant 0 : index
    %c0_78 = arith.constant 0 : index
    %143 = vector.load %arg2[%c1_75, %c0_76, %c0_77, %c0_78] : memref<3x9x128x128xbf16, #tpu.memory_space<vmem>>, vector<1x1x128x128xbf16>
    %144 = vector.shape_cast %143 : vector<1x1x128x128xbf16> to vector<128x128xbf16>
    %cst_79 = arith.constant dense<0.000000e+00> : vector<128x128xf32>
    %145 = tpu.matmul %142, %144, %cst_79 {dimension_numbers = #tpu.dot_dimension_numbers<[1], [0], [0], [1], [0, 0, 1, 1], [], []>} : vector<128x128xbf16>, vector<128x128xbf16>, vector<128x128xf32> -> vector<128x128xf32>
    %c8_i32_80 = arith.constant 8 : i32
    %146 = tpu.dynamic_rotate %131 by %c8_i32_80 dim 0 : vector<128x128xf32>, i32 -> vector<128x128xf32>
    %c8_i32_81 = arith.constant 8 : i32
    %147 = vector.broadcast %c8_i32_81 : i32 to vector<128x128xi32>
    %148 = arith.cmpi sge, %16, %147 : vector<128x128xi32>
    %cst_82 = arith.constant 0.000000e+00 : f32
    %149 = vector.broadcast %cst_82 : f32 to vector<128x128xf32>
    %150 = arith.select %148, %146, %149 : vector<128x128xi1>, vector<128x128xf32>
    %151 = arith.truncf %150 : vector<128x128xf32> to vector<128x128xbf16>
    %c1_83 = arith.constant 1 : index
    %c1_84 = arith.constant 1 : index
    %c0_85 = arith.constant 0 : index
    %c0_86 = arith.constant 0 : index
    %152 = vector.load %arg2[%c1_83, %c1_84, %c0_85, %c0_86] : memref<3x9x128x128xbf16, #tpu.memory_space<vmem>>, vector<1x1x128x128xbf16>
    %153 = vector.shape_cast %152 : vector<1x1x128x128xbf16> to vector<128x128xbf16>
    %cst_87 = arith.constant dense<0.000000e+00> : vector<128x128xf32>
    %154 = tpu.matmul %151, %153, %cst_87 {dimension_numbers = #tpu.dot_dimension_numbers<[1], [0], [0], [1], [0, 0, 1, 1], [], []>} : vector<128x128xbf16>, vector<128x128xbf16>, vector<128x128xf32> -> vector<128x128xf32>
    %155 = arith.addf %145, %154 : vector<128x128xf32>
    %c7_i32_88 = arith.constant 7 : i32
    %156 = tpu.dynamic_rotate %131 by %c7_i32_88 dim 0 : vector<128x128xf32>, i32 -> vector<128x128xf32>
    %c8_i32_89 = arith.constant 8 : i32
    %157 = vector.broadcast %c8_i32_89 : i32 to vector<128x128xi32>
    %158 = arith.cmpi sge, %16, %157 : vector<128x128xi32>
    %c7_i32_90 = arith.constant 7 : i32
    %159 = vector.broadcast %c7_i32_90 : i32 to vector<128x128xi32>
    %160 = arith.andi %16, %159 : vector<128x128xi32>
    %c7_i32_91 = arith.constant 7 : i32
    %161 = vector.broadcast %c7_i32_91 : i32 to vector<128x128xi32>
    %162 = arith.cmpi slt, %160, %161 : vector<128x128xi32>
    %163 = arith.andi %158, %162 : vector<128x128xi1>
    %cst_92 = arith.constant 0.000000e+00 : f32
    %164 = vector.broadcast %cst_92 : f32 to vector<128x128xf32>
    %165 = arith.select %163, %156, %164 : vector<128x128xi1>, vector<128x128xf32>
    %166 = arith.truncf %165 : vector<128x128xf32> to vector<128x128xbf16>
    %c1_93 = arith.constant 1 : index
    %c2_94 = arith.constant 2 : index
    %c0_95 = arith.constant 0 : index
    %c0_96 = arith.constant 0 : index
    %167 = vector.load %arg2[%c1_93, %c2_94, %c0_95, %c0_96] : memref<3x9x128x128xbf16, #tpu.memory_space<vmem>>, vector<1x1x128x128xbf16>
    %168 = vector.shape_cast %167 : vector<1x1x128x128xbf16> to vector<128x128xbf16>
    %cst_97 = arith.constant dense<0.000000e+00> : vector<128x128xf32>
    %169 = tpu.matmul %166, %168, %cst_97 {dimension_numbers = #tpu.dot_dimension_numbers<[1], [0], [0], [1], [0, 0, 1, 1], [], []>} : vector<128x128xbf16>, vector<128x128xbf16>, vector<128x128xf32> -> vector<128x128xf32>
    %170 = arith.addf %155, %169 : vector<128x128xf32>
    %c1_i32_98 = arith.constant 1 : i32
    %171 = tpu.dynamic_rotate %131 by %c1_i32_98 dim 0 : vector<128x128xf32>, i32 -> vector<128x128xf32>
    %c7_i32_99 = arith.constant 7 : i32
    %172 = vector.broadcast %c7_i32_99 : i32 to vector<128x128xi32>
    %173 = arith.andi %16, %172 : vector<128x128xi32>
    %c1_i32_100 = arith.constant 1 : i32
    %174 = vector.broadcast %c1_i32_100 : i32 to vector<128x128xi32>
    %175 = arith.cmpi sge, %173, %174 : vector<128x128xi32>
    %cst_101 = arith.constant 0.000000e+00 : f32
    %176 = vector.broadcast %cst_101 : f32 to vector<128x128xf32>
    %177 = arith.select %175, %171, %176 : vector<128x128xi1>, vector<128x128xf32>
    %178 = arith.truncf %177 : vector<128x128xf32> to vector<128x128xbf16>
    %c1_102 = arith.constant 1 : index
    %c3_103 = arith.constant 3 : index
    %c0_104 = arith.constant 0 : index
    %c0_105 = arith.constant 0 : index
    %179 = vector.load %arg2[%c1_102, %c3_103, %c0_104, %c0_105] : memref<3x9x128x128xbf16, #tpu.memory_space<vmem>>, vector<1x1x128x128xbf16>
    %180 = vector.shape_cast %179 : vector<1x1x128x128xbf16> to vector<128x128xbf16>
    %cst_106 = arith.constant dense<0.000000e+00> : vector<128x128xf32>
    %181 = tpu.matmul %178, %180, %cst_106 {dimension_numbers = #tpu.dot_dimension_numbers<[1], [0], [0], [1], [0, 0, 1, 1], [], []>} : vector<128x128xbf16>, vector<128x128xbf16>, vector<128x128xf32> -> vector<128x128xf32>
    %182 = arith.addf %170, %181 : vector<128x128xf32>
    %183 = arith.truncf %131 : vector<128x128xf32> to vector<128x128xbf16>
    %c1_107 = arith.constant 1 : index
    %c4_108 = arith.constant 4 : index
    %c0_109 = arith.constant 0 : index
    %c0_110 = arith.constant 0 : index
    %184 = vector.load %arg2[%c1_107, %c4_108, %c0_109, %c0_110] : memref<3x9x128x128xbf16, #tpu.memory_space<vmem>>, vector<1x1x128x128xbf16>
    %185 = vector.shape_cast %184 : vector<1x1x128x128xbf16> to vector<128x128xbf16>
    %cst_111 = arith.constant dense<0.000000e+00> : vector<128x128xf32>
    %186 = tpu.matmul %183, %185, %cst_111 {dimension_numbers = #tpu.dot_dimension_numbers<[1], [0], [0], [1], [0, 0, 1, 1], [], []>} : vector<128x128xbf16>, vector<128x128xbf16>, vector<128x128xf32> -> vector<128x128xf32>
    %187 = arith.addf %182, %186 : vector<128x128xf32>
    %c127_i32_112 = arith.constant 127 : i32
    %188 = tpu.dynamic_rotate %131 by %c127_i32_112 dim 0 : vector<128x128xf32>, i32 -> vector<128x128xf32>
    %c7_i32_113 = arith.constant 7 : i32
    %189 = vector.broadcast %c7_i32_113 : i32 to vector<128x128xi32>
    %190 = arith.andi %16, %189 : vector<128x128xi32>
    %c7_i32_114 = arith.constant 7 : i32
    %191 = vector.broadcast %c7_i32_114 : i32 to vector<128x128xi32>
    %192 = arith.cmpi slt, %190, %191 : vector<128x128xi32>
    %cst_115 = arith.constant 0.000000e+00 : f32
    %193 = vector.broadcast %cst_115 : f32 to vector<128x128xf32>
    %194 = arith.select %192, %188, %193 : vector<128x128xi1>, vector<128x128xf32>
    %195 = arith.truncf %194 : vector<128x128xf32> to vector<128x128xbf16>
    %c1_116 = arith.constant 1 : index
    %c5_117 = arith.constant 5 : index
    %c0_118 = arith.constant 0 : index
    %c0_119 = arith.constant 0 : index
    %196 = vector.load %arg2[%c1_116, %c5_117, %c0_118, %c0_119] : memref<3x9x128x128xbf16, #tpu.memory_space<vmem>>, vector<1x1x128x128xbf16>
    %197 = vector.shape_cast %196 : vector<1x1x128x128xbf16> to vector<128x128xbf16>
    %cst_120 = arith.constant dense<0.000000e+00> : vector<128x128xf32>
    %198 = tpu.matmul %195, %197, %cst_120 {dimension_numbers = #tpu.dot_dimension_numbers<[1], [0], [0], [1], [0, 0, 1, 1], [], []>} : vector<128x128xbf16>, vector<128x128xbf16>, vector<128x128xf32> -> vector<128x128xf32>
    %199 = arith.addf %187, %198 : vector<128x128xf32>
    %c121_i32_121 = arith.constant 121 : i32
    %200 = tpu.dynamic_rotate %131 by %c121_i32_121 dim 0 : vector<128x128xf32>, i32 -> vector<128x128xf32>
    %c56_i32_122 = arith.constant 56 : i32
    %201 = vector.broadcast %c56_i32_122 : i32 to vector<128x128xi32>
    %202 = arith.cmpi slt, %16, %201 : vector<128x128xi32>
    %c7_i32_123 = arith.constant 7 : i32
    %203 = vector.broadcast %c7_i32_123 : i32 to vector<128x128xi32>
    %204 = arith.andi %16, %203 : vector<128x128xi32>
    %c1_i32_124 = arith.constant 1 : i32
    %205 = vector.broadcast %c1_i32_124 : i32 to vector<128x128xi32>
    %206 = arith.cmpi sge, %204, %205 : vector<128x128xi32>
    %207 = arith.andi %202, %206 : vector<128x128xi1>
    %cst_125 = arith.constant 0.000000e+00 : f32
    %208 = vector.broadcast %cst_125 : f32 to vector<128x128xf32>
    %209 = arith.select %207, %200, %208 : vector<128x128xi1>, vector<128x128xf32>
    %210 = arith.truncf %209 : vector<128x128xf32> to vector<128x128xbf16>
    %c1_126 = arith.constant 1 : index
    %c6_127 = arith.constant 6 : index
    %c0_128 = arith.constant 0 : index
    %c0_129 = arith.constant 0 : index
    %211 = vector.load %arg2[%c1_126, %c6_127, %c0_128, %c0_129] : memref<3x9x128x128xbf16, #tpu.memory_space<vmem>>, vector<1x1x128x128xbf16>
    %212 = vector.shape_cast %211 : vector<1x1x128x128xbf16> to vector<128x128xbf16>
    %cst_130 = arith.constant dense<0.000000e+00> : vector<128x128xf32>
    %213 = tpu.matmul %210, %212, %cst_130 {dimension_numbers = #tpu.dot_dimension_numbers<[1], [0], [0], [1], [0, 0, 1, 1], [], []>} : vector<128x128xbf16>, vector<128x128xbf16>, vector<128x128xf32> -> vector<128x128xf32>
    %214 = arith.addf %199, %213 : vector<128x128xf32>
    %c120_i32_131 = arith.constant 120 : i32
    %215 = tpu.dynamic_rotate %131 by %c120_i32_131 dim 0 : vector<128x128xf32>, i32 -> vector<128x128xf32>
    %c56_i32_132 = arith.constant 56 : i32
    %216 = vector.broadcast %c56_i32_132 : i32 to vector<128x128xi32>
    %217 = arith.cmpi slt, %16, %216 : vector<128x128xi32>
    %cst_133 = arith.constant 0.000000e+00 : f32
    %218 = vector.broadcast %cst_133 : f32 to vector<128x128xf32>
    %219 = arith.select %217, %215, %218 : vector<128x128xi1>, vector<128x128xf32>
    %220 = arith.truncf %219 : vector<128x128xf32> to vector<128x128xbf16>
    %c1_134 = arith.constant 1 : index
    %c7_135 = arith.constant 7 : index
    %c0_136 = arith.constant 0 : index
    %c0_137 = arith.constant 0 : index
    %221 = vector.load %arg2[%c1_134, %c7_135, %c0_136, %c0_137] : memref<3x9x128x128xbf16, #tpu.memory_space<vmem>>, vector<1x1x128x128xbf16>
    %222 = vector.shape_cast %221 : vector<1x1x128x128xbf16> to vector<128x128xbf16>
    %cst_138 = arith.constant dense<0.000000e+00> : vector<128x128xf32>
    %223 = tpu.matmul %220, %222, %cst_138 {dimension_numbers = #tpu.dot_dimension_numbers<[1], [0], [0], [1], [0, 0, 1, 1], [], []>} : vector<128x128xbf16>, vector<128x128xbf16>, vector<128x128xf32> -> vector<128x128xf32>
    %224 = arith.addf %214, %223 : vector<128x128xf32>
    %c119_i32_139 = arith.constant 119 : i32
    %225 = tpu.dynamic_rotate %131 by %c119_i32_139 dim 0 : vector<128x128xf32>, i32 -> vector<128x128xf32>
    %c56_i32_140 = arith.constant 56 : i32
    %226 = vector.broadcast %c56_i32_140 : i32 to vector<128x128xi32>
    %227 = arith.cmpi slt, %16, %226 : vector<128x128xi32>
    %c7_i32_141 = arith.constant 7 : i32
    %228 = vector.broadcast %c7_i32_141 : i32 to vector<128x128xi32>
    %229 = arith.andi %16, %228 : vector<128x128xi32>
    %c7_i32_142 = arith.constant 7 : i32
    %230 = vector.broadcast %c7_i32_142 : i32 to vector<128x128xi32>
    %231 = arith.cmpi slt, %229, %230 : vector<128x128xi32>
    %232 = arith.andi %227, %231 : vector<128x128xi1>
    %cst_143 = arith.constant 0.000000e+00 : f32
    %233 = vector.broadcast %cst_143 : f32 to vector<128x128xf32>
    %234 = arith.select %232, %225, %233 : vector<128x128xi1>, vector<128x128xf32>
    %235 = arith.truncf %234 : vector<128x128xf32> to vector<128x128xbf16>
    %c1_144 = arith.constant 1 : index
    %c8_145 = arith.constant 8 : index
    %c0_146 = arith.constant 0 : index
    %c0_147 = arith.constant 0 : index
    %236 = vector.load %arg2[%c1_144, %c8_145, %c0_146, %c0_147] : memref<3x9x128x128xbf16, #tpu.memory_space<vmem>>, vector<1x1x128x128xbf16>
    %237 = vector.shape_cast %236 : vector<1x1x128x128xbf16> to vector<128x128xbf16>
    %cst_148 = arith.constant dense<0.000000e+00> : vector<128x128xf32>
    %238 = tpu.matmul %235, %237, %cst_148 {dimension_numbers = #tpu.dot_dimension_numbers<[1], [0], [0], [1], [0, 0, 1, 1], [], []>} : vector<128x128xbf16>, vector<128x128xbf16>, vector<128x128xf32> -> vector<128x128xf32>
    %239 = arith.addf %224, %238 : vector<128x128xf32>
    %c1_149 = arith.constant 1 : index
    %c0_150 = arith.constant 0 : index
    %c0_151 = arith.constant 0 : index
    %240 = vector.load %arg3[%c1_149, %c0_150, %c0_151] : memref<3x1x128xf32, #tpu.memory_space<vmem>>, vector<1x1x128xf32>
    %241 = vector.shape_cast %240 : vector<1x1x128xf32> to vector<1x128xf32>
    %242 = vector.broadcast %241 : vector<1x128xf32> to vector<128x128xf32>
    %243 = arith.addf %239, %242 : vector<128x128xf32>
    %cst_152 = arith.constant 0.000000e+00 : f32
    %244 = vector.broadcast %cst_152 : f32 to vector<128x128xf32>
    %245 = arith.maximumf %243, %244 : vector<128x128xf32>
    %c9_i32_153 = arith.constant 9 : i32
    %246 = tpu.dynamic_rotate %245 by %c9_i32_153 dim 0 : vector<128x128xf32>, i32 -> vector<128x128xf32>
    %c8_i32_154 = arith.constant 8 : i32
    %247 = vector.broadcast %c8_i32_154 : i32 to vector<128x128xi32>
    %248 = arith.cmpi sge, %16, %247 : vector<128x128xi32>
    %c7_i32_155 = arith.constant 7 : i32
    %249 = vector.broadcast %c7_i32_155 : i32 to vector<128x128xi32>
    %250 = arith.andi %16, %249 : vector<128x128xi32>
    %c1_i32_156 = arith.constant 1 : i32
    %251 = vector.broadcast %c1_i32_156 : i32 to vector<128x128xi32>
    %252 = arith.cmpi sge, %250, %251 : vector<128x128xi32>
    %253 = arith.andi %248, %252 : vector<128x128xi1>
    %cst_157 = arith.constant 0.000000e+00 : f32
    %254 = vector.broadcast %cst_157 : f32 to vector<128x128xf32>
    %255 = arith.select %253, %246, %254 : vector<128x128xi1>, vector<128x128xf32>
    %256 = arith.truncf %255 : vector<128x128xf32> to vector<128x128xbf16>
    %c2_158 = arith.constant 2 : index
    %c0_159 = arith.constant 0 : index
    %c0_160 = arith.constant 0 : index
    %c0_161 = arith.constant 0 : index
    %257 = vector.load %arg2[%c2_158, %c0_159, %c0_160, %c0_161] : memref<3x9x128x128xbf16, #tpu.memory_space<vmem>>, vector<1x1x128x128xbf16>
    %258 = vector.shape_cast %257 : vector<1x1x128x128xbf16> to vector<128x128xbf16>
    %cst_162 = arith.constant dense<0.000000e+00> : vector<128x128xf32>
    %259 = tpu.matmul %256, %258, %cst_162 {dimension_numbers = #tpu.dot_dimension_numbers<[1], [0], [0], [1], [0, 0, 1, 1], [], []>} : vector<128x128xbf16>, vector<128x128xbf16>, vector<128x128xf32> -> vector<128x128xf32>
    %c8_i32_163 = arith.constant 8 : i32
    %260 = tpu.dynamic_rotate %245 by %c8_i32_163 dim 0 : vector<128x128xf32>, i32 -> vector<128x128xf32>
    %c8_i32_164 = arith.constant 8 : i32
    %261 = vector.broadcast %c8_i32_164 : i32 to vector<128x128xi32>
    %262 = arith.cmpi sge, %16, %261 : vector<128x128xi32>
    %cst_165 = arith.constant 0.000000e+00 : f32
    %263 = vector.broadcast %cst_165 : f32 to vector<128x128xf32>
    %264 = arith.select %262, %260, %263 : vector<128x128xi1>, vector<128x128xf32>
    %265 = arith.truncf %264 : vector<128x128xf32> to vector<128x128xbf16>
    %c2_166 = arith.constant 2 : index
    %c1_167 = arith.constant 1 : index
    %c0_168 = arith.constant 0 : index
    %c0_169 = arith.constant 0 : index
    %266 = vector.load %arg2[%c2_166, %c1_167, %c0_168, %c0_169] : memref<3x9x128x128xbf16, #tpu.memory_space<vmem>>, vector<1x1x128x128xbf16>
    %267 = vector.shape_cast %266 : vector<1x1x128x128xbf16> to vector<128x128xbf16>
    %cst_170 = arith.constant dense<0.000000e+00> : vector<128x128xf32>
    %268 = tpu.matmul %265, %267, %cst_170 {dimension_numbers = #tpu.dot_dimension_numbers<[1], [0], [0], [1], [0, 0, 1, 1], [], []>} : vector<128x128xbf16>, vector<128x128xbf16>, vector<128x128xf32> -> vector<128x128xf32>
    %269 = arith.addf %259, %268 : vector<128x128xf32>
    %c7_i32_171 = arith.constant 7 : i32
    %270 = tpu.dynamic_rotate %245 by %c7_i32_171 dim 0 : vector<128x128xf32>, i32 -> vector<128x128xf32>
    %c8_i32_172 = arith.constant 8 : i32
    %271 = vector.broadcast %c8_i32_172 : i32 to vector<128x128xi32>
    %272 = arith.cmpi sge, %16, %271 : vector<128x128xi32>
    %c7_i32_173 = arith.constant 7 : i32
    %273 = vector.broadcast %c7_i32_173 : i32 to vector<128x128xi32>
    %274 = arith.andi %16, %273 : vector<128x128xi32>
    %c7_i32_174 = arith.constant 7 : i32
    %275 = vector.broadcast %c7_i32_174 : i32 to vector<128x128xi32>
    %276 = arith.cmpi slt, %274, %275 : vector<128x128xi32>
    %277 = arith.andi %272, %276 : vector<128x128xi1>
    %cst_175 = arith.constant 0.000000e+00 : f32
    %278 = vector.broadcast %cst_175 : f32 to vector<128x128xf32>
    %279 = arith.select %277, %270, %278 : vector<128x128xi1>, vector<128x128xf32>
    %280 = arith.truncf %279 : vector<128x128xf32> to vector<128x128xbf16>
    %c2_176 = arith.constant 2 : index
    %c2_177 = arith.constant 2 : index
    %c0_178 = arith.constant 0 : index
    %c0_179 = arith.constant 0 : index
    %281 = vector.load %arg2[%c2_176, %c2_177, %c0_178, %c0_179] : memref<3x9x128x128xbf16, #tpu.memory_space<vmem>>, vector<1x1x128x128xbf16>
    %282 = vector.shape_cast %281 : vector<1x1x128x128xbf16> to vector<128x128xbf16>
    %cst_180 = arith.constant dense<0.000000e+00> : vector<128x128xf32>
    %283 = tpu.matmul %280, %282, %cst_180 {dimension_numbers = #tpu.dot_dimension_numbers<[1], [0], [0], [1], [0, 0, 1, 1], [], []>} : vector<128x128xbf16>, vector<128x128xbf16>, vector<128x128xf32> -> vector<128x128xf32>
    %284 = arith.addf %269, %283 : vector<128x128xf32>
    %c1_i32_181 = arith.constant 1 : i32
    %285 = tpu.dynamic_rotate %245 by %c1_i32_181 dim 0 : vector<128x128xf32>, i32 -> vector<128x128xf32>
    %c7_i32_182 = arith.constant 7 : i32
    %286 = vector.broadcast %c7_i32_182 : i32 to vector<128x128xi32>
    %287 = arith.andi %16, %286 : vector<128x128xi32>
    %c1_i32_183 = arith.constant 1 : i32
    %288 = vector.broadcast %c1_i32_183 : i32 to vector<128x128xi32>
    %289 = arith.cmpi sge, %287, %288 : vector<128x128xi32>
    %cst_184 = arith.constant 0.000000e+00 : f32
    %290 = vector.broadcast %cst_184 : f32 to vector<128x128xf32>
    %291 = arith.select %289, %285, %290 : vector<128x128xi1>, vector<128x128xf32>
    %292 = arith.truncf %291 : vector<128x128xf32> to vector<128x128xbf16>
    %c2_185 = arith.constant 2 : index
    %c3_186 = arith.constant 3 : index
    %c0_187 = arith.constant 0 : index
    %c0_188 = arith.constant 0 : index
    %293 = vector.load %arg2[%c2_185, %c3_186, %c0_187, %c0_188] : memref<3x9x128x128xbf16, #tpu.memory_space<vmem>>, vector<1x1x128x128xbf16>
    %294 = vector.shape_cast %293 : vector<1x1x128x128xbf16> to vector<128x128xbf16>
    %cst_189 = arith.constant dense<0.000000e+00> : vector<128x128xf32>
    %295 = tpu.matmul %292, %294, %cst_189 {dimension_numbers = #tpu.dot_dimension_numbers<[1], [0], [0], [1], [0, 0, 1, 1], [], []>} : vector<128x128xbf16>, vector<128x128xbf16>, vector<128x128xf32> -> vector<128x128xf32>
    %296 = arith.addf %284, %295 : vector<128x128xf32>
    %297 = arith.truncf %245 : vector<128x128xf32> to vector<128x128xbf16>
    %c2_190 = arith.constant 2 : index
    %c4_191 = arith.constant 4 : index
    %c0_192 = arith.constant 0 : index
    %c0_193 = arith.constant 0 : index
    %298 = vector.load %arg2[%c2_190, %c4_191, %c0_192, %c0_193] : memref<3x9x128x128xbf16, #tpu.memory_space<vmem>>, vector<1x1x128x128xbf16>
    %299 = vector.shape_cast %298 : vector<1x1x128x128xbf16> to vector<128x128xbf16>
    %cst_194 = arith.constant dense<0.000000e+00> : vector<128x128xf32>
    %300 = tpu.matmul %297, %299, %cst_194 {dimension_numbers = #tpu.dot_dimension_numbers<[1], [0], [0], [1], [0, 0, 1, 1], [], []>} : vector<128x128xbf16>, vector<128x128xbf16>, vector<128x128xf32> -> vector<128x128xf32>
    %301 = arith.addf %296, %300 : vector<128x128xf32>
    %c127_i32_195 = arith.constant 127 : i32
    %302 = tpu.dynamic_rotate %245 by %c127_i32_195 dim 0 : vector<128x128xf32>, i32 -> vector<128x128xf32>
    %c7_i32_196 = arith.constant 7 : i32
    %303 = vector.broadcast %c7_i32_196 : i32 to vector<128x128xi32>
    %304 = arith.andi %16, %303 : vector<128x128xi32>
    %c7_i32_197 = arith.constant 7 : i32
    %305 = vector.broadcast %c7_i32_197 : i32 to vector<128x128xi32>
    %306 = arith.cmpi slt, %304, %305 : vector<128x128xi32>
    %cst_198 = arith.constant 0.000000e+00 : f32
    %307 = vector.broadcast %cst_198 : f32 to vector<128x128xf32>
    %308 = arith.select %306, %302, %307 : vector<128x128xi1>, vector<128x128xf32>
    %309 = arith.truncf %308 : vector<128x128xf32> to vector<128x128xbf16>
    %c2_199 = arith.constant 2 : index
    %c5_200 = arith.constant 5 : index
    %c0_201 = arith.constant 0 : index
    %c0_202 = arith.constant 0 : index
    %310 = vector.load %arg2[%c2_199, %c5_200, %c0_201, %c0_202] : memref<3x9x128x128xbf16, #tpu.memory_space<vmem>>, vector<1x1x128x128xbf16>
    %311 = vector.shape_cast %310 : vector<1x1x128x128xbf16> to vector<128x128xbf16>
    %cst_203 = arith.constant dense<0.000000e+00> : vector<128x128xf32>
    %312 = tpu.matmul %309, %311, %cst_203 {dimension_numbers = #tpu.dot_dimension_numbers<[1], [0], [0], [1], [0, 0, 1, 1], [], []>} : vector<128x128xbf16>, vector<128x128xbf16>, vector<128x128xf32> -> vector<128x128xf32>
    %313 = arith.addf %301, %312 : vector<128x128xf32>
    %c121_i32_204 = arith.constant 121 : i32
    %314 = tpu.dynamic_rotate %245 by %c121_i32_204 dim 0 : vector<128x128xf32>, i32 -> vector<128x128xf32>
    %c56_i32_205 = arith.constant 56 : i32
    %315 = vector.broadcast %c56_i32_205 : i32 to vector<128x128xi32>
    %316 = arith.cmpi slt, %16, %315 : vector<128x128xi32>
    %c7_i32_206 = arith.constant 7 : i32
    %317 = vector.broadcast %c7_i32_206 : i32 to vector<128x128xi32>
    %318 = arith.andi %16, %317 : vector<128x128xi32>
    %c1_i32_207 = arith.constant 1 : i32
    %319 = vector.broadcast %c1_i32_207 : i32 to vector<128x128xi32>
    %320 = arith.cmpi sge, %318, %319 : vector<128x128xi32>
    %321 = arith.andi %316, %320 : vector<128x128xi1>
    %cst_208 = arith.constant 0.000000e+00 : f32
    %322 = vector.broadcast %cst_208 : f32 to vector<128x128xf32>
    %323 = arith.select %321, %314, %322 : vector<128x128xi1>, vector<128x128xf32>
    %324 = arith.truncf %323 : vector<128x128xf32> to vector<128x128xbf16>
    %c2_209 = arith.constant 2 : index
    %c6_210 = arith.constant 6 : index
    %c0_211 = arith.constant 0 : index
    %c0_212 = arith.constant 0 : index
    %325 = vector.load %arg2[%c2_209, %c6_210, %c0_211, %c0_212] : memref<3x9x128x128xbf16, #tpu.memory_space<vmem>>, vector<1x1x128x128xbf16>
    %326 = vector.shape_cast %325 : vector<1x1x128x128xbf16> to vector<128x128xbf16>
    %cst_213 = arith.constant dense<0.000000e+00> : vector<128x128xf32>
    %327 = tpu.matmul %324, %326, %cst_213 {dimension_numbers = #tpu.dot_dimension_numbers<[1], [0], [0], [1], [0, 0, 1, 1], [], []>} : vector<128x128xbf16>, vector<128x128xbf16>, vector<128x128xf32> -> vector<128x128xf32>
    %328 = arith.addf %313, %327 : vector<128x128xf32>
    %c120_i32_214 = arith.constant 120 : i32
    %329 = tpu.dynamic_rotate %245 by %c120_i32_214 dim 0 : vector<128x128xf32>, i32 -> vector<128x128xf32>
    %c56_i32_215 = arith.constant 56 : i32
    %330 = vector.broadcast %c56_i32_215 : i32 to vector<128x128xi32>
    %331 = arith.cmpi slt, %16, %330 : vector<128x128xi32>
    %cst_216 = arith.constant 0.000000e+00 : f32
    %332 = vector.broadcast %cst_216 : f32 to vector<128x128xf32>
    %333 = arith.select %331, %329, %332 : vector<128x128xi1>, vector<128x128xf32>
    %334 = arith.truncf %333 : vector<128x128xf32> to vector<128x128xbf16>
    %c2_217 = arith.constant 2 : index
    %c7_218 = arith.constant 7 : index
    %c0_219 = arith.constant 0 : index
    %c0_220 = arith.constant 0 : index
    %335 = vector.load %arg2[%c2_217, %c7_218, %c0_219, %c0_220] : memref<3x9x128x128xbf16, #tpu.memory_space<vmem>>, vector<1x1x128x128xbf16>
    %336 = vector.shape_cast %335 : vector<1x1x128x128xbf16> to vector<128x128xbf16>
    %cst_221 = arith.constant dense<0.000000e+00> : vector<128x128xf32>
    %337 = tpu.matmul %334, %336, %cst_221 {dimension_numbers = #tpu.dot_dimension_numbers<[1], [0], [0], [1], [0, 0, 1, 1], [], []>} : vector<128x128xbf16>, vector<128x128xbf16>, vector<128x128xf32> -> vector<128x128xf32>
    %338 = arith.addf %328, %337 : vector<128x128xf32>
    %c119_i32_222 = arith.constant 119 : i32
    %339 = tpu.dynamic_rotate %245 by %c119_i32_222 dim 0 : vector<128x128xf32>, i32 -> vector<128x128xf32>
    %c56_i32_223 = arith.constant 56 : i32
    %340 = vector.broadcast %c56_i32_223 : i32 to vector<128x128xi32>
    %341 = arith.cmpi slt, %16, %340 : vector<128x128xi32>
    %c7_i32_224 = arith.constant 7 : i32
    %342 = vector.broadcast %c7_i32_224 : i32 to vector<128x128xi32>
    %343 = arith.andi %16, %342 : vector<128x128xi32>
    %c7_i32_225 = arith.constant 7 : i32
    %344 = vector.broadcast %c7_i32_225 : i32 to vector<128x128xi32>
    %345 = arith.cmpi slt, %343, %344 : vector<128x128xi32>
    %346 = arith.andi %341, %345 : vector<128x128xi1>
    %cst_226 = arith.constant 0.000000e+00 : f32
    %347 = vector.broadcast %cst_226 : f32 to vector<128x128xf32>
    %348 = arith.select %346, %339, %347 : vector<128x128xi1>, vector<128x128xf32>
    %349 = arith.truncf %348 : vector<128x128xf32> to vector<128x128xbf16>
    %c2_227 = arith.constant 2 : index
    %c8_228 = arith.constant 8 : index
    %c0_229 = arith.constant 0 : index
    %c0_230 = arith.constant 0 : index
    %350 = vector.load %arg2[%c2_227, %c8_228, %c0_229, %c0_230] : memref<3x9x128x128xbf16, #tpu.memory_space<vmem>>, vector<1x1x128x128xbf16>
    %351 = vector.shape_cast %350 : vector<1x1x128x128xbf16> to vector<128x128xbf16>
    %cst_231 = arith.constant dense<0.000000e+00> : vector<128x128xf32>
    %352 = tpu.matmul %349, %351, %cst_231 {dimension_numbers = #tpu.dot_dimension_numbers<[1], [0], [0], [1], [0, 0, 1, 1], [], []>} : vector<128x128xbf16>, vector<128x128xbf16>, vector<128x128xf32> -> vector<128x128xf32>
    %353 = arith.addf %338, %352 : vector<128x128xf32>
    %c2_232 = arith.constant 2 : index
    %c0_233 = arith.constant 0 : index
    %c0_234 = arith.constant 0 : index
    %354 = vector.load %arg3[%c2_232, %c0_233, %c0_234] : memref<3x1x128xf32, #tpu.memory_space<vmem>>, vector<1x1x128xf32>
    %355 = vector.shape_cast %354 : vector<1x1x128xf32> to vector<1x128xf32>
    %356 = vector.broadcast %355 : vector<1x128xf32> to vector<128x128xf32>
    %357 = arith.addf %353, %356 : vector<128x128xf32>
    %cst_235 = arith.constant 0.000000e+00 : f32
    %358 = vector.broadcast %cst_235 : f32 to vector<128x128xf32>
    %359 = arith.maximumf %357, %358 : vector<128x128xf32>
    %360 = arith.truncf %359 : vector<128x128xf32> to vector<128x128xbf16>
    %c0_236 = arith.constant 0 : index
    %c0_237 = arith.constant 0 : index
    %361 = vector.load %arg4[%c0_236, %c0_237] : memref<128x128xbf16, #tpu.memory_space<vmem>>, vector<128x128xbf16>
    %cst_238 = arith.constant dense<0.000000e+00> : vector<128x128xf32>
    %362 = tpu.matmul %360, %361, %cst_238 {dimension_numbers = #tpu.dot_dimension_numbers<[1], [0], [0], [1], [0, 0, 1, 1], [], []>} : vector<128x128xbf16>, vector<128x128xbf16>, vector<128x128xf32> -> vector<128x128xf32>
    %c0_239 = arith.constant 0 : index
    %c0_240 = arith.constant 0 : index
    %363 = vector.load %arg5[%c0_239, %c0_240] : memref<1x128xf32, #tpu.memory_space<vmem>>, vector<1x128xf32>
    %364 = vector.broadcast %363 : vector<1x128xf32> to vector<128x128xf32>
    %365 = arith.addf %362, %364 : vector<128x128xf32>
    %cst_241 = arith.constant 0.000000e+00 : f32
    %366 = vector.broadcast %cst_241 : f32 to vector<128x128xf32>
    %367 = arith.maximumf %365, %366 : vector<128x128xf32>
    %368 = arith.truncf %367 : vector<128x128xf32> to vector<128x128xbf16>
    %c0_242 = arith.constant 0 : index
    %c0_243 = arith.constant 0 : index
    %369 = vector.load %arg6[%c0_242, %c0_243] : memref<128x128xbf16, #tpu.memory_space<vmem>>, vector<128x128xbf16>
    tpu.vector_store %arg6[%c0_242, %c0_243], %368 {strides = array<i32>} : memref<128x128xbf16, #tpu.memory_space<vmem>>, vector<128x128xbf16>,
    return
  }
  func.func @transform_0(%arg0: i32) -> (i32, i32) {
    %c0_i32 = arith.constant 0 : i32
    %c0_i32_0 = arith.constant 0 : i32
    return %arg0, %c0_i32 : i32, i32
  }
  func.func @transform_1(%arg0: i32) -> (i32, i32, i32, i32) {
    %c0_i32 = arith.constant 0 : i32
    %c0_i32_0 = arith.constant 0 : i32
    %c0_i32_1 = arith.constant 0 : i32
    %c0_i32_2 = arith.constant 0 : i32
    %c0_i32_3 = arith.constant 0 : i32
    return %c0_i32, %c0_i32_0, %c0_i32_1, %c0_i32_2 : i32, i32, i32, i32
  }
  func.func @transform_2(%arg0: i32) -> (i32, i32, i32) {
    %c0_i32 = arith.constant 0 : i32
    %c0_i32_0 = arith.constant 0 : i32
    %c0_i32_1 = arith.constant 0 : i32
    %c0_i32_2 = arith.constant 0 : i32
    return %c0_i32, %c0_i32_0, %c0_i32_1 : i32, i32, i32
  }
  func.func @transform_3(%arg0: i32) -> (i32, i32) {
    %c0_i32 = arith.constant 0 : i32
    %c0_i32_0 = arith.constant 0 : i32
    %c0_i32_1 = arith.constant 0 : i32
    return %c0_i32, %c0_i32_0 : i32, i32
  }
  func.func @transform_4(%arg0: i32) -> (i32, i32) {
    %c0_i32 = arith.constant 0 : i32
    %c0_i32_0 = arith.constant 0 : i32
    %c0_i32_1 = arith.constant 0 : i32
    return %c0_i32, %c0_i32_0 : i32, i32
  }
  func.func @transform_5(%arg0: i32) -> (i32, i32) {
    %c0_i32 = arith.constant 0 : i32
    %c0_i32_0 = arith.constant 0 : i32
    return %arg0, %c0_i32 : i32, i32
  }
}

module attributes {stable_mosaic.version = 11 : i64} {
  func.func @_heads_kernel(%arg0: i32, %arg1: memref<2x2048xbf16, #tpu.memory_space<vmem>>, %arg2: memref<2x2048xbf16, #tpu.memory_space<vmem>>, %arg3: memref<2048x256xbf16, #tpu.memory_space<vmem>>, %arg4: memref<1x256xf32, #tpu.memory_space<vmem>>, %arg5: memref<2048x128xbf16, #tpu.memory_space<vmem>>, %arg6: memref<1x128xf32, #tpu.memory_space<vmem>>, %arg7: memref<128x128xf32, #tpu.memory_space<vmem>>, %arg8: memref<1x128xf32, #tpu.memory_space<vmem>>, %arg9: memref<2x256xf32, #tpu.memory_space<vmem>>, %arg10: memref<1x2x128xf32, #tpu.memory_space<vmem>>) attributes {dimension_semantics = [#tpu.dimension_semantics<parallel>], iteration_bounds = array<i64: 8>, scalar_prefetch = 0 : i64, scratch_operands = 0 : i64, tpu.core_type = #tpu.core_type<tc>, window_params = [{pipeline_mode = #tpu.pipeline_mode<synchronous>, transform_indices = @transform_0, window_bounds = array<i64: 2, 2048>}, {pipeline_mode = #tpu.pipeline_mode<synchronous>, transform_indices = @transform_1, window_bounds = array<i64: 2, 2048>}, {transform_indices = @transform_2, window_bounds = array<i64: 2048, 256>}, {transform_indices = @transform_3, window_bounds = array<i64: 1, 256>}, {pipeline_mode = #tpu.pipeline_mode<synchronous>, transform_indices = @transform_4, window_bounds = array<i64: 2048, 128>}, {pipeline_mode = #tpu.pipeline_mode<synchronous>, transform_indices = @transform_5, window_bounds = array<i64: 1, 128>}, {pipeline_mode = #tpu.pipeline_mode<synchronous>, transform_indices = @transform_6, window_bounds = array<i64: 128, 128>}, {pipeline_mode = #tpu.pipeline_mode<synchronous>, transform_indices = @transform_7, window_bounds = array<i64: 1, 128>}, {transform_indices = @transform_8, window_bounds = array<i64: 2, 256>}, {transform_indices = @transform_9, window_bounds = array<i64: 1, 2, 128>}]} {
    %c0 = arith.constant 0 : index
    %c0_0 = arith.constant 0 : index
    %0 = vector.load %arg1[%c0, %c0_0] : memref<2x2048xbf16, #tpu.memory_space<vmem>>, vector<2x2048xbf16>
    %c0_1 = arith.constant 0 : index
    %c0_2 = arith.constant 0 : index
    %1 = vector.load %arg3[%c0_1, %c0_2] : memref<2048x256xbf16, #tpu.memory_space<vmem>>, vector<2048x256xbf16>
    %cst = arith.constant dense<0.000000e+00> : vector<2x256xf32>
    %2 = tpu.matmul %0, %1, %cst {dimension_numbers = #tpu.dot_dimension_numbers<[1], [0], [0], [1], [0, 0, 1, 1], [], []>} : vector<2x2048xbf16>, vector<2048x256xbf16>, vector<2x256xf32> -> vector<2x256xf32>
    %c0_3 = arith.constant 0 : index
    %c0_4 = arith.constant 0 : index
    %3 = vector.load %arg4[%c0_3, %c0_4] : memref<1x256xf32, #tpu.memory_space<vmem>>, vector<1x256xf32>
    %4 = vector.broadcast %3 : vector<1x256xf32> to vector<2x256xf32>
    %5 = arith.addf %2, %4 : vector<2x256xf32>
    %c0_5 = arith.constant 0 : index
    %c0_6 = arith.constant 0 : index
    %6 = vector.load %arg9[%c0_5, %c0_6] : memref<2x256xf32, #tpu.memory_space<vmem>>, vector<2x256xf32>
    tpu.vector_store %arg9[%c0_5, %c0_6], %5 {strides = array<i32>} : memref<2x256xf32, #tpu.memory_space<vmem>>, vector<2x256xf32>,
    %c0_7 = arith.constant 0 : index
    %c0_8 = arith.constant 0 : index
    %7 = vector.load %arg2[%c0_7, %c0_8] : memref<2x2048xbf16, #tpu.memory_space<vmem>>, vector<2x2048xbf16>
    %c0_9 = arith.constant 0 : index
    %c0_10 = arith.constant 0 : index
    %8 = vector.load %arg5[%c0_9, %c0_10] : memref<2048x128xbf16, #tpu.memory_space<vmem>>, vector<2048x128xbf16>
    %cst_11 = arith.constant dense<0.000000e+00> : vector<2x128xf32>
    %9 = tpu.matmul %7, %8, %cst_11 {dimension_numbers = #tpu.dot_dimension_numbers<[1], [0], [0], [1], [0, 0, 1, 1], [], []>} : vector<2x2048xbf16>, vector<2048x128xbf16>, vector<2x128xf32> -> vector<2x128xf32>
    %c0_12 = arith.constant 0 : index
    %c0_13 = arith.constant 0 : index
    %10 = vector.load %arg6[%c0_12, %c0_13] : memref<1x128xf32, #tpu.memory_space<vmem>>, vector<1x128xf32>
    %11 = vector.broadcast %10 : vector<1x128xf32> to vector<2x128xf32>
    %12 = arith.addf %9, %11 : vector<2x128xf32>
    %cst_14 = arith.constant 0.000000e+00 : f32
    %13 = vector.broadcast %cst_14 : f32 to vector<2x128xf32>
    %14 = arith.maximumf %12, %13 : vector<2x128xf32>
    %c0_15 = arith.constant 0 : index
    %c0_16 = arith.constant 0 : index
    %15 = vector.load %arg7[%c0_15, %c0_16] : memref<128x128xf32, #tpu.memory_space<vmem>>, vector<128x128xf32>
    %cst_17 = arith.constant dense<0.000000e+00> : vector<2x128xf32>
    %16 = tpu.matmul %14, %15, %cst_17 {dimension_numbers = #tpu.dot_dimension_numbers<[1], [0], [0], [1], [0, 0, 1, 1], [], []>} : vector<2x128xf32>, vector<128x128xf32>, vector<2x128xf32> -> vector<2x128xf32>
    %c0_18 = arith.constant 0 : index
    %c0_19 = arith.constant 0 : index
    %17 = vector.load %arg8[%c0_18, %c0_19] : memref<1x128xf32, #tpu.memory_space<vmem>>, vector<1x128xf32>
    %18 = vector.broadcast %17 : vector<1x128xf32> to vector<2x128xf32>
    %19 = arith.addf %16, %18 : vector<2x128xf32>
    %20 = math.tanh %19 : vector<2x128xf32>
    %c0_20 = arith.constant 0 : index
    %c0_21 = arith.constant 0 : index
    %c0_22 = arith.constant 0 : index
    %21 = vector.load %arg10[%c0_20, %c0_21, %c0_22] : memref<1x2x128xf32, #tpu.memory_space<vmem>>, vector<1x2x128xf32>
    %22 = vector.shape_cast %21 : vector<1x2x128xf32> to vector<2x128xf32>
    %23 = vector.shape_cast %20 : vector<2x128xf32> to vector<1x2x128xf32>
    tpu.vector_store %arg10[%c0_20, %c0_21, %c0_22], %23 {strides = array<i32>} : memref<1x2x128xf32, #tpu.memory_space<vmem>>, vector<1x2x128xf32>,
    return
  }
  func.func @transform_0(%arg0: i32) -> (i32, i32) {
    %c0_i32 = arith.constant 0 : i32
    %c0_i32_0 = arith.constant 0 : i32
    %c0_i32_1 = arith.constant 0 : i32
    return %c0_i32, %c0_i32_0 : i32, i32
  }
  func.func @transform_1(%arg0: i32) -> (i32, i32) {
    %c0_i32 = arith.constant 0 : i32
    %c0_i32_0 = arith.constant 0 : i32
    %c0_i32_1 = arith.constant 0 : i32
    return %c0_i32, %c0_i32_0 : i32, i32
  }
  func.func @transform_2(%arg0: i32) -> (i32, i32) {
    %c0_i32 = arith.constant 0 : i32
    %c0_i32_0 = arith.constant 0 : i32
    return %c0_i32, %arg0 : i32, i32
  }
  func.func @transform_3(%arg0: i32) -> (i32, i32) {
    %c0_i32 = arith.constant 0 : i32
    %c0_i32_0 = arith.constant 0 : i32
    return %c0_i32, %arg0 : i32, i32
  }
  func.func @transform_4(%arg0: i32) -> (i32, i32) {
    %c0_i32 = arith.constant 0 : i32
    %c0_i32_0 = arith.constant 0 : i32
    %c0_i32_1 = arith.constant 0 : i32
    return %c0_i32, %c0_i32_0 : i32, i32
  }
  func.func @transform_5(%arg0: i32) -> (i32, i32) {
    %c0_i32 = arith.constant 0 : i32
    %c0_i32_0 = arith.constant 0 : i32
    %c0_i32_1 = arith.constant 0 : i32
    return %c0_i32, %c0_i32_0 : i32, i32
  }
  func.func @transform_6(%arg0: i32) -> (i32, i32) {
    %c0_i32 = arith.constant 0 : i32
    %c0_i32_0 = arith.constant 0 : i32
    %c0_i32_1 = arith.constant 0 : i32
    return %c0_i32, %c0_i32_0 : i32, i32
  }
  func.func @transform_7(%arg0: i32) -> (i32, i32) {
    %c0_i32 = arith.constant 0 : i32
    %c0_i32_0 = arith.constant 0 : i32
    %c0_i32_1 = arith.constant 0 : i32
    return %c0_i32, %c0_i32_0 : i32, i32
  }
  func.func @transform_8(%arg0: i32) -> (i32, i32) {
    %c0_i32 = arith.constant 0 : i32
    %c0_i32_0 = arith.constant 0 : i32
    return %c0_i32, %arg0 : i32, i32
  }
  func.func @transform_9(%arg0: i32) -> (i32, i32, i32) {
    %c0_i32 = arith.constant 0 : i32
    %c0_i32_0 = arith.constant 0 : i32
    %c0_i32_1 = arith.constant 0 : i32
    return %arg0, %c0_i32, %c0_i32_0 : i32, i32, i32
  }
}

</mosaic_0001>

<bundles_post_ra>
// kernel: forward_pallas.3
= control target key start
LH: loop header
LB: loop body
LE: loop exit
PB: predicated region body
PF: predicated region fallthrough
CT: control target
= control target key end

     0   :  { %s6590_s0 = inlined_call_operand.vmem [shape: bf16[2,2048], index: 0, kind: input, shape index: {}]   ;;  %s6591_s1 = inlined_call_operand.vmem [shape: bf16[2,2048], index: 1, kind: input, shape index: {}]   ;;  %s6592_s2 = inlined_call_operand.hbm [shape: bf16[2048,2048], index: 2, kind: input, shape index: {}]   ;;  %s6593_s3 = inlined_call_operand.hbm [shape: f32[1,2048], index: 3, kind: input, shape index: {}]   ;;  %s6594_s4 = inlined_call_operand.hbm [shape: bf16[2048,128], index: 4, kind: input, shape index: {}]   ;;  %s6595_s5 = inlined_call_operand.hbm [shape: f32[1,128], index: 5, kind: input, shape index: {}]   ;;  %s6596_s6 = inlined_call_operand.hbm [shape: f32[128,128], index: 6, kind: input, shape index: {}]   ;;  %s6597_s7 = inlined_call_operand.hbm [shape: f32[1,128], index: 7, kind: input, shape index: {}]   ;;  %s6598_s8 = inlined_call_operand.hbm [shape: f32[2,2048], index: 8, kind: output, shape index: {0}]   ;;  %s6599_s9 = inlined_call_operand.vmem [shape: f32[8,2,128], index: 9, kind: output, shape index: {1}]  }
   0x1   :  { %6607 = sst [smem:[#allocation22_spill]] %s6592_s2 }
   0x2   :  { %6608 = sst [smem:[#allocation23_spill]] %s6594_s4 }
   0x3   :  { %6609 = sst [smem:[#allocation24_spill]] %s6595_s5 }
   0x4   :  { %6610 = sst [smem:[#allocation25_spill]] %s6596_s6 }
   0x5   :  { %6611 = sst [smem:[#allocation26_spill]] %s6597_s7 }
   0x6   :  { %6612 = sst [smem:[#allocation27_spill]] %s6599_s9 }
   0x7   :  { %15 = vsyncpa [#allocation3], 0 }
   0x8   :  { %17 = vsyncpa [#allocation3 + $0x1], 0 }
   0x9   :  { %18 = vsyncpa [#allocation6], 0 }
   0xa   :  { %20 = vsyncpa [#allocation6 + $0x1], 0 }
   0xb   :  { %21 = vsyncpa [#allocation9], 0 }
   0xc   :  { %22 = vsyncpa [#allocation12], 0 }
   0xd   :  { %23 = vsyncpa [#allocation4], 0 }
   0xe   :  { %25 = vsyncpa [#allocation4 + $0x1], 0  ;;  %s5844_s30 = smov 0   ;;  %s5846_s10 = smov 0  }
   0xf   :  { %s5848_s11 = smov 0   ;;  %s5850_s12 = smov 0  }
  0x10 LB: > { %6613 = sst [smem:[#allocation20_spill]] %s5764_s30  ;;  %s5865_s13 = sadd.s32 4294967295, %s5776_s12   ;;  %s5776_s12 = sphi %s5850_s12, %s6646_s12   ;;  %s5772_s11 = sphi %s5848_s11, %s6645_s11   ;;  %s5768_s10 = sphi %s5846_s10, %s6644_s10   ;;  %s5764_s30 = sphi %s5844_s30, %s6643_s30  }
  0x11   : > { %s4206_s14 = sadd.s32 4294967294, %s5776_s12   ;;  %p93_p0 = scmp.ne.s32.totalorder %s5768_s10, %s5764_s30 }
  0x12   : > { %p6600_p1 = scmp.eq.s32.totalorder %s5865_s13, 0  ;;  %p233_p3 = scmp.eq.s32.totalorder %s4206_s14, 7 }
  0x13   : > { %p4207_p5 = scmp.ge.s32.totalorder %s5776_s12, 1  ;;  %p266_p7 = scmp.lt.s32.totalorder %s5776_s12, 9 }
  0x14   : > { %p5874_p4 = por %p6600_p1, %p93_p0  ;;  %p5879_p6 = por %p233_p3, %p93_p0 }
  0x15   : > { %p5884_p8 = pnand %p4207_p5, %p266_p7  ;;  %s5778_s18 = smov [#allocation7]  }
  0x16   : > { %s6614_s15 = scalar_select %p5874_p4, 1, 0 }
  0x17   : > { %s6615_s16 = scalar_select %p5879_p6, 1, 0 }
  0x18   : > { %s6617_s17 = scalar_select %p5884_p8, 1, 0 }
  0x19   : > { %6616 = sst [smem:[#allocation21_spill]] %s6615_s16  ;;  %s284_s19 = sshll.u32 %s5778_s18, 4  ;;  %s5888_s19 = int_to_ptr.vmem [resolvable:$true] %s284_s19 }
  0x1a   : > { %p4925_p9 = pneg %p5884_p8  ;;  %s5779_s21 = smov [#allocation8]  }
  0x1b   : > { %s298_s22 = sshll.u32 %s5779_s21, 4  ;;  %s5780_s23 = smov [#allocation10]   ;;  %s5898_s22 = int_to_ptr.vmem [resolvable:$true] %s298_s22 }
  0x1c   : > { %p5894_p10 = pnand %p4925_p9, %p6600_p1  ;;  %s5900_s24 = sshll.u32 %s5780_s23, 4  ;;  %s309_s24 = int_to_ptr.vmem [resolvable:$true] %s5900_s24 }
  0x1d   : > { %s6619_s4 = sld [smem:[#allocation23_spill]] }
  0x1e   : > { %p5910_p12 = pneg %p5894_p10 }
  0x23   : > { %s5522_s27 = scalar_lea.hbm %s6619_s4, 16384 }
  0x24   : > { %p5523_p11 = scmp.ne.s32.totalorder %s6619_s4, %s5522_s27  ;;  %p5529_p3 = scmp.lt.u32.totalorder %s5522_s27, %s6619_s4 }
  0x26   : > { %p5525_p13 = pnand %p5910_p12, %p5523_p11 }
  0x28   : > { %p5526_p0 = pneg %p5525_p13 }
  0x2a   : > { %p5531_p5 = pnand %p5529_p3, %p5526_p0 }
  0x2c   : > { %5534 = shalt.err (!%p5531_p5)
}
  0x2d   : > { %s5535_s23 = scalar_lea.vmem %s5888_s19, 16384  ;;  %p5543_p2 = scmp.lt.s32.totalorder %s5888_s19, %s5888_s19 }
  0x2e   : > { %p5536_p7 = scmp.ne.s32.totalorder %s5888_s19, %s5535_s23  ;;  %p5544_p6 = scmp.lt.s32.totalorder %s5535_s23, %s5535_s23 }
  0x30   : > { %p5538_p9 = pnand %p5536_p7, %p5910_p12  ;;  %p5545_p11 = por %p5544_p6, %p5543_p2 }
  0x32   : > { %p5539_p1 = pneg %p5538_p9 }
  0x34   : > { %p5546_p13 = pnand %p5545_p11, %p5539_p1 }
  0x36   : > { %5549 = shalt.err (!%p5546_p13)
}
  0x37   : > { %s5781_s25 = smov 64   ;;  %s5782_s26 = smov 4  }
  0x38   : > { %4928 = dma.hbm_to_vmem [thread:$0]  (!%p5894_p10), %s6619_s4, 16384, %s5888_s19, [#allocation6], %s5781_s25, %s5781_s25, %s5782_s26  }
  0x39   : > { %s6621_s5 = sld [smem:[#allocation24_spill]] }
  0x3f   : > { %s5550_s21 = scalar_lea.hbm %s6621_s5, 16 }
  0x40   : > { %p5551_p2 = scmp.ne.s32.totalorder %s6621_s5, %s5550_s21  ;;  %p5557_p0 = scmp.lt.u32.totalorder %s5550_s21, %s6621_s5 }
  0x42   : > { %p5553_p1 = pnand %p5551_p2, %p5910_p12 }
  0x44   : > { %p5554_p6 = pneg %p5553_p1 }
  0x46   : > { %p5559_p3 = pnand %p5557_p0, %p5554_p6 }
  0x48   : > { %5562 = shalt.err (!%p5559_p3)
}
  0x49   : > { %s5563_s19 = scalar_lea.vmem %s5898_s22, 16  ;;  %s5570_s30 = scalar_lea.vmem %s5898_s22, 32 }
  0x4a   : > { %p5564_p5 = scmp.ne.s32.totalorder %s5898_s22, %s5563_s19  ;;  %p5571_p11 = scmp.lt.s32.totalorder %s5898_s22, %s5898_s22 }
  0x4b   : > { %p5572_p13 = scmp.lt.s32.totalorder %s5570_s30, %s5563_s19 }
  0x4c   : > { %p5566_p7 = pnand %p5564_p5, %p5910_p12 }
  0x4d   : > { %p5573_p2 = por %p5572_p13, %p5571_p11 }
  0x4e   : > { %p5567_p9 = pneg %p5566_p7 }
  0x50   : > { %p5574_p1 = pnand %p5573_p2, %p5567_p9 }
  0x52   : > { %5577 = shalt.err (!%p5574_p1)
}
  0x53   : > { %4931 = dma.hbm_to_vmem [thread:$0]  (!%p5894_p10), %s6621_s5, 16, %s5898_s22, [#allocation9]  }
  0x54   : > { %s6622_s6 = sld [smem:[#allocation25_spill]] }
  0x5a   : > { %s5578_s27 = scalar_lea.hbm %s6622_s6, 2048 }
  0x5b   : > { %p5579_p6 = scmp.ne.s32.totalorder %s6622_s6, %s5578_s27  ;;  %p5585_p5 = scmp.lt.u32.totalorder %s5578_s27, %s6622_s6 }
  0x5d   : > { %p5581_p0 = pnand %p5579_p6, %p5910_p12 }
  0x5f   : > { %p5582_p3 = pneg %p5581_p0 }
  0x61   : > { %p5587_p7 = pnand %p5585_p5, %p5582_p3 }
  0x63   : > { %5590 = shalt.err (!%p5587_p7)
}
  0x64   : > { %s5591_s23 = scalar_lea.vmem %s309_s24, 2048  ;;  %p5599_p2 = scmp.lt.s32.totalorder %s309_s24, %s309_s24 }
  0x65   : > { %p5592_p9 = scmp.ne.s32.totalorder %s309_s24, %s5591_s23  ;;  %p5600_p1 = scmp.lt.s32.totalorder %s5591_s23, %s5591_s23 }
  0x67   : > { %p5594_p11 = pnand %p5592_p9, %p5910_p12  ;;  %p5601_p4 = por %p5600_p1, %p5599_p2 }
  0x69   : > { %p5595_p13 = pneg %p5594_p11 }
  0x6b   : > { %p5602_p8 = pnand %p5601_p4, %p5595_p13 }
  0x6d   : > { %5605 = shalt.err (!%p5602_p8)
}
  0x6e   : > { %s6605_s22 = smov 128   ;;  %s5784_s19 = smov 8  }
  0x6f   : > { %4934 = dma.hbm_to_vmem [thread:$0]  (!%p5894_p10), %s6622_s6, 2048, %s309_s24, [#allocation9], %s6605_s22, %s6605_s22, %s5784_s19  }
  0x70   : > { %s5785_s16 = smov [#allocation11]   ;;  %s6623_s7 = sld [smem:[#allocation26_spill]] }
  0x71   : > { %s322_s25 = sshll.u32 %s5785_s16, 4  ;;  %s323_s25 = int_to_ptr.vmem [resolvable:$true] %s322_s25 }
  0x76   : > { %s5606_s28 = scalar_lea.hbm %s6623_s7, 16 }
  0x77   : > { %p5607_p4 = scmp.ne.s32.totalorder %s6623_s7, %s5606_s28  ;;  %p5613_p0 = scmp.lt.u32.totalorder %s5606_s28, %s6623_s7 }
  0x79   : > { %p5609_p8 = pnand %p5607_p4, %p5910_p12 }
  0x7b   : > { %p5610_p6 = pneg %p5609_p8 }
  0x7d   : > { %p5615_p3 = pnand %p5613_p0, %p5610_p6 }
  0x7f   : > { %5618 = shalt.err (!%p5615_p3)
}
  0x80   : > { %s5619_s24 = scalar_lea.vmem %s323_s25, 16  ;;  %s5626_s30 = scalar_lea.vmem %s323_s25, 32 }
  0x81   : > { %p5620_p5 = scmp.ne.s32.totalorder %s323_s25, %s5619_s24  ;;  %p5627_p11 = scmp.lt.s32.totalorder %s323_s25, %s323_s25 }
  0x82   : > { %p5628_p13 = scmp.lt.s32.totalorder %s5626_s30, %s5619_s24 }
  0x83   : > { %p5622_p7 = pnand %p5620_p5, %p5910_p12 }
  0x84   : > { %p5629_p2 = por %p5628_p13, %p5627_p11 }
  0x85   : > { %p5623_p9 = pneg %p5622_p7 }
  0x87   : > { %p5630_p1 = pnand %p5629_p2, %p5623_p9 }
  0x89   : > { %5633 = shalt.err (!%p5630_p1)
}
  0x8a   : > { %4937 = dma.hbm_to_vmem [thread:$0]  (!%p5894_p10), %s6623_s7, 16, %s323_s25, [#allocation12]  }
  0x8b   : > { %s5996_s14 = sadd.s32 1, %s5776_s12   ;;  %s80_s26 = sadd.s32 1, %s5772_s11 }
  0x8c   : > { %s77_s20 = ssub.s32 %s5776_s12, %s5996_s14  ;;  %p87_p12 = scmp.ne.s32.totalorder %s5772_s11, %s5768_s10 }
  0x8d   : > { %p78_p4 = scmp.eq.s32.totalorder %s77_s20, 0  ;;  %p88_p8 = scmp.eq.s32.totalorder %s5776_s12, 0 }
  0x8e   : > { %p6624_p6 = scmp.eq.s32.totalorder %s5865_s13, 7  ;;  %p4953_p3 = scmp.lt.s32.totalorder %s5776_s12, 8 }
  0x8f   : > { %s6012_s28 = scalar_select %p78_p4, %s5772_s11, %s80_s26  }
  0x90   : > { %p6006_p0 = por %p6624_p6, %p87_p12  ;;  %p89_p5 = por %p88_p8, %p87_p12 }
  0x91   : > { %s6015_s29 = sand.u32 1, %s5772_s11   ;;  %s4620_s18 = sshll.u32 %s5776_s12, 7 }
  0x92   : > { %s6625_s27 = scalar_select %p6006_p0, 1, 0 }
  0x93   : > { %s4213_s25 = sshll.u32 %s6015_s29, 11  ;;  %s6626_s2 = sld [smem:[#allocation22_spill]] }
  0x94   : > { %s337_s30 = scalar_lea.vmem [#allocation2], %s4213_s25  ;;  %p6026_p10 = pnand %p4953_p3, %p89_p5 }
  0x95   : > { %s344_s9 = sshll.u32 %s337_s30, 4  ;;  %s334_s20 = scalar_lea.sflag [#allocation3], %s6015_s29  ;;  %s6024_s9 = int_to_ptr.vmem [resolvable:$true] %s344_s9 }
  0x96   : > { %p5636_p9 = pneg %p6026_p10 }
  0x99   : > { %s6022_s24 = scalar_lea.hbm %s6626_s2, %s4620_s18  ;;  %s5639_s21 = scalar_lea.hbm %s6626_s2, 262144 }
  0x9a   : > { %s5634_s22 = scalar_lea.hbm %s6022_s24, 32768  ;;  %p5640_p2 = scmp.lt.u32.totalorder %s6022_s24, %s6626_s2 }
  0x9b   : > { %p5635_p7 = scmp.ne.s32.totalorder %s6022_s24, %s5634_s22  ;;  %p5641_p1 = scmp.lt.u32.totalorder %s5639_s21, %s5634_s22 }
  0x9c   : > { %p5643_p4 = scmp.lt.u32.totalorder %s5634_s22, %s6022_s24 }
  0x9d   : > { %p5637_p11 = pnand %p5636_p9, %p5635_p7  ;;  %p5642_p12 = por %p5641_p1, %p5640_p2 }
  0x9f   : > { %p5638_p13 = pneg %p5637_p11  ;;  %p5644_p8 = por %p5643_p4, %p5642_p12 }
  0xa1   : > { %p5645_p6 = pnand %p5644_p8, %p5638_p13 }
  0xa3   : > { %5648 = shalt.err (!%p5645_p6)
}
  0xa4   : > { %s5649_s26 = scalar_lea.vmem %s6024_s9, 32768  ;;  %s5786_s25 = smov [#allocation2]  }
  0xa5   : > { %p5650_p3 = scmp.ne.s32.totalorder %s6024_s9, %s5649_s26  ;;  %s5654_s18 = sshll.u32 %s5786_s25, 4  ;;  %s5655_s18 = int_to_ptr.vmem [resolvable:$false] %s5654_s18 }
  0xa6   : > { %s5656_s23 = scalar_lea.vmem %s5655_s18, 65536  ;;  %p5657_p11 = scmp.lt.s32.totalorder %s6024_s9, %s5655_s18 }
  0xa7   : > { %p5652_p5 = pnand %p5650_p3, %p5636_p9  ;;  %p5658_p2 = scmp.lt.s32.totalorder %s5656_s23, %s5649_s26 }
  0xa9   : > { %p5653_p7 = pneg %p5652_p5  ;;  %p5659_p1 = por %p5658_p2, %p5657_p11 }
  0xab   : > { %p5660_p12 = pnand %p5659_p1, %p5653_p7 }
  0xad   : > { %5663 = shalt.err (!%p5660_p12)
}
  0xae   : > { %s5787_s22 = smov 1024   ;;  %s6628_s21 = smov 128  }
  0xaf   : > { %4941 = dma.hbm_to_vmem [thread:$0]  (!%p6026_p10), %s6022_s24, 32768, %s6024_s9, %s334_s20, %s5787_s22, %s6628_s21, %s5784_s19  }
  0xb0   : > { %s4216_s30 = sshll.u32 %s6015_s29, 1  ;;  %s4621_s25 = sshll.u32 %s5776_s12, 5 }
  0xb1   : > { %s6066_s23 = scalar_lea.hbm %s6593_s3, %s4621_s25  ;;  %s358_s2 = scalar_lea.vmem [#allocation5], %s4216_s30 }
  0xb2   : > { %s366_s4 = sshll.u32 %s358_s2, 4  ;;  %s6629_s5 = sand.u32 1, %s5776_s12   ;;  %s367_s4 = int_to_ptr.vmem [resolvable:$true] %s366_s4 }
  0xb3   : > { %s355_s6 = scalar_lea.sflag [#allocation6], %s6629_s5  ;;  %s5664_s7 = scalar_lea.hbm %s6066_s23, 32 }
  0xb4   : > { %p5665_p13 = scmp.ne.s32.totalorder %s6066_s23, %s5664_s7  ;;  %s5669_s24 = scalar_lea.hbm %s6593_s3, 256 }
  0xb5   : > { %p5670_p6 = scmp.lt.u32.totalorder %s6066_s23, %s6593_s3  ;;  %p5671_p3 = scmp.lt.u32.totalorder %s5669_s24, %s5664_s7 }
  0xb6   : > { %p5667_p4 = pnand %p5665_p13, %p5636_p9  ;;  %p5673_p7 = scmp.lt.u32.totalorder %s5664_s7, %s6066_s23 }
  0xb7   : > { %p5672_p5 = por %p5671_p3, %p5670_p6 }
  0xb8   : > { %p5668_p8 = pneg %p5667_p4 }
  0xb9   : > { %p5674_p11 = por %p5673_p7, %p5672_p5 }
  0xbb   : > { %p5675_p2 = pnand %p5674_p11, %p5668_p8 }
  0xbd   : > { %5678 = shalt.err (!%p5675_p2)
}
  0xbe   : > { %s5679_s2 = scalar_lea.vmem %s367_s4, 32  ;;  %s5788_s5 = smov [#allocation5]  }
  0xbf   : > { %p5680_p1 = scmp.ne.s32.totalorder %s367_s4, %s5679_s2  ;;  %s5684_s22 = sshll.u32 %s5788_s5, 4  ;;  %s5685_s22 = int_to_ptr.vmem [resolvable:$false] %s5684_s22 }
  0xc0   : > { %s5686_s21 = scalar_lea.vmem %s5685_s22, 64  ;;  %p5687_p4 = scmp.lt.s32.totalorder %s367_s4, %s5685_s22 }
  0xc1   : > { %p5682_p12 = pnand %p5680_p1, %p5636_p9  ;;  %p5688_p0 = scmp.lt.s32.totalorder %s5686_s21, %s5679_s2 }
  0xc3   : > { %p5683_p13 = pneg %p5682_p12  ;;  %p5689_p3 = por %p5688_p0, %p5687_p4 }
  0xc5   : > { %p5690_p6 = pnand %p5689_p3, %p5683_p13 }
  0xc7   : > { %5693 = shalt.err (!%p5690_p6)
}
  0xc8   : > { %4944 = dma.hbm_to_vmem [thread:$0]  (!%p6026_p10), %s6066_s23, 32, %s367_s4, %s355_s6  }
  0xc9   : > { %p6630_p8 = scmp.ne.s32.totalorder %s6617_s17, 0 }
  0xca   : > { %s6092_s7 = sand.u32 (!%p6630_p8), 1, %s5768_s10   ;;  %p6631_p0 = scmp.ne.s32.totalorder (!%p6630_p8), %s6614_s15, 0 }
  0xcb   : > { %375 = sbr.rel (%p6630_p8) target bundleno = 1054 (0x41e), region = 52  ;;  %s4220_s30 = sshll.u32 (!%p6630_p8), %s6092_s7, 11 }
  0xcc   : > { %s378_s25 = scalar_lea.sflag (!%p6630_p8), [#allocation3], %s6092_s7  ;;  %s6096_s26 = scalar_lea.vmem (!%p6630_p8), [#allocation2], %s4220_s30 }
  0xd2   : > { %5739 = dma.done.wait (%p6631_p0), %s378_s25, 32768  }
  0xd3   : > { %5741 = vsyncadd (%p6631_p0), %s378_s25, 4294934528  ;;  %s386_s4 = sand.u32 1, %s5865_s13   ;;  %s4221_s6 = sshll.u32 %s6092_s7, 1 }
  0xd4   : > { %s387_s17 = scalar_lea.sflag [#allocation6], %s386_s4  ;;  %s6104_s16 = scalar_lea.vmem [#allocation5], %s4221_s6 }
  0xd5   : > { %5743 = dma.done.wait (%p6631_p0), %s387_s17, 32  }
  0xd6   : > { %5745 = vsyncadd (%p6631_p0), %s387_s17, 4294967264  ;;  %p6632_p10 = scmp.eq.s32.totalorder %s5865_s13, 0 }
  0xd8   : > { %5747 = dma.done.wait (%p6632_p10), [#allocation6], 16384   ;;  %p6633_p9 = pmov %p6632_p10 }
  0xda   : > { %5749 = vsyncadd (%p6633_p9), [#allocation6], 4294950912  ;;  %p6634_p5 = pmov %p6633_p9 }
  0xdc   : > { %5751 = dma.done.wait (%p6634_p5), [#allocation9], 2064   ;;  %p6635_p7 = pmov %p6634_p5 }
  0xdd   : > { %p6636_p11 = pmov %p6634_p5 }
  0xde   : > { %5753 = vsyncadd (%p6635_p7), [#allocation9], 4294965232 }
  0xdf   : > { %5755 = dma.done.wait (%p6636_p11), [#allocation12], 16   ;;  %p6637_p2 = pmov %p6634_p5 }
  0xe0   : > { %v5004_v0 = vld [vmem:[%s6096_s26 + $0x4] ss:$8 sps:$4 sm:$0xff]   ;;  %v5008_v2 = vld [vmem:[%s6096_s26] ss:$8 sps:$4 sm:$0xff]   ;;  %v5010_v4 = vld [vmem:[%s6096_s26 + $0x14] ss:$8 sps:$4 sm:$0xff]   ;;  %v718_v36 = vlaneseq }
  0xe1   : > { %5757 = vsyncadd (%p6637_p2), [#allocation12], 4294967280  ;;  %v5006_v1 = vld [vmem:[%s6096_s26 + $0x204] ss:$8 sps:$4 sm:$0xff]   ;;  %2124 = vmatprep.subr.bf16.mxu1 %v5004_v0  ;;  %v5009_v3 = vld [vmem:[%s6096_s26 + $0x200] ss:$8 sps:$4 sm:$0xff]  }
  0xe2   : > { %2206 = vmatprep.subr.bf16.mxu0 %v5006_v1  ;;  %2125 = vmatpush1.bf16.msra.mxu1 %v5008_v2  ;;  %v5012_v5 = vld [vmem:[%s6096_s26 + $0x214] ss:$8 sps:$4 sm:$0xff]   ;;  %v5014_v6 = vld [vmem:[%s6096_s26 + $0x10] ss:$8 sps:$4 sm:$0xff]   ;;  %v5016_v8 = vld [vmem:[%s6096_s26 + $0x24] ss:$8 sps:$4 sm:$0xff]  }
  0xe3   : > { %2207 = vmatpush1.bf16.msra.mxu0 %v5009_v3  ;;  %2126 = vmatprep.subr.bf16.mxu1 %v5010_v4  ;;  %v5015_v7 = vld [vmem:[%s6096_s26 + $0x210] ss:$8 sps:$4 sm:$0xff]   ;;  %v5018_v9 = vld [vmem:[%s6096_s26 + $0x224] ss:$8 sps:$4 sm:$0xff]   ;;  %v5020_v10 = vld [vmem:[%s6096_s26 + $0x20] ss:$8 sps:$4 sm:$0xff]  }
  0xe4   : > { %2208 = vmatprep.subr.bf16.mxu0 %v5012_v5  ;;  %v5021_v11 = vld [vmem:[%s6096_s26 + $0x220] ss:$8 sps:$4 sm:$0xff]   ;;  %v5022_v12 = vld [vmem:[%s6096_s26 + $0x34] ss:$8 sps:$4 sm:$0xff]   ;;  %v5026_v14 = vld [vmem:[%s6096_s26 + $0x30] ss:$8 sps:$4 sm:$0xff]  }
  0xe5   : > { %v5024_v13 = vld [vmem:[%s6096_s26 + $0x234] ss:$8 sps:$4 sm:$0xff]   ;;  %v5027_v15 = vld [vmem:[%s6096_s26 + $0x230] ss:$8 sps:$4 sm:$0xff]   ;;  %v5028_v16 = vld [vmem:[%s6096_s26 + $0x44] ss:$8 sps:$4 sm:$0xff]  }
  0xe6   : > { %2127 = vmatpush1.bf16.msra.mxu1 %v5014_v6  ;;  %v5030_v17 = vld [vmem:[%s6096_s26 + $0x244] ss:$8 sps:$4 sm:$0xff]   ;;  %v5032_v18 = vld [vmem:[%s6096_s26 + $0x40] ss:$8 sps:$4 sm:$0xff]   ;;  %v5034_v20 = vld [vmem:[%s6096_s26 + $0x54] ss:$8 sps:$4 sm:$0xff]  }
  0xe7   : > { %2209 = vmatpush1.bf16.msra.mxu0 %v5015_v7  ;;  %2128 = vmatprep.subr.bf16.mxu1 %v5016_v8  ;;  %v5033_v19 = vld [vmem:[%s6096_s26 + $0x240] ss:$8 sps:$4 sm:$0xff]   ;;  %v5036_v21 = vld [vmem:[%s6096_s26 + $0x254] ss:$8 sps:$4 sm:$0xff]   ;;  %v5038_v22 = vld [vmem:[%s6096_s26 + $0x50] ss:$8 sps:$4 sm:$0xff]  }
  0xe8   : > { %2210 = vmatprep.subr.bf16.mxu0 %v5018_v9  ;;  %v5039_v23 = vld [vmem:[%s6096_s26 + $0x250] ss:$8 sps:$4 sm:$0xff]   ;;  %v5040_v24 = vld [vmem:[%s6096_s26 + $0x64] ss:$8 sps:$4 sm:$0xff]   ;;  %v5044_v26 = vld [vmem:[%s6096_s26 + $0x60] ss:$8 sps:$4 sm:$0xff]  }
  0xe9   : > { %v5042_v25 = vld [vmem:[%s6096_s26 + $0x264] ss:$8 sps:$4 sm:$0xff]   ;;  %v5045_v27 = vld [vmem:[%s6096_s26 + $0x260] ss:$8 sps:$4 sm:$0xff]   ;;  %v5046_v28 = vld [vmem:[%s6096_s26 + $0x74] ss:$8 sps:$4 sm:$0xff]  }
  0xea   : > { %2129 = vmatpush1.bf16.msra.mxu1 %v5020_v10  ;;  %v5048_v29 = vld [vmem:[%s6096_s26 + $0x274] ss:$8 sps:$4 sm:$0xff]   ;;  %v5050_v30 = vld [vmem:[%s6096_s26 + $0x70] ss:$8 sps:$4 sm:$0xff]   ;;  %v5052_v32 = vld [vmem:[%s6096_s26 + $0x84] ss:$8 sps:$4 sm:$0xff]  }
  0xeb   : > { %2211 = vmatpush1.bf16.msra.mxu0 %v5021_v11  ;;  %2130 = vmatprep.subr.bf16.mxu1 %v5022_v12  ;;  %v5051_v31 = vld [vmem:[%s6096_s26 + $0x270] ss:$8 sps:$4 sm:$0xff]   ;;  %v5054_v33 = vld [vmem:[%s6096_s26 + $0x284] ss:$8 sps:$4 sm:$0xff]   ;;  %v5056_v34 = vld [vmem:[%s6096_s26 + $0x80] ss:$8 sps:$4 sm:$0xff]  }
  0xec   : > { %2212 = vmatprep.subr.bf16.mxu0 %v5024_v13  ;;  %v5057_v35 = vld [vmem:[%s6096_s26 + $0x280] ss:$8 sps:$4 sm:$0xff]   ;;  %v5789_v37 = vmov 1966171168   ;;  %v5058_v39 = vld [vmem:[%s6096_s26 + $0x94] ss:$8 sps:$4 sm:$0xff]  }
  0xed   : > { %v732_v38 = vunpack.c.l.s4 %v5789_v37  ;;  %v5060_v40 = vld [vmem:[%s6096_s26 + $0x294] ss:$8 sps:$4 sm:$0xff]   ;;  %v5062_v41 = vld [vmem:[%s6096_s26 + $0x90] ss:$8 sps:$4 sm:$0xff]   ;;  %v6161_v42 = vshrl.u32 %v718_v36, 7  ;;  %v458_v52 = vld [vmem:[%s6590_s0] sm:$0xff] }
  0xee   : > { %2131 = vmatpush1.bf16.msra.mxu1 %v5026_v14  ;;  %v5063_v44 = vld [vmem:[%s6096_s26 + $0x290] ss:$8 sps:$4 sm:$0xff]   ;;  %v5064_v45 = vld [vmem:[%s6096_s26 + $0xa4] ss:$8 sps:$4 sm:$0xff]   ;;  %v5068_v47 = vld [vmem:[%s6096_s26 + $0xa0] ss:$8 sps:$4 sm:$0xff]   ;;  %v730_v55 = vcombine.high %v458_v52, %v458_v52 }
  0xef   : > { %2213 = vmatpush1.bf16.msra.mxu0 %v5027_v15  ;;  %2132 = vmatprep.subr.bf16.mxu1 %v5028_v16  ;;  %v733_v43 = vunpack.c.0.s8 %v732_v38  ;;  %v5066_v46 = vld [vmem:[%s6096_s26 + $0x2a4] ss:$8 sps:$4 sm:$0xff]   ;;  %v5069_v48 = vld [vmem:[%s6096_s26 + $0x2a0] ss:$8 sps:$4 sm:$0xff]   ;;  %v5070_v50 = vld [vmem:[%s6096_s26 + $0xb4] ss:$8 sps:$4 sm:$0xff]  }
  0xf0   : > { %2214 = vmatprep.subr.bf16.mxu0 %v5030_v17  ;;  %v5072_v51 = vld [vmem:[%s6096_s26 + $0x2b4] ss:$8 sps:$4 sm:$0xff]   ;;  %v5074_v53 = vld [vmem:[%s6096_s26 + $0xb0] ss:$8 sps:$4 sm:$0xff]   ;;  %v5076_v57 = vld [vmem:[%s6096_s26 + $0xc4] ss:$8 sps:$4 sm:$0xff]  }
  0xf1   : > { %v6169_v49 = vsub.s32 %v733_v43, %v6161_v42  ;;  %v5075_v56 = vld [vmem:[%s6096_s26 + $0x2b0] ss:$8 sps:$4 sm:$0xff]   ;;  %v5078_v58 = vld [vmem:[%s6096_s26 + $0x2c4] ss:$8 sps:$4 sm:$0xff]   ;;  %v5080_v61 = vld [vmem:[%s6096_s26 + $0xc0] ss:$8 sps:$4 sm:$0xff]  }
  0xf2   : > { %2133 = vmatpush1.bf16.msra.mxu1 %v5032_v18  ;;  %v5081_v0 = vld [vmem:[%s6096_s26 + $0x2c0] ss:$8 sps:$4 sm:$0xff]   ;;  %v5082_v1 = vld [vmem:[%s6096_s26 + $0xd4] ss:$8 sps:$4 sm:$0xff]   ;;  %v5086_v4 = vld [vmem:[%s6096_s26 + $0xd0] ss:$8 sps:$4 sm:$0xff]  }
  0xf3   : > { %2215 = vmatpush1.bf16.msra.mxu0 %v5033_v19  ;;  %2134 = vmatprep.subr.bf16.mxu1 %v5034_v20  ;;  %v737_v54 = vrot.slane %v458_v52, %v6169_v49  ;;  %v744_v60 = vrot.slane %v730_v55, %v6169_v49  ;;  %v5084_v2 = vld [vmem:[%s6096_s26 + $0x2d4] ss:$8 sps:$4 sm:$0xff]   ;;  %v5087_v5 = vld [vmem:[%s6096_s26 + $0x2d0] ss:$8 sps:$4 sm:$0xff]   ;;  %v5088_v6 = vld [vmem:[%s6096_s26 + $0xe4] ss:$8 sps:$4 sm:$0xff]  }
  0xf4   : > { %2216 = vmatprep.subr.bf16.mxu0 %v5036_v21  ;;  %v5090_v7 = vld [vmem:[%s6096_s26 + $0x2e4] ss:$8 sps:$4 sm:$0xff]   ;;  %v5092_v8 = vld [vmem:[%s6096_s26 + $0xe0] ss:$8 sps:$4 sm:$0xff]   ;;  %v5094_v10 = vld [vmem:[%s6096_s26 + $0xf4] ss:$8 sps:$4 sm:$0xff]  }
  0xf5   : > { %v745_v59 = vcombine.high %v737_v54, %v737_v54  ;;  %v746_v63 = vcombine.high %v744_v60, %v744_v60  ;;  %v5093_v9 = vld [vmem:[%s6096_s26 + $0x2e0] ss:$8 sps:$4 sm:$0xff]   ;;  %v5096_v11 = vld [vmem:[%s6096_s26 + $0x2f4] ss:$8 sps:$4 sm:$0xff]   ;;  %v5098_v12 = vld [vmem:[%s6096_s26 + $0xf0] ss:$8 sps:$4 sm:$0xff]   ;;  %v6202_v17 = vrot.slane %v737_v54, %v6169_v49  ;;  %v6205_v18 = vrot.slane %v744_v60, %v6169_v49 }
  0xf6   : > { %2135 = vmatpush1.bf16.msra.mxu1 %v5038_v22  ;;  %v5099_v13 = vld [vmem:[%s6096_s26 + $0x2f0] ss:$8 sps:$4 sm:$0xff]   ;;  %v5102_v14 = vld [vmem:[%s6096_s26 + $0x104] ss:$8 sps:$4 sm:$0xff]   ;;  %v5100_v16 = vld [vmem:[%s6096_s26 + $0x100] ss:$8 sps:$4 sm:$0xff]  }
  0xf7   : > { %2217 = vmatpush1.bf16.msra.mxu0 %v5039_v23  ;;  %2136 = vmatprep.subr.bf16.mxu1 %v5040_v24  ;;  %v767_v62 = vrot.slane %v745_v59, %v6169_v49  ;;  %v774_v3 = vrot.slane %v746_v63, %v6169_v49  ;;  %v5106_v15 = vld [vmem:[%s6096_s26 + $0x304] ss:$8 sps:$4 sm:$0xff]   ;;  %v5104_v19 = vld [vmem:[%s6096_s26 + $0x300] ss:$8 sps:$4 sm:$0xff]   ;;  %v5109_v20 = vld [vmem:[%s6096_s26 + $0x114] ss:$8 sps:$4 sm:$0xff]  }
  0xf8   : > { %2218 = vmatprep.subr.bf16.mxu0 %v5042_v25  ;;  %v5112_v21 = vld [vmem:[%s6096_s26 + $0x314] ss:$8 sps:$4 sm:$0xff]   ;;  %v5107_v24 = vld [vmem:[%s6096_s26 + $0x110] ss:$8 sps:$4 sm:$0xff]   ;;  %v5125_v36 = vld [vmem:[%s6096_s26 + $0x140] ss:$8 sps:$4 sm:$0xff]  }
  0xf9   : > { %2156 = vmatprep.mubr.bf16.mxu1 %v767_v62  ;;  %2238 = vmatprep.mubr.bf16.mxu0 %v774_v3  ;;  %v777_v22 = vcombine.high %v767_v62, %v767_v62  ;;  %v778_v23 = vcombine.high %v774_v3, %v774_v3  ;;  %v5110_v25 = vld [vmem:[%s6096_s26 + $0x310] ss:$8 sps:$4 sm:$0xff]   ;;  %v5128_v37 = vld [vmem:[%s6096_s26 + $0x340] ss:$8 sps:$4 sm:$0xff]   ;;  %v5133_v38 = vld [vmem:[%s6096_s26 + $0x154] ss:$8 sps:$4 sm:$0xff]  }
  0xfa   : > { %2137 = vmatpush1.bf16.msra.mxu1 %v5044_v26  ;;  %v5115_v26 = vld [vmem:[%s6096_s26 + $0x124] ss:$8 sps:$4 sm:$0xff]   ;;  %v5149_v54 = vld [vmem:[%s6096_s26 + $0x180] ss:$8 sps:$4 sm:$0xff]   ;;  %v5158_v59 = vld [vmem:[%s6096_s26 + $0x390] ss:$8 sps:$4 sm:$0xff]  }
  0xfb   : > { %2219 = vmatpush1.bf16.msra.mxu0 %v5045_v27  ;;  %2138 = vmatprep.subr.bf16.mxu1 %v5046_v28  ;;  %v5118_v27 = vld [vmem:[%s6096_s26 + $0x324] ss:$8 sps:$4 sm:$0xff]   ;;  %v5113_v28 = vld [vmem:[%s6096_s26 + $0x120] ss:$8 sps:$4 sm:$0xff]   ;;  %v5170_v3 = vld [vmem:[%s6096_s26 + $0x3b0] ss:$8 sps:$4 sm:$0xff]  }
  0xfc   : > { %2220 = vmatprep.subr.bf16.mxu0 %v5048_v29  ;;  %v5116_v29 = vld [vmem:[%s6096_s26 + $0x320] ss:$8 sps:$4 sm:$0xff]   ;;  %v5139_v43 = vld [vmem:[%s6096_s26 + $0x164] ss:$8 sps:$4 sm:$0xff]   ;;  %vm5791_vm0 = vmmov 0   ;;  %s4226_s2 = sshll.u32 %s6092_s7, 2 }
  0xfd   : > { %v5151_v52 = vld [vmem:[%s6096_s26 + $0x184] ss:$8 sps:$4 sm:$0xff]   ;;  %v5152_v55 = vld [vmem:[%s6096_s26 + $0x380] ss:$8 sps:$4 sm:$0xff]   ;;  %s443_s5 = scalar_lea.vmem [#allocation13], %s4226_s2  ;;  %s4622_s22 = sshll.u32 %s5865_s13, 6 }
  0xfe   : > { %2139 = vmatpush1.bf16.msra.mxu1 %v5050_v30  ;;  %v5121_v30 = vld [vmem:[%s6096_s26 + $0x134] ss:$8 sps:$4 sm:$0xff]   ;;  %v5163_v60 = vld [vmem:[%s6096_s26 + $0x1a4] ss:$8 sps:$4 sm:$0xff]   ;;  %v5161_v62 = vld [vmem:[%s6096_s26 + $0x1a0] ss:$8 sps:$4 sm:$0xff]  }
  0xff   : > { %2221 = vmatpush1.bf16.msra.mxu0 %v5051_v31  ;;  %2140 = vmatprep.subr.bf16.mxu1 %v5052_v32  ;;  %v5124_v31 = vld [vmem:[%s6096_s26 + $0x334] ss:$8 sps:$4 sm:$0xff]   ;;  %v5119_v32 = vld [vmem:[%s6096_s26 + $0x130] ss:$8 sps:$4 sm:$0xff]   ;;  %v5164_v63 = vld [vmem:[%s6096_s26 + $0x3a0] ss:$8 sps:$4 sm:$0xff]  }
 0x100   : > { %2222 = vmatprep.subr.bf16.mxu0 %v5054_v33  ;;  %v5122_v33 = vld [vmem:[%s6096_s26 + $0x330] ss:$8 sps:$4 sm:$0xff]   ;;  %s4048_s21 = sshll.u32 %s443_s5, 4  ;;  %s4030_s4 = scalar_lea.sflag [#allocation4], %s6092_s7  ;;  %s4049_s21 = int_to_ptr.vmem [resolvable:$true] %s4048_s21 }
 0x101   : > { %s5694_s6 = scalar_lea.vmem %s4049_s21, 64  ;;  %p6638_p12 = scmp.ne.s32.totalorder %s6625_s27, 0 }
 0x102   : > { %2141 = vmatpush1.bf16.msra.mxu1 %v5056_v34  ;;  %v5127_v34 = vld [vmem:[%s6096_s26 + $0x144] ss:$8 sps:$4 sm:$0xff]   ;;  %p5695_p1 = scmp.ne.s32.totalorder %s4049_s21, %s5694_s6  ;;  %s5793_s17 = smov [#allocation13]  }
 0x103   : > { %2223 = vmatpush1.bf16.msra.mxu0 %v5057_v35  ;;  %2142 = vmatprep.subr.bf16.mxu1 %v5058_v39  ;;  %v5130_v35 = vld [vmem:[%s6096_s26 + $0x344] ss:$8 sps:$4 sm:$0xff]   ;;  %v5136_v39 = vld [vmem:[%s6096_s26 + $0x354] ss:$8 sps:$4 sm:$0xff]  }
 0x104   : > { %2224 = vmatprep.subr.bf16.mxu0 %v5060_v40  ;;  %v5131_v40 = vld [vmem:[%s6096_s26 + $0x150] ss:$8 sps:$4 sm:$0xff]   ;;  %p5696_p13 = pnand %p5695_p1, %p6638_p12 }
 0x106   : > { %2143 = vmatpush1.bf16.msra.mxu1 %v5062_v41  ;;  %v5134_v41 = vld [vmem:[%s6096_s26 + $0x350] ss:$8 sps:$4 sm:$0xff]   ;;  %p5697_p4 = pneg %p5696_p13 }
 0x107   : > { %2225 = vmatpush1.bf16.msra.mxu0 %v5063_v44  ;;  %2144 = vmatprep.subr.bf16.mxu1 %v5064_v45  ;;  %v5142_v44 = vld [vmem:[%s6096_s26 + $0x364] ss:$8 sps:$4 sm:$0xff]   ;;  %v5137_v45 = vld [vmem:[%s6096_s26 + $0x160] ss:$8 sps:$4 sm:$0xff]  }
 0x108   : > { %2226 = vmatprep.subr.bf16.mxu0 %v5066_v46  ;;  %v5140_v46 = vld [vmem:[%s6096_s26 + $0x360] ss:$8 sps:$4 sm:$0xff]  }
 0x10a   : > { %2145 = vmatpush1.bf16.msra.mxu1 %v5068_v47  ;;  %v5145_v47 = vld [vmem:[%s6096_s26 + $0x174] ss:$8 sps:$4 sm:$0xff]  }
 0x10b   : > { %2227 = vmatpush1.bf16.msra.mxu0 %v5069_v48  ;;  %2146 = vmatprep.subr.bf16.mxu1 %v5070_v50  ;;  %v5148_v48 = vld [vmem:[%s6096_s26 + $0x374] ss:$8 sps:$4 sm:$0xff]   ;;  %v5143_v50 = vld [vmem:[%s6096_s26 + $0x170] ss:$8 sps:$4 sm:$0xff]  }
 0x10c   : > { %2228 = vmatprep.subr.bf16.mxu0 %v5072_v51  ;;  %v5146_v51 = vld [vmem:[%s6096_s26 + $0x370] ss:$8 sps:$4 sm:$0xff]  }
 0x10e   : > { %2147 = vmatpush1.bf16.msra.mxu1 %v5074_v53  ;;  %v5154_v53 = vld [vmem:[%s6096_s26 + $0x384] ss:$8 sps:$4 sm:$0xff]  }
 0x10f   : > { %2229 = vmatpush1.bf16.msra.mxu0 %v5075_v56  ;;  %2148 = vmatprep.subr.bf16.mxu1 %v5076_v57  ;;  %v5157_v56 = vld [vmem:[%s6096_s26 + $0x194] ss:$8 sps:$4 sm:$0xff]  }
 0x110   : > { %2230 = vmatprep.subr.bf16.mxu0 %v5078_v58  ;;  %v5160_v57 = vld [vmem:[%s6096_s26 + $0x394] ss:$8 sps:$4 sm:$0xff]   ;;  %v5155_v58 = vld [vmem:[%s6096_s26 + $0x190] ss:$8 sps:$4 sm:$0xff]  }
 0x112   : > { %2149 = vmatpush1.bf16.msra.mxu1 %v5080_v61  ;;  %v5166_v61 = vld [vmem:[%s6096_s26 + $0x3a4] ss:$8 sps:$4 sm:$0xff]  }
 0x113   : > { %2231 = vmatpush1.bf16.msra.mxu0 %v5081_v0  ;;  %2150 = vmatprep.subr.bf16.mxu1 %v5082_v1  ;;  %v5169_v0 = vld [vmem:[%s6096_s26 + $0x1b4] ss:$8 sps:$4 sm:$0xff]  }
 0x114   : > { %2232 = vmatprep.subr.bf16.mxu0 %v5084_v2  ;;  %v5172_v1 = vld [vmem:[%s6096_s26 + $0x3b4] ss:$8 sps:$4 sm:$0xff]   ;;  %v5167_v2 = vld [vmem:[%s6096_s26 + $0x1b0] ss:$8 sps:$4 sm:$0xff]  }
 0x116   : > { %2151 = vmatpush1.bf16.msra.mxu1 %v5086_v4  ;;  %v5175_v4 = vld [vmem:[%s6096_s26 + $0x1c4] ss:$8 sps:$4 sm:$0xff]  }
 0x117   : > { %2233 = vmatpush1.bf16.msra.mxu0 %v5087_v5  ;;  %2152 = vmatprep.subr.bf16.mxu1 %v5088_v6  ;;  %v5178_v5 = vld [vmem:[%s6096_s26 + $0x3c4] ss:$8 sps:$4 sm:$0xff]   ;;  %v5173_v6 = vld [vmem:[%s6096_s26 + $0x1c0] ss:$8 sps:$4 sm:$0xff]  }
 0x118   : > { %2234 = vmatprep.subr.bf16.mxu0 %v5090_v7  ;;  %v5176_v7 = vld [vmem:[%s6096_s26 + $0x3c0] ss:$8 sps:$4 sm:$0xff]  }
 0x11a   : > { %2153 = vmatpush1.bf16.msra.mxu1 %v5092_v8  ;;  %v5181_v8 = vld [vmem:[%s6096_s26 + $0x1d4] ss:$8 sps:$4 sm:$0xff]  }
 0x11b   : > { %2235 = vmatpush1.bf16.msra.mxu0 %v5093_v9  ;;  %2154 = vmatprep.subr.bf16.mxu1 %v5094_v10  ;;  %v5184_v9 = vld [vmem:[%s6096_s26 + $0x3d4] ss:$8 sps:$4 sm:$0xff]   ;;  %v5179_v10 = vld [vmem:[%s6096_s26 + $0x1d0] ss:$8 sps:$4 sm:$0xff]  }
 0x11c   : > { %2236 = vmatprep.subr.bf16.mxu0 %v5096_v11  ;;  %v5182_v11 = vld [vmem:[%s6096_s26 + $0x3d0] ss:$8 sps:$4 sm:$0xff]  }
 0x11e   : > { %2155 = vmatpush1.bf16.msra.mxu1 %v5098_v12  ;;  %v5187_v12 = vld [vmem:[%s6096_s26 + $0x1e4] ss:$8 sps:$4 sm:$0xff]  }
 0x11f   : > { %2237 = vmatpush1.bf16.msra.mxu0 %v5099_v13  ;;  %2165 = vmatprep.subr.bf16.mxu1 %v5102_v14  ;;  %v5190_v13 = vld [vmem:[%s6096_s26 + $0x3e4] ss:$8 sps:$4 sm:$0xff]   ;;  %v5185_v14 = vld [vmem:[%s6096_s26 + $0x1e0] ss:$8 sps:$4 sm:$0xff]  }
 0x120   : > { %2247 = vmatprep.subr.bf16.mxu0 %v5106_v15  ;;  %v6268_v15 = vld [vmem:[%s6591_s1] sm:$0xff] }
 0x121   : > { %2157 = vmatmul.mubr.bf16.vlgmr.msra.gmra.mrb[0].mxu1 %v6202_v17 }
 0x122   : > { %2239 = vmatmul.mubr.bf16.vlgmr.msra.gmra.mrb[0].mxu0 %v6205_v18  ;;  %2166 = vmatpush1.bf16.msra.mxu1 %v5100_v16  ;;  %v5188_v16 = vld [vmem:[%s6096_s26 + $0x3e0] ss:$8 sps:$4 sm:$0xff]  }
 0x123   : > { %2248 = vmatpush1.bf16.msra.mxu0 %v5104_v19  ;;  %2167 = vmatprep.subr.bf16.mxu1 %v5109_v20  ;;  %v5193_v19 = vld [vmem:[%s6096_s26 + $0x1f4] ss:$8 sps:$4 sm:$0xff]  }
 0x124   : > { %2249 = vmatprep.subr.bf16.mxu0 %v5112_v21  ;;  %2197 = vmatprep.mubr.bf16.mxu1 %v777_v22  ;;  %v5196_v20 = vld [vmem:[%s6096_s26 + $0x3f4] ss:$8 sps:$4 sm:$0xff]   ;;  %v6275_v21 = vrot.slane %v6268_v15, %v6169_v49  ;;  %v5191_v22 = vld [vmem:[%s6096_s26 + $0x1f0] ss:$8 sps:$4 sm:$0xff]  }
 0x125   : > { %2279 = vmatprep.mubr.bf16.mxu0 %v778_v23  ;;  %v5194_v23 = vld [vmem:[%s6096_s26 + $0x3f0] ss:$8 sps:$4 sm:$0xff]  }
 0x126   : > { %2168 = vmatpush1.bf16.msra.mxu1 %v5107_v24  ;;  %v5199_v24 = vld [vmem:[%s6096_s26 + $0x404] ss:$8 sps:$4 sm:$0xff]  }
 0x127   : > { %2250 = vmatpush1.bf16.msra.mxu0 %v5110_v25  ;;  %2169 = vmatprep.subr.bf16.mxu1 %v5115_v26  ;;  %v5200_v25 = vld [vmem:[#allocation7 + $0x40] sm:$0xff]  }
 0x128   : > { %2251 = vmatprep.subr.bf16.mxu0 %v5118_v27  ;;  %v5197_v26 = vld [vmem:[%s6096_s26 + $0x400] ss:$8 sps:$4 sm:$0xff]   ;;  %v2746_v27 = vcombine.high %v6275_v21, %v6275_v21 }
 0x12a   : > { %2170 = vmatpush1.bf16.msra.mxu1 %v5113_v28  ;;  %v775_v28 = vcombine.high %v6202_v17, %v6202_v17  ;;  %v5206_v17 = vld [vmem:[#allocation7 + $0x8] sm:$0xff]  }
 0x12b   : > { %2252 = vmatpush1.bf16.msra.mxu0 %v5116_v29  ;;  %2171 = vmatprep.subr.bf16.mxu1 %v5121_v30  ;;  %v776_v29 = vcombine.high %v6205_v18, %v6205_v18  ;;  %v5201_v30 = vld [vmem:[#allocation7] sm:$0xff]  }
 0x12c   : > { %2253 = vmatprep.subr.bf16.mxu0 %v5124_v31  ;;  %v5204_v31 = vld [vmem:[%s6096_s26 + $0x414] ss:$8 sps:$4 sm:$0xff]   ;;  %v5209_v18 = vld [vmem:[%s6096_s26 + $0x424] ss:$8 sps:$4 sm:$0xff]  }
 0x12e   : > { %2172 = vmatpush1.bf16.msra.mxu1 %v5119_v32  ;;  %v5205_v32 = vld [vmem:[#allocation7 + $0x48] sm:$0xff]  }
 0x12f   : > { %2254 = vmatpush1.bf16.msra.mxu0 %v5122_v33  ;;  %2173 = vmatprep.subr.bf16.mxu1 %v5127_v34  ;;  %v6289_v33 = vrot.slane %v2746_v27, %v6169_v49  ;;  %v5202_v34 = vld [vmem:[%s6096_s26 + $0x410] ss:$8 sps:$4 sm:$0xff]  }
 0x130   : > { %2255 = vmatprep.subr.bf16.mxu0 %v5130_v35  ;;  %v5210_v35 = vld [vmem:[#allocation7 + $0x50] sm:$0xff]  }
 0x131   : > { %v5262_v27 = vld [vmem:[%s6096_s26 + $0x4d0] ss:$8 sps:$4 sm:$0xff]  }
 0x132   : > { %2174 = vmatpush1.bf16.msra.mxu1 %v5125_v36  ;;  %v5207_v36 = vld [vmem:[%s6096_s26 + $0x420] ss:$8 sps:$4 sm:$0xff]  }
 0x133   : > { %2256 = vmatpush1.bf16.msra.mxu0 %v5128_v37  ;;  %2175 = vmatprep.subr.bf16.mxu1 %v5133_v38  ;;  %v5211_v37 = vld [vmem:[#allocation7 + $0x10] sm:$0xff]  }
 0x134   : > { %2257 = vmatprep.subr.bf16.mxu0 %v5136_v39  ;;  %v5214_v38 = vld [vmem:[%s6096_s26 + $0x434] ss:$8 sps:$4 sm:$0xff]  }
 0x135   : > { %v5215_v39 = vld [vmem:[#allocation7 + $0x58] sm:$0xff]  }
 0x136   : > { %2176 = vmatpush1.bf16.msra.mxu1 %v5131_v40  ;;  %v5212_v40 = vld [vmem:[%s6096_s26 + $0x430] ss:$8 sps:$4 sm:$0xff]  }
 0x137   : > { %2258 = vmatpush1.bf16.msra.mxu0 %v5134_v41  ;;  %2177 = vmatprep.subr.bf16.mxu1 %v5139_v43  ;;  %v6300_v41 = vld [vmem:[%s6590_s0 + $0x8] sm:$0xff]  ;;  %v5216_v43 = vld [vmem:[#allocation7 + $0x18] sm:$0xff]  }
 0x138   : > { %2259 = vmatprep.subr.bf16.mxu0 %v5142_v44  ;;  %v5219_v44 = vld [vmem:[%s6096_s26 + $0x444] ss:$8 sps:$4 sm:$0xff]  }
 0x13a   : > { %2178 = vmatpush1.bf16.msra.mxu1 %v5137_v45  ;;  %v6305_v45 = vrot.slane %v6300_v41, %v6169_v49 }
 0x13b   : > { %2260 = vmatpush1.bf16.msra.mxu0 %v5140_v46  ;;  %2179 = vmatprep.subr.bf16.mxu1 %v5145_v47  ;;  %v5220_v46 = vld [vmem:[#allocation7 + $0x60] sm:$0xff]  }
 0x13c   : > { %2261 = vmatprep.subr.bf16.mxu0 %v5148_v48  ;;  %v5217_v47 = vld [vmem:[%s6096_s26 + $0x440] ss:$8 sps:$4 sm:$0xff]   ;;  %v794_v48 = vcombine.high %v6305_v45, %v6305_v45 }
 0x13e   : > { %2180 = vmatpush1.bf16.msra.mxu1 %v5143_v50  ;;  %v5221_v50 = vld [vmem:[#allocation7 + $0x20] sm:$0xff]  }
 0x13f   : > { %2262 = vmatpush1.bf16.msra.mxu0 %v5146_v51  ;;  %2181 = vmatprep.subr.bf16.mxu1 %v5151_v52  ;;  %v5224_v51 = vld [vmem:[%s6096_s26 + $0x454] ss:$8 sps:$4 sm:$0xff]   ;;  %v6312_v52 = vrot.slane %v794_v48, %v6169_v49 }
 0x140   : > { %2263 = vmatprep.subr.bf16.mxu0 %v5154_v53  ;;  %v5225_v53 = vld [vmem:[#allocation7 + $0x68] sm:$0xff]  }
 0x142   : > { %2182 = vmatpush1.bf16.msra.mxu1 %v5149_v54  ;;  %v5222_v54 = vld [vmem:[%s6096_s26 + $0x450] ss:$8 sps:$4 sm:$0xff]  }
 0x143   : > { %2264 = vmatpush1.bf16.msra.mxu0 %v5152_v55  ;;  %2183 = vmatprep.subr.bf16.mxu1 %v5157_v56  ;;  %v5226_v55 = vld [vmem:[#allocation7 + $0x28] sm:$0xff]  }
 0x144   : > { %2265 = vmatprep.subr.bf16.mxu0 %v5160_v57  ;;  %v5229_v56 = vld [vmem:[%s6096_s26 + $0x464] ss:$8 sps:$4 sm:$0xff]   ;;  %v5230_v57 = vld [vmem:[#allocation7 + $0x70] sm:$0xff]  }
 0x146   : > { %2184 = vmatpush1.bf16.msra.mxu1 %v5155_v58  ;;  %v5227_v58 = vld [vmem:[%s6096_s26 + $0x460] ss:$8 sps:$4 sm:$0xff]  }
 0x147   : > { %2266 = vmatpush1.bf16.msra.mxu0 %v5158_v59  ;;  %2185 = vmatprep.subr.bf16.mxu1 %v5163_v60  ;;  %v5231_v59 = vld [vmem:[#allocation7 + $0x30] sm:$0xff]  }
 0x148   : > { %2267 = vmatprep.subr.bf16.mxu0 %v5166_v61  ;;  %v5234_v60 = vld [vmem:[%s6096_s26 + $0x474] ss:$8 sps:$4 sm:$0xff]  }
 0x149   : > { %v5235_v61 = vld [vmem:[#allocation7 + $0x78] sm:$0xff]  }
 0x14a   : > { %2186 = vmatpush1.bf16.msra.mxu1 %v5161_v62  ;;  %v5232_v62 = vld [vmem:[%s6096_s26 + $0x470] ss:$8 sps:$4 sm:$0xff]  }
 0x14b   : > { %2268 = vmatpush1.bf16.msra.mxu0 %v5164_v63  ;;  %2187 = vmatprep.subr.bf16.mxu1 %v5169_v0  ;;  %v5236_v63 = vld [vmem:[#allocation7 + $0x38] sm:$0xff]   ;;  %v5239_v0 = vld [vmem:[%s6096_s26 + $0x484] ss:$8 sps:$4 sm:$0xff]  }
 0x14c   : > { %2269 = vmatprep.subr.bf16.mxu0 %v5172_v1  ;;  %v5240_v1 = vld [vmem:[#allocation7 + $0xc0] sm:$0xff]  }
 0x14e   : > { %2188 = vmatpush1.bf16.msra.mxu1 %v5167_v2  ;;  %v5237_v2 = vld [vmem:[%s6096_s26 + $0x480] ss:$8 sps:$4 sm:$0xff]  }
 0x14f   : > { %2270 = vmatpush1.bf16.msra.mxu0 %v5170_v3  ;;  %2189 = vmatprep.subr.bf16.mxu1 %v5175_v4  ;;  %v6324_v3 = vrot.slane %v6275_v21, %v6169_v49  ;;  %v5241_v4 = vld [vmem:[#allocation7 + $0x80] sm:$0xff]  }
 0x150   : > { %2271 = vmatprep.subr.bf16.mxu0 %v5178_v5  ;;  %v5244_v5 = vld [vmem:[%s6096_s26 + $0x494] ss:$8 sps:$4 sm:$0xff]   ;;  %v5259_v21 = vld [vmem:[%s6096_s26 + $0x4c4] ss:$8 sps:$4 sm:$0xff]  }
 0x152   : > { %2190 = vmatpush1.bf16.msra.mxu1 %v5173_v6  ;;  %v5245_v6 = vld [vmem:[#allocation7 + $0xc8] sm:$0xff]  }
 0x153   : > { %2272 = vmatpush1.bf16.msra.mxu0 %v5176_v7  ;;  %2191 = vmatprep.subr.bf16.mxu1 %v5181_v8  ;;  %v5242_v7 = vld [vmem:[%s6096_s26 + $0x490] ss:$8 sps:$4 sm:$0xff]   ;;  %v2778_v8 = vcombine.high %v6289_v33, %v6289_v33 }
 0x154   : > { %2273 = vmatprep.subr.bf16.mxu0 %v5184_v9  ;;  %v5246_v9 = vld [vmem:[#allocation7 + $0x88] sm:$0xff]  }
 0x156   : > { %2192 = vmatpush1.bf16.msra.mxu1 %v5179_v10  ;;  %v5249_v10 = vld [vmem:[%s6096_s26 + $0x4a4] ss:$8 sps:$4 sm:$0xff]  }
 0x157   : > { %2274 = vmatpush1.bf16.msra.mxu0 %v5182_v11  ;;  %2193 = vmatprep.subr.bf16.mxu1 %v5187_v12  ;;  %v5250_v11 = vld [vmem:[#allocation7 + $0xd0] sm:$0xff]   ;;  %v5247_v12 = vld [vmem:[%s6096_s26 + $0x4a0] ss:$8 sps:$4 sm:$0xff]  }
 0x158   : > { %2275 = vmatprep.subr.bf16.mxu0 %v5190_v13  ;;  %v5251_v13 = vld [vmem:[#allocation7 + $0x90] sm:$0xff]  }
 0x15a   : > { %2194 = vmatpush1.bf16.msra.mxu1 %v5185_v14  ;;  %v5254_v14 = vld [vmem:[%s6096_s26 + $0x4b4] ss:$8 sps:$4 sm:$0xff]  }
 0x15b   : > { %2276 = vmatpush1.bf16.msra.mxu0 %v5188_v16  ;;  %2195 = vmatprep.subr.bf16.mxu1 %v5193_v19  ;;  %v5255_v16 = vld [vmem:[#allocation7 + $0xd8] sm:$0xff]   ;;  %v5252_v19 = vld [vmem:[%s6096_s26 + $0x4b0] ss:$8 sps:$4 sm:$0xff]  }
 0x15c   : > { %2277 = vmatprep.subr.bf16.mxu0 %v5196_v20  ;;  %v5256_v20 = vld [vmem:[#allocation7 + $0x98] sm:$0xff]  }
 0x15e   : > { %2196 = vmatpush1.bf16.msra.mxu1 %v5191_v22  ;;  %v5260_v22 = vld [vmem:[#allocation7 + $0xe0] sm:$0xff]  }
 0x15f   : > { %2278 = vmatpush1.bf16.msra.mxu0 %v5194_v23  ;;  %4623 = vmatprep.subr.bf16.mxu1 %v5200_v25  ;;  %v5257_v23 = vld [vmem:[%s6096_s26 + $0x4c0] ss:$8 sps:$4 sm:$0xff]   ;;  %v5264_v25 = vld [vmem:[%s6096_s26 + $0x4d4] ss:$8 sps:$4 sm:$0xff]  }
 0x160   : > { %2288 = vmatprep.subr.bf16.mxu0 %v5199_v24  ;;  %v5261_v24 = vld [vmem:[#allocation7 + $0xa0] sm:$0xff]  }
 0x161   : > { %2198 = vmatmul.mubr.bf16.vlgmr.msra.gmra.mrb[0].mxu1 %v775_v28  ;;  %v5266_v28 = vld [vmem:[#allocation7 + $0xa8] sm:$0xff]  }
 0x162   : > { %2280 = vmatmul.mubr.bf16.vlgmr.msra.gmra.mrb[0].mxu0 %v776_v29  ;;  %4624 = vmatpush3.bf16.msra.mxu1 %v5201_v30  ;;  %v5269_v29 = vld [vmem:[%s6096_s26 + $0x4e4] ss:$8 sps:$4 sm:$0xff]   ;;  %v5270_v30 = vld [vmem:[#allocation7 + $0xf0] sm:$0xff]  }
 0x163   : > { %2289 = vmatpush1.bf16.msra.mxu0 %v5197_v26  ;;  %4625 = vmatprep.subr.bf16.mxu1 %v5205_v32  ;;  %v5265_v26 = vld [vmem:[#allocation7 + $0xe8] sm:$0xff]   ;;  %v2731_v32 = vcombine.high %v6268_v15, %v6268_v15  ;;  %v5280_v15 = vld [vmem:[#allocation7 + $0x140] sm:$0xff]  }
 0x164   : > { %2290 = vmatprep.subr.bf16.mxu0 %v5204_v31  ;;  %3645 = vmatprep.mubr.bf16.mxu1 %v6289_v33  ;;  %v5267_v31 = vld [vmem:[%s6096_s26 + $0x4e0] ss:$8 sps:$4 sm:$0xff]   ;;  %v5271_v33 = vld [vmem:[#allocation7 + $0xb0] sm:$0xff]  }
 0x165   : > { %2320 = vmatprep.mubr.bf16.mxu0 %v6312_v52 }
 0x166   : > { %4626 = vmatpush3.bf16.msra.mxu1 %v5206_v17  ;;  %v5275_v17 = vld [vmem:[#allocation7 + $0xf8] sm:$0xff]  }
 0x167   : > { %2291 = vmatpush1.bf16.msra.mxu0 %v5202_v34  ;;  %4627 = vmatprep.subr.bf16.mxu1 %v5210_v35  ;;  %v5274_v34 = vld [vmem:[%s6096_s26 + $0x4f4] ss:$8 sps:$4 sm:$0xff]   ;;  %v5272_v35 = vld [vmem:[%s6096_s26 + $0x4f0] ss:$8 sps:$4 sm:$0xff]  }
 0x168   : > { %2292 = vmatprep.subr.bf16.mxu0 %v5209_v18  ;;  %v6345_v18 = vrot.slane %v2731_v32, %v6169_v49  ;;  %v5337_v32 = vld [vmem:[#allocation7 + $0x198] sm:$0xff]  }
 0x16a   : > { %4628 = vmatpush3.bf16.msra.mxu1 %v5211_v37  ;;  %v5279_v37 = vld [vmem:[%s6096_s26 + $0x504] ss:$8 sps:$4 sm:$0xff]  }
 0x16b   : > { %2293 = vmatpush1.bf16.msra.mxu0 %v5207_v36  ;;  %4629 = vmatprep.subr.bf16.mxu1 %v5215_v39  ;;  %v5276_v36 = vld [vmem:[#allocation7 + $0xb8] sm:$0xff]   ;;  %v2747_v39 = vcombine.high %v6345_v18, %v6345_v18 }
 0x16c   : > { %2294 = vmatprep.subr.bf16.mxu0 %v5214_v38  ;;  %v5277_v38 = vld [vmem:[%s6096_s26 + $0x500] ss:$8 sps:$4 sm:$0xff]  }
 0x16d   : > { %v6360_v48 = vrot.slane %v2747_v39, %v6169_v49  ;;  %v5351_v39 = vld [vmem:[#allocation7 + $0x1f0] sm:$0xff]  }
 0x16e   : > { %4630 = vmatpush3.bf16.msra.mxu1 %v5216_v43  ;;  %v6356_v43 = vrot.slane %v6305_v45, %v6169_v49  ;;  %v5282_v45 = vld [vmem:[%s6096_s26 + $0x510] ss:$8 sps:$4 sm:$0xff]  }
 0x16f   : > { %2295 = vmatpush1.bf16.msra.mxu0 %v5212_v40  ;;  %4631 = vmatprep.subr.bf16.mxu1 %v5220_v46  ;;  %v2776_v40 = vcombine.high %v6324_v3, %v6324_v3  ;;  %v5284_v46 = vld [vmem:[%s6096_s26 + $0x514] ss:$8 sps:$4 sm:$0xff]  }
 0x170   : > { %2296 = vmatprep.subr.bf16.mxu0 %v5219_v44  ;;  %v5281_v44 = vld [vmem:[#allocation7 + $0x100] sm:$0xff]  }
 0x172   : > { %4632 = vmatpush3.bf16.msra.mxu1 %v5221_v50  ;;  %v826_v50 = vcombine.high %v6312_v52, %v6312_v52  ;;  %v5291_v52 = vld [vmem:[#allocation7 + $0x110] sm:$0xff]  }
 0x173   : > { %2297 = vmatpush1.bf16.msra.mxu0 %v5217_v47  ;;  %4633 = vmatprep.subr.bf16.mxu1 %v5225_v53  ;;  %v5285_v47 = vld [vmem:[#allocation7 + $0x148] sm:$0xff]  }
 0x174   : > { %2298 = vmatprep.subr.bf16.mxu0 %v5224_v51  ;;  %v5286_v51 = vld [vmem:[#allocation7 + $0x108] sm:$0xff]  }
 0x175   : > { %v5289_v53 = vld [vmem:[%s6096_s26 + $0x524] ss:$8 sps:$4 sm:$0xff]  }
 0x176   : > { %4634 = vmatpush3.bf16.msra.mxu1 %v5226_v55  ;;  %v5287_v55 = vld [vmem:[%s6096_s26 + $0x520] ss:$8 sps:$4 sm:$0xff]  }
 0x177   : > { %2299 = vmatpush1.bf16.msra.mxu0 %v5222_v54  ;;  %4635 = vmatprep.subr.bf16.mxu1 %v5230_v57  ;;  %v5290_v54 = vld [vmem:[#allocation7 + $0x150] sm:$0xff]   ;;  %v5295_v57 = vld [vmem:[#allocation7 + $0x158] sm:$0xff]  }
 0x178   : > { %2300 = vmatprep.subr.bf16.mxu0 %v5229_v56  ;;  %v5294_v56 = vld [vmem:[%s6096_s26 + $0x534] ss:$8 sps:$4 sm:$0xff]  }
 0x17a   : > { %4636 = vmatpush3.bf16.msra.mxu1 %v5231_v59  ;;  %v5296_v59 = vld [vmem:[#allocation7 + $0x118] sm:$0xff]  }
 0x17b   : > { %2301 = vmatpush1.bf16.msra.mxu0 %v5227_v58  ;;  %4637 = vmatprep.subr.bf16.mxu1 %v5235_v61  ;;  %v5292_v58 = vld [vmem:[%s6096_s26 + $0x530] ss:$8 sps:$4 sm:$0xff]   ;;  %v5300_v61 = vld [vmem:[#allocation7 + $0x160] sm:$0xff]  }
 0x17c   : > { %2302 = vmatprep.subr.bf16.mxu0 %v5234_v60  ;;  %v5299_v60 = vld [vmem:[%s6096_s26 + $0x544] ss:$8 sps:$4 sm:$0xff]  }
 0x17e   : > { %4638 = vmatpush3.bf16.msra.mxu1 %v5236_v63  ;;  %v5301_v63 = vld [vmem:[#allocation7 + $0x120] sm:$0xff]  }
 0x17f   : > { %2303 = vmatpush1.bf16.msra.mxu0 %v5232_v62  ;;  %4645 = vmatprep.subr.bf16.mxu1 %v5240_v1  ;;  %v5297_v62 = vld [vmem:[%s6096_s26 + $0x540] ss:$8 sps:$4 sm:$0xff]   ;;  %v5305_v1 = vld [vmem:[#allocation7 + $0x168] sm:$0xff]  }
 0x180   : > { %2304 = vmatprep.subr.bf16.mxu0 %v5239_v0  ;;  %v5304_v0 = vld [vmem:[%s6096_s26 + $0x554] ss:$8 sps:$4 sm:$0xff]  }
 0x181   : > { %3646 = vmatmul.mubr.bf16.vlgmr.msra.gmra.mrb[4].mxu1 %v6324_v3  ;;  %v5306_v3 = vld [vmem:[#allocation7 + $0x128] sm:$0xff]  }
 0x182   : > { %4646 = vmatpush3.bf16.msra.mxu1 %v5241_v4  ;;  %3685 = vmatprep.mubr.bf16.mxu1 %v2778_v8  ;;  %v5309_v4 = vld [vmem:[%s6096_s26 + $0x564] ss:$8 sps:$4 sm:$0xff]   ;;  %v5314_v8 = vld [vmem:[%s6096_s26 + $0x574] ss:$8 sps:$4 sm:$0xff]  }
 0x183   : > { %2305 = vmatpush1.bf16.msra.mxu0 %v5237_v2  ;;  %4647 = vmatprep.subr.bf16.mxu1 %v5245_v6  ;;  %v5302_v2 = vld [vmem:[%s6096_s26 + $0x550] ss:$8 sps:$4 sm:$0xff]   ;;  %v5307_v6 = vld [vmem:[%s6096_s26 + $0x560] ss:$8 sps:$4 sm:$0xff]  }
 0x184   : > { %2306 = vmatprep.subr.bf16.mxu0 %v5244_v5  ;;  %v5310_v5 = vld [vmem:[#allocation7 + $0x170] sm:$0xff]  }
 0x186   : > { %4648 = vmatpush3.bf16.msra.mxu1 %v5246_v9  ;;  %v5315_v9 = vld [vmem:[#allocation7 + $0x178] sm:$0xff]  }
 0x187   : > { %2307 = vmatpush1.bf16.msra.mxu0 %v5242_v7  ;;  %4649 = vmatprep.subr.bf16.mxu1 %v5250_v11  ;;  %v5311_v7 = vld [vmem:[#allocation7 + $0x130] sm:$0xff]   ;;  %v5316_v11 = vld [vmem:[#allocation7 + $0x138] sm:$0xff]  }
 0x188   : > { %2308 = vmatprep.subr.bf16.mxu0 %v5249_v10  ;;  %v5312_v10 = vld [vmem:[%s6096_s26 + $0x570] ss:$8 sps:$4 sm:$0xff]  }
 0x18a   : > { %4650 = vmatpush3.bf16.msra.mxu1 %v5251_v13  ;;  %v5321_v13 = vld [vmem:[#allocation7 + $0x1c0] sm:$0xff]  }
 0x18b   : > { %2309 = vmatpush1.bf16.msra.mxu0 %v5247_v12  ;;  %4651 = vmatprep.subr.bf16.mxu1 %v5255_v16  ;;  %v5320_v12 = vld [vmem:[%s6096_s26 + $0x584] ss:$8 sps:$4 sm:$0xff]   ;;  %v6383_v16 = vrot.slane %v6345_v18, %v6169_v49 }
 0x18c   : > { %2310 = vmatprep.subr.bf16.mxu0 %v5254_v14  ;;  %v5318_v14 = vld [vmem:[%s6096_s26 + $0x580] ss:$8 sps:$4 sm:$0xff]  }
 0x18d   : > { %v5342_v18 = vld [vmem:[#allocation7 + $0x1a0] sm:$0xff]  }
 0x18e   : > { %4652 = vmatpush3.bf16.msra.mxu1 %v5256_v20  ;;  %v5325_v20 = vld [vmem:[%s6096_s26 + $0x594] ss:$8 sps:$4 sm:$0xff]  }
 0x18f   : > { %2311 = vmatpush1.bf16.msra.mxu0 %v5252_v19  ;;  %4653 = vmatprep.subr.bf16.mxu1 %v5260_v22  ;;  %v5322_v19 = vld [vmem:[#allocation7 + $0x180] sm:$0xff]   ;;  %v2779_v22 = vcombine.high %v6360_v48, %v6360_v48 }
 0x190   : > { %2312 = vmatprep.subr.bf16.mxu0 %v5259_v21  ;;  %v5326_v21 = vld [vmem:[#allocation7 + $0x1c8] sm:$0xff]  }
 0x192   : > { %4654 = vmatpush3.bf16.msra.mxu1 %v5261_v24  ;;  %v5327_v24 = vld [vmem:[#allocation7 + $0x188] sm:$0xff]  }
 0x193   : > { %2313 = vmatpush1.bf16.msra.mxu0 %v5257_v23  ;;  %4655 = vmatprep.subr.bf16.mxu1 %v5265_v26  ;;  %v5323_v23 = vld [vmem:[%s6096_s26 + $0x590] ss:$8 sps:$4 sm:$0xff]  }
 0x194   : > { %2314 = vmatprep.subr.bf16.mxu0 %v5264_v25  ;;  %v5330_v25 = vld [vmem:[%s6096_s26 + $0x5a4] ss:$8 sps:$4 sm:$0xff]   ;;  %v5331_v26 = vld [vmem:[#allocation7 + $0x1d0] sm:$0xff]  }
 0x196   : > { %4656 = vmatpush3.bf16.msra.mxu1 %v5266_v28  ;;  %v5332_v28 = vld [vmem:[#allocation7 + $0x190] sm:$0xff]  }
 0x197   : > { %2315 = vmatpush1.bf16.msra.mxu0 %v5262_v27  ;;  %4657 = vmatprep.subr.bf16.mxu1 %v5270_v30  ;;  %v5328_v27 = vld [vmem:[%s6096_s26 + $0x5a0] ss:$8 sps:$4 sm:$0xff]  }
 0x198   : > { %2316 = vmatprep.subr.bf16.mxu0 %v5269_v29  ;;  %v5335_v29 = vld [vmem:[%s6096_s26 + $0x5b4] ss:$8 sps:$4 sm:$0xff]  }
 0x199   : > { %v5336_v30 = vld [vmem:[#allocation7 + $0x1d8] sm:$0xff]  }
 0x19a   : > { %4658 = vmatpush3.bf16.msra.mxu1 %v5271_v33  ;;  %v5340_v33 = vld [vmem:[%s6096_s26 + $0x5c4] ss:$8 sps:$4 sm:$0xff]  }
 0x19b   : > { %2317 = vmatpush1.bf16.msra.mxu0 %v5267_v31  ;;  %4659 = vmatprep.subr.bf16.mxu1 %v5275_v17  ;;  %v5333_v31 = vld [vmem:[%s6096_s26 + $0x5b0] ss:$8 sps:$4 sm:$0xff]   ;;  %v5338_v17 = vld [vmem:[%s6096_s26 + $0x5c0] ss:$8 sps:$4 sm:$0xff]  }
 0x19c   : > { %2318 = vmatprep.subr.bf16.mxu0 %v5274_v34  ;;  %v5341_v34 = vld [vmem:[#allocation7 + $0x1e0] sm:$0xff]  }
 0x19e   : > { %4660 = vmatpush3.bf16.msra.mxu1 %v5276_v36  ;;  %v5346_v36 = vld [vmem:[#allocation7 + $0x1e8] sm:$0xff]  }
 0x19f   : > { %2319 = vmatpush1.bf16.msra.mxu0 %v5272_v35  ;;  %4667 = vmatprep.subr.bf16.mxu1 %v5280_v15  ;;  %v5345_v35 = vld [vmem:[%s6096_s26 + $0x5d4] ss:$8 sps:$4 sm:$0xff]   ;;  %v5347_v15 = vld [vmem:[#allocation7 + $0x1a8] sm:$0xff]  }
 0x1a0   : > { %2329 = vmatprep.subr.bf16.mxu0 %v5279_v37  ;;  %v5343_v37 = vld [vmem:[%s6096_s26 + $0x5d0] ss:$8 sps:$4 sm:$0xff]  }
 0x1a1   : > { %3686 = vmatmul.mubr.bf16.vlgmr.msra.gmra.mrb[8].mxu1 %v2776_v40  ;;  %v5348_v40 = vld [vmem:[%s6096_s26 + $0x5e0] ss:$8 sps:$4 sm:$0xff]  }
 0x1a2   : > { %2321 = vmatmul.mubr.bf16.vlgmr.msra.gmra.mrb[0].mxu0 %v6356_v43  ;;  %4668 = vmatpush3.bf16.msra.mxu1 %v5281_v44  ;;  %v779_v44 = vcombine.high %v6300_v41, %v6300_v41 }
 0x1a3   : > { %2330 = vmatpush1.bf16.msra.mxu0 %v5277_v38  ;;  %4669 = vmatprep.subr.bf16.mxu1 %v5285_v47  ;;  %v5350_v38 = vld [vmem:[%s6096_s26 + $0x5e4] ss:$8 sps:$4 sm:$0xff]  }
 0x1a4   : > { %2331 = vmatprep.subr.bf16.mxu0 %v5284_v46  ;;  %3725 = vmatprep.mubr.bf16.mxu1 %v6360_v48  ;;  %v5352_v46 = vld [vmem:[#allocation7 + $0x1b0] sm:$0xff]   ;;  %v6405_v47 = vld [vmem:[%s6591_s1 + $0x8] sm:$0xff]  ;;  %v6414_v41 = vrot.slane %v779_v44, %v6169_v49  ;;  %v5416_v44 = vld [vmem:[#allocation7 + $0x2d8] sm:$0xff]  }
 0x1a5   : > { %2361 = vmatprep.mubr.bf16.mxu0 %v826_v50  ;;  %v5355_v48 = vld [vmem:[%s6096_s26 + $0x5f4] ss:$8 sps:$4 sm:$0xff]  }
 0x1a6   : > { %4670 = vmatpush3.bf16.msra.mxu1 %v5286_v51  ;;  %v5356_v50 = vld [vmem:[#allocation7 + $0x1f8] sm:$0xff]   ;;  %v6411_v51 = vrot.slane %v6405_v47, %v6169_v49 }
 0x1a7   : > { %2332 = vmatpush1.bf16.msra.mxu0 %v5282_v45  ;;  %4671 = vmatprep.subr.bf16.mxu1 %v5290_v54  ;;  %v5353_v45 = vld [vmem:[%s6096_s26 + $0x5f0] ss:$8 sps:$4 sm:$0xff]   ;;  %v5360_v54 = vld [vmem:[%s6096_s26 + $0x604] ss:$8 sps:$4 sm:$0xff]  }
 0x1a8   : > { %2333 = vmatprep.subr.bf16.mxu0 %v5289_v53  ;;  %v5357_v53 = vld [vmem:[#allocation7 + $0x1b8] sm:$0xff]  }
 0x1aa   : > { %4672 = vmatpush3.bf16.msra.mxu1 %v5291_v52  ;;  %v2795_v52 = vcombine.high %v6411_v51, %v6411_v51 }
 0x1ab   : > { %2334 = vmatpush1.bf16.msra.mxu0 %v5287_v55  ;;  %4673 = vmatprep.subr.bf16.mxu1 %v5295_v57  ;;  %v5361_v55 = vld [vmem:[#allocation7 + $0x240] sm:$0xff]  }
 0x1ac   : > { %2335 = vmatprep.subr.bf16.mxu0 %v5294_v56  ;;  %v795_v56 = vcombine.high %v6414_v41, %v6414_v41  ;;  %v5358_v57 = vld [vmem:[%s6096_s26 + $0x600] ss:$8 sps:$4 sm:$0xff]  }
 0x1ae   : > { %4674 = vmatpush3.bf16.msra.mxu1 %v5296_v59  ;;  %v824_v59 = vcombine.high %v6356_v43, %v6356_v43  ;;  %v5367_v43 = vld [vmem:[#allocation7 + $0x208] sm:$0xff]  }
 0x1af   : > { %2336 = vmatpush1.bf16.msra.mxu0 %v5292_v58  ;;  %4675 = vmatprep.subr.bf16.mxu1 %v5300_v61  ;;  %v2777_v58 = vcombine.high %v6383_v16, %v6383_v16  ;;  %v5365_v61 = vld [vmem:[%s6096_s26 + $0x614] ss:$8 sps:$4 sm:$0xff]  }
 0x1b0   : > { %2337 = vmatprep.subr.bf16.mxu0 %v5299_v60  ;;  %v5362_v60 = vld [vmem:[#allocation7 + $0x200] sm:$0xff]  }
 0x1b2   : > { %4676 = vmatpush3.bf16.msra.mxu1 %v5301_v63  ;;  %v5363_v63 = vld [vmem:[%s6096_s26 + $0x610] ss:$8 sps:$4 sm:$0xff]  }
 0x1b3   : > { %2338 = vmatpush1.bf16.msra.mxu0 %v5297_v62  ;;  %4677 = vmatprep.subr.bf16.mxu1 %v5305_v1  ;;  %v5366_v62 = vld [vmem:[#allocation7 + $0x248] sm:$0xff]   ;;  %v6432_v1 = vrot.slane %v795_v56, %v6169_v49 }
 0x1b4   : > { %2339 = vmatprep.subr.bf16.mxu0 %v5304_v0  ;;  %v6429_v0 = vrot.slane %v2795_v52, %v6169_v49  ;;  %v5423_v52 = vld [vmem:[%s6096_s26 + $0x6d0] ss:$8 sps:$4 sm:$0xff]  }
 0x1b5   : > { %v5427_v56 = vld [vmem:[#allocation7 + $0x2a8] sm:$0xff]  }
 0x1b6   : > { %4678 = vmatpush3.bf16.msra.mxu1 %v5306_v3  ;;  %v5371_v3 = vld [vmem:[#allocation7 + $0x250] sm:$0xff]  }
 0x1b7   : > { %2340 = vmatpush1.bf16.msra.mxu0 %v5302_v2  ;;  %4679 = vmatprep.subr.bf16.mxu1 %v5310_v5  ;;  %v5370_v2 = vld [vmem:[%s6096_s26 + $0x624] ss:$8 sps:$4 sm:$0xff]   ;;  %v5372_v5 = vld [vmem:[#allocation7 + $0x210] sm:$0xff]  }
 0x1b8   : > { %2341 = vmatprep.subr.bf16.mxu0 %v5309_v4  ;;  %v5368_v4 = vld [vmem:[%s6096_s26 + $0x620] ss:$8 sps:$4 sm:$0xff]  }
 0x1ba   : > { %4680 = vmatpush3.bf16.msra.mxu1 %v5311_v7  ;;  %v5376_v7 = vld [vmem:[#allocation7 + $0x258] sm:$0xff]  }
 0x1bb   : > { %2342 = vmatpush1.bf16.msra.mxu0 %v5307_v6  ;;  %4681 = vmatprep.subr.bf16.mxu1 %v5315_v9  ;;  %v5375_v6 = vld [vmem:[%s6096_s26 + $0x634] ss:$8 sps:$4 sm:$0xff]  }
 0x1bc   : > { %2343 = vmatprep.subr.bf16.mxu0 %v5314_v8  ;;  %v5373_v8 = vld [vmem:[%s6096_s26 + $0x630] ss:$8 sps:$4 sm:$0xff]   ;;  %v5377_v9 = vld [vmem:[#allocation7 + $0x218] sm:$0xff]  }
 0x1be   : > { %4682 = vmatpush3.bf16.msra.mxu1 %v5316_v11  ;;  %v5381_v11 = vld [vmem:[#allocation7 + $0x260] sm:$0xff]  }
 0x1bf   : > { %2344 = vmatpush1.bf16.msra.mxu0 %v5312_v10  ;;  %4689 = vmatprep.subr.bf16.mxu1 %v5321_v13  ;;  %v5380_v10 = vld [vmem:[%s6096_s26 + $0x644] ss:$8 sps:$4 sm:$0xff]  }
 0x1c0   : > { %2345 = vmatprep.subr.bf16.mxu0 %v5320_v12  ;;  %v5378_v12 = vld [vmem:[%s6096_s26 + $0x640] ss:$8 sps:$4 sm:$0xff]  }
 0x1c1   : > { %3726 = vmatmul.mubr.bf16.vlgmr.msra.gmra.mrb[12].mxu1 %v6383_v16  ;;  %v5382_v13 = vld [vmem:[#allocation7 + $0x220] sm:$0xff]   ;;  %v5386_v16 = vld [vmem:[#allocation7 + $0x268] sm:$0xff]  }
 0x1c2   : > { %4690 = vmatpush3.bf16.msra.mxu1 %v5322_v19  ;;  %3765 = vmatprep.mubr.bf16.mxu1 %v2779_v22  ;;  %v5383_v19 = vld [vmem:[%s6096_s26 + $0x650] ss:$8 sps:$4 sm:$0xff]  }
 0x1c3   : > { %2346 = vmatpush1.bf16.msra.mxu0 %v5318_v14  ;;  %4691 = vmatprep.subr.bf16.mxu1 %v5326_v21  ;;  %v5385_v14 = vld [vmem:[%s6096_s26 + $0x654] ss:$8 sps:$4 sm:$0xff]   ;;  %v5390_v21 = vld [vmem:[%s6096_s26 + $0x664] ss:$8 sps:$4 sm:$0xff]  }
 0x1c4   : > { %2347 = vmatprep.subr.bf16.mxu0 %v5325_v20  ;;  %v5387_v20 = vld [vmem:[#allocation7 + $0x228] sm:$0xff]   ;;  %v5391_v22 = vld [vmem:[#allocation7 + $0x270] sm:$0xff]  }
 0x1c6   : > { %4692 = vmatpush3.bf16.msra.mxu1 %v5327_v24  ;;  %v5392_v24 = vld [vmem:[#allocation7 + $0x230] sm:$0xff]  }
 0x1c7   : > { %2348 = vmatpush1.bf16.msra.mxu0 %v5323_v23  ;;  %4693 = vmatprep.subr.bf16.mxu1 %v5331_v26  ;;  %v5388_v23 = vld [vmem:[%s6096_s26 + $0x660] ss:$8 sps:$4 sm:$0xff]  }
 0x1c8   : > { %2349 = vmatprep.subr.bf16.mxu0 %v5330_v25  ;;  %v5395_v25 = vld [vmem:[%s6096_s26 + $0x674] ss:$8 sps:$4 sm:$0xff]  }
 0x1c9   : > { %v5396_v26 = vld [vmem:[#allocation7 + $0x278] sm:$0xff]  }
 0x1ca   : > { %4694 = vmatpush3.bf16.msra.mxu1 %v5332_v28  ;;  %v5397_v28 = vld [vmem:[#allocation7 + $0x238] sm:$0xff]  }
 0x1cb   : > { %2350 = vmatpush1.bf16.msra.mxu0 %v5328_v27  ;;  %4695 = vmatprep.subr.bf16.mxu1 %v5336_v30  ;;  %v5393_v27 = vld [vmem:[%s6096_s26 + $0x670] ss:$8 sps:$4 sm:$0xff]   ;;  %v5401_v30 = vld [vmem:[#allocation7 + $0x2c0] sm:$0xff]  }
 0x1cc   : > { %2351 = vmatprep.subr.bf16.mxu0 %v5335_v29  ;;  %v5400_v29 = vld [vmem:[%s6096_s26 + $0x684] ss:$8 sps:$4 sm:$0xff]  }
 0x1ce   : > { %4696 = vmatpush3.bf16.msra.mxu1 %v5337_v32  ;;  %v6452_v32 = vrot.slane %v6411_v51, %v6169_v49  ;;  %v5418_v51 = vld [vmem:[%s6096_s26 + $0x6c0] ss:$8 sps:$4 sm:$0xff]  }
 0x1cf   : > { %2352 = vmatpush1.bf16.msra.mxu0 %v5333_v31  ;;  %4697 = vmatprep.subr.bf16.mxu1 %v5341_v34  ;;  %v5398_v31 = vld [vmem:[%s6096_s26 + $0x680] ss:$8 sps:$4 sm:$0xff]   ;;  %v5405_v34 = vld [vmem:[%s6096_s26 + $0x694] ss:$8 sps:$4 sm:$0xff]  }
 0x1d0   : > { %2353 = vmatprep.subr.bf16.mxu0 %v5340_v33  ;;  %v5402_v33 = vld [vmem:[#allocation7 + $0x280] sm:$0xff]  }
 0x1d2   : > { %4698 = vmatpush3.bf16.msra.mxu1 %v5342_v18  ;;  %v2827_v18 = vcombine.high %v6429_v0, %v6429_v0 }
 0x1d3   : > { %2354 = vmatpush1.bf16.msra.mxu0 %v5338_v17  ;;  %4699 = vmatprep.subr.bf16.mxu1 %v5346_v36  ;;  %v5406_v17 = vld [vmem:[#allocation7 + $0x2c8] sm:$0xff]  }
 0x1d4   : > { %2355 = vmatprep.subr.bf16.mxu0 %v5345_v35  ;;  %v5403_v35 = vld [vmem:[%s6096_s26 + $0x690] ss:$8 sps:$4 sm:$0xff]  }
 0x1d5   : > { %v5407_v36 = vld [vmem:[#allocation7 + $0x288] sm:$0xff]  }
 0x1d6   : > { %4700 = vmatpush3.bf16.msra.mxu1 %v5347_v15  ;;  %v5411_v15 = vld [vmem:[#allocation7 + $0x2d0] sm:$0xff]  }
 0x1d7   : > { %2356 = vmatpush1.bf16.msra.mxu0 %v5343_v37  ;;  %4701 = vmatprep.subr.bf16.mxu1 %v5351_v39  ;;  %v5410_v37 = vld [vmem:[%s6096_s26 + $0x6a4] ss:$8 sps:$4 sm:$0xff]   ;;  %v5412_v39 = vld [vmem:[#allocation7 + $0x290] sm:$0xff]  }
 0x1d8   : > { %2357 = vmatprep.subr.bf16.mxu0 %v5350_v38  ;;  %v5408_v38 = vld [vmem:[%s6096_s26 + $0x6a0] ss:$8 sps:$4 sm:$0xff]  }
 0x1da   : > { %4702 = vmatpush3.bf16.msra.mxu1 %v5352_v46  ;;  %v5413_v46 = vld [vmem:[%s6096_s26 + $0x6b0] ss:$8 sps:$4 sm:$0xff]  }
 0x1db   : > { %2358 = vmatpush1.bf16.msra.mxu0 %v5348_v40  ;;  %4703 = vmatprep.subr.bf16.mxu1 %v5356_v50  ;;  %v5415_v40 = vld [vmem:[%s6096_s26 + $0x6b4] ss:$8 sps:$4 sm:$0xff]   ;;  %v5420_v50 = vld [vmem:[%s6096_s26 + $0x6c4] ss:$8 sps:$4 sm:$0xff]  }
 0x1dc   : > { %2359 = vmatprep.subr.bf16.mxu0 %v5355_v48  ;;  %v5417_v48 = vld [vmem:[#allocation7 + $0x298] sm:$0xff]  }
 0x1de   : > { %4704 = vmatpush3.bf16.msra.mxu1 %v5357_v53  ;;  %v5422_v53 = vld [vmem:[#allocation7 + $0x2a0] sm:$0xff]  }
 0x1df   : > { %2360 = vmatpush1.bf16.msra.mxu0 %v5353_v45  ;;  %4711 = vmatprep.subr.bf16.mxu1 %v5361_v55  ;;  %v5421_v45 = vld [vmem:[#allocation7 + $0x2e0] sm:$0xff]   ;;  %v5426_v55 = vld [vmem:[#allocation7 + $0x2e8] sm:$0xff]  }
 0x1e0   : > { %2370 = vmatprep.subr.bf16.mxu0 %v5360_v54  ;;  %v5425_v54 = vld [vmem:[%s6096_s26 + $0x6d4] ss:$8 sps:$4 sm:$0xff]  }
 0x1e1   : > { %3766 = vmatmul.mubr.bf16.vlgmr.msra.gmra.mrb[16].mxu1 %v2777_v58  ;;  %v5431_v58 = vld [vmem:[#allocation7 + $0x2f0] sm:$0xff]  }
 0x1e2   : > { %2362 = vmatmul.mubr.bf16.vlgmr.msra.gmra.mrb[0].mxu0 %v824_v59  ;;  %4712 = vmatpush3.bf16.msra.mxu1 %v5362_v60  ;;  %v2780_v59 = vcombine.high %v6405_v47, %v6405_v47  ;;  %v5428_v60 = vld [vmem:[%s6096_s26 + $0x6e0] ss:$8 sps:$4 sm:$0xff]   ;;  %v5441_v47 = vld [vmem:[%s6096_s26 + $0x704] ss:$8 sps:$4 sm:$0xff]  }
 0x1e3   : > { %2371 = vmatpush1.bf16.msra.mxu0 %v5358_v57  ;;  %4713 = vmatprep.subr.bf16.mxu1 %v5366_v62  ;;  %v5430_v57 = vld [vmem:[%s6096_s26 + $0x6e4] ss:$8 sps:$4 sm:$0xff]   ;;  %v5435_v62 = vld [vmem:[%s6096_s26 + $0x6f4] ss:$8 sps:$4 sm:$0xff]  }
 0x1e4   : > { %2372 = vmatprep.subr.bf16.mxu0 %v5365_v61  ;;  %3805 = vmatprep.mubr.bf16.mxu1 %v6429_v0  ;;  %v5432_v61 = vld [vmem:[#allocation7 + $0x2b0] sm:$0xff]   ;;  %v6473_v0 = vrot.slane %v2780_v59, %v6169_v49 }
 0x1e5   : > { %2402 = vmatprep.mubr.bf16.mxu0 %v6432_v1  ;;  %v5497_v59 = vld [vmem:[%s6096_s26 + $0x7b4] ss:$8 sps:$4 sm:$0xff]  }
 0x1e6   : > { %4714 = vmatpush3.bf16.msra.mxu1 %v5367_v43  ;;  %v5433_v43 = vld [vmem:[%s6096_s26 + $0x6f0] ss:$8 sps:$4 sm:$0xff]  }
 0x1e7   : > { %2373 = vmatpush1.bf16.msra.mxu0 %v5363_v63  ;;  %4715 = vmatprep.subr.bf16.mxu1 %v5371_v3  ;;  %v5436_v63 = vld [vmem:[#allocation7 + $0x2f8] sm:$0xff]   ;;  %v5442_v3 = vld [vmem:[#allocation7 + $0x340] sm:$0xff]  }
 0x1e8   : > { %2374 = vmatprep.subr.bf16.mxu0 %v5370_v2  ;;  %v5437_v2 = vld [vmem:[#allocation7 + $0x2b8] sm:$0xff]  }
 0x1ea   : > { %4716 = vmatpush3.bf16.msra.mxu1 %v5372_v5  ;;  %v2825_v5 = vcombine.high %v6452_v32, %v6452_v32 }
 0x1eb   : > { %2375 = vmatpush1.bf16.msra.mxu0 %v5368_v4  ;;  %4717 = vmatprep.subr.bf16.mxu1 %v5376_v7  ;;  %v2796_v4 = vcombine.high %v6473_v0, %v6473_v0  ;;  %v5439_v7 = vld [vmem:[%s6096_s26 + $0x700] ss:$8 sps:$4 sm:$0xff]  }
 0x1ec   : > { %2376 = vmatprep.subr.bf16.mxu0 %v5375_v6  ;;  %v6483_v6 = vrot.slane %v6414_v41, %v6169_v49  ;;  %v5444_v41 = vld [vmem:[%s6096_s26 + $0x710] ss:$8 sps:$4 sm:$0xff]  }
 0x1ee   : > { %4718 = vmatpush3.bf16.msra.mxu1 %v5377_v9  ;;  %v5446_v9 = vld [vmem:[%s6096_s26 + $0x714] ss:$8 sps:$4 sm:$0xff]  }
 0x1ef   : > { %2377 = vmatpush1.bf16.msra.mxu0 %v5373_v8  ;;  %4719 = vmatprep.subr.bf16.mxu1 %v5381_v11  ;;  %v5443_v8 = vld [vmem:[#allocation7 + $0x300] sm:$0xff]   ;;  %v6488_v11 = vrot.slane %v2796_v4, %v6169_v49  ;;  %v5505_v4 = vld [vmem:[%s6096_s26 + $0x7d0] ss:$8 sps:$4 sm:$0xff]  }
 0x1f0   : > { %2378 = vmatprep.subr.bf16.mxu0 %v5380_v10  ;;  %v5447_v10 = vld [vmem:[#allocation7 + $0x348] sm:$0xff]  }
 0x1f2   : > { %4720 = vmatpush3.bf16.msra.mxu1 %v5382_v13  ;;  %v5448_v13 = vld [vmem:[#allocation7 + $0x308] sm:$0xff]  }
 0x1f3   : > { %2379 = vmatpush1.bf16.msra.mxu0 %v5378_v12  ;;  %4721 = vmatprep.subr.bf16.mxu1 %v5386_v16  ;;  %v827_v12 = vcombine.high %v6432_v1, %v6432_v1  ;;  %v5452_v16 = vld [vmem:[#allocation7 + $0x350] sm:$0xff]   ;;  %v5449_v1 = vld [vmem:[%s6096_s26 + $0x720] ss:$8 sps:$4 sm:$0xff]  }
 0x1f4   : > { %2380 = vmatprep.subr.bf16.mxu0 %v5385_v14  ;;  %v5451_v14 = vld [vmem:[%s6096_s26 + $0x724] ss:$8 sps:$4 sm:$0xff]  }
 0x1f6   : > { %4722 = vmatpush3.bf16.msra.mxu1 %v5387_v20  ;;  %v5456_v20 = vld [vmem:[%s6096_s26 + $0x734] ss:$8 sps:$4 sm:$0xff]  }
 0x1f7   : > { %2381 = vmatpush1.bf16.msra.mxu0 %v5383_v19  ;;  %4723 = vmatprep.subr.bf16.mxu1 %v5391_v22  ;;  %v5453_v19 = vld [vmem:[#allocation7 + $0x310] sm:$0xff]  }
 0x1f8   : > { %2382 = vmatprep.subr.bf16.mxu0 %v5390_v21  ;;  %v5457_v21 = vld [vmem:[#allocation7 + $0x358] sm:$0xff]   ;;  %v5454_v22 = vld [vmem:[%s6096_s26 + $0x730] ss:$8 sps:$4 sm:$0xff]  }
 0x1fa   : > { %4724 = vmatpush3.bf16.msra.mxu1 %v5392_v24  ;;  %v5461_v24 = vld [vmem:[%s6096_s26 + $0x744] ss:$8 sps:$4 sm:$0xff]  }
 0x1fb   : > { %2383 = vmatpush1.bf16.msra.mxu0 %v5388_v23  ;;  %4725 = vmatprep.subr.bf16.mxu1 %v5396_v26  ;;  %v5458_v23 = vld [vmem:[#allocation7 + $0x318] sm:$0xff]  }
 0x1fc   : > { %2384 = vmatprep.subr.bf16.mxu0 %v5395_v25  ;;  %v5462_v25 = vld [vmem:[#allocation7 + $0x360] sm:$0xff]  }
 0x1fd   : > { %v5459_v26 = vld [vmem:[%s6096_s26 + $0x740] ss:$8 sps:$4 sm:$0xff]  }
 0x1fe   : > { %4726 = vmatpush3.bf16.msra.mxu1 %v5397_v28  ;;  %v5466_v28 = vld [vmem:[%s6096_s26 + $0x754] ss:$8 sps:$4 sm:$0xff]  }
 0x1ff   : > { %2385 = vmatpush1.bf16.msra.mxu0 %v5393_v27  ;;  %4733 = vmatprep.subr.bf16.mxu1 %v5401_v30  ;;  %v5463_v27 = vld [vmem:[#allocation7 + $0x320] sm:$0xff]   ;;  %v5464_v30 = vld [vmem:[%s6096_s26 + $0x750] ss:$8 sps:$4 sm:$0xff]  }
 0x200   : > { %2386 = vmatprep.subr.bf16.mxu0 %v5400_v29  ;;  %v5467_v29 = vld [vmem:[#allocation7 + $0x368] sm:$0xff]  }
 0x201   : > { %3806 = vmatmul.mubr.bf16.vlgmr.msra.gmra.mrb[20].mxu1 %v6452_v32  ;;  %v5471_v32 = vld [vmem:[%s6096_s26 + $0x764] ss:$8 sps:$4 sm:$0xff]  }
 0x202   : > { %4734 = vmatpush3.bf16.msra.mxu1 %v5402_v33  ;;  %3845 = vmatprep.mubr.bf16.mxu1 %v2827_v18  ;;  %v5472_v33 = vld [vmem:[#allocation7 + $0x370] sm:$0xff]  }
 0x203   : > { %2387 = vmatpush1.bf16.msra.mxu0 %v5398_v31  ;;  %4735 = vmatprep.subr.bf16.mxu1 %v5406_v17  ;;  %v5468_v31 = vld [vmem:[#allocation7 + $0x328] sm:$0xff]  }
 0x204   : > { %2388 = vmatprep.subr.bf16.mxu0 %v5405_v34 }
 0x206   : > { %4736 = vmatpush3.bf16.msra.mxu1 %v5407_v36  ;;  %v5473_v36 = vld [vmem:[#allocation7 + $0x330] sm:$0xff]  }
 0x207   : > { %2389 = vmatpush1.bf16.msra.mxu0 %v5403_v35  ;;  %4737 = vmatprep.subr.bf16.mxu1 %v5411_v15  ;;  %v5469_v35 = vld [vmem:[%s6096_s26 + $0x760] ss:$8 sps:$4 sm:$0xff]   ;;  %v5476_v15 = vld [vmem:[%s6096_s26 + $0x774] ss:$8 sps:$4 sm:$0xff]  }
 0x208   : > { %2390 = vmatprep.subr.bf16.mxu0 %v5410_v37 }
 0x20a   : > { %4738 = vmatpush3.bf16.msra.mxu1 %v5412_v39  ;;  %v5474_v39 = vld [vmem:[%s6096_s26 + $0x770] ss:$8 sps:$4 sm:$0xff]  }
 0x20b   : > { %2391 = vmatpush1.bf16.msra.mxu0 %v5408_v38  ;;  %4739 = vmatprep.subr.bf16.mxu1 %v5416_v44  ;;  %v5477_v38 = vld [vmem:[#allocation7 + $0x378] sm:$0xff]   ;;  %v5482_v44 = vld [vmem:[%s6096_s26 + $0x784] ss:$8 sps:$4 sm:$0xff]  }
 0x20c   : > { %2392 = vmatprep.subr.bf16.mxu0 %v5415_v40  ;;  %v5478_v40 = vld [vmem:[#allocation7 + $0x338] sm:$0xff]  }
 0x20e   : > { %4740 = vmatpush3.bf16.msra.mxu1 %v5417_v48  ;;  %v6514_v48 = vrot.slane %v6473_v0, %v6169_v49  ;;  %v5485_v49 = vld [vmem:[%s6096_s26 + $0x790] ss:$8 sps:$4 sm:$0xff]   ;;  %v5503_v0 = vld [vmem:[#allocation7 + $0x3e0] sm:$0xff]  }
 0x20f   : > { %2393 = vmatpush1.bf16.msra.mxu0 %v5413_v46  ;;  %4741 = vmatprep.subr.bf16.mxu1 %v5421_v45  ;;  %v5483_v46 = vld [vmem:[#allocation7 + $0x3c0] sm:$0xff]  }
 0x210   : > { %2394 = vmatprep.subr.bf16.mxu0 %v5420_v50  ;;  %v5480_v50 = vld [vmem:[%s6096_s26 + $0x780] ss:$8 sps:$4 sm:$0xff]  }
 0x211   : > { %v5484_v45 = vld [vmem:[#allocation7 + $0x380] sm:$0xff]  }
 0x212   : > { %4742 = vmatpush3.bf16.msra.mxu1 %v5422_v53  ;;  %v5488_v53 = vld [vmem:[#allocation7 + $0x3c8] sm:$0xff]  }
 0x213   : > { %2395 = vmatpush1.bf16.msra.mxu0 %v5418_v51  ;;  %4743 = vmatprep.subr.bf16.mxu1 %v5426_v55  ;;  %v5487_v51 = vld [vmem:[%s6096_s26 + $0x794] ss:$8 sps:$4 sm:$0xff]   ;;  %v5489_v55 = vld [vmem:[#allocation7 + $0x388] sm:$0xff]  }
 0x214   : > { %2396 = vmatprep.subr.bf16.mxu0 %v5425_v54  ;;  %v2828_v54 = vcombine.high %v6488_v11, %v6488_v11 }
 0x216   : > { %4744 = vmatpush3.bf16.msra.mxu1 %v5427_v56  ;;  %v5493_v56 = vld [vmem:[#allocation7 + $0x3d0] sm:$0xff]  }
 0x217   : > { %2397 = vmatpush1.bf16.msra.mxu0 %v5423_v52  ;;  %4745 = vmatprep.subr.bf16.mxu1 %v5431_v58  ;;  %v5492_v52 = vld [vmem:[%s6096_s26 + $0x7a4] ss:$8 sps:$4 sm:$0xff]   ;;  %v5494_v58 = vld [vmem:[#allocation7 + $0x390] sm:$0xff]  }
 0x218   : > { %2398 = vmatprep.subr.bf16.mxu0 %v5430_v57  ;;  %v5490_v57 = vld [vmem:[%s6096_s26 + $0x7a0] ss:$8 sps:$4 sm:$0xff]  }
 0x21a   : > { %4746 = vmatpush3.bf16.msra.mxu1 %v5432_v61  ;;  %v5495_v61 = vld [vmem:[%s6096_s26 + $0x7b0] ss:$8 sps:$4 sm:$0xff]  }
 0x21b   : > { %2399 = vmatpush1.bf16.msra.mxu0 %v5428_v60  ;;  %4747 = vmatprep.subr.bf16.mxu1 %v5436_v63  ;;  %v5498_v60 = vld [vmem:[#allocation7 + $0x3d8] sm:$0xff]   ;;  %v5502_v63 = vld [vmem:[%s6096_s26 + $0x7c4] ss:$8 sps:$4 sm:$0xff]  }
 0x21c   : > { %2400 = vmatprep.subr.bf16.mxu0 %v5435_v62  ;;  %v5499_v62 = vld [vmem:[#allocation7 + $0x398] sm:$0xff]  }
 0x21e   : > { %4748 = vmatpush3.bf16.msra.mxu1 %v5437_v2  ;;  %v5504_v2 = vld [vmem:[#allocation7 + $0x3a0] sm:$0xff]  }
 0x21f   : > { %2401 = vmatpush1.bf16.msra.mxu0 %v5433_v43  ;;  %4755 = vmatprep.subr.bf16.mxu1 %v5442_v3  ;;  %v5500_v43 = vld [vmem:[%s6096_s26 + $0x7c0] ss:$8 sps:$4 sm:$0xff]   ;;  %v5508_v3 = vld [vmem:[#allocation7 + $0x3e8] sm:$0xff]  }
 0x220   : > { %2411 = vmatprep.subr.bf16.mxu0 %v5441_v47  ;;  %v5507_v47 = vld [vmem:[%s6096_s26 + $0x7d4] ss:$8 sps:$4 sm:$0xff]  }
 0x221   : > { %3846 = vmatmul.mubr.bf16.vlgmr.msra.gmra.mrb[24].mxu1 %v2825_v5  ;;  %v5509_v5 = vld [vmem:[#allocation7 + $0x3a8] sm:$0xff]  }
 0x222   : > { %2403 = vmatmul.mubr.bf16.vlgmr.msra.gmra.mrb[0].mxu0 %v6483_v6  ;;  %4756 = vmatpush3.bf16.msra.mxu1 %v5443_v8  ;;  %v5513_v8 = vld [vmem:[#allocation7 + $0x3f0] sm:$0xff]  }
 0x223   : > { %2412 = vmatpush1.bf16.msra.mxu0 %v5439_v7  ;;  %4757 = vmatprep.subr.bf16.mxu1 %v5447_v10  ;;  %v5512_v7 = vld [vmem:[%s6096_s26 + $0x7e4] ss:$8 sps:$4 sm:$0xff]  }
 0x224   : > { %2413 = vmatprep.subr.bf16.mxu0 %v5446_v9  ;;  %3885 = vmatprep.mubr.bf16.mxu1 %v6488_v11 }
 0x225   : > { %2443 = vmatprep.mubr.bf16.mxu0 %v827_v12 }
 0x226   : > { %4758 = vmatpush3.bf16.msra.mxu1 %v5448_v13  ;;  %v5514_v13 = vld [vmem:[#allocation7 + $0x3b0] sm:$0xff]  }
 0x227   : > { %2414 = vmatpush1.bf16.msra.mxu0 %v5444_v41  ;;  %4759 = vmatprep.subr.bf16.mxu1 %v5452_v16  ;;  %v5510_v41 = vld [vmem:[%s6096_s26 + $0x7e0] ss:$8 sps:$4 sm:$0xff]   ;;  %v5517_v16 = vld [vmem:[%s6096_s26 + $0x7f4] ss:$8 sps:$4 sm:$0xff]  }
 0x228   : > { %2415 = vmatprep.subr.bf16.mxu0 %v5451_v14 }
 0x22a   : > { %4760 = vmatpush3.bf16.msra.mxu1 %v5453_v19  ;;  %v5515_v19 = vld [vmem:[%s6096_s26 + $0x7f0] ss:$8 sps:$4 sm:$0xff]   ;;  %s6548_s26 = scalar_lea.hbm %s6598_s8, %s4622_s22 }
 0x22b   : > { %2416 = vmatpush1.bf16.msra.mxu0 %v5449_v1  ;;  %4761 = vmatprep.subr.bf16.mxu1 %v5457_v21  ;;  %v5518_v1 = vld [vmem:[#allocation7 + $0x3f8] sm:$0xff]   ;;  %v825_v21 = vcombine.high %v6483_v6, %v6483_v6 }
 0x22c   : > { %2417 = vmatprep.subr.bf16.mxu0 %v5456_v20  ;;  %v5519_v20 = vld [vmem:[#allocation7 + $0x3b8] sm:$0xff]  }
 0x22e   : > { %4762 = vmatpush3.bf16.msra.mxu1 %v5458_v23  ;;  %v4485_v23 = vld [vmem:[#allocation8] ss:$0 sm:$0xff] }
 0x22f   : > { %2418 = vmatpush1.bf16.msra.mxu0 %v5454_v22  ;;  %4763 = vmatprep.subr.bf16.mxu1 %v5462_v25  ;;  %v2826_v22 = vcombine.high %v6514_v48, %v6514_v48 }
 0x230   : > { %2419 = vmatprep.subr.bf16.mxu0 %v5461_v24 }
 0x232   : > { %4764 = vmatpush3.bf16.msra.mxu1 %v5463_v27 }
 0x233   : > { %2420 = vmatpush1.bf16.msra.mxu0 %v5459_v26  ;;  %4765 = vmatprep.subr.bf16.mxu1 %v5467_v29 }
 0x234   : > { %2421 = vmatprep.subr.bf16.mxu0 %v5466_v28  ;;  %v6504_v34 = vpop.f32.mrb[0].mxu1 }
 0x235   : > { %v6506_v17 = vpop.f32.mrb[1].mxu1 }
 0x236   : > { %v2203_v18 = vpop.f32.mrb[2].mxu1  ;;  %4766 = vmatpush3.bf16.msra.mxu1 %v5468_v31 }
 0x237   : > { %2422 = vmatpush1.bf16.msra.mxu0 %v5464_v30  ;;  %v2204_v37 = vpop.f32.mrb[3].mxu1  ;;  %4767 = vmatprep.subr.bf16.mxu1 %v5472_v33 }
 0x238   : > { %2423 = vmatprep.subr.bf16.mxu0 %v5471_v32  ;;  %v3935_v37 = vld [vmem:[#allocation10 + $0x8] sm:$0xff] }
 0x23a   : > { %4768 = vmatpush3.bf16.msra.mxu1 %v5473_v36  ;;  %v3934_v36 = vld [vmem:[#allocation10] sm:$0xff] }
 0x23b   : > { %2424 = vmatpush1.bf16.msra.mxu0 %v5469_v35  ;;  %4769 = vmatprep.subr.bf16.mxu1 %v5477_v38  ;;  %v5790_v38 = vmov 0.0|0.0  }
 0x23c   : > { %2425 = vmatprep.subr.bf16.mxu0 %v5476_v15  ;;  %v3936_v15 = vld [vmem:[#allocation10 + $0x10] sm:$0xff] }
 0x23e   : > { %4770 = vmatpush3.bf16.msra.mxu1 %v5478_v40  ;;  %v3937_v40 = vld [vmem:[#allocation10 + $0x18] sm:$0xff] }
 0x23f   : > { %2426 = vmatpush1.bf16.msra.mxu0 %v5474_v39  ;;  %4777 = vmatprep.subr.bf16.mxu1 %v5483_v46  ;;  %v4852_v39 = vpack.c.bf16 %v3935_v37, %v3934_v36  ;;  %v3938_v46 = vld [vmem:[#allocation10 + $0x20] sm:$0xff] }
 0x240   : > { %2427 = vmatprep.subr.bf16.mxu0 %v5482_v44  ;;  %v4855_v44 = vpack.c.bf16 %v3937_v40, %v3936_v15 }
 0x241   : > { %3886 = vmatmul.mubr.bf16.vlgmr.msra.gmra.mrb[28].mxu1 %v6514_v48  ;;  %v3939_v48 = vld [vmem:[#allocation10 + $0x28] sm:$0xff] }
 0x242   : > { %4778 = vmatpush3.bf16.msra.mxu1 %v5484_v45  ;;  %3925 = vmatprep.mubr.bf16.mxu1 %v2828_v54  ;;  %v3940_v45 = vld [vmem:[#allocation10 + $0x30] sm:$0xff]  ;;  %v3942_v54 = vld [vmem:[#allocation10 + $0x40] sm:$0xff] }
 0x243   : > { %2428 = vmatpush1.bf16.msra.mxu0 %v5480_v50  ;;  %4779 = vmatprep.subr.bf16.mxu1 %v5488_v53  ;;  %v4858_v50 = vpack.c.bf16 %v3939_v48, %v3938_v46 }
 0x244   : > { %2429 = vmatprep.subr.bf16.mxu0 %v5487_v51  ;;  %v3941_v51 = vld [vmem:[#allocation10 + $0x38] sm:$0xff] }
 0x245   : > { %v4861_v53 = vpack.c.bf16 %v3941_v51, %v3940_v45 }
 0x246   : > { %4780 = vmatpush3.bf16.msra.mxu1 %v5489_v55 }
 0x247   : > { %2430 = vmatpush1.bf16.msra.mxu0 %v5485_v49  ;;  %4781 = vmatprep.subr.bf16.mxu1 %v5493_v56  ;;  %v3943_v49 = vld [vmem:[#allocation10 + $0x48] sm:$0xff]  ;;  %v3945_v56 = vld [vmem:[#allocation10 + $0x58] sm:$0xff] }
 0x248   : > { %2431 = vmatprep.subr.bf16.mxu0 %v5492_v52  ;;  %v4864_v55 = vpack.c.bf16 %v3943_v49, %v3942_v54  ;;  %v3944_v52 = vld [vmem:[#allocation10 + $0x50] sm:$0xff] }
 0x24a   : > { %4782 = vmatpush3.bf16.msra.mxu1 %v5494_v58  ;;  %v3946_v58 = vld [vmem:[#allocation10 + $0x60] sm:$0xff] }
 0x24b   : > { %2432 = vmatpush1.bf16.msra.mxu0 %v5490_v57  ;;  %4783 = vmatprep.subr.bf16.mxu1 %v5498_v60  ;;  %v4867_v57 = vpack.c.bf16 %v3945_v56, %v3944_v52 }
 0x24c   : > { %2433 = vmatprep.subr.bf16.mxu0 %v5497_v59  ;;  %v3947_v59 = vld [vmem:[#allocation10 + $0x68] sm:$0xff] }
 0x24d   : > { %v4870_v60 = vpack.c.bf16 %v3947_v59, %v3946_v58 }
 0x24e   : > { %4784 = vmatpush3.bf16.msra.mxu1 %v5499_v62 }
 0x24f   : > { %2434 = vmatpush1.bf16.msra.mxu0 %v5495_v61  ;;  %4785 = vmatprep.subr.bf16.mxu1 %v5503_v0 }
 0x250   : > { %2435 = vmatprep.subr.bf16.mxu0 %v5502_v63 }
 0x252   : > { %4786 = vmatpush3.bf16.msra.mxu1 %v5504_v2  ;;  %v3949_v2 = vld [vmem:[#allocation10 + $0x78] sm:$0xff] }
 0x253   : > { %2436 = vmatpush1.bf16.msra.mxu0 %v5500_v43  ;;  %4787 = vmatprep.subr.bf16.mxu1 %v5508_v3  ;;  %v3948_v43 = vld [vmem:[#allocation10 + $0x70] sm:$0xff] }
 0x254   : > { %2437 = vmatprep.subr.bf16.mxu0 %v5507_v47  ;;  %v4639_v9 = vpop.f32.mrb[4].mxu1  ;;  %v4873_v3 = vpack.c.bf16 %v3949_v2, %v3948_v43 }
 0x255   : > { %v4640_v10 = vpop.f32.mrb[5].mxu1 }
 0x256   : > { %v4641_v11 = vadd.f32 %v4640_v10, %v4639_v9  ;;  %v4642_v12 = vpop.f32.mrb[6].mxu1  ;;  %4788 = vmatpush3.bf16.msra.mxu1 %v5509_v5  ;;  %v5792_v5 = vmov 0.0  }
 0x257   : > { %2438 = vmatpush1.bf16.msra.mxu0 %v5505_v4  ;;  %v4643_v14 = vpop.f32.mrb[7].mxu1  ;;  %4789 = vmatprep.subr.bf16.mxu1 %v5513_v8 }
 0x258   : > { %2439 = vmatprep.subr.bf16.mxu0 %v5512_v7  ;;  %v3648_v26 = vadd.f32 %v4641_v11, %v4485_v23 }
 0x25a   : > { %4790 = vmatpush3.bf16.msra.mxu1 %v5514_v13 }
 0x25b   : > { %2440 = vmatpush1.bf16.msra.mxu0 %v5510_v41  ;;  %4791 = vmatprep.subr.bf16.mxu1 %v5518_v1 }
 0x25c   : > { %2441 = vmatprep.subr.bf16.mxu0 %v5517_v16 }
 0x25e   : > { %4792 = vmatpush3.bf16.msra.mxu1 %v5519_v20 }
 0x25f   : > { %2442 = vmatpush1.bf16.msra.mxu0 %v5515_v19  ;;  %4851 = vmatprep.subr.bf16.mxu1 %v5790_v38 }
 0x261   : > { %3926 = vmatmul.mubr.bf16.vlgmr.msra.gmra.mrb[32].mxu1 %v2826_v22 }
 0x262   : > { %2444 = vmatmul.mubr.bf16.vlgmr.msra.gmra.mrb[0].mxu0 %v825_v21  ;;  %4853 = vmatpush3.bf16.msra.mxu1 %v4852_v39 }
 0x263   : > { %4854 = vmatprep.subr.bf16.mxu1 %v5790_v38  ;;  %4848 = vmatprep.mubr.msk.f32.mxu1 %vm5791_vm0, %v5792_v5 }
 0x266   : > { %4856 = vmatpush3.bf16.msra.mxu1 %v4855_v44 }
 0x267   : > { %4857 = vmatprep.subr.bf16.mxu1 %v5790_v38 }
 0x26a   : > { %4859 = vmatpush3.bf16.msra.mxu1 %v4858_v50 }
 0x26b   : > { %4860 = vmatprep.subr.bf16.mxu1 %v5790_v38 }
 0x26e   : > { %4862 = vmatpush3.bf16.msra.mxu1 %v4861_v53 }
 0x26f   : > { %4863 = vmatprep.subr.bf16.mxu1 %v5790_v38 }
 0x272   : > { %4865 = vmatpush3.bf16.msra.mxu1 %v4864_v55 }
 0x273   : > { %4866 = vmatprep.subr.bf16.mxu1 %v5790_v38 }
 0x274   : > { %v4661_v24 = vpop.f32.mrb[8].mxu1 }
 0x275   : > { %v4662_v25 = vpop.f32.mrb[9].mxu1 }
 0x276   : > { %v4663_v27 = vadd.f32 %v4662_v25, %v4661_v24  ;;  %v4664_v28 = vpop.f32.mrb[10].mxu1  ;;  %4868 = vmatpush3.bf16.msra.mxu1 %v4867_v57 }
 0x277   : > { %v4665_v29 = vpop.f32.mrb[11].mxu1  ;;  %4869 = vmatprep.subr.bf16.mxu1 %v5790_v38  ;;  %v724_v28 = vsub.s32 1, %v6161_v42 }
 0x278   : > { %v3688_v30 = vadd.f32 %v4663_v27, %v3648_v26  ;;  %v720_v26 = vsub.s32 0, %v6161_v42  ;;  %v716_v27 = vld [vmem:[%s6104_s16] sm:$0x3]  ;;  %s5698_s16 = sshll.u32 %s5793_s17, 4  ;;  %s5699_s16 = int_to_ptr.vmem [resolvable:$false] %s5698_s16 }
 0x279   : > { %s5700_s15 = scalar_lea.vmem %s5699_s16, 128  ;;  %p5701_p3 = scmp.lt.s32.totalorder %s4049_s21, %s5699_s16 }
 0x27a   : > { %4871 = vmatpush3.bf16.msra.mxu1 %v4870_v60  ;;  %v721_v29 = vrot.slane %v716_v27, %v720_v26  ;;  %p5702_p6 = scmp.lt.s32.totalorder %s5700_s15, %s5694_s6 }
 0x27b   : > { %4872 = vmatprep.subr.bf16.mxu1 %v5790_v38 }
 0x27c   : > { %p5703_p8 = por %p5702_p6, %p5701_p3 }
 0x27e   : > { %4874 = vmatpush3.bf16.msra.mxu1 %v4873_v3  ;;  %p5704_p0 = pnand %p5703_p8, %p5697_p4 }
 0x294   : > { %v4683_v31 = vpop.f32.mrb[12].mxu1 }
 0x295   : > { %v4684_v32 = vpop.f32.mrb[13].mxu1 }
 0x296   : > { %v4685_v33 = vadd.f32 %v4684_v32, %v4683_v31  ;;  %v4686_v18 = vpop.f32.mrb[14].mxu1  ;;  %v4875_v31 = vadd.f32 %v6504_v34, %v721_v29 }
 0x297   : > { %v4687_v6 = vpop.f32.mrb[15].mxu1 }
 0x298   : > { %v3728_v35 = vadd.f32 %v4685_v33, %v3688_v30  ;;  %v725_v30 = vrot.slane %v716_v27, %v724_v28 }
 0x29a   : > { %v4877_v32 = vadd.f32 %v6506_v17, %v725_v30 }
 0x2b4   : > { %v4705_v61 = vpop.f32.mrb[16].mxu1 }
 0x2b5   : > { %v4706_v62 = vpop.f32.mrb[17].mxu1 }
 0x2b6   : > { %v4707_v63 = vadd.f32 %v4706_v62, %v4705_v61  ;;  %v4708_v0 = vpop.f32.mrb[18].mxu1 }
 0x2b7   : > { %v4709_v47 = vpop.f32.mrb[19].mxu1 }
 0x2b8   : > { %v3768_v4 = vadd.f32 %v4707_v63, %v3728_v35 }
 0x2d4   : > { %v4727_v7 = vpop.f32.mrb[20].mxu1 }
 0x2d5   : > { %v4728_v8 = vpop.f32.mrb[21].mxu1 }
 0x2d6   : > { %v4729_v9 = vadd.f32 %v4728_v8, %v4727_v7  ;;  %v4730_v10 = vpop.f32.mrb[22].mxu1 }
 0x2d7   : > { %v4731_v11 = vpop.f32.mrb[23].mxu1 }
 0x2d8   : > { %v3808_v12 = vadd.f32 %v4729_v9, %v3768_v4 }
 0x2f4   : > { %v4749_v41 = vpop.f32.mrb[24].mxu1 }
 0x2f5   : > { %v4750_v13 = vpop.f32.mrb[25].mxu1 }
 0x2f6   : > { %v4751_v14 = vadd.f32 %v4750_v13, %v4749_v41  ;;  %v4752_v16 = vpop.f32.mrb[26].mxu1 }
 0x2f7   : > { %v4753_v1 = vpop.f32.mrb[27].mxu1 }
 0x2f8   : > { %v3848_v19 = vadd.f32 %v4751_v14, %v3808_v12 }
 0x314   : > { %v4771_v20 = vpop.f32.mrb[28].mxu1 }
 0x315   : > { %v4772_v21 = vpop.f32.mrb[29].mxu1 }
 0x316   : > { %v4773_v22 = vadd.f32 %v4772_v21, %v4771_v20  ;;  %v4774_v23 = vpop.f32.mrb[30].mxu1 }
 0x317   : > { %v4775_v24 = vpop.f32.mrb[31].mxu1 }
 0x318   : > { %v3888_v25 = vadd.f32 %v4773_v22, %v3848_v19 }
 0x334   : > { %v4793_v18 = vpop.f32.mrb[32].mxu1 }
 0x335   : > { %v2445_v33 = vpop.f32.mrb[0].mxu0  ;;  %v4794_v36 = vpop.f32.mrb[33].mxu1 }
 0x336   : > { %v4876_v6 = vadd.f32 %v4875_v31, %v2445_v33  ;;  %v2447_v35 = vpop.f32.mrb[1].mxu0  ;;  %v4795_v15 = vadd.f32 %v4794_v36, %v4793_v18  ;;  %v4796_v39 = vpop.f32.mrb[34].mxu1 }
 0x337   : > { %v4878_v37 = vadd.f32 %v4877_v32, %v2447_v35  ;;  %v2449_v38 = vpop.f32.mrb[2].mxu0  ;;  %v4797_v40 = vpop.f32.mrb[35].mxu1 }
 0x338   : > { %v2450_v42 = vpop.f32.mrb[3].mxu0  ;;  %v3928_v46 = vadd.f32 %v4795_v15, %v3888_v25 }
 0x339   : > { %v2454_v44 = vcombine.low %v4876_v6, %v4878_v37 }
 0x33a   : > { %v3933_v34 = vmax.f32 %v3928_v46, 0.0 }
 0x33b   : > { %4484 = vst.sshfl [vmem:[%s443_s5] sm:$0x33 pattern:$0x76325410] %v2454_v44 }
 0x33c   : > { %4849 = vmatmul.mubr.f32.vlgmr.msra.gmra.mrb[36].mxu1 %v3933_v34 }
 0x33d   : > { %5707 = shalt.err (!%p5704_p0)
}
 0x33e   : > { %s5708_s7 = scalar_lea.hbm %s6548_s26, 64  ;;  %s5712_s19 = scalar_lea.hbm %s6598_s8, 512 }
 0x33f   : > { %p5709_p10 = scmp.ne.s32.totalorder %s6548_s26, %s5708_s7  ;;  %p5713_p7 = scmp.lt.u32.totalorder %s6548_s26, %s6598_s8 }
 0x340   : > { %p5714_p11 = scmp.lt.u32.totalorder %s5712_s19, %s5708_s7  ;;  %p5716_p1 = scmp.lt.u32.totalorder %s5708_s7, %s6548_s26 }
 0x341   : > { %p5710_p9 = pnand %p5709_p10, %p6638_p12 }
 0x342   : > { %p5715_p2 = por %p5714_p11, %p5713_p7 }
 0x343   : > { %p5711_p5 = pneg %p5710_p9 }
 0x344   : > { %p5717_p13 = por %p5716_p1, %p5715_p2 }
 0x346   : > { %p5718_p4 = pnand %p5717_p13, %p5711_p5 }
 0x348   : > { %5721 = shalt.err (!%p5718_p4)
}
 0x349   : > { %4923 = dma.vmem_to_hbm [thread:$0]  (%p6638_p12), %s4049_s21, 64, %s6548_s26, %s4030_s4   ;;  %v4614_v17 = vld [vmem:[#allocation11] ss:$0 sm:$0xff] }
 0x34a   : > { %p453_p3 = scmp.lt.s32.totalorder %s5865_s13, 7  ;;  %s6639_s5 = sld [smem:[#allocation27_spill]] }
 0x34c   : > { %s6648_s13 = smov (!%p453_p3, %s5865_s13), 7 }
 0x34d   : > { %s4227_s9 = sshll.u32 %s6648_s13, 1 }
 0x350   : > { %s456_s22 = scalar_lea.vmem %s6639_s5, %s4227_s9 }
 0x40f   : > { %v4023_v48 = vpop.f32.mrb[36].mxu1 }
 0x410   : > { %v4024_v50 = vadd.f32 %v4614_v17, %v4023_v48  ;;  %v4850_v45 = vpop.f32.mrb[37].mxu1 }
 0x412   : > { %5520 = vtanh.f32 %v4024_v50 }
 0x41c   : > { %v5521_v51 = vpop.eup %5520 }
 0x41d   : > { %4028 = vst [vmem:[%s456_s22] sm:$0x3] %v5521_v51 }
 0x41e PF: > { %s6640_s27 = sld [smem:[#allocation20_spill]]  ;;  %s6641_s30 = sld [smem:[#allocation21_spill]] }
 0x41f   : > { %p4958_p6 = scmp.ge.s32.totalorder %s5776_s12, 2 }
 0x424   : > { %s4063_s21 = sand.u32 1, %s6640_s27   ;;  %p6642_p12 = scmp.ne.s32.totalorder %s6641_s30, 0 }
 0x425   : > { %s4064_s25 = scalar_lea.sflag [#allocation4], %s4063_s21 }
 0x426   : > { %p4946_p8 = pnand %p4958_p6, %p6642_p12 }
 0x428   : > { %5759 = dma.done.wait (!%p4946_p8), %s4064_s25, 64  }
 0x429   : > { %5761 = vsyncadd (!%p4946_p8), %s4064_s25, 4294967232  ;;  %p28_p0 = scmp.ge.s32.totalorder %s5996_s14, 10   ;;  %s6643_s30 = smov %s5768_s10 }
 0x42a   : > { %s6644_s10 = smov %s5772_s11  ;;  %s6645_s11 = smov %s6012_s28 }
 0x42b   : > { %s6646_s12 = smov %s5996_s14  ;;  %30 = sbr.rel (!%p28_p0) target bundleno = 16 (0x10), region = 138 }
 0x432   :  { %4076 = vsyncpa [#allocation3], 1 }
 0x433   :  { %4078 = vsyncpa [#allocation3 + $0x1], 1 }
 0x434   :  { %4079 = vsyncpa [#allocation6], 1 }
 0x435   :  { %4081 = vsyncpa [#allocation6 + $0x1], 1 }
 0x436   :  { %4082 = vsyncpa [#allocation9], 1 }
 0x437   :  { %4083 = vsyncpa [#allocation12], 1 }
 0x438   :  { %4084 = vsyncpa [#allocation4], 1 }
 0x439   :  { %4086 = vsyncpa [#allocation4 + $0x1], 1 }

// kernel: forward_pallas.2
= control target key start
LH: loop header
LB: loop body
LE: loop exit
PB: predicated region body
PF: predicated region fallthrough
CT: control target
= control target key end

     0   :  { %10 = vsyncpa [#allocation3], 0  ;;  %s11331_s0 = inlined_call_operand.vmem [shape: f32[128,128], index: 0, kind: input, shape index: {}]   ;;  %s11332_s1 = inlined_call_operand.hbm [shape: bf16[3,9,128,128], index: 1, kind: input, shape index: {}]   ;;  %s11333_s2 = inlined_call_operand.hbm [shape: f32[3,1,128], index: 2, kind: input, shape index: {}]   ;;  %s11334_s3 = inlined_call_operand.hbm [shape: bf16[128,128], index: 3, kind: input, shape index: {}]   ;;  %s11335_s4 = inlined_call_operand.hbm [shape: f32[1,128], index: 4, kind: input, shape index: {}]   ;;  %s11336_s5 = inlined_call_operand.vmem [shape: bf16[128,128], index: 5, kind: output, shape index: {}]  }
   0x1   :  { %11 = vsyncpa [#allocation5], 0 }
   0x2   :  { %12 = vsyncpa [#allocation8], 0  ;;  %s9141_s18 = smov [#allocation4]   ;;  %s9047_s22 = scalar_lea.hbm %s11333_s2, 48 }
   0x3   :  { %s32_s19 = sshll.u32 %s9141_s18, 4  ;;  %p9048_p0 = scmp.ne.s32.totalorder %s11333_s2, %s9047_s22  ;;  %s33_s19 = int_to_ptr.vmem [resolvable:$true] %s32_s19 }
   0x4   :  { %p9051_p1 = scmp.lt.u32.totalorder %s9047_s22, %s11333_s2 }
   0x6   :  { %p9053_p2 = pnand %p9051_p1, %p9048_p0 }
   0x8   :  { %9056 = shalt.err (!%p9053_p2)
}
   0x9   :  { %s9057_s27 = scalar_lea.vmem %s33_s19, 48  ;;  %s9061_s28 = scalar_lea.vmem %s33_s19, 64 }
   0xa   :  { %p9058_p3 = scmp.ne.s32.totalorder %s33_s19, %s9057_s27  ;;  %p9062_p4 = scmp.lt.s32.totalorder %s33_s19, %s33_s19 }
   0xb   :  { %p9063_p5 = scmp.lt.s32.totalorder %s9061_s28, %s9057_s27 }
   0xd   :  { %p9064_p6 = por %p9063_p5, %p9062_p4 }
   0xf   :  { %p9065_p7 = pnand %p9064_p6, %p9058_p3 }
  0x11   :  { %9068 = shalt.err (!%p9065_p7)
}
  0x12   :  { %s9142_s29 = smov 16   ;;  %s9143_s30 = smov 1  }
  0x13   :  { %38 = dma.hbm_to_vmem [thread:$0]  %s11333_s2, 48, %s33_s19, [#allocation5], %s9142_s29, %s9142_s29, %s9143_s30  }
  0x14   :  { %s9144_s8 = smov [#allocation2]   ;;  %s9069_s12 = scalar_lea.hbm %s11332_s1, 27648 }
  0x15   :  { %s20_s9 = sshll.u32 %s9144_s8, 4  ;;  %p9070_p8 = scmp.ne.s32.totalorder %s11332_s1, %s9069_s12  ;;  %s21_s9 = int_to_ptr.vmem [resolvable:$true] %s20_s9 }
  0x16   :  { %p9073_p9 = scmp.lt.u32.totalorder %s9069_s12, %s11332_s1 }
  0x18   :  { %p9075_p10 = pnand %p9073_p9, %p9070_p8 }
  0x1a   :  { %9078 = shalt.err (!%p9075_p10)
}
  0x1b   :  { %s9079_s17 = scalar_lea.vmem %s21_s9, 27648  ;;  %p9084_p12 = scmp.lt.s32.totalorder %s21_s9, %s21_s9 }
  0x1c   :  { %p9080_p11 = scmp.ne.s32.totalorder %s21_s9, %s9079_s17  ;;  %p9085_p13 = scmp.lt.s32.totalorder %s9079_s17, %s9079_s17 }
  0x1e   :  { %p9086_p0 = por %p9085_p13, %p9084_p12 }
  0x20   :  { %p9087_p1 = pnand %p9086_p0, %p9080_p11 }
  0x22   :  { %9090 = shalt.err (!%p9087_p1)
}
  0x23   :  { %s9145_s2 = smov 64   ;;  %s9146_s18 = smov 4  }
  0x24   :  { %26 = dma.hbm_to_vmem [thread:$0]  %s11332_s1, 27648, %s21_s9, [#allocation3], %s9145_s2, %s9145_s2, %s9146_s18  }
  0x25   :  { %s9147_s21 = smov [#allocation6]   ;;  %s9148_s23 = smov [#allocation7]  }
  0x26   :  { %s44_s22 = sshll.u32 %s9147_s21, 4  ;;  %s57_s24 = sshll.u32 %s9148_s23, 4  ;;  %s45_s22 = int_to_ptr.vmem [resolvable:$true] %s44_s22  ;;  %s58_s24 = int_to_ptr.vmem [resolvable:$true] %s57_s24 }
  0x27   :  { %s9091_s27 = scalar_lea.hbm %s11334_s3, 1024 }
  0x28   :  { %p9092_p2 = scmp.ne.s32.totalorder %s11334_s3, %s9091_s27  ;;  %p9095_p3 = scmp.lt.u32.totalorder %s9091_s27, %s11334_s3 }
  0x2a   :  { %p9097_p4 = pnand %p9095_p3, %p9092_p2 }
  0x2c   :  { %9100 = shalt.err (!%p9097_p4)
}
  0x2d   :  { %s9101_s1 = scalar_lea.vmem %s45_s22, 1024  ;;  %p9106_p6 = scmp.lt.s32.totalorder %s45_s22, %s45_s22 }
  0x2e   :  { %p9102_p5 = scmp.ne.s32.totalorder %s45_s22, %s9101_s1  ;;  %p9107_p7 = scmp.lt.s32.totalorder %s9101_s1, %s9101_s1 }
  0x30   :  { %p9108_p8 = por %p9107_p7, %p9106_p6 }
  0x32   :  { %p9109_p9 = pnand %p9108_p8, %p9102_p5 }
  0x34   :  { %9112 = shalt.err (!%p9109_p9)
}
  0x35   :  { %50 = dma.hbm_to_vmem [thread:$0]  %s11334_s3, 1024, %s45_s22, [#allocation5], %s9145_s2, %s9145_s2, %s9146_s18  }
  0x36   :  { %s9113_s11 = scalar_lea.hbm %s11335_s4, 16 }
  0x37   :  { %p9114_p10 = scmp.ne.s32.totalorder %s11335_s4, %s9113_s11  ;;  %p9117_p11 = scmp.lt.u32.totalorder %s9113_s11, %s11335_s4 }
  0x39   :  { %p9119_p12 = pnand %p9117_p11, %p9114_p10 }
  0x3b   :  { %9122 = shalt.err (!%p9119_p12)
}
  0x3c   :  { %s9123_s16 = scalar_lea.vmem %s58_s24, 16  ;;  %s9127_s17 = scalar_lea.vmem %s58_s24, 32 }
  0x3d   :  { %p9124_p13 = scmp.ne.s32.totalorder %s58_s24, %s9123_s16  ;;  %p9128_p0 = scmp.lt.s32.totalorder %s58_s24, %s58_s24 }
  0x3e   :  { %p9129_p1 = scmp.lt.s32.totalorder %s9127_s17, %s9123_s16 }
  0x40   :  { %p9130_p2 = por %p9129_p1, %p9128_p0 }
  0x42   :  { %p9131_p3 = pnand %p9130_p2, %p9124_p13 }
  0x44   :  { %9134 = shalt.err (!%p9131_p3)
}
  0x45   :  { %60 = dma.hbm_to_vmem [thread:$0]  %s11335_s4, 16, %s58_s24, [#allocation8]  }
  0x46   :  { %9135 = dma.done.wait [#allocation3], 27648  }
  0x47   :  { %9136 = vsyncadd [#allocation3], 4294939648 }
  0x48   :  { %9137 = dma.done.wait [#allocation5], 1072  }
  0x49   :  { %9138 = vsyncadd [#allocation5], 4294966224 }
  0x4a   :  { %9139 = dma.done.wait [#allocation8], 16  }
  0x4b   :  { %9140 = vsyncadd [#allocation8], 4294967280  ;;  %v8821_v0 = vld [vmem:[#allocation2 + $0x40] sm:$0xff]   ;;  %v8823_v2 = vld [vmem:[#allocation2 + $0x48] sm:$0xff]   ;;  %v11339_v14 = vmov 0.0   ;;  %v74_v16 = vlaneseq  ;;  %vm11343_vm13 = vmmov 1  }
  0x4c   :  { %v8822_v1 = vld [vmem:[#allocation2 + $0x100] sm:$0xff]   ;;  %7531 = vmatprep.subr.bf16.mxu1 %v8821_v0  ;;  %v8824_v3 = vld [vmem:[#allocation2 + $0x108] sm:$0xff]   ;;  %v8825_v4 = vld [vmem:[#allocation2 + $0x50] sm:$0xff]  }
  0x4d   :  { %7659 = vmatprep.subr.bf16.mxu0 %v8822_v1  ;;  %7532 = vmatpush3.bf16.msra.mxu1 %v8821_v0  ;;  %v8826_v5 = vld [vmem:[#allocation2 + $0x110] sm:$0xff]   ;;  %v8827_v6 = vld [vmem:[#allocation2 + $0x58] sm:$0xff]   ;;  %v8829_v8 = vld [vmem:[#allocation2 + $0x60] sm:$0xff]   ;;  %v9243_v20 = vshrl.u32 %v74_v16, 7 }
  0x4e   :  { %7660 = vmatpush3.bf16.msra.mxu0 %v8822_v1  ;;  %7533 = vmatprep.subr.bf16.mxu1 %v8823_v2  ;;  %v8828_v7 = vld [vmem:[#allocation2 + $0x118] sm:$0xff]   ;;  %v8830_v9 = vld [vmem:[#allocation2 + $0x120] sm:$0xff]   ;;  %v8831_v10 = vld [vmem:[#allocation2 + $0x68] sm:$0xff]  }
  0x4f   :  { %7661 = vmatprep.subr.bf16.mxu0 %v8824_v3  ;;  %v9232_v11 = vld [vmem:[%s11331_s0] sm:$0xff]  ;;  %v9237_v12 = vld [vmem:[%s11331_s0 + $0x8] sm:$0xff]  ;;  %v8833_v18 = vld [vmem:[#allocation2 + $0x70] sm:$0xff]   ;;  %11512 = vst [vmem:[#allocation12_spill] sm:$0xff] %v9243_v20  ;;  %v76_v23 = vadd.s32 8, %v9243_v20  ;;  %v77_v24 = vadd.s32 16, %v9243_v20 }
  0x50   :  { %v8832_v13 = vld [vmem:[#allocation2 + $0x128] sm:$0xff]   ;;  %v452_v15 = vpack.c.bf16 %v9232_v11, %v11339_v14  ;;  %v1236_v17 = vpack.c.bf16 %v9237_v12, %v9232_v11  ;;  %v8834_v19 = vld [vmem:[#allocation2 + $0x130] sm:$0xff]   ;;  %v8835_v21 = vld [vmem:[#allocation2 + $0x78] sm:$0xff]   ;;  %v78_v26 = vadd.s32 24, %v9243_v20  ;;  %v79_v30 = vadd.s32 32, %v9243_v20 }
  0x51   :  { %7534 = vmatpush3.bf16.msra.mxu1 %v8823_v2  ;;  %v8836_v22 = vld [vmem:[#allocation2 + $0x138] sm:$0xff]   ;;  %v9250_v25 = vld [vmem:[%s11331_s0 + $0x10] sm:$0xff]  ;;  %v8837_v27 = vld [vmem:[#allocation2] sm:$0xff]   ;;  %v95_v33 = vand.u32 63, %v9243_v20  ;;  %v102_v34 = vand.u32 63, %v76_v23  ;;  %v80_v35 = vadd.s32 40, %v9243_v20 }
  0x52   :  { %7662 = vmatpush3.bf16.msra.mxu0 %v8824_v3  ;;  %7535 = vmatprep.subr.bf16.mxu1 %v8825_v4  ;;  %v9256_v28 = vld [vmem:[%s11331_s0 + $0x18] sm:$0xff]  ;;  %v8838_v29 = vld [vmem:[#allocation2 + $0x140] sm:$0xff]   ;;  %v9261_v31 = vpack.c.bf16 %v9250_v25, %v9237_v12  ;;  %v8839_v37 = vld [vmem:[#allocation2 + $0x8] sm:$0xff]   ;;  %v109_v39 = vand.u32 63, %v77_v24  ;;  %v116_v40 = vand.u32 63, %v78_v26  ;;  %v123_v43 = vand.u32 63, %v79_v30 }
  0x53   :  { %7663 = vmatprep.subr.bf16.mxu0 %v8826_v5  ;;  %7547 = vmatprep.mubr.bf16.mxu1 %v452_v15  ;;  %v9266_v32 = vld [vmem:[%s11331_s0 + $0x20] sm:$0xff]  ;;  %v1237_v36 = vpack.c.bf16 %v9256_v28, %v9250_v25  ;;  %v9275_v38 = vld [vmem:[%s11331_s0 + $0x28] sm:$0xff]  ;;  %v9284_v45 = vand.u32 7, %v95_v33  ;;  %v9289_v46 = vld [vmem:[%s11331_s0 + $0x30] sm:$0xff]  ;;  %v130_v47 = vand.u32 63, %v80_v35  ;;  %v9292_v48 = vadd.s32 48, %v9243_v20 }
  0x54   :  { %7675 = vmatprep.mubr.bf16.mxu0 %v1236_v17  ;;  %v8840_v41 = vld [vmem:[#allocation2 + $0x148] sm:$0xff]   ;;  %v9279_v42 = vpack.c.bf16 %v9266_v32, %v9256_v28  ;;  %v1238_v44 = vpack.c.bf16 %v9275_v38, %v9266_v32  ;;  %v9295_v49 = vadd.s32 56, %v9243_v20  ;;  %v8841_v50 = vld [vmem:[#allocation2 + $0x10] sm:$0xff]   ;;  %v9300_v51 = vld [vmem:[%s11331_s0 + $0x38] sm:$0xff]  ;;  %v9302_v52 = vand.u32 7, %v102_v34 }
  0x55   :  { %7536 = vmatpush3.bf16.msra.mxu1 %v8825_v4  ;;  %v9304_v53 = vand.u32 7, %v109_v39  ;;  %v8842_v54 = vld [vmem:[#allocation2 + $0x150] sm:$0xff]   ;;  %v9310_v55 = vld [vmem:[%s11331_s0 + $0x40] sm:$0xff]  ;;  %v9312_v56 = vand.u32 7, %v116_v40  ;;  %v9314_v57 = vand.u32 7, %v123_v43  ;;  %v9318_v58 = vpack.c.bf16 %v9289_v46, %v9275_v38  ;;  %v9325_v60 = vld [vmem:[%s11331_s0 + $0x48] sm:$0xff] }
  0x56   :  { %7664 = vmatpush3.bf16.msra.mxu0 %v8826_v5  ;;  %7537 = vmatprep.subr.bf16.mxu1 %v8827_v6  ;;  %11513 = vst [vmem:[#allocation13_spill] sm:$0xff] %v9279_v42  ;;  %v1239_v59 = vpack.c.bf16 %v9300_v51, %v9289_v46  ;;  %v9327_v61 = vand.u32 7, %v130_v47  ;;  %v8843_v62 = vld [vmem:[#allocation2 + $0x18] sm:$0xff]   ;;  %v137_v63 = vand.u32 63, %v9292_v48  ;;  %v456_v1 = vpack.c.bf16 %v9310_v55, %v11339_v14  ;;  %v9340_v5 = vld [vmem:[%s11331_s0 + $0x50] sm:$0xff]  ;;  %v8846_v16 = vld [vmem:[#allocation2 + $0x160] sm:$0xff]  }
  0x57   :  { %7665 = vmatprep.subr.bf16.mxu0 %v8828_v7  ;;  %11514 = vst [vmem:[#allocation14_spill] sm:$0xff] %v9318_v58  ;;  %v8844_v0 = vld [vmem:[#allocation2 + $0x158] sm:$0xff]   ;;  %v144_v2 = vand.u32 63, %v9295_v49  ;;  %v299_v3 = vrot.slane %v9232_v11, 7  ;;  %v1240_v4 = vpack.c.bf16 %v9325_v60, %v9310_v55  ;;  %vm11361_vm0 = vcmp.lt.s32.totalorder %v9243_v20, 7  ;;  %v9370_v23 = vld [vmem:[%s11331_s0 + $0x68] sm:$0xff] }
  0x58   :  { %vm11376_vm1 = vcmp.lt.s32.totalorder %v9243_v20, 1  ;;  %v769_v15 = vrot.slane %v9250_v25, 1  ;;  %v302_v17 = vrot.slane %v9256_v28, 7  ;;  %vm11341_vm2 = vcmp.ge.s32.totalorder %v9302_v52, 1  ;;  %v9385_v34 = vld [vmem:[%s11331_s0 + $0x78] sm:$0xff] }
  0x59   :  { %7538 = vmatpush3.bf16.msra.mxu1 %v8827_v6  ;;  %v11337_v6 = vrot.slane %v9232_v11, 1  ;;  %v303_v24 = vrot.slane %v9266_v32, 7  ;;  %v771_v26 = vrot.slane %v9266_v32, 1  ;;  %vm11342_vm3 = vcmp.lt.s32.totalorder %v9302_v52, 7  ;;  %vm9483_vm14 = vmpackc.low %vm11341_vm2, %vm11343_vm13 }
  0x5a   :  { %7666 = vmatpush3.bf16.msra.mxu0 %v8828_v7  ;;  %7539 = vmatprep.subr.bf16.mxu1 %v8829_v8  ;;  %v8845_v7 = vld [vmem:[#allocation2 + $0x20] sm:$0xff]   ;;  %vm800_vm4 = vcmp.lt.s32.totalorder %v9284_v45, 7  ;;  %v304_v30 = vrot.slane %v9275_v38, 7  ;;  %v772_v35 = vrot.slane %v9275_v38, 1  ;;  %v11338_v39 = vrot.slane %v9385_v34, 7 }
  0x5b   :  { %7667 = vmatprep.subr.bf16.mxu0 %v8830_v9  ;;  %v11345_v40 = vrot.slane %v9289_v46, 1  ;;  %v774_v43 = vrot.slane %v9300_v51, 1  ;;  %vm366_vm5 = vcmp.ge.s32.totalorder %v9304_v53, 1  ;;  %vm367_vm6 = vcmp.ge.s32.totalorder %v9312_v56, 1  ;;  %vm9497_vm15 = vmpackc.low %vm11342_vm3, %vm800_vm4 }
  0x5c   :  { %vm802_vm7 = vcmp.lt.s32.totalorder %v9304_v53, 7  ;;  %vm803_vm8 = vcmp.lt.s32.totalorder %v9312_v56, 7  ;;  %vm368_vm9 = vcmp.ge.s32.totalorder %v9314_v57, 1  ;;  %vm369_vm10 = vcmp.ge.s32.totalorder %v9327_v61, 1  ;;  %vm9547_vm3 = vmpackc.low %vm367_vm6, %vm366_vm5  ;;  %v9026_v56 = vld [vmem:[#allocation2 + $0x668] sm:$0xff]  }
  0x5d   :  { %7540 = vmatpush3.bf16.msra.mxu1 %v8829_v8  ;;  %v300_v8 = vrot.slane %v9237_v12, 7  ;;  %vm804_vm11 = vcmp.lt.s32.totalorder %v9314_v57, 7  ;;  %vm805_vm12 = vcmp.lt.s32.totalorder %v9327_v61, 7  ;;  %v11518_v48 = vmov 0  ;;  %vm9576_vm6 = vmpackc.low %vm803_vm8, %vm802_vm7 }
  0x5e   :  { %7668 = vmatpush3.bf16.msra.mxu0 %v8830_v9  ;;  %7541 = vmatprep.subr.bf16.mxu1 %v8831_v10  ;;  %v9349_v9 = vld [vmem:[%s11331_s0 + $0x58] sm:$0xff]  ;;  %v11519_v48 = vsel %vm9483_vm14, 4294967295, %v11518_v48  ;;  %vm9598_vm7 = vmpackc.low %vm369_vm10, %vm368_vm9  ;;  %v11537_v38 = vrot.slane %v9289_v46, 1  ;;  %v87_v61 = vadd.s32 96, %v9243_v20 }
  0x5f   :  { %7669 = vmatprep.subr.bf16.mxu0 %v8832_v13  ;;  %11520 = vst [vmem:[#allocation18_spill] sm:$0xff] %v11519_v48  ;;  %vm9624_vm8 = vmpackc.low %vm805_vm12, %vm804_vm11 }
  0x60   :  { %v9642_v57 = vsel %vm11361_vm0, %v11537_v38, %v774_v43  ;;  %v11539_v38 = vrot.slane %v9300_v51, 7 }
  0x61   :  { %7542 = vmatpush3.bf16.msra.mxu1 %v8831_v10  ;;  %v768_v10 = vrot.slane %v9237_v12, 1 }
  0x62   :  { %7670 = vmatpush3.bf16.msra.mxu0 %v8832_v13  ;;  %7543 = vmatprep.subr.bf16.mxu1 %v8833_v18  ;;  %v301_v13 = vrot.slane %v9250_v25, 7  ;;  %v9557_v25 = vsel %vm11361_vm0, %v772_v35, %v11345_v40 }
  0x63   :  { %7671 = vmatprep.subr.bf16.mxu0 %v8834_v19 }
  0x65   :  { %7544 = vmatpush3.bf16.msra.mxu1 %v8833_v18  ;;  %v9357_v18 = vpack.c.bf16 %v9340_v5, %v9325_v60 }
  0x66   :  { %7672 = vmatpush3.bf16.msra.mxu0 %v8834_v19  ;;  %7545 = vmatprep.subr.bf16.mxu1 %v8835_v21  ;;  %v9362_v19 = vld [vmem:[%s11331_s0 + $0x60] sm:$0xff] }
  0x67   :  { %7673 = vmatprep.subr.bf16.mxu0 %v8836_v22  ;;  %11515 = vst [vmem:[#allocation15_spill] sm:$0xff] %v9357_v18  ;;  %v9380_v33 = vpack.c.bf16 %v9362_v19, %v9349_v9 }
  0x69   :  { %7546 = vmatpush3.bf16.msra.mxu1 %v8835_v21  ;;  %v770_v21 = vrot.slane %v9256_v28, 1  ;;  %11516 = vst [vmem:[#allocation16_spill] sm:$0xff] %v9380_v33  ;;  %v9565_v28 = vsel %vm11361_vm0, %v771_v26, %v772_v35 }
  0x6a   :  { %7674 = vmatpush3.bf16.msra.mxu0 %v8836_v22  ;;  %7563 = vmatprep.subr.bf16.mxu1 %v8837_v27  ;;  %v1241_v22 = vpack.c.bf16 %v9349_v9, %v9340_v5 }
  0x6b   :  { %7691 = vmatprep.subr.bf16.mxu0 %v8838_v29 }
  0x6c   :  { %7548 = vmatmul.mubr.bf16.vlgmr.msra.gmra.mrb[0].mxu1 %v9261_v31 }
  0x6d   :  { %7676 = vmatmul.mubr.bf16.vlgmr.msra.gmra.mrb[0].mxu0 %v1237_v36  ;;  %7564 = vmatpush3.bf16.msra.mxu1 %v8837_v27  ;;  %v8847_v27 = vld [vmem:[#allocation2 + $0x28] sm:$0xff]   ;;  %v11346_v36 = vrot.slane %v9289_v46, 7 }
  0x6e   :  { %7692 = vmatpush3.bf16.msra.mxu0 %v8838_v29  ;;  %7565 = vmatprep.subr.bf16.mxu1 %v8839_v37  ;;  %v8848_v29 = vld [vmem:[#allocation2 + $0x168] sm:$0xff]  }
  0x6f   :  { %7693 = vmatprep.subr.bf16.mxu0 %v8840_v41  ;;  %7551 = vmatprep.mubr.bf16.mxu1 %v9279_v42 }
  0x70   :  { %7679 = vmatprep.mubr.bf16.mxu0 %v1238_v44  ;;  %v9399_v44 = vld [vmem:[%s11331_s0 + $0x70] sm:$0xff] }
  0x71   :  { %7566 = vmatpush3.bf16.msra.mxu1 %v8839_v37  ;;  %v1242_v37 = vpack.c.bf16 %v9370_v23, %v9362_v19 }
  0x72   :  { %7694 = vmatpush3.bf16.msra.mxu0 %v8840_v41  ;;  %7567 = vmatprep.subr.bf16.mxu1 %v8841_v50  ;;  %v8853_v41 = vld [vmem:[#allocation2 + $0x80] sm:$0xff]  }
  0x73   :  { %7695 = vmatprep.subr.bf16.mxu0 %v8842_v54 }
  0x74   :  { %7552 = vmatmul.mubr.bf16.gmra.mrb[4].mxu1 %v9318_v58 }
  0x75   :  { %7680 = vmatmul.mubr.bf16.gmra.mrb[4].mxu0 %v1239_v59  ;;  %7568 = vmatpush3.bf16.msra.mxu1 %v8841_v50  ;;  %v8849_v50 = vld [vmem:[#allocation2 + $0x30] sm:$0xff]   ;;  %v84_v59 = vadd.s32 72, %v9243_v20 }
  0x76   :  { %7696 = vmatpush3.bf16.msra.mxu0 %v8842_v54  ;;  %7569 = vmatprep.subr.bf16.mxu1 %v8843_v62  ;;  %v11347_v54 = vrot.slane %v9310_v55, 1 }
  0x77   :  { %7697 = vmatprep.subr.bf16.mxu0 %v8844_v0  ;;  %7555 = vmatprep.mubr.bf16.mxu1 %v456_v1  ;;  %v9414_v1 = vsel %vm11361_vm0, %v11337_v6, %v768_v10  ;;  %v9454_v6 = vand.u32 7, %v144_v2  ;;  %v9475_v2 = vsel %vm11376_vm1, %v300_v8, %v301_v13 }
  0x78   :  { %7683 = vmatprep.mubr.bf16.mxu0 %v1240_v4  ;;  %v9442_v4 = vsel %vm11361_vm0, %v768_v10, %v769_v15  ;;  %v83_v10 = vadd.s32 64, %v9243_v20  ;;  %v9634_v32 = vsel %vm11361_vm0, %v774_v43, %v11347_v54  ;;  %v89_v43 = vadd.s32 112, %v9243_v20 }
  0x79   :  { %7570 = vmatpush3.bf16.msra.mxu1 %v8843_v62  ;;  %v6465_v12 = vpack.c.bf16 %v9442_v4, %v9414_v1  ;;  %vm371_vm2 = vcmp.ge.s32.totalorder %v9454_v6, 1  ;;  %vm807_vm13 = vcmp.lt.s32.totalorder %v9454_v6, 7  ;;  %v8857_v62 = vld [vmem:[#allocation2 + $0x90] sm:$0xff]   ;;  %11536 = vst [vmem:[#allocation24_spill] sm:$0xff] %v9634_v32 }
  0x7a   :  { %7698 = vmatpush3.bf16.msra.mxu0 %v8844_v0  ;;  %7571 = vmatprep.subr.bf16.mxu1 %v8845_v7  ;;  %v8850_v0 = vld [vmem:[#allocation2 + $0x170] sm:$0xff]   ;;  %v193_v6 = vand.u32 63, %v89_v43 }
  0x7b   :  { %7699 = vmatprep.subr.bf16.mxu0 %v8846_v16 }
  0x7c   :  { %7556 = vmatmul.mubr.bf16.gmra.mrb[8].mxu1 %v9357_v18 }
  0x7d   :  { %7684 = vmatmul.mubr.bf16.gmra.mrb[8].mxu0 %v1241_v22  ;;  %7572 = vmatpush3.bf16.msra.mxu1 %v8845_v7  ;;  %v9430_v22 = vsel %vm11376_vm1, %v11338_v39, %v299_v3  ;;  %v8851_v39 = vld [vmem:[#allocation2 + $0x38] sm:$0xff]   ;;  %v11521_v7 = vmov 0 }
  0x7e   :  { %7700 = vmatpush3.bf16.msra.mxu0 %v8846_v16  ;;  %7573 = vmatprep.subr.bf16.mxu1 %v8847_v27  ;;  %v9422_v16 = vpack.c.bf16 %v9399_v44, %v9370_v23  ;;  %v6361_v49 = vpack.c.bf16 %v9430_v22, %v11339_v14  ;;  %v11522_v7 = vsel %vm9497_vm15, 4294967295, %v11521_v7  ;;  %v8854_v14 = vld [vmem:[#allocation2 + $0x180] sm:$0xff]  }
  0x7f   :  { %7701 = vmatprep.subr.bf16.mxu0 %v8848_v29  ;;  %7559 = vmatprep.mubr.bf16.mxu1 %v9380_v33  ;;  %11523 = vst [vmem:[#allocation19_spill] sm:$0xff] %v11522_v7  ;;  %v11545_v33 = vrot.slane %v9325_v60, 1 }
  0x80   :  { %7687 = vmatprep.mubr.bf16.mxu0 %v1242_v37  ;;  %11517 = vst [vmem:[#allocation17_spill] sm:$0xff] %v9422_v16  ;;  %v1243_v37 = vpack.c.bf16 %v9385_v34, %v9399_v44 }
  0x81   :  { %7574 = vmatpush3.bf16.msra.mxu1 %v8847_v27  ;;  %v9450_v27 = vand.u32 7, %v137_v63  ;;  %v8852_v63 = vld [vmem:[#allocation2 + $0x178] sm:$0xff]  }
  0x82   :  { %7702 = vmatpush3.bf16.msra.mxu0 %v8848_v29  ;;  %7575 = vmatprep.subr.bf16.mxu1 %v8849_v50  ;;  %v9464_v29 = vsel %vm11376_vm1, %v299_v3, %v300_v8  ;;  %v9507_v3 = vsel %vm11361_vm0, %v770_v21, %v771_v26  ;;  %v11526_v26 = vmov 0 }
  0x83   :  { %7703 = vmatprep.subr.bf16.mxu0 %v8850_v0  ;;  %vm11356_vm4 = vcmp.ge.s32.totalorder %v9450_v27, 1  ;;  %vm11357_vm5 = vcmp.lt.s32.totalorder %v9450_v27, 7  ;;  %v11527_v26 = vsel %vm9576_vm6, 4294967295, %v11526_v26 }
  0x84   :  { %7560 = vmatmul.mubr.bf16.gmra.mrb[12].mxu1 %v9422_v16  ;;  %11528 = vst [vmem:[#allocation20_spill] sm:$0xff] %v11527_v26  ;;  %vm9672_vm10 = vmpackc.low %vm371_vm2, %vm11356_vm4  ;;  %v11544_v16 = vrot.slane %v9340_v5, 1  ;;  %vm11566_vm2 = vcmp.lt.s32.totalorder %v9243_v20, 7 }
  0x85   :  { %7688 = vmatmul.mubr.bf16.gmra.mrb[12].mxu0 %v1243_v37  ;;  %7576 = vmatpush3.bf16.msra.mxu1 %v8849_v50  ;;  %v9515_v50 = vsel %vm11361_vm0, %v769_v15, %v770_v21  ;;  %v9523_v37 = vpack.c.bf16 %v9475_v2, %v9464_v29  ;;  %v9531_v15 = vsel %vm11376_vm1, %v302_v17, %v303_v24  ;;  %vm9697_vm11 = vmpackc.low %vm807_vm13, %vm11357_vm5  ;;  %vm11555_vm13 = vmmov 1  }
  0x86   :  { %7704 = vmatpush3.bf16.msra.mxu0 %v8850_v0  ;;  %7577 = vmatprep.subr.bf16.mxu1 %v8851_v39  ;;  %v158_v0 = vand.u32 63, %v84_v59  ;;  %v9539_v21 = vsel %vm11376_vm1, %v301_v13, %v302_v17  ;;  %v151_v59 = vand.u32 63, %v83_v10  ;;  %v85_v13 = vadd.s32 80, %v9243_v20 }
  0x87   :  { %7705 = vmatprep.subr.bf16.mxu0 %v8852_v63  ;;  %7579 = vmatprep.mubr.msk.bf16.mxu1 %vm9483_vm14, %v6361_v49  ;;  %v86_v17 = vadd.s32 88, %v9243_v20  ;;  %v6468_v10 = vpack.c.bf16 %v9507_v3, %v9515_v50  ;;  %v9585_v8 = vpack.c.bf16 %v9531_v15, %v9539_v21  ;;  %vm11582_vm14 = vcmp.lt.s32.totalorder %v9243_v20, 7  ;;  %v9025_v49 = vld [vmem:[#allocation2 + $0x660] sm:$0xff]  }
  0x88   :  { %7707 = vmatprep.mubr.msk.bf16.mxu0 %vm9497_vm15, %v6465_v12  ;;  %v8855_v12 = vld [vmem:[#allocation2 + $0x88] sm:$0xff]   ;;  %v9581_v35 = vand.u32 7, %v158_v0  ;;  %v9589_v53 = vand.u32 7, %v151_v59  ;;  %v9608_v0 = vsel %vm11376_vm1, %v304_v30, %v11346_v36  ;;  %v9616_v59 = vsel %vm11376_vm1, %v303_v24, %v304_v30  ;;  %v8858_v30 = vld [vmem:[#allocation2 + $0x190] sm:$0xff]  }
  0x89   :  { %7578 = vmatpush3.bf16.msra.mxu1 %v8851_v39  ;;  %v8856_v39 = vld [vmem:[#allocation2 + $0x188] sm:$0xff]   ;;  %11531 = vst [vmem:[#allocation21_spill] sm:$0xff] %v9608_v0  ;;  %11532 = vst [vmem:[#allocation22_spill] sm:$0xff] %v9616_v59  ;;  %v165_v47 = vand.u32 63, %v85_v13  ;;  %v172_v40 = vand.u32 63, %v86_v17  ;;  %v11533_v36 = vmov 0 }
  0x8a   :  { %7706 = vmatpush3.bf16.msra.mxu0 %v8852_v63  ;;  %7595 = vmatprep.subr.bf16.mxu1 %v8853_v41  ;;  %v6471_v63 = vpack.c.bf16 %v9557_v25, %v9565_v28  ;;  %v11534_v36 = vsel %vm9624_vm8, 4294967295, %v11533_v36  ;;  %v88_v24 = vadd.s32 104, %v9243_v20  ;;  %vm11362_vm9 = vcmp.ge.s32.totalorder %v9581_v35, 1  ;;  %v8859_v17 = vld [vmem:[#allocation2 + $0x98] sm:$0xff]  }
  0x8b   :  { %7723 = vmatprep.subr.bf16.mxu0 %v8854_v14  ;;  %11535 = vst [vmem:[#allocation23_spill] sm:$0xff] %v11534_v36  ;;  %v90_v13 = vadd.s32 120, %v9243_v20  ;;  %v358_v48 = vand.u32 7, %v165_v47  ;;  %v359_v7 = vand.u32 7, %v172_v40  ;;  %v11546_v40 = vmov %v11545_v33  ;;  %vm9719_vm5 = vmpackc.low %vm11362_vm9, %vm11555_vm13 }
  0x8c   :  { %7580 = vmatmul.mubr.msk.bf16.vlgmr.msra.gmra.mrb[0].mxu1 %vm9547_vm3, %v9523_v37  ;;  %v11547_v47 = vrot.slane %v9310_v55, 1  ;;  %v186_v18 = vand.u32 63, %v88_v24  ;;  %vm11367_vm12 = vcmp.lt.s32.totalorder %v9581_v35, 7  ;;  %vm808_vm4 = vcmp.lt.s32.totalorder %v9589_v53, 7 }
  0x8d   :  { %7708 = vmatmul.mubr.msk.bf16.vlgmr.msra.gmra.mrb[0].mxu0 %vm9576_vm6, %v6468_v10  ;;  %7596 = vmatpush3.bf16.msra.mxu1 %v8853_v41  ;;  %v9652_v41 = vpack.c.bf16 %v9608_v0, %v9616_v59  ;;  %v11538_v10 = vrot.slane %v9310_v55, 7  ;;  %v11552_v24 = vrot.slane %v9340_v5, 7  ;;  %v11556_v0 = vmov 0  ;;  %vm9739_vm9 = vmpackc.low %vm11367_vm12, %vm808_vm4 }
  0x8e   :  { %7724 = vmatpush3.bf16.msra.mxu0 %v8854_v14  ;;  %7597 = vmatprep.subr.bf16.mxu1 %v8855_v12  ;;  %v6474_v14 = vpack.c.bf16 %v9634_v32, %v9642_v57  ;;  %v8860_v32 = vld [vmem:[#allocation2 + $0x198] sm:$0xff]   ;;  %v11557_v0 = vsel %vm9719_vm5, 4294967295, %v11556_v0  ;;  %v361_v59 = vand.u32 7, %v186_v18 }
  0x8f   :  { %7725 = vmatprep.subr.bf16.mxu0 %v8856_v39  ;;  %7583 = vmatprep.mubr.msk.bf16.mxu1 %vm9598_vm7, %v9585_v8  ;;  %v9666_v54 = vsel %vm11376_vm1, %v11539_v38, %v11538_v10  ;;  %v9682_v10 = vsel %vm11361_vm0, %v11545_v33, %v11544_v16  ;;  %v179_v38 = vand.u32 63, %v87_v61  ;;  %v11548_v33 = vmov 0  ;;  %11558 = vst [vmem:[#allocation29_spill] sm:$0xff] %v11557_v0 }
  0x90   :  { %7711 = vmatprep.mubr.msk.bf16.mxu0 %vm9624_vm8, %v6471_v63  ;;  %11540 = vst [vmem:[#allocation25_spill] sm:$0xff] %v9666_v54  ;;  %v11541_v63 = vmov 0  ;;  %v11549_v33 = vsel %vm9697_vm11, 4294967295, %v11548_v33  ;;  %v11551_v16 = vmov 0.0   ;;  %v11578_v0 = vmov 0 }
  0x91   :  { %7598 = vmatpush3.bf16.msra.mxu1 %v8855_v12  ;;  %v11542_v63 = vsel %vm9672_vm10, 4294967295, %v11541_v63  ;;  %v9690_v12 = vsel %vm11361_vm0, %v11547_v47, %v11546_v40  ;;  %11550 = vst [vmem:[#allocation27_spill] sm:$0xff] %v11549_v33  ;;  %v6373_v61 = vpack.c.bf16 %v9666_v54, %v11551_v16  ;;  %v200_v47 = vand.u32 63, %v90_v13  ;;  %v8861_v13 = vld [vmem:[#allocation2 + $0xa0] sm:$0xff]   ;;  %vm11569_vm0 = vmmov %vm11566_vm2 }
  0x92   :  { %11543 = vst [vmem:[#allocation26_spill] sm:$0xff] %v11542_v63  ;;  %7726 = vmatpush3.bf16.msra.mxu0 %v8856_v39  ;;  %7599 = vmatprep.subr.bf16.mxu1 %v8857_v62  ;;  %v11553_v39 = vrot.slane %v9325_v60, 7  ;;  %v6477_v54 = vpack.c.bf16 %v9682_v10, %v9690_v12  ;;  %v8862_v63 = vld [vmem:[#allocation2 + $0x1a0] sm:$0xff]   ;;  %v360_v42 = vand.u32 7, %v179_v38  ;;  %v11570_v38 = vrot.slane %v9362_v19, 7 }
  0x93   :  { %7727 = vmatprep.subr.bf16.mxu0 %v8858_v30 }
  0x94   :  { %v9711_v40 = vsel %vm11376_vm1, %v11553_v39, %v11552_v24  ;;  %7584 = vmatmul.mubr.msk.bf16.gmra.mrb[4].mxu1 %vm9672_vm10, %v9652_v41  ;;  %v11559_v58 = vmov %v11553_v39  ;;  %v11560_v24 = vrot.slane %v9310_v55, 7  ;;  %v11561_v39 = vmov 0 }
  0x95   :  { %11554 = vst [vmem:[#allocation28_spill] sm:$0xff] %v9711_v40  ;;  %7712 = vmatmul.mubr.msk.bf16.gmra.mrb[4].mxu0 %vm9697_vm11, %v6474_v14  ;;  %7600 = vmatpush3.bf16.msra.mxu1 %v8857_v62  ;;  %v11562_v39 = vsel %vm9739_vm9, 4294967295, %v11561_v39  ;;  %v11564_v55 = vrot.slane %v9362_v19, 1  ;;  %v11568_v62 = vrot.slane %v9340_v5, 1  ;;  %vm376_vm4 = vcmp.ge.s32.totalorder %v360_v42, 1 }
  0x96   :  { %v9731_v43 = vsel %vm11376_vm1, %v11560_v24, %v11559_v58  ;;  %11563 = vst [vmem:[#allocation30_spill] sm:$0xff] %v11562_v39  ;;  %v11565_v58 = vrot.slane %v9349_v9, 1  ;;  %7728 = vmatpush3.bf16.msra.mxu0 %v8858_v30  ;;  %7601 = vmatprep.subr.bf16.mxu1 %v8859_v17  ;;  %v8863_v30 = vld [vmem:[#allocation2 + $0xa8] sm:$0xff]   ;;  %vm812_vm15 = vcmp.lt.s32.totalorder %v360_v42, 7  ;;  %vm11593_vm10 = vcmp.lt.s32.totalorder %v9302_v52, 7 }
  0x97   :  { %7729 = vmatprep.subr.bf16.mxu0 %v8860_v32  ;;  %7587 = vmatprep.mubr.msk.bf16.mxu1 %vm9719_vm5, %v6373_v61  ;;  %v8864_v39 = vld [vmem:[#allocation2 + $0x1a8] sm:$0xff]   ;;  %vm377_vm5 = vcmp.ge.s32.totalorder %v361_v59, 1  ;;  %vm11597_vm11 = vcmp.ge.s32.totalorder %v9284_v45, 1  ;;  %v11607_v45 = vrot.slane %v9370_v23, 7 }
  0x98   :  { %v9749_v60 = vsel %vm11566_vm2, %v11565_v58, %v11564_v55  ;;  %v11567_v24 = vmov %v11565_v58  ;;  %v9761_v55 = vand.u32 7, %v193_v6  ;;  %v363_v58 = vand.u32 7, %v200_v47  ;;  %7715 = vmatprep.mubr.msk.bf16.mxu0 %vm9739_vm9, %v6477_v54 }
  0x99   :  { %v9757_v14 = vsel %vm11569_vm0, %v11568_v62, %v11567_v24  ;;  %v9767_v24 = vpack.c.bf16 %v9711_v40, %v9731_v43  ;;  %v11571_v62 = vrot.slane %v9349_v9, 7  ;;  %v11574_v54 = vrot.slane %v9340_v5, 7  ;;  %7602 = vmatpush3.bf16.msra.mxu1 %v8859_v17 }
  0x9a   :  { %v6480_v18 = vpack.c.bf16 %v9749_v60, %v9757_v14  ;;  %vm11576_vm0 = vcmp.ge.s32.totalorder %v358_v48, 1  ;;  %vm11577_vm2 = vcmp.ge.s32.totalorder %v359_v7, 1  ;;  %v11581_v9 = vrot.slane %v9370_v23, 1  ;;  %7730 = vmatpush3.bf16.msra.mxu0 %v8860_v32  ;;  %7603 = vmatprep.subr.bf16.mxu1 %v8861_v13  ;;  %v8865_v32 = vld [vmem:[#allocation2 + $0xb0] sm:$0xff]  }
  0x9b   :  { %v9777_v61 = vsel %vm11376_vm1, %v11571_v62, %v11570_v38  ;;  %v11573_v6 = vmov %v11571_v62  ;;  %vm9789_vm12 = vmpackc.low %vm11577_vm2, %vm11576_vm0  ;;  %v11580_v38 = vrot.slane %v9399_v44, 1  ;;  %v11584_v17 = vrot.slane %v9362_v19, 1  ;;  %7731 = vmatprep.subr.bf16.mxu0 %v8862_v63 }
  0x9c   :  { %11572 = vst [vmem:[#allocation31_spill] sm:$0xff] %v9777_v61  ;;  %v9785_v47 = vsel %vm11376_vm1, %v11574_v54, %v11573_v6  ;;  %v11579_v0 = vsel %vm9789_vm12, 4294967295, %v11578_v0  ;;  %v11583_v62 = vmov %v11581_v9  ;;  %vm11585_vm0 = vmmov %vm11582_vm14  ;;  %vm11586_vm2 = vcmp.lt.s32.totalorder %v358_v48, 7  ;;  %7588 = vmatmul.mubr.msk.bf16.gmra.mrb[8].mxu1 %vm9789_vm12, %v9767_v24 }
  0x9d   :  { %11575 = vst [vmem:[#allocation32_spill] sm:$0xff] %v9785_v47  ;;  %v9799_v5 = vsel %vm11582_vm14, %v11581_v9, %v11580_v38  ;;  %v9807_v6 = vsel %vm11585_vm0, %v11584_v17, %v11583_v62  ;;  %vm11587_vm1 = vcmp.lt.s32.totalorder %v359_v7, 7  ;;  %v11588_v54 = vmov 0  ;;  %vm9823_vm0 = vmpackc.low %vm377_vm5, %vm376_vm4  ;;  %7604 = vmatpush3.bf16.msra.mxu1 %v8861_v13  ;;  %v9030_v7 = vld [vmem:[#allocation2 + $0x688] sm:$0xff]  }
  0x9e   :  { %vm9811_vm9 = vmpackc.low %vm11587_vm1, %vm11586_vm2  ;;  %v9817_v38 = vpack.c.bf16 %v9777_v61, %v9785_v47  ;;  %v6483_v48 = vpack.c.bf16 %v9799_v5, %v9807_v6  ;;  %v11594_v9 = vmov 0  ;;  %vm11598_vm5 = vcmp.ge.s32.totalorder %v9302_v52, 1  ;;  %7732 = vmatpush3.bf16.msra.mxu0 %v8862_v63  ;;  %7605 = vmatprep.subr.bf16.mxu1 %v8863_v30 }
  0x9f   :  { %v11589_v54 = vsel %vm9811_vm9, 4294967295, %v11588_v54  ;;  %vm9833_vm14 = vmpackc.low %vm11593_vm10, %vm11555_vm13  ;;  %v11599_v62 = vmov 0  ;;  %7716 = vmatmul.mubr.msk.bf16.gmra.mrb[8].mxu0 %vm9811_vm9, %v6480_v18  ;;  %vm11602_vm2 = vcmp.lt.s32.totalorder %v361_v59, 7  ;;  %v11603_v17 = vmov 0  ;;  %7733 = vmatprep.subr.bf16.mxu0 %v8864_v39 }
  0xa0   :  { %11590 = vst [vmem:[#allocation33_spill] sm:$0xff] %v11589_v54  ;;  %v11595_v9 = vsel %vm9833_vm14, 4294967295, %v11594_v9  ;;  %vm9841_vm4 = vmpackc.low %vm11598_vm5, %vm11597_vm11  ;;  %v11606_v61 = vrot.slane %v9399_v44, 7  ;;  %vm11608_vm10 = vcmp.lt.s32.totalorder %v9243_v20, 1  ;;  %v11609_v47 = vmov %v11607_v45  ;;  %7591 = vmatprep.mubr.msk.bf16.mxu1 %vm9823_vm0, %v9817_v38 }
  0xa1   :  { %11596 = vst [vmem:[#allocation34_spill] sm:$0xff] %v11595_v9  ;;  %v11600_v62 = vsel %vm9841_vm4, 4294967295, %v11599_v62  ;;  %vm9849_vm1 = vmpackc.low %vm11602_vm2, %vm812_vm15  ;;  %v11610_v40 = vrot.slane %v9362_v19, 7  ;;  %vm11612_vm15 = vcmp.ge.s32.totalorder %v9761_v55, 1  ;;  %vm11613_vm2 = vcmp.ge.s32.totalorder %v363_v58, 1  ;;  %7606 = vmatpush3.bf16.msra.mxu1 %v8863_v30  ;;  %v8870_v30 = vld [vmem:[#allocation2 + $0x1c0] sm:$0xff]  }
  0xa2   :  { %11601 = vst [vmem:[#allocation35_spill] sm:$0xff] %v11600_v62  ;;  %v11604_v17 = vsel %vm9849_vm1, 4294967295, %v11603_v17  ;;  %v9859_v52 = vsel %vm11608_vm10, %v11607_v45, %v11606_v61  ;;  %vm11611_vm11 = vmmov %vm11608_vm10  ;;  %v11614_v59 = vmov 0  ;;  %v11617_v13 = vrot.slane %v9385_v34, 1  ;;  %7719 = vmatprep.mubr.msk.bf16.mxu0 %vm9849_vm1, %v6483_v48  ;;  %v8867_v45 = vld [vmem:[#allocation2 + $0xb8] sm:$0xff]   ;;  %7734 = vmatpush3.bf16.msra.mxu0 %v8864_v39  ;;  %v8869_v48 = vld [vmem:[#allocation2 + $0xc0] sm:$0xff]  }
  0xa3   :  { %11605 = vst [vmem:[#allocation36_spill] sm:$0xff] %v11604_v17  ;;  %v9867_v42 = vsel %vm11611_vm11, %v11610_v40, %v11609_v47  ;;  %vm9872_vm5 = vmpackc.low %vm11613_vm2, %vm11612_vm15  ;;  %v11618_v18 = vrot.slane %v9399_v44, 1  ;;  %vm11619_vm10 = vcmp.lt.s32.totalorder %v9243_v20, 7  ;;  %v11620_v23 = vrot.slane %v9232_v11, 1  ;;  %v8866_v47 = vld [vmem:[#allocation2 + $0x1b0] sm:$0xff]   ;;  %7607 = vmatprep.subr.bf16.mxu1 %v8865_v32 }
  0xa4   :  { %v11615_v59 = vsel %vm9872_vm5, 4294967295, %v11614_v59  ;;  %v11621_v63 = vmov %v11617_v13  ;;  %vm11622_vm11 = vmmov %vm11619_vm10  ;;  %vm11623_vm15 = vcmp.lt.s32.totalorder %v9761_v55, 7  ;;  %vm11624_vm2 = vcmp.lt.s32.totalorder %v363_v58, 7  ;;  %7735 = vmatprep.subr.bf16.mxu0 %v8866_v47 }
  0xa5   :  { %11616 = vst [vmem:[#allocation37_spill] sm:$0xff] %v11615_v59  ;;  %v9882_v19 = vsel %vm11619_vm10, %v11618_v18, %v11617_v13  ;;  %v9890_v40 = vsel %vm11622_vm11, %v11621_v63, %v11620_v23  ;;  %vm9898_vm12 = vmpackc.low %vm11624_vm2, %vm11623_vm15  ;;  %v11625_v61 = vmov 0  ;;  %v9906_v11 = vpack.c.bf16 %v9859_v52, %v9867_v42  ;;  %v8868_v18 = vld [vmem:[#allocation2 + $0x1b8] sm:$0xff]   ;;  %7608 = vmatpush3.bf16.msra.mxu1 %v8865_v32  ;;  %v8872_v23 = vld [vmem:[#allocation2 + $0x1c8] sm:$0xff]  }
  0xa6   :  { %v11626_v61 = vsel %vm9898_vm12, 4294967295, %v11625_v61  ;;  %v6486_v13 = vpack.c.bf16 %v9890_v40, %v9882_v19  ;;  %v6393_v58 = vpack.c.bf16 %v9414_v1, %v11551_v16  ;;  %7736 = vmatpush3.bf16.msra.mxu0 %v8866_v47  ;;  %7609 = vmatprep.subr.bf16.mxu1 %v8867_v45  ;;  %v9922_v39 = vpack.c.bf16 %v9515_v50, %v9442_v4  ;;  %v8871_v1 = vld [vmem:[#allocation2 + $0xc8] sm:$0xff]   ;;  %v8873_v50 = vld [vmem:[#allocation2 + $0xd0] sm:$0xff]  }
  0xa7   :  { %11627 = vst [vmem:[#allocation38_spill] sm:$0xff] %v11626_v61  ;;  %7592 = vmatmul.mubr.msk.bf16.gmra.mrb[12].mxu1 %vm9872_vm5, %v9906_v11  ;;  %7737 = vmatprep.subr.bf16.mxu0 %v8868_v18  ;;  %vm11628_vm11 = vcmp.ge.s32.totalorder %v9450_v27, 1  ;;  %v11629_v32 = vmov 0  ;;  %v9936_v4 = vpack.c.bf16 %v9565_v28, %v9507_v3  ;;  %vm11632_vm2 = vcmp.lt.s32.totalorder %v9581_v35, 7  ;;  %v8874_v3 = vld [vmem:[#allocation2 + $0x1d0] sm:$0xff]  }
  0xa8   :  { %7720 = vmatmul.mubr.msk.bf16.gmra.mrb[12].mxu0 %vm9898_vm12, %v6486_v13  ;;  %7611 = vmatprep.mubr.msk.bf16.mxu1 %vm9833_vm14, %v6393_v58  ;;  %vm9930_vm15 = vmpackc.low %vm11555_vm13, %vm11628_vm11  ;;  %vm11636_vm11 = vcmp.ge.s32.totalorder %v9589_v53, 1  ;;  %vm11637_vm14 = vcmp.ge.s32.totalorder %v9581_v35, 1  ;;  %v11638_v63 = vmov 0  ;;  %v11641_v28 = vrot.slane %v9300_v51, 7  ;;  %v8875_v51 = vld [vmem:[#allocation2 + $0xd8] sm:$0xff]   ;;  %v8880_v13 = vld [vmem:[#allocation2 + $0x1e8] sm:$0xff]  }
  0xa9   :  { %7739 = vmatprep.mubr.msk.bf16.mxu0 %vm9841_vm4, %v9523_v37  ;;  %7610 = vmatpush3.bf16.msra.mxu1 %v8867_v45  ;;  %v11630_v32 = vsel %vm9930_vm15, 4294967295, %v11629_v32  ;;  %vm9944_vm10 = vmpackc.low %vm11632_vm2, %vm11555_vm13  ;;  %v11633_v37 = vmov 0  ;;  %v11642_v47 = vrot.slane %v9289_v46, 7  ;;  %vm11643_vm2 = vcmp.lt.s32.totalorder %v9243_v20, 1  ;;  %v8876_v35 = vld [vmem:[#allocation2 + $0x1d8] sm:$0xff]  }
  0xaa   :  { %7738 = vmatpush3.bf16.msra.mxu0 %v8868_v18  ;;  %7627 = vmatprep.subr.bf16.mxu1 %v8869_v48  ;;  %11631 = vst [vmem:[#allocation39_spill] sm:$0xff] %v11630_v32  ;;  %v11634_v37 = vsel %vm9944_vm10, 4294967295, %v11633_v37  ;;  %vm9952_vm5 = vmpackc.low %vm11637_vm14, %vm11636_vm11  ;;  %v6405_v45 = vpack.c.bf16 %v9690_v12, %v11551_v16  ;;  %vm11644_vm14 = vnez %v11549_v33  ;;  %v8879_v12 = vld [vmem:[#allocation2 + $0xe8] sm:$0xff]   ;;  %vm11645_vm11 = vcmp.ge.s32.totalorder %v9761_v55, 1 }
  0xab   :  { %7755 = vmatprep.subr.bf16.mxu0 %v8870_v30  ;;  %11635 = vst [vmem:[#allocation40_spill] sm:$0xff] %v11634_v37  ;;  %v11639_v63 = vsel %vm9952_vm5, 4294967295, %v11638_v63  ;;  %v9965_v53 = vsel %vm11643_vm2, %v11642_v47, %v11641_v28  ;;  %vm9998_vm2 = vmpackc.low %vm11555_vm13, %vm11645_vm11  ;;  %v11646_v18 = vmov 0  ;;  %v11650_v58 = vrot.slane %v9385_v34, 7  ;;  %v8883_v34 = vld [vmem:[#allocation2 + $0xf8] sm:$0xff]   ;;  %v11657_v28 = vld [vmem:[#allocation25_spill] sm:$0xff] }
  0xac   :  { %11640 = vst [vmem:[#allocation41_spill] sm:$0xff] %v11639_v63  ;;  %v6506_v46 = vpack.c.bf16 %v11551_v16, %v9965_v53  ;;  %v11647_v18 = vsel %vm9998_vm2, 4294967295, %v11646_v18  ;;  %vm11652_vm11 = vcmp.lt.s32.totalorder %v9243_v20, 1  ;;  %v6437_v47 = vpack.c.bf16 %v9731_v43, %v11657_v28 }
  0xad   :  { %11648 = vst [vmem:[#allocation42_spill] sm:$0xff] %v11647_v18 }
  0xaf   :  { %7612 = vmatmul.mubr.msk.bf16.vlgmr.msra.gmra.mrb[0].mxu1 %vm9576_vm6, %v9922_v39 }
  0xb0   :  { %7740 = vmatmul.mubr.msk.bf16.vlgmr.msra.gmra.mrb[0].mxu0 %vm9547_vm3, %v9585_v8  ;;  %7628 = vmatpush3.bf16.msra.mxu1 %v8869_v48  ;;  %v9975_v8 = vpack.c.bf16 %v9642_v57, %v9557_v25  ;;  %v8878_v25 = vld [vmem:[#allocation2 + $0x1e0] sm:$0xff]   ;;  %v9993_v57 = vpack.c.bf16 %v9757_v14, %v9682_v10  ;;  %v8881_v10 = vld [vmem:[#allocation2 + $0xf0] sm:$0xff]   ;;  %v11651_v48 = vrot.slane %v9399_v44, 7 }
  0xb1   :  { %7756 = vmatpush3.bf16.msra.mxu0 %v8870_v30  ;;  %7629 = vmatprep.subr.bf16.mxu1 %v8871_v1  ;;  %v8882_v14 = vld [vmem:[#allocation2 + $0x1f0] sm:$0xff]   ;;  %v6425_v30 = vpack.c.bf16 %v9464_v29, %v9430_v22  ;;  %v8886_v22 = vld [vmem:[#allocation2 + $0x208] sm:$0xff]  }
  0xb2   :  { %7757 = vmatprep.subr.bf16.mxu0 %v8872_v23  ;;  %7615 = vmatprep.mubr.msk.bf16.mxu1 %vm9624_vm8, %v9936_v4  ;;  %v11653_v29 = vld [vmem:[#allocation22_spill] sm:$0xff] }
  0xb3   :  { %7743 = vmatprep.mubr.msk.bf16.mxu0 %vm9598_vm7, %v9652_v41  ;;  %v8877_v41 = vld [vmem:[#allocation2 + $0xe0] sm:$0xff]  }
  0xb4   :  { %7630 = vmatpush3.bf16.msra.mxu1 %v8871_v1  ;;  %v11654_v1 = vld [vmem:[#allocation13_spill] sm:$0xff] }
  0xb5   :  { %7758 = vmatpush3.bf16.msra.mxu0 %v8872_v23  ;;  %7631 = vmatprep.subr.bf16.mxu1 %v8873_v50  ;;  %v8887_v23 = vld [vmem:[#allocation2 + $0x210] sm:$0xff]  }
  0xb6   :  { %7759 = vmatprep.subr.bf16.mxu0 %v8874_v3 }
  0xb7   :  { %7616 = vmatmul.mubr.msk.bf16.gmra.mrb[4].mxu1 %vm11644_vm14, %v9975_v8 }
  0xb8   :  { %7744 = vmatmul.mubr.msk.bf16.gmra.mrb[4].mxu0 %vm9930_vm15, %v6506_v46  ;;  %7632 = vmatpush3.bf16.msra.mxu1 %v8873_v50  ;;  %vm11649_vm15 = vnez %v11579_v0  ;;  %v11660_v46 = vld [vmem:[#allocation15_spill] sm:$0xff] }
  0xb9   :  { %7760 = vmatpush3.bf16.msra.mxu0 %v8874_v3  ;;  %7633 = vmatprep.subr.bf16.mxu1 %v8875_v51  ;;  %v8888_v3 = vld [vmem:[#allocation2 + $0x218] sm:$0xff]   ;;  %v9029_v0 = vld [vmem:[#allocation2 + $0x680] sm:$0xff]  }
  0xba   :  { %7761 = vmatprep.subr.bf16.mxu0 %v8876_v35  ;;  %7619 = vmatprep.mubr.msk.bf16.mxu1 %vm9944_vm10, %v6405_v45  ;;  %v11662_v45 = vld [vmem:[#allocation32_spill] sm:$0xff] }
  0xbb   :  { %7747 = vmatprep.mubr.msk.bf16.mxu0 %vm9952_vm5, %v9767_v24  ;;  %v10004_v24 = vpack.c.bf16 %v9807_v6, %v9749_v60  ;;  %v10018_v60 = vsel %vm11652_vm11, %v11651_v48, %v11650_v58  ;;  %v10028_v6 = vpack.c.bf16 %v9882_v19, %v9799_v5  ;;  %v8885_v5 = vld [vmem:[#allocation2 + $0x200] sm:$0xff]   ;;  %v6428_v19 = vpack.c.bf16 %v9539_v21, %v9475_v2  ;;  %v11655_v2 = vld [vmem:[#allocation14_spill] sm:$0xff] }
  0xbc   :  { %7634 = vmatpush3.bf16.msra.mxu1 %v8875_v51  ;;  %v6518_v44 = vpack.c.bf16 %v11551_v16, %v10018_v60  ;;  %v11658_v51 = vld [vmem:[#allocation26_spill] sm:$0xff]  ;;  %v6446_v58 = vpack.c.bf16 %v10018_v60, %v9859_v52  ;;  %v11670_v52 = vmov 0  ;;  %v11673_v60 = vld [vmem:[#allocation24_spill] sm:$0xff] }
  0xbd   :  { %7762 = vmatpush3.bf16.msra.mxu0 %v8876_v35  ;;  %7635 = vmatprep.subr.bf16.mxu1 %v8877_v41  ;;  %vm11659_vm11 = vnez %v11658_v51  ;;  %v11661_v35 = vld [vmem:[#allocation28_spill] sm:$0xff] }
  0xbe   :  { %7763 = vmatprep.subr.bf16.mxu0 %v8878_v25 }
  0xbf   :  { %7620 = vmatmul.mubr.msk.bf16.gmra.mrb[8].mxu1 %vm9811_vm9, %v9993_v57 }
  0xc0   :  { %7748 = vmatmul.mubr.msk.bf16.gmra.mrb[8].mxu0 %vm11649_vm15, %v9817_v38  ;;  %7636 = vmatpush3.bf16.msra.mxu1 %v8877_v41  ;;  %v8884_v38 = vld [vmem:[#allocation2 + $0x1f8] sm:$0xff]   ;;  %v6440_v41 = vpack.c.bf16 %v11662_v45, %v11661_v35 }
  0xc1   :  { %7764 = vmatpush3.bf16.msra.mxu0 %v8878_v25  ;;  %7637 = vmatprep.subr.bf16.mxu1 %v8879_v12  ;;  %v8890_v25 = vld [vmem:[#allocation2 + $0x228] sm:$0xff]  }
  0xc2   :  { %7765 = vmatprep.subr.bf16.mxu0 %v8880_v13  ;;  %7623 = vmatprep.mubr.msk.bf16.mxu1 %vm9849_vm1, %v10004_v24 }
  0xc3   :  { %7751 = vmatprep.mubr.msk.bf16.mxu0 %vm9823_vm0, %v9906_v11  ;;  %v6431_v11 = vpack.c.bf16 %v11653_v29, %v9531_v15  ;;  %v9045_v15 = vld [vmem:[%s11331_s0 + $0x38] sm:$0xff] }
  0xc4   :  { %7638 = vmatpush3.bf16.msra.mxu1 %v8879_v12  ;;  %v1877_v50 = vpack.c.bf16 %v11551_v16, %v9045_v15  ;;  %v11663_v12 = vld [vmem:[#allocation31_spill] sm:$0xff] }
  0xc5   :  { %7766 = vmatpush3.bf16.msra.mxu0 %v8880_v13  ;;  %7639 = vmatprep.subr.bf16.mxu1 %v8881_v10  ;;  %v6443_v43 = vpack.c.bf16 %v9867_v42, %v11663_v12  ;;  %v11664_v13 = vld [vmem:[#allocation16_spill] sm:$0xff]  ;;  %v9046_v42 = vld [vmem:[%s11331_s0 + $0x78] sm:$0xff] }
  0xc6   :  { %7767 = vmatprep.subr.bf16.mxu0 %v8882_v14  ;;  %v1881_v48 = vpack.c.bf16 %v11551_v16, %v9046_v42 }
  0xc7   :  { %7624 = vmatmul.mubr.msk.bf16.gmra.mrb[12].mxu1 %vm9898_vm12, %v10028_v6 }
  0xc8   :  { %7752 = vmatmul.mubr.msk.bf16.gmra.mrb[12].mxu0 %vm9998_vm2, %v6518_v44  ;;  %7640 = vmatpush3.bf16.msra.mxu1 %v8881_v10  ;;  %v8891_v10 = vld [vmem:[#allocation2 + $0x230] sm:$0xff]   ;;  %vm11666_vm2 = vnez %v11615_v59  ;;  %v11667_v44 = vld [vmem:[#allocation19_spill] sm:$0xff] }
  0xc9   :  { %7768 = vmatpush3.bf16.msra.mxu0 %v8882_v14  ;;  %7641 = vmatprep.subr.bf16.mxu1 %v8883_v34  ;;  %v11665_v14 = vld [vmem:[#allocation17_spill] sm:$0xff]  ;;  %v11735_v59 = vld [vmem:[#allocation18_spill] sm:$0xff] }
  0xca   :  { %7769 = vmatprep.subr.bf16.mxu0 %v8884_v38  ;;  %7643 = vmatprep.mubr.msk.bf16.mxu1 %vm9841_vm4, %v6425_v30  ;;  %vm11669_vm4 = vcmp.lt.s32.totalorder %v9450_v27, 7  ;;  %v11674_v27 = vld [vmem:[#allocation30_spill] sm:$0xff]  ;;  %v8897_v30 = vld [vmem:[#allocation2 + $0x2a0] sm:$0xff]  }
  0xcb   :  { %7771 = vmatprep.mubr.bf16.mxu0 %v9261_v31  ;;  %v11656_v31 = vld [vmem:[#allocation21_spill] sm:$0xff]  ;;  %vm10089_vm12 = vmpackc.low %vm11555_vm13, %vm11669_vm4  ;;  %vm11675_vm4 = vnez %v11674_v27 }
  0xcc   :  { %7642 = vmatpush3.bf16.msra.mxu1 %v8883_v34  ;;  %v6434_v21 = vpack.c.bf16 %v9965_v53, %v11656_v31  ;;  %v8889_v53 = vld [vmem:[#allocation2 + $0x220] sm:$0xff]   ;;  %v8892_v34 = vld [vmem:[#allocation2 + $0x238] sm:$0xff]   ;;  %v11671_v52 = vsel %vm10089_vm12, 4294967295, %v11670_v52 }
  0xcd   :  { %7770 = vmatpush3.bf16.msra.mxu0 %v8884_v38  ;;  %11672 = vst [vmem:[#allocation22_spill] sm:$0xff] %v11671_v52  ;;  %v11677_v38 = vmov 0 }
  0xce   :  { %7787 = vmatprep.subr.bf16.mxu0 %v8885_v5 }
  0xcf   :  { %7644 = vmatmul.mubr.msk.bf16.vlgmr.msra.gmra.mrb[0].mxu1 %vm9547_vm3, %v6428_v19  ;;  %v10123_v19 = vld [vmem:[#allocation2 + $0x240] sm:$0xff]  }
  0xd0   :  { %7772 = vmatmul.mubr.bf16.vlgmr.msra.gmra.mrb[0].mxu0 %v11654_v1  ;;  %7647 = vmatprep.mubr.msk.bf16.mxu1 %vm9598_vm7, %v6431_v11 }
  0xd1   :  { %7788 = vmatpush3.bf16.msra.mxu0 %v8885_v5  ;;  %7775 = vmatprep.mubr.bf16.mxu0 %v11655_v2  ;;  %v8900_v5 = vld [vmem:[#allocation2 + $0x2b8] sm:$0xff]  }
  0xd2   :  { %7789 = vmatprep.subr.bf16.mxu0 %v8886_v22 }
  0xd5   :  { %7790 = vmatpush3.bf16.msra.mxu0 %v8886_v22 }
  0xd6   :  { %7791 = vmatprep.subr.bf16.mxu0 %v8887_v23 }
  0xd7   :  { %7648 = vmatmul.mubr.msk.bf16.gmra.mrb[4].mxu1 %vm11659_vm11, %v6434_v21 }
  0xd8   :  { %7776 = vmatmul.mubr.bf16.gmra.mrb[4].mxu0 %v1877_v50  ;;  %7651 = vmatprep.mubr.msk.bf16.mxu1 %vm9952_vm5, %v6437_v47  ;;  %vm11668_vm5 = vnez %v11667_v44 }
  0xd9   :  { %7792 = vmatpush3.bf16.msra.mxu0 %v8887_v23  ;;  %7779 = vmatprep.mubr.bf16.mxu0 %v11660_v46 }
  0xda   :  { %7793 = vmatprep.subr.bf16.mxu0 %v8888_v3 }
  0xdd   :  { %7794 = vmatpush3.bf16.msra.mxu0 %v8888_v3 }
  0xde   :  { %7795 = vmatprep.subr.bf16.mxu0 %v8889_v53 }
  0xdf   :  { %7652 = vmatmul.mubr.msk.bf16.gmra.mrb[8].mxu1 %vm11649_vm15, %v6440_v41  ;;  %v10142_v41 = vld [vmem:[#allocation4] ss:$0 sm:$0xff] }
  0xe0   :  { %7780 = vmatmul.mubr.bf16.gmra.mrb[8].mxu0 %v11664_v13  ;;  %7655 = vmatprep.mubr.msk.bf16.mxu1 %vm9823_vm0, %v6443_v43 }
  0xe1   :  { %7796 = vmatpush3.bf16.msra.mxu0 %v8889_v53  ;;  %7783 = vmatprep.mubr.bf16.mxu0 %v11665_v14 }
  0xe2   :  { %7797 = vmatprep.subr.bf16.mxu0 %v8890_v25 }
  0xe5   :  { %7798 = vmatpush3.bf16.msra.mxu0 %v8890_v25 }
  0xe6   :  { %7799 = vmatprep.subr.bf16.mxu0 %v8891_v10 }
  0xe7   :  { %7656 = vmatmul.mubr.msk.bf16.gmra.mrb[12].mxu1 %vm11666_vm2, %v6446_v58 }
  0xe8   :  { %7784 = vmatmul.mubr.bf16.gmra.mrb[12].mxu0 %v1881_v48 }
  0xe9   :  { %7800 = vmatpush3.bf16.msra.mxu0 %v8891_v10  ;;  %7803 = vmatprep.mubr.msk.bf16.mxu0 %vm11668_vm5, %v9922_v39  ;;  %v6546_v39 = vpack.c.bf16 %v11551_v16, %v11673_v60  ;;  %vm11676_vm5 = vcmp.lt.s32.totalorder %v9761_v55, 7  ;;  %v8893_v55 = vld [vmem:[#allocation2 + $0x280] sm:$0xff]  }
  0xea   :  { %7801 = vmatprep.subr.bf16.mxu0 %v8892_v34  ;;  %vm10109_vm10 = vmpackc.low %vm11555_vm13, %vm11676_vm5  ;;  %7819 = vmatprep.subr.bf16.mxu1 %v8893_v55  ;;  %vm11684_vm13 = vcmp.lt.s32.totalorder %v9243_v20, 7  ;;  %vm11686_vm5 = vcmp.lt.s32.totalorder %v9243_v20, 1 }
  0xeb   :  { %v11678_v38 = vsel %vm10109_vm10, 4294967295, %v11677_v38  ;;  %7820 = vmatpush3.bf16.msra.mxu1 %v8893_v55 }
  0xec   :  { %11679 = vst [vmem:[#allocation13_spill] sm:$0xff] %v11678_v38 }
  0xed   :  { %7802 = vmatpush3.bf16.msra.mxu0 %v8892_v34 }
  0xf0   :  { %7804 = vmatmul.mubr.msk.bf16.vlgmr.msra.gmra.mrb[0].mxu0 %vm9576_vm6, %v9936_v4  ;;  %v6558_v4 = vpack.c.bf16 %v11551_v16, %v9890_v40  ;;  %v8899_v40 = vld [vmem:[#allocation2 + $0x2b0] sm:$0xff]  }
  0xf1   :  { %7807 = vmatprep.mubr.msk.bf16.mxu0 %vm9624_vm8, %v9975_v8  ;;  %v8894_v8 = vld [vmem:[#allocation2 + $0x288] sm:$0xff]  }
  0xf2   :  { %7821 = vmatprep.subr.bf16.mxu1 %v8894_v8 }
  0xf3   :  { %7822 = vmatpush3.bf16.msra.mxu1 %v8894_v8 }
  0xf8   :  { %7808 = vmatmul.mubr.msk.bf16.gmra.mrb[4].mxu0 %vm10089_vm12, %v6546_v39  ;;  %vm11690_vm12 = vmmov %vm11686_vm5 }
  0xf9   :  { %7811 = vmatprep.mubr.msk.bf16.mxu0 %vm11675_vm4, %v9993_v57  ;;  %v8895_v57 = vld [vmem:[#allocation2 + $0x290] sm:$0xff]  }
  0xfa   :  { %7823 = vmatprep.subr.bf16.mxu1 %v8895_v57 }
  0xfb   :  { %7824 = vmatpush3.bf16.msra.mxu1 %v8895_v57 }
 0x100   :  { %7812 = vmatmul.mubr.msk.bf16.gmra.mrb[8].mxu0 %vm9811_vm9, %v10004_v24  ;;  %v8896_v24 = vld [vmem:[#allocation2 + $0x298] sm:$0xff]  }
 0x101   :  { %7815 = vmatprep.mubr.msk.bf16.mxu0 %vm9849_vm1, %v10028_v6  ;;  %7825 = vmatprep.subr.bf16.mxu1 %v8896_v24  ;;  %v8898_v6 = vld [vmem:[#allocation2 + $0x2a8] sm:$0xff]  }
 0x102   :  { %7826 = vmatpush3.bf16.msra.mxu1 %v8896_v24 }
 0x103   :  { %7827 = vmatprep.subr.bf16.mxu1 %v8897_v30 }
 0x106   :  { %7828 = vmatpush3.bf16.msra.mxu1 %v8897_v30 }
 0x107   :  { %7829 = vmatprep.subr.bf16.mxu1 %v8898_v6 }
 0x108   :  { %7816 = vmatmul.mubr.msk.bf16.gmra.mrb[12].mxu0 %vm10109_vm10, %v6558_v4  ;;  %vm11688_vm10 = vmmov %vm11686_vm5 }
 0x10a   :  { %7830 = vmatpush3.bf16.msra.mxu1 %v8898_v6 }
 0x10b   :  { %7831 = vmatprep.subr.bf16.mxu1 %v8899_v40 }
 0x10e   :  { %7832 = vmatpush3.bf16.msra.mxu1 %v8899_v40 }
 0x10f   :  { %7833 = vmatprep.subr.bf16.mxu1 %v8900_v5 }
 0x112   :  { %7834 = vmatpush3.bf16.msra.mxu1 %v8900_v5 }
 0x113   :  { %7851 = vmatprep.subr.bf16.mxu1 %v10123_v19 }
 0x1a2   :  { %v7645_v22 = vpop.f32.mrb[0].mxu1 }
 0x1a3   :  { %v1157_v29 = vpop.f32.mrb[1].mxu1 }
 0x1a4   :  { %v7646_v11 = vpop.f32.mrb[2].mxu1 }
 0x1a5   :  { %v1160_v1 = vpop.f32.mrb[3].mxu1 }
 0x1aa   :  { %v7649_v23 = vpop.f32.mrb[4].mxu1 }
 0x1ab   :  { %v1173_v2 = vpop.f32.mrb[5].mxu1 }
 0x1ac   :  { %v7650_v31 = vpop.f32.mrb[6].mxu1 }
 0x1ad   :  { %v1176_v21 = vpop.f32.mrb[7].mxu1 }
 0x1b2   :  { %v10126_v15 = vpop.f32.mrb[8].mxu1 }
 0x1b3   :  { %v10128_v50 = vpop.f32.mrb[9].mxu1 }
 0x1b4   :  { %v10130_v3 = vpop.f32.mrb[10].mxu1 }
 0x1b5   :  { %v10132_v28 = vpop.f32.mrb[11].mxu1 }
 0x1ba   :  { %v10134_v47 = vpop.f32.mrb[12].mxu1 }
 0x1bb   :  { %v10136_v53 = vpop.f32.mrb[13].mxu1 }
 0x1bc   :  { %v10138_v46 = vpop.f32.mrb[14].mxu1 }
 0x1bd   :  { %v10140_v35 = vpop.f32.mrb[15].mxu1 }
 0x1c3   :  { %v7805_v45 = vpop.f32.mrb[0].mxu0 }
 0x1c4   :  { %v8427_v25 = vadd.f32 %v7805_v45, %v7645_v22  ;;  %v2199_v12 = vpop.f32.mrb[1].mxu0 }
 0x1c5   :  { %v8428_v43 = vadd.f32 %v2199_v12, %v1157_v29  ;;  %v7806_v13 = vpop.f32.mrb[2].mxu0 }
 0x1c6   :  { %v2287_v10 = vadd.f32 %v8427_v25, %v10142_v41  ;;  %v8429_v14 = vadd.f32 %v7806_v13, %v7646_v11  ;;  %v2202_v58 = vpop.f32.mrb[3].mxu0 }
 0x1c7   :  { %v2285_v42 = vadd.f32 %v8428_v43, %v10142_v41  ;;  %v8430_v48 = vadd.f32 %v2202_v58, %v1160_v1 }
 0x1c8   :  { %v10146_v34 = vmax.f32 %v2287_v10, 0.0  ;;  %v2288_v60 = vadd.f32 %v8429_v14, %v10142_v41  ;;  %v8902_v14 = vld [vmem:[#allocation2 + $0x248] sm:$0xff]  }
 0x1c9   :  { %v10149_v39 = vmax.f32 %v2285_v42, 0.0  ;;  %v2286_v4 = vadd.f32 %v8430_v48, %v10142_v41 }
 0x1ca   :  { %11680 = vst [vmem:[#allocation14_spill] sm:$0xff] %v10146_v34  ;;  %v2319_v55 = vrot.slane %v10146_v34, 7  ;;  %v2723_v8 = vrot.slane %v10146_v34, 1  ;;  %v10154_v57 = vmax.f32 %v2288_v60, 0.0 }
 0x1cb   :  { %v11410_v24 = vrot.slane %v10149_v39, 7  ;;  %v11411_v30 = vrot.slane %v10149_v39, 1  ;;  %v10158_v6 = vmax.f32 %v2286_v4, 0.0  ;;  %v7809_v40 = vpop.f32.mrb[4].mxu0  ;;  %v2406_v5 = vpack.c.bf16 %v10149_v39, %v11551_v16 }
 0x1cc   :  { %11681 = vst [vmem:[#allocation21_spill] sm:$0xff] %v10154_v57  ;;  %v2320_v22 = vrot.slane %v10154_v57, 7  ;;  %v2724_v29 = vrot.slane %v10154_v57, 1  ;;  %v8431_v1 = vadd.f32 %v7809_v40, %v7649_v23  ;;  %v2215_v45 = vpop.f32.mrb[5].mxu0 }
 0x1cd   :  { %11682 = vst [vmem:[#allocation25_spill] sm:$0xff] %v10158_v6  ;;  %v2318_v25 = vrot.slane %v10158_v6, 7  ;;  %v10169_v12 = vpack.c.bf16 %v10146_v34, %v10158_v6  ;;  %v2722_v43 = vrot.slane %v10158_v6, 1  ;;  %v8432_v13 = vadd.f32 %v2215_v45, %v1173_v2  ;;  %v7810_v10 = vpop.f32.mrb[6].mxu0  ;;  %7835 = vmatprep.mubr.bf16.mxu1 %v2406_v5 }
 0x1ce   :  { %v10174_v58 = vsel %vm11684_vm13, %v2723_v8, %v2724_v29  ;;  %v2291_v42 = vadd.f32 %v8431_v1, %v10142_v41  ;;  %v8433_v23 = vadd.f32 %v7810_v10, %v7650_v31  ;;  %v2218_v48 = vpop.f32.mrb[7].mxu0  ;;  %v10179_v60 = vsel %vm11686_vm5, %v2319_v55, %v2320_v22 }
 0x1cf   :  { %11683 = vst [vmem:[#allocation26_spill] sm:$0xff] %v10169_v12  ;;  %11685 = vst [vmem:[#allocation15_spill] sm:$0xff] %v10174_v58  ;;  %v10183_v4 = vsel %vm11688_vm10, %v2318_v25, %v2319_v55  ;;  %v10189_v2 = vsel %vm11690_vm12, %v11410_v24, %v2318_v25  ;;  %v10193_v40 = vsel %vm11684_vm13, %v2722_v43, %v2723_v8  ;;  %7836 = vmatmul.mubr.bf16.vlgmr.msra.gmra.mrb[16].mxu1 %v10169_v12  ;;  %v8904_v12 = vld [vmem:[#allocation2 + $0x258] sm:$0xff]  }
 0x1d0   :  { %11687 = vst [vmem:[#allocation28_spill] sm:$0xff] %v10179_v60  ;;  %11689 = vst [vmem:[#allocation32_spill] sm:$0xff] %v10183_v4  ;;  %v2289_v31 = vadd.f32 %v8432_v13, %v10142_v41  ;;  %v10199_v5 = vpack.c.bf16 %v10183_v4, %v10189_v2  ;;  %v10203_v55 = vpack.c.bf16 %v10174_v58, %v10193_v40  ;;  %v10205_v1 = vmax.f32 %v2291_v42, 0.0  ;;  %v8903_v13 = vld [vmem:[#allocation2 + $0x250] sm:$0xff]  }
 0x1d1   :  { %v2292_v45 = vadd.f32 %v8433_v23, %v10142_v41  ;;  %7852 = vmatpush3.bf16.msra.mxu1 %v10123_v19  ;;  %v8434_v25 = vadd.f32 %v2218_v48, %v1176_v21  ;;  %vm11692_vm12 = vmmov %vm11684_vm13 }
 0x1d2   :  { %11691 = vst [vmem:[#allocation31_spill] sm:$0xff] %v10203_v55  ;;  %v10209_v8 = vmax.f32 %v2289_v31, 0.0  ;;  %7853 = vmatprep.subr.bf16.mxu1 %v8902_v14  ;;  %v10217_v11 = vsel %vm11692_vm12, %v11411_v30, %v2722_v43  ;;  %vm11694_vm10 = vmmov %vm11686_vm5 }
 0x1d3   :  { %v10220_v24 = vmax.f32 %v2292_v45, 0.0  ;;  %v2290_v21 = vadd.f32 %v8434_v25, %v10142_v41  ;;  %v7813_v48 = vpop.f32.mrb[8].mxu0  ;;  %vm11696_vm5 = vmmov %vm11692_vm12 }
 0x1d4   :  { %v2321_v19 = vrot.slane %v10209_v8, 7  ;;  %v2725_v23 = vrot.slane %v10209_v8, 1  ;;  %v10227_v31 = vpack.c.bf16 %v10209_v8, %v10154_v57  ;;  %v8435_v30 = vadd.f32 %v7813_v48, %v10126_v15  ;;  %v2231_v42 = vpop.f32.mrb[9].mxu0  ;;  %vm11701_vm13 = vmmov %vm11696_vm5 }
 0x1d5   :  { %7854 = vmatpush3.bf16.msra.mxu1 %v8902_v14  ;;  %v10234_v38 = vmax.f32 %v2290_v21, 0.0  ;;  %v8436_v25 = vadd.f32 %v2231_v42, %v10128_v50  ;;  %v7814_v52 = vpop.f32.mrb[10].mxu0  ;;  %v11700_v42 = vrot.slane %v10205_v1, 1  ;;  %vm11703_vm12 = vmmov %vm11694_vm10  ;;  %v11707_v63 = vrot.slane %v10220_v24, 7 }
 0x1d6   :  { %11693 = vst [vmem:[#allocation16_spill] sm:$0xff] %v10227_v31  ;;  %7839 = vmatprep.mubr.bf16.mxu1 %v10227_v31  ;;  %7855 = vmatprep.subr.bf16.mxu1 %v8903_v13  ;;  %v10240_v10 = vsel %vm11694_vm10, %v2320_v22, %v2321_v19  ;;  %v10244_v15 = vsel %vm11696_vm5, %v2724_v29, %v2725_v23  ;;  %v2234_v48 = vpop.f32.mrb[11].mxu0 }
 0x1d7   :  { %11695 = vst [vmem:[#allocation17_spill] sm:$0xff] %v10240_v10  ;;  %11697 = vst [vmem:[#allocation24_spill] sm:$0xff] %v10244_v15  ;;  %v2295_v14 = vadd.f32 %v8435_v30, %v10142_v41  ;;  %v8437_v21 = vadd.f32 %v7814_v52, %v10130_v3  ;;  %v10250_v50 = vpack.c.bf16 %v10240_v10, %v10179_v60  ;;  %v2322_v45 = vrot.slane %v10234_v38, 7  ;;  %v11744_v10 = vld [vmem:[#allocation37_spill] sm:$0xff] }
 0x1d8   :  { %v2726_v22 = vrot.slane %v10234_v38, 1  ;;  %v2293_v43 = vadd.f32 %v8436_v25, %v10142_v41  ;;  %v8438_v29 = vadd.f32 %v2234_v48, %v10132_v28  ;;  %v10263_v3 = vpack.c.bf16 %v10205_v1, %v10234_v38 }
 0x1d9   :  { %v10258_v31 = vmax.f32 %v2295_v14, 0.0  ;;  %v2296_v52 = vadd.f32 %v8437_v21, %v10142_v41  ;;  %7856 = vmatpush3.bf16.msra.mxu1 %v8903_v13  ;;  %v11699_v30 = vrot.slane %v10220_v24, 1  ;;  %v8905_v14 = vld [vmem:[#allocation2 + $0x260] sm:$0xff]   ;;  %v11702_v21 = vrot.slane %v10205_v1, 7 }
 0x1da   :  { %11698 = vst [vmem:[#allocation43_spill] sm:$0xff] %v10263_v3  ;;  %v10273_v25 = vmax.f32 %v2293_v43, 0.0  ;;  %v2294_v28 = vadd.f32 %v8438_v29, %v10142_v41  ;;  %7857 = vmatprep.subr.bf16.mxu1 %v8904_v12  ;;  %v10284_v13 = vsel %vm11694_vm10, %v2321_v19, %v2322_v45  ;;  %7840 = vmatmul.mubr.bf16.gmra.mrb[20].mxu1 %v10263_v3 }
 0x1db   :  { %v10271_v18 = vsel %vm11701_vm13, %v11700_v42, %v11699_v30  ;;  %v10280_v48 = vsel %vm11703_vm12, %v2322_v45, %v11702_v21  ;;  %11704 = vst [vmem:[#allocation44_spill] sm:$0xff] %v10284_v13  ;;  %v10287_v42 = vmax.f32 %v2296_v52, 0.0  ;;  %v2327_v29 = vrot.slane %v10258_v31, 7  ;;  %v7817_v27 = vpop.f32.mrb[12].mxu0  ;;  %vm11708_vm13 = vmmov %vm11694_vm10 }
 0x1dc   :  { %v10292_v43 = vpack.c.bf16 %v10280_v48, %v10284_v13  ;;  %v2325_v30 = vrot.slane %v10273_v25, 7  ;;  %v10296_v21 = vmax.f32 %v2294_v28, 0.0  ;;  %v2410_v19 = vpack.c.bf16 %v10273_v25, %v11551_v16  ;;  %v2247_v3 = vpop.f32.mrb[13].mxu0  ;;  %vm11709_vm12 = vmmov %vm11694_vm10 }
 0x1dd   :  { %v2731_v45 = vrot.slane %v10258_v31, 1  ;;  %v2328_v52 = vrot.slane %v10287_v42, 7  ;;  %v8439_v32 = vadd.f32 %v7817_v27, %v10134_v47  ;;  %7858 = vmatpush3.bf16.msra.mxu1 %v8904_v12  ;;  %v10305_v58 = vsel %vm11696_vm5, %v2725_v23, %v2726_v22  ;;  %v7818_v57 = vpop.f32.mrb[14].mxu0  ;;  %v8906_v27 = vld [vmem:[#allocation2 + $0x268] sm:$0xff]   ;;  %vm11710_vm5 = vmmov %vm11694_vm10 }
 0x1de   :  { %11705 = vst [vmem:[#allocation45_spill] sm:$0xff] %v10292_v43  ;;  %v2732_v44 = vrot.slane %v10287_v42, 1  ;;  %v2326_v28 = vrot.slane %v10296_v21, 7  ;;  %v8440_v34 = vadd.f32 %v2247_v3, %v10136_v53  ;;  %7843 = vmatprep.mubr.bf16.mxu1 %v2410_v19  ;;  %v10312_v6 = vpack.c.bf16 %v10258_v31, %v10296_v21  ;;  %7859 = vmatprep.subr.bf16.mxu1 %v8905_v14  ;;  %v2250_v23 = vpop.f32.mrb[15].mxu0 }
 0x1df   :  { %v2299_v47 = vadd.f32 %v8439_v32, %v10142_v41  ;;  %v8441_v12 = vadd.f32 %v7818_v57, %v10138_v46  ;;  %v10320_v4 = vsel %vm11708_vm13, %v11707_v63, %v2325_v30  ;;  %v10324_v53 = vsel %vm11709_vm12, %v2327_v29, %v2328_v52 }
 0x1e0   :  { %11706 = vst [vmem:[#allocation46_spill] sm:$0xff] %v10312_v6  ;;  %v2730_v3 = vrot.slane %v10296_v21, 1  ;;  %v2297_v19 = vadd.f32 %v8440_v34, %v10142_v41  ;;  %v8442_v60 = vadd.f32 %v2250_v23, %v10140_v35  ;;  %v10331_v32 = vsel %vm11694_vm10, %v2326_v28, %v2327_v29  ;;  %v8907_v29 = vld [vmem:[#allocation2 + $0x270] sm:$0xff]  }
 0x1e1   :  { %v10333_v46 = vmax.f32 %v2299_v47, 0.0  ;;  %v2300_v57 = vadd.f32 %v8441_v12, %v10142_v41  ;;  %7860 = vmatpush3.bf16.msra.mxu1 %v8905_v14  ;;  %v10338_v63 = vsel %vm11710_vm5, %v2325_v30, %v2326_v28  ;;  %v10342_v62 = vpack.c.bf16 %v10305_v58, %v10244_v15 }
 0x1e2   :  { %v10344_v34 = vmax.f32 %v2297_v19, 0.0  ;;  %v2298_v35 = vadd.f32 %v8442_v60, %v10142_v41  ;;  %7861 = vmatprep.subr.bf16.mxu1 %v8906_v27  ;;  %v10349_v47 = vpack.c.bf16 %v10331_v32, %v10338_v63  ;;  %v11713_v14 = vrot.slane %v10205_v1, 1  ;;  %7844 = vmatmul.mubr.bf16.gmra.mrb[24].mxu1 %v10312_v6 }
 0x1e3   :  { %11711 = vst [vmem:[#allocation47_spill] sm:$0xff] %v10342_v62  ;;  %vm11714_vm13 = vcmp.lt.s32.totalorder %v9243_v20, 7  ;;  %v2729_v28 = vrot.slane %v10273_v25, 1  ;;  %v2331_v12 = vrot.slane %v10333_v46, 7  ;;  %v10359_v23 = vmax.f32 %v2300_v57, 0.0 }
 0x1e4   :  { %11712 = vst [vmem:[#allocation48_spill] sm:$0xff] %v10349_v47  ;;  %v10355_v30 = vsel %vm11714_vm13, %v2726_v22, %v11713_v14  ;;  %v2329_v60 = vrot.slane %v10344_v34, 7  ;;  %v2733_v19 = vrot.slane %v10344_v34, 1  ;;  %v10368_v15 = vmax.f32 %v2298_v35, 0.0  ;;  %vm11717_vm12 = vmmov %vm11714_vm13 }
 0x1e5   :  { %v10364_v41 = vpack.c.bf16 %v10271_v18, %v10355_v30  ;;  %v10372_v22 = vpack.c.bf16 %v10344_v34, %v10287_v42  ;;  %v2332_v14 = vrot.slane %v10359_v23, 7  ;;  %v2736_v57 = vrot.slane %v10359_v23, 1  ;;  %7862 = vmatpush3.bf16.msra.mxu1 %v8906_v27  ;;  %vm11718_vm10 = vmmov %vm11717_vm12  ;;  %v8908_v27 = vld [vmem:[#allocation2 + $0x278] sm:$0xff]  }
 0x1e6   :  { %v10378_v6 = vsel %vm11717_vm12, %v2729_v28, %v2730_v3  ;;  %v10382_v61 = vsel %vm11718_vm10, %v2731_v45, %v2732_v44  ;;  %v2330_v35 = vrot.slane %v10368_v15, 7  ;;  %v2734_v17 = vrot.slane %v10368_v15, 1  ;;  %7863 = vmatprep.subr.bf16.mxu1 %v8907_v29  ;;  %vm11721_vm13 = vmmov %vm11710_vm5 }
 0x1e7   :  { %11715 = vst [vmem:[#allocation49_spill] sm:$0xff] %v10364_v41  ;;  %11716 = vst [vmem:[#allocation50_spill] sm:$0xff] %v10372_v22  ;;  %7847 = vmatprep.mubr.bf16.mxu1 %v10372_v22  ;;  %v10389_v54 = vpack.c.bf16 %v10333_v46, %v10368_v15  ;;  %v10393_v37 = vsel %vm11710_vm5, %v2328_v52, %v2329_v60  ;;  %v2735_v33 = vrot.slane %v10333_v46, 1  ;;  %v11720_v41 = vrot.slane %v10149_v39, 7 }
 0x1e8   :  { %v10404_v22 = vpack.c.bf16 %v10393_v37, %v10324_v53  ;;  %vm11723_vm12 = vmmov %vm11718_vm10  ;;  %v10418_v55 = vsel %vm11710_vm5, %v2329_v60, %v2330_v35 }
 0x1e9   :  { %11719 = vst [vmem:[#allocation51_spill] sm:$0xff] %v10389_v54  ;;  %v10400_v36 = vsel %vm11721_vm13, %v2332_v14, %v11720_v41  ;;  %v10408_v62 = vsel %vm11723_vm12, %v2730_v3, %v2731_v45  ;;  %vm11724_vm10 = vmmov %vm11710_vm5  ;;  %7864 = vmatpush3.bf16.msra.mxu1 %v8907_v29  ;;  %v10434_v9 = vsel %vm11723_vm12, %v2732_v44, %v2733_v19 }
 0x1ea   :  { %11722 = vst [vmem:[#allocation52_spill] sm:$0xff] %v10404_v22  ;;  %v6578_v52 = vpack.c.bf16 %v10400_v36, %v11551_v16  ;;  %v10414_v26 = vsel %vm11724_vm10, %v2330_v35, %v2331_v12  ;;  %v10422_v41 = vpack.c.bf16 %v10382_v61, %v10408_v62  ;;  %vm11727_vm13 = vmmov %vm11723_vm12  ;;  %7865 = vmatprep.subr.bf16.mxu1 %v8908_v27  ;;  %v8909_v35 = vld [vmem:[#allocation2 + $0x2c0] sm:$0xff]  }
 0x1eb   :  { %v10426_v45 = vpack.c.bf16 %v10414_v26, %v10418_v55  ;;  %v10430_v3 = vsel %vm11727_vm13, %v2733_v19, %v2734_v17  ;;  %vm11728_vm10 = vmmov %vm11723_vm12  ;;  %7848 = vmatmul.mubr.bf16.gmra.mrb[28].mxu1 %v10389_v54  ;;  %vm11734_vm13 = vcmp.lt.s32.totalorder %v9243_v20, 1  ;;  %vm11736_vm12 = vnez %v11735_v59  ;;  %v11747_v54 = vld [vmem:[#allocation31_spill] sm:$0xff]  ;;  %v8919_v20 = vld [vmem:[#allocation2 + $0x310] sm:$0xff]  }
 0x1ec   :  { %11725 = vst [vmem:[#allocation53_spill] sm:$0xff] %v10422_v41  ;;  %v10438_v60 = vsel %vm11728_vm10, %v2735_v33, %v2736_v57  ;;  %v10442_v29 = vpack.c.bf16 %v10430_v3, %v10434_v9  ;;  %vm11730_vm5 = vmmov %vm11728_vm10  ;;  %7867 = vmatprep.mubr.msk.bf16.mxu1 %vm11736_vm12, %v6578_v52  ;;  %v11738_v52 = vrot.slane %v10220_v24, 1 }
 0x1ed   :  { %11726 = vst [vmem:[#allocation54_spill] sm:$0xff] %v10426_v45  ;;  %v10446_v41 = vsel %vm11730_vm5, %v2734_v17, %v2735_v33  ;;  %v11732_v45 = vrot.slane %v10220_v24, 7  ;;  %vm11737_vm10 = vmmov %vm11734_vm13  ;;  %7866 = vmatpush3.bf16.msra.mxu1 %v8908_v27  ;;  %v11745_v27 = vld [vmem:[#allocation34_spill] sm:$0xff]  ;;  %v8917_v17 = vld [vmem:[#allocation2 + $0x300] sm:$0xff]  }
 0x1ee   :  { %11729 = vst [vmem:[#allocation55_spill] sm:$0xff] %v10442_v29  ;;  %v10455_v19 = vpack.c.bf16 %v10438_v60, %v10446_v41  ;;  %v11733_v29 = vrot.slane %v10205_v1, 7  ;;  %v10477_v13 = vsel %vm11737_vm10, %v2331_v12, %v2332_v14  ;;  %7883 = vmatprep.subr.bf16.mxu1 %v8909_v35  ;;  %v10501_v44 = vsel %vm11730_vm5, %v11738_v52, %v2729_v28  ;;  %v8910_v28 = vld [vmem:[#allocation2 + $0x2c8] sm:$0xff]   ;;  %v8911_v14 = vld [vmem:[#allocation2 + $0x2d0] sm:$0xff]   ;;  %v8912_v12 = vld [vmem:[#allocation2 + $0x2d8] sm:$0xff]  }
 0x1ef   :  { %v8913_v52 = vld [vmem:[#allocation2 + $0x2e0] sm:$0xff]  }
 0x1f0   :  { %11731 = vst [vmem:[#allocation56_spill] sm:$0xff] %v10455_v19  ;;  %v10463_v33 = vsel %vm11734_vm13, %v11733_v29, %v11732_v45  ;;  %v11739_v45 = vrot.slane %v10149_v39, 1  ;;  %vm11740_vm13 = vmmov %vm11730_vm5  ;;  %vm11746_vm5 = vnez %v11745_v27 }
 0x1f2   :  { %v10515_v29 = vsel %vm11740_vm13, %v2736_v57, %v11739_v45  ;;  %v6590_v57 = vpack.c.bf16 %v10320_v4, %v11551_v16  ;;  %v11741_v45 = vld [vmem:[#allocation29_spill] sm:$0xff] }
 0x1f3   :  { %7868 = vmatmul.mubr.msk.bf16.vlgmr.msra.gmra.mrb[16].mxu1 %vm9547_vm3, %v10199_v5  ;;  %vm11742_vm10 = vnez %v11741_v45  ;;  %v11749_v45 = vld [vmem:[#allocation47_spill] sm:$0xff] }
 0x1f4   :  { %7871 = vmatprep.mubr.msk.bf16.mxu1 %vm9598_vm7, %v10250_v50  ;;  %7884 = vmatpush3.bf16.msra.mxu1 %v8909_v35  ;;  %v8914_v35 = vld [vmem:[#allocation2 + $0x2e8] sm:$0xff]  }
 0x1f5   :  { %7885 = vmatprep.subr.bf16.mxu1 %v8910_v28 }
 0x1f8   :  { %7886 = vmatpush3.bf16.msra.mxu1 %v8910_v28  ;;  %v8915_v28 = vld [vmem:[#allocation2 + $0x2f0] sm:$0xff]  }
 0x1f9   :  { %7887 = vmatprep.subr.bf16.mxu1 %v8911_v14 }
 0x1fb   :  { %7872 = vmatmul.mubr.msk.bf16.gmra.mrb[20].mxu1 %vm11659_vm11, %v10292_v43  ;;  %v11767_v43 = vld [vmem:[#allocation44_spill] sm:$0xff] }
 0x1fc   :  { %7875 = vmatprep.mubr.msk.bf16.mxu1 %vm11742_vm10, %v6590_v57  ;;  %7888 = vmatpush3.bf16.msra.mxu1 %v8911_v14  ;;  %v8916_v57 = vld [vmem:[#allocation2 + $0x2f8] sm:$0xff]   ;;  %v6610_v14 = vpack.c.bf16 %v10217_v11, %v11551_v16 }
 0x1fd   :  { %7889 = vmatprep.subr.bf16.mxu1 %v8912_v12 }
 0x200   :  { %7890 = vmatpush3.bf16.msra.mxu1 %v8912_v12  ;;  %v11743_v12 = vld [vmem:[#allocation54_spill] sm:$0xff] }
 0x201   :  { %7891 = vmatprep.subr.bf16.mxu1 %v8913_v52 }
 0x203   :  { %7876 = vmatmul.mubr.msk.bf16.gmra.mrb[24].mxu1 %vm11649_vm15, %v10349_v47  ;;  %v8995_v47 = vld [vmem:[#allocation2 + $0x570] sm:$0xff]  }
 0x204   :  { %7879 = vmatprep.mubr.msk.bf16.mxu1 %vm9823_vm0, %v10404_v22  ;;  %7892 = vmatpush3.bf16.msra.mxu1 %v8913_v52  ;;  %v8918_v52 = vld [vmem:[#allocation2 + $0x308] sm:$0xff]   ;;  %v11757_v22 = vld [vmem:[#allocation55_spill] sm:$0xff] }
 0x205   :  { %7893 = vmatprep.subr.bf16.mxu1 %v8914_v35 }
 0x208   :  { %7894 = vmatpush3.bf16.msra.mxu1 %v8914_v35 }
 0x209   :  { %7895 = vmatprep.subr.bf16.mxu1 %v8915_v28 }
 0x20b   :  { %7880 = vmatmul.mubr.msk.bf16.gmra.mrb[28].mxu1 %vm11666_vm2, %v11743_v12  ;;  %v11753_v12 = vld [vmem:[#allocation40_spill] sm:$0xff] }
 0x20c   :  { %7896 = vmatpush3.bf16.msra.mxu1 %v8915_v28  ;;  %7899 = vmatprep.mubr.msk.bf16.mxu1 %vm11746_vm5, %v6610_v14  ;;  %v8920_v28 = vld [vmem:[#allocation2 + $0x318] sm:$0xff]   ;;  %v6622_v14 = vpack.c.bf16 %v10378_v6, %v11551_v16  ;;  %vm11754_vm13 = vnez %v11753_v12 }
 0x20d   :  { %7897 = vmatprep.subr.bf16.mxu1 %v8916_v57  ;;  %v11762_v12 = vld [vmem:[#allocation35_spill] sm:$0xff] }
 0x20e   :  { %vm11763_vm5 = vnez %v11762_v12 }
 0x210   :  { %7898 = vmatpush3.bf16.msra.mxu1 %v8916_v57  ;;  %v11751_v57 = vld [vmem:[#allocation49_spill] sm:$0xff] }
 0x211   :  { %7915 = vmatprep.subr.bf16.mxu1 %v8917_v17 }
 0x213   :  { %7900 = vmatmul.mubr.msk.bf16.vlgmr.msra.gmra.mrb[16].mxu1 %vm9576_vm6, %v11747_v54  ;;  %v8921_v54 = vld [vmem:[#allocation2 + $0x320] sm:$0xff]  }
 0x214   :  { %7903 = vmatprep.mubr.msk.bf16.mxu1 %vm9624_vm8, %v11749_v45  ;;  %7916 = vmatpush3.bf16.msra.mxu1 %v8917_v17  ;;  %v8922_v17 = vld [vmem:[#allocation2 + $0x328] sm:$0xff]  }
 0x215   :  { %7917 = vmatprep.subr.bf16.mxu1 %v8918_v52  ;;  %v11755_v45 = vld [vmem:[#allocation53_spill] sm:$0xff] }
 0x218   :  { %7918 = vmatpush3.bf16.msra.mxu1 %v8918_v52 }
 0x219   :  { %7919 = vmatprep.subr.bf16.mxu1 %v8919_v20 }
 0x21b   :  { %7904 = vmatmul.mubr.msk.bf16.gmra.mrb[20].mxu1 %vm11644_vm14, %v11751_v57  ;;  %v8923_v57 = vld [vmem:[#allocation2 + $0x330] sm:$0xff]  }
 0x21c   :  { %7907 = vmatprep.mubr.msk.bf16.mxu1 %vm11754_vm13, %v6622_v14  ;;  %7920 = vmatpush3.bf16.msra.mxu1 %v8919_v20  ;;  %v8924_v14 = vld [vmem:[#allocation2 + $0x338] sm:$0xff]  }
 0x21d   :  { %7921 = vmatprep.subr.bf16.mxu1 %v8920_v28  ;;  %v11759_v20 = vld [vmem:[#allocation38_spill] sm:$0xff] }
 0x21e   :  { %vm11760_vm13 = vnez %v11759_v20 }
 0x220   :  { %7922 = vmatpush3.bf16.msra.mxu1 %v8920_v28  ;;  %v11761_v28 = vpack.c.bf16 %v10189_v2, %v10400_v36  ;;  %v8927_v36 = vld [vmem:[#allocation2 + $0x350] sm:$0xff]   ;;  %v8928_v2 = vld [vmem:[#allocation2 + $0x358] sm:$0xff]  }
 0x221   :  { %7923 = vmatprep.subr.bf16.mxu1 %v8921_v54 }
 0x223   :  { %7908 = vmatmul.mubr.msk.bf16.gmra.mrb[24].mxu1 %vm9811_vm9, %v11755_v45  ;;  %v8925_v45 = vld [vmem:[#allocation2 + $0x340] sm:$0xff]  }
 0x224   :  { %7911 = vmatprep.mubr.msk.bf16.mxu1 %vm9849_vm1, %v11757_v22  ;;  %7924 = vmatpush3.bf16.msra.mxu1 %v8921_v54  ;;  %v8926_v54 = vld [vmem:[#allocation2 + $0x348] sm:$0xff]  }
 0x225   :  { %7925 = vmatprep.subr.bf16.mxu1 %v8922_v17  ;;  %v11764_v22 = vld [vmem:[#allocation28_spill] sm:$0xff] }
 0x228   :  { %7926 = vmatpush3.bf16.msra.mxu1 %v8922_v17  ;;  %v11765_v17 = vld [vmem:[#allocation32_spill] sm:$0xff] }
 0x229   :  { %7927 = vmatprep.subr.bf16.mxu1 %v8923_v57  ;;  %v11766_v16 = vpack.c.bf16 %v11764_v22, %v11765_v17  ;;  %v11772_v22 = vld [vmem:[#allocation41_spill] sm:$0xff]  ;;  %v11780_v17 = vld [vmem:[#allocation14_spill] sm:$0xff] }
 0x22a   :  { %vm11773_vm10 = vnez %v11772_v22 }
 0x22b   :  { %7912 = vmatmul.mubr.msk.bf16.gmra.mrb[28].mxu1 %vm11760_vm13, %v10455_v19  ;;  %v11768_v19 = vld [vmem:[#allocation17_spill] sm:$0xff] }
 0x22c   :  { %7928 = vmatpush3.bf16.msra.mxu1 %v8923_v57  ;;  %7931 = vmatprep.mubr.msk.bf16.mxu1 %vm11763_vm5, %v11761_v28  ;;  %v11769_v57 = vpack.c.bf16 %v11767_v43, %v11768_v19  ;;  %v8929_v43 = vld [vmem:[#allocation2 + $0x360] sm:$0xff]   ;;  %v8930_v19 = vld [vmem:[#allocation2 + $0x368] sm:$0xff]   ;;  %v11776_v28 = vpack.c.bf16 %v10477_v13, %v10414_v26  ;;  %v11782_v26 = vpack.c.bf16 %v10234_v38, %v10209_v8 }
 0x22d   :  { %7929 = vmatprep.subr.bf16.mxu1 %v8924_v14  ;;  %v8938_v38 = vld [vmem:[#allocation2 + $0x3a8] sm:$0xff]   ;;  %v11785_v8 = vpack.c.bf16 %v10287_v42, %v10258_v31  ;;  %v11788_v31 = vpack.c.bf16 %v10193_v40, %v10217_v11  ;;  %v11789_v42 = vld [vmem:[#allocation19_spill] sm:$0xff]  ;;  %v11794_v40 = vpack.c.bf16 %v10355_v30, %v10305_v58  ;;  %v11796_v30 = vpack.c.bf16 %v10408_v62, %v10378_v6  ;;  %v8947_v6 = vld [vmem:[#allocation2 + $0x3f0] sm:$0xff]  }
 0x22e   :  { %v8968_v11 = vld [vmem:[#allocation2 + $0x4d8] sm:$0xff]   ;;  %v8970_v58 = vld [vmem:[#allocation2 + $0x4e8] sm:$0xff]   ;;  %v11799_v62 = vpack.c.bf16 %v10446_v41, %v10430_v3  ;;  %v8951_v3 = vld [vmem:[#allocation2 + $0x410] sm:$0xff]  }
 0x22f   :  { %v11801_v41 = vld [vmem:[#allocation45_spill] sm:$0xff] }
 0x230   :  { %7930 = vmatpush3.bf16.msra.mxu1 %v8924_v14  ;;  %v11770_v14 = vpack.c.bf16 %v10463_v33, %v10280_v48  ;;  %v11775_v48 = vpack.c.bf16 %v10418_v55, %v10393_v37  ;;  %v8933_v37 = vld [vmem:[#allocation2 + $0x380] sm:$0xff]   ;;  %v8934_v55 = vld [vmem:[#allocation2 + $0x388] sm:$0xff]  }
 0x231   :  { %7947 = vmatprep.subr.bf16.mxu1 %v8925_v45 }
 0x233   :  { %7932 = vmatmul.mubr.msk.bf16.vlgmr.msra.gmra.mrb[16].mxu1 %vm9547_vm3, %v11766_v16  ;;  %v11771_v16 = vpack.c.bf16 %v10338_v63, %v10320_v4  ;;  %v8931_v4 = vld [vmem:[#allocation2 + $0x370] sm:$0xff]   ;;  %v8932_v63 = vld [vmem:[#allocation2 + $0x378] sm:$0xff]  }
 0x234   :  { %7935 = vmatprep.mubr.msk.bf16.mxu1 %vm9598_vm7, %v11769_v57  ;;  %7948 = vmatpush3.bf16.msra.mxu1 %v8925_v45  ;;  %v11774_v45 = vpack.c.bf16 %v10324_v53, %v10331_v32  ;;  %v11777_v53 = vld [vmem:[#allocation25_spill] sm:$0xff] }
 0x235   :  { %7949 = vmatprep.subr.bf16.mxu1 %v8926_v54  ;;  %v11778_v32 = vpack.c.bf16 %v11777_v53, %v10149_v39  ;;  %v8936_v39 = vld [vmem:[#allocation2 + $0x398] sm:$0xff]   ;;  %v8969_v53 = vld [vmem:[#allocation2 + $0x4e0] sm:$0xff]  }
 0x238   :  { %7950 = vmatpush3.bf16.msra.mxu1 %v8926_v54  ;;  %v11779_v54 = vld [vmem:[#allocation21_spill] sm:$0xff] }
 0x239   :  { %7951 = vmatprep.subr.bf16.mxu1 %v8927_v36  ;;  %v11781_v57 = vpack.c.bf16 %v11779_v54, %v11780_v17  ;;  %v8945_v54 = vld [vmem:[#allocation2 + $0x3e0] sm:$0xff]   ;;  %v8946_v17 = vld [vmem:[#allocation2 + $0x3e8] sm:$0xff]  }
 0x23b   :  { %7936 = vmatmul.mubr.msk.bf16.gmra.mrb[20].mxu1 %vm11659_vm11, %v11770_v14  ;;  %v11784_v14 = vpack.c.bf16 %v10296_v21, %v10273_v25  ;;  %v8940_v25 = vld [vmem:[#allocation2 + $0x3b8] sm:$0xff]   ;;  %v11787_v21 = vpack.c.bf16 %v10359_v23, %v10333_v46  ;;  %v11791_v46 = vld [vmem:[#allocation24_spill] sm:$0xff] }
 0x23c   :  { %7939 = vmatprep.mubr.msk.bf16.mxu1 %vm11773_vm10, %v11771_v16  ;;  %7952 = vmatpush3.bf16.msra.mxu1 %v8927_v36  ;;  %v8935_v36 = vld [vmem:[#allocation2 + $0x390] sm:$0xff]   ;;  %v8937_v16 = vld [vmem:[#allocation2 + $0x3a0] sm:$0xff]  }
 0x23d   :  { %7953 = vmatprep.subr.bf16.mxu1 %v8928_v2 }
 0x240   :  { %7954 = vmatpush3.bf16.msra.mxu1 %v8928_v2  ;;  %v11783_v2 = vpack.c.bf16 %v10220_v24, %v10205_v1  ;;  %v8939_v1 = vld [vmem:[#allocation2 + $0x3b0] sm:$0xff]  }
 0x241   :  { %7955 = vmatprep.subr.bf16.mxu1 %v8929_v43 }
 0x243   :  { %7940 = vmatmul.mubr.msk.bf16.gmra.mrb[24].mxu1 %vm11649_vm15, %v11774_v45  ;;  %v8966_v45 = vld [vmem:[#allocation2 + $0x4c8] sm:$0xff]  }
 0x244   :  { %7943 = vmatprep.mubr.msk.bf16.mxu1 %vm9823_vm0, %v11775_v48  ;;  %7956 = vmatpush3.bf16.msra.mxu1 %v8929_v43  ;;  %v11786_v43 = vpack.c.bf16 %v10368_v15, %v10344_v34  ;;  %v8941_v15 = vld [vmem:[#allocation2 + $0x3c0] sm:$0xff]   ;;  %v8967_v34 = vld [vmem:[#allocation2 + $0x4d0] sm:$0xff]   ;;  %v8942_v48 = vld [vmem:[#allocation2 + $0x3c8] sm:$0xff]  }
 0x245   :  { %7957 = vmatprep.subr.bf16.mxu1 %v8930_v19 }
 0x248   :  { %7958 = vmatpush3.bf16.msra.mxu1 %v8930_v19  ;;  %v8965_v19 = vld [vmem:[#allocation2 + $0x4c0] sm:$0xff]  }
 0x249   :  { %7959 = vmatprep.subr.bf16.mxu1 %v8931_v4  ;;  %8107 = vmatprep.subr.bf16.mxu0 %v8965_v19 }
 0x24a   :  { %8108 = vmatpush3.bf16.msra.mxu0 %v8965_v19  ;;  %v8958_v19 = vld [vmem:[#allocation2 + $0x448] sm:$0xff]  }
 0x24b   :  { %7944 = vmatmul.mubr.msk.bf16.gmra.mrb[28].mxu1 %vm11666_vm2, %v11776_v28  ;;  %vm11790_vm2 = vnez %v11789_v42  ;;  %8109 = vmatprep.subr.bf16.mxu0 %v8966_v45  ;;  %v8943_v28 = vld [vmem:[#allocation2 + $0x3d0] sm:$0xff]  }
 0x24c   :  { %7960 = vmatpush3.bf16.msra.mxu1 %v8931_v4  ;;  %7963 = vmatprep.mubr.bf16.mxu1 %v11778_v32  ;;  %v11792_v4 = vld [vmem:[#allocation15_spill] sm:$0xff] }
 0x24d   :  { %7961 = vmatprep.subr.bf16.mxu1 %v8932_v63  ;;  %v8944_v32 = vld [vmem:[#allocation2 + $0x3d8] sm:$0xff]  }
 0x24e   :  { %8110 = vmatpush3.bf16.msra.mxu0 %v8966_v45  ;;  %v11811_v45 = vld [vmem:[#allocation16_spill] sm:$0xff] }
 0x24f   :  { %8111 = vmatprep.subr.bf16.mxu0 %v8967_v34 }
 0x250   :  { %7962 = vmatpush3.bf16.msra.mxu1 %v8932_v63  ;;  %v11793_v63 = vpack.c.bf16 %v11791_v46, %v11792_v4  ;;  %v8961_v46 = vld [vmem:[#allocation2 + $0x460] sm:$0xff]   ;;  %v8962_v4 = vld [vmem:[#allocation2 + $0x468] sm:$0xff]  }
 0x251   :  { %7979 = vmatprep.subr.bf16.mxu1 %v8933_v37 }
 0x252   :  { %8112 = vmatpush3.bf16.msra.mxu0 %v8967_v34  ;;  %v8960_v34 = vld [vmem:[#allocation2 + $0x458] sm:$0xff]  }
 0x253   :  { %7964 = vmatmul.mubr.bf16.vlgmr.msra.gmra.mrb[16].mxu1 %v11781_v57  ;;  %8113 = vmatprep.subr.bf16.mxu0 %v8968_v11  ;;  %v8948_v57 = vld [vmem:[#allocation2 + $0x3f8] sm:$0xff]  }
 0x254   :  { %7967 = vmatprep.mubr.bf16.mxu1 %v11782_v26  ;;  %7980 = vmatpush3.bf16.msra.mxu1 %v8933_v37  ;;  %v11795_v37 = vpack.c.bf16 %v10501_v44, %v10271_v18  ;;  %v11798_v18 = vpack.c.bf16 %v10434_v9, %v10382_v61  ;;  %v11800_v26 = vpack.c.bf16 %v10515_v29, %v10438_v60  ;;  %v8949_v9 = vld [vmem:[#allocation2 + $0x400] sm:$0xff]   ;;  %v8950_v61 = vld [vmem:[#allocation2 + $0x408] sm:$0xff]   ;;  %v11802_v60 = vmov 0.0  }
 0x255   :  { %7981 = vmatprep.subr.bf16.mxu1 %v8934_v55 }
 0x256   :  { %8114 = vmatpush3.bf16.msra.mxu0 %v8968_v11  ;;  %v11815_v11 = vld [vmem:[#allocation51_spill] sm:$0xff] }
 0x257   :  { %8115 = vmatprep.subr.bf16.mxu0 %v8969_v53 }
 0x258   :  { %7982 = vmatpush3.bf16.msra.mxu1 %v8934_v55 }
 0x259   :  { %7983 = vmatprep.subr.bf16.mxu1 %v8935_v36 }
 0x25a   :  { %8116 = vmatpush3.bf16.msra.mxu0 %v8969_v53  ;;  %v11816_v53 = vld [vmem:[#allocation31_spill] sm:$0xff] }
 0x25b   :  { %7968 = vmatmul.mubr.bf16.gmra.mrb[20].mxu1 %v11783_v2  ;;  %8117 = vmatprep.subr.bf16.mxu0 %v8970_v58  ;;  %v11805_v2 = vld [vmem:[#allocation48_spill] sm:$0xff] }
 0x25c   :  { %7971 = vmatprep.mubr.bf16.mxu1 %v11784_v14  ;;  %7984 = vmatpush3.bf16.msra.mxu1 %v8935_v36  ;;  %v8952_v36 = vld [vmem:[#allocation2 + $0x418] sm:$0xff]   ;;  %v8954_v14 = vld [vmem:[#allocation2 + $0x428] sm:$0xff]  }
 0x25d   :  { %7985 = vmatprep.subr.bf16.mxu1 %v8936_v39 }
 0x25e   :  { %8118 = vmatpush3.bf16.msra.mxu0 %v8970_v58  ;;  %v11819_v58 = vld [vmem:[#allocation22_spill] sm:$0xff] }
 0x260   :  { %7986 = vmatpush3.bf16.msra.mxu1 %v8936_v39  ;;  %v11803_v39 = vld [vmem:[#allocation39_spill] sm:$0xff] }
 0x261   :  { %7987 = vmatprep.subr.bf16.mxu1 %v8937_v16 }
 0x263   :  { %7972 = vmatmul.mubr.bf16.gmra.mrb[24].mxu1 %v11785_v8  ;;  %v6735_v8 = vpack.c.bf16 %v11802_v60, %v10477_v13  ;;  %v8959_v13 = vld [vmem:[#allocation2 + $0x450] sm:$0xff]  }
 0x264   :  { %7975 = vmatprep.mubr.bf16.mxu1 %v11786_v43  ;;  %7988 = vmatpush3.bf16.msra.mxu1 %v8937_v16  ;;  %v11806_v16 = vld [vmem:[#allocation52_spill] sm:$0xff]  ;;  %v8956_v43 = vld [vmem:[#allocation2 + $0x438] sm:$0xff]  }
 0x265   :  { %7989 = vmatprep.subr.bf16.mxu1 %v8938_v38 }
 0x268   :  { %7990 = vmatpush3.bf16.msra.mxu1 %v8938_v38  ;;  %v8955_v38 = vld [vmem:[#allocation2 + $0x430] sm:$0xff]  }
 0x269   :  { %7991 = vmatprep.subr.bf16.mxu1 %v8939_v1 }
 0x26b   :  { %7976 = vmatmul.mubr.bf16.gmra.mrb[28].mxu1 %v11787_v21  ;;  %v8957_v21 = vld [vmem:[#allocation2 + $0x440] sm:$0xff]  }
 0x26c   :  { %7992 = vmatpush3.bf16.msra.mxu1 %v8939_v1  ;;  %7995 = vmatprep.mubr.msk.bf16.mxu1 %vm11790_vm2, %v11788_v31  ;;  %v11808_v1 = vld [vmem:[#allocation42_spill] sm:$0xff]  ;;  %v11812_v31 = vld [vmem:[#allocation43_spill] sm:$0xff] }
 0x26d   :  { %7993 = vmatprep.subr.bf16.mxu1 %v8940_v25 }
 0x270   :  { %7994 = vmatpush3.bf16.msra.mxu1 %v8940_v25  ;;  %v11810_v25 = vld [vmem:[#allocation26_spill] sm:$0xff] }
 0x271   :  { %8011 = vmatprep.subr.bf16.mxu1 %v8941_v15 }
 0x273   :  { %7996 = vmatmul.mubr.msk.bf16.vlgmr.msra.gmra.mrb[16].mxu1 %vm9576_vm6, %v11793_v63  ;;  %v11814_v63 = vld [vmem:[#allocation50_spill] sm:$0xff] }
 0x274   :  { %7999 = vmatprep.mubr.msk.bf16.mxu1 %vm9624_vm8, %v11794_v40  ;;  %8012 = vmatpush3.bf16.msra.mxu1 %v8941_v15  ;;  %v3766_v15 = vpack.c.bf16 %v11802_v60, %v10220_v24  ;;  %v8963_v40 = vld [vmem:[#allocation2 + $0x470] sm:$0xff]   ;;  %v3770_v24 = vpack.c.bf16 %v11802_v60, %v10359_v23  ;;  %v6763_v23 = vpack.c.bf16 %v11802_v60, %v10501_v44 }
 0x275   :  { %8013 = vmatprep.subr.bf16.mxu1 %v8942_v48  ;;  %v8971_v44 = vld [vmem:[#allocation2 + $0x4f0] sm:$0xff]  }
 0x276   :  { %8119 = vmatprep.subr.bf16.mxu0 %v8971_v44 }
 0x277   :  { %8120 = vmatpush3.bf16.msra.mxu0 %v8971_v44 }
 0x278   :  { %8014 = vmatpush3.bf16.msra.mxu1 %v8942_v48  ;;  %v11813_v48 = vld [vmem:[#allocation46_spill] sm:$0xff] }
 0x279   :  { %8015 = vmatprep.subr.bf16.mxu1 %v8943_v28 }
 0x27b   :  { %8000 = vmatmul.mubr.msk.bf16.gmra.mrb[20].mxu1 %vm11644_vm14, %v11795_v37  ;;  %v11818_v37 = vld [vmem:[#allocation49_spill] sm:$0xff] }
 0x27c   :  { %8003 = vmatprep.mubr.msk.bf16.mxu1 %vm11675_vm4, %v11796_v30  ;;  %8016 = vmatpush3.bf16.msra.mxu1 %v8943_v28  ;;  %v8964_v28 = vld [vmem:[#allocation2 + $0x478] sm:$0xff]   ;;  %v11821_v30 = vld [vmem:[#allocation53_spill] sm:$0xff] }
 0x27d   :  { %8017 = vmatprep.subr.bf16.mxu1 %v8944_v32 }
 0x280   :  { %8018 = vmatpush3.bf16.msra.mxu1 %v8944_v32  ;;  %v11817_v32 = vld [vmem:[#allocation47_spill] sm:$0xff] }
 0x281   :  { %8019 = vmatprep.subr.bf16.mxu1 %v8945_v54 }
 0x283   :  { %8004 = vmatmul.mubr.msk.bf16.gmra.mrb[24].mxu1 %vm9811_vm9, %v11798_v18  ;;  %v6775_v18 = vpack.c.bf16 %v11802_v60, %v10515_v29 }
 0x284   :  { %8007 = vmatprep.mubr.msk.bf16.mxu1 %vm9849_vm1, %v11799_v62  ;;  %8020 = vmatpush3.bf16.msra.mxu1 %v8945_v54  ;;  %v11822_v54 = vld [vmem:[#allocation55_spill] sm:$0xff]  ;;  %v11824_v62 = vld [vmem:[#allocation13_spill] sm:$0xff] }
 0x285   :  { %8021 = vmatprep.subr.bf16.mxu1 %v8946_v17 }
 0x288   :  { %8022 = vmatpush3.bf16.msra.mxu1 %v8946_v17  ;;  %v11823_v17 = vld [vmem:[#allocation56_spill] sm:$0xff] }
 0x289   :  { %8023 = vmatprep.subr.bf16.mxu1 %v8947_v6 }
 0x28b   :  { %8008 = vmatmul.mubr.msk.bf16.gmra.mrb[28].mxu1 %vm11760_vm13, %v11800_v26  ;;  %v10733_v26 = vld [vmem:[#allocation4 + $0x1] ss:$0 sm:$0xff] }
 0x28c   :  { %8024 = vmatpush3.bf16.msra.mxu1 %v8947_v6  ;;  %8027 = vmatprep.mubr.msk.bf16.mxu1 %vm11763_vm5, %v10199_v5  ;;  %v6723_v5 = vpack.c.bf16 %v11802_v60, %v10463_v33  ;;  %vm11804_vm5 = vnez %v11803_v39  ;;  %v11807_v33 = vld [vmem:[#allocation54_spill] sm:$0xff] }
 0x28d   :  { %8025 = vmatprep.subr.bf16.mxu1 %v8948_v57  ;;  %v8972_v6 = vld [vmem:[#allocation2 + $0x4f8] sm:$0xff]  }
 0x28e   :  { %8121 = vmatprep.subr.bf16.mxu0 %v8972_v6 }
 0x28f   :  { %8122 = vmatpush3.bf16.msra.mxu0 %v8972_v6 }
 0x290   :  { %8026 = vmatpush3.bf16.msra.mxu1 %v8948_v57  ;;  %v8973_v57 = vld [vmem:[#allocation2 + $0x480] sm:$0xff]  }
 0x291   :  { %8043 = vmatprep.subr.bf16.mxu1 %v8949_v9  ;;  %8139 = vmatprep.subr.bf16.mxu0 %v8973_v57 }
 0x293   :  { %8028 = vmatmul.mubr.msk.bf16.vlgmr.msra.gmra.mrb[16].mxu1 %vm9547_vm3, %v10250_v50  ;;  %v8953_v50 = vld [vmem:[#allocation2 + $0x420] sm:$0xff]  }
 0x294   :  { %8031 = vmatprep.mubr.msk.bf16.mxu1 %vm9598_vm7, %v11801_v41  ;;  %8044 = vmatpush3.bf16.msra.mxu1 %v8949_v9 }
 0x295   :  { %8045 = vmatprep.subr.bf16.mxu1 %v8950_v61 }
 0x298   :  { %8046 = vmatpush3.bf16.msra.mxu1 %v8950_v61 }
 0x299   :  { %8047 = vmatprep.subr.bf16.mxu1 %v8951_v3 }
 0x29b   :  { %8032 = vmatmul.mubr.msk.bf16.gmra.mrb[20].mxu1 %vm11804_vm5, %v6723_v5  ;;  %vm11809_vm5 = vnez %v11808_v1 }
 0x29c   :  { %8035 = vmatprep.mubr.msk.bf16.mxu1 %vm11773_vm10, %v11805_v2  ;;  %8048 = vmatpush3.bf16.msra.mxu1 %v8951_v3 }
 0x29d   :  { %8049 = vmatprep.subr.bf16.mxu1 %v8952_v36 }
 0x2a0   :  { %8050 = vmatpush3.bf16.msra.mxu1 %v8952_v36 }
 0x2a1   :  { %8051 = vmatprep.subr.bf16.mxu1 %v8953_v50 }
 0x2a3   :  { %8036 = vmatmul.mubr.msk.bf16.gmra.mrb[24].mxu1 %vm11649_vm15, %v11806_v16 }
 0x2a4   :  { %8039 = vmatprep.mubr.msk.bf16.mxu1 %vm9823_vm0, %v11807_v33  ;;  %8052 = vmatpush3.bf16.msra.mxu1 %v8953_v50 }
 0x2a5   :  { %8053 = vmatprep.subr.bf16.mxu1 %v8954_v14 }
 0x2a8   :  { %8054 = vmatpush3.bf16.msra.mxu1 %v8954_v14 }
 0x2a9   :  { %8055 = vmatprep.subr.bf16.mxu1 %v8955_v38 }
 0x2ab   :  { %8040 = vmatmul.mubr.msk.bf16.gmra.mrb[28].mxu1 %vm11809_vm5, %v6735_v8  ;;  %vm11820_vm5 = vnez %v11819_v58 }
 0x2ac   :  { %8056 = vmatpush3.bf16.msra.mxu1 %v8955_v38  ;;  %8059 = vmatprep.mubr.bf16.mxu1 %v11810_v25 }
 0x2ad   :  { %8057 = vmatprep.subr.bf16.mxu1 %v8956_v43 }
 0x2b0   :  { %8058 = vmatpush3.bf16.msra.mxu1 %v8956_v43 }
 0x2b1   :  { %8075 = vmatprep.subr.bf16.mxu1 %v8957_v21 }
 0x2b3   :  { %8060 = vmatmul.mubr.bf16.vlgmr.msra.gmra.mrb[16].mxu1 %v11811_v45 }
 0x2b4   :  { %8063 = vmatprep.mubr.bf16.mxu1 %v11812_v31  ;;  %8076 = vmatpush3.bf16.msra.mxu1 %v8957_v21 }
 0x2b5   :  { %8077 = vmatprep.subr.bf16.mxu1 %v8958_v19 }
 0x2b8   :  { %8078 = vmatpush3.bf16.msra.mxu1 %v8958_v19 }
 0x2b9   :  { %8079 = vmatprep.subr.bf16.mxu1 %v8959_v13 }
 0x2bb   :  { %8064 = vmatmul.mubr.bf16.gmra.mrb[20].mxu1 %v3766_v15 }
 0x2bc   :  { %8067 = vmatprep.mubr.bf16.mxu1 %v11813_v48  ;;  %8080 = vmatpush3.bf16.msra.mxu1 %v8959_v13  ;;  %v8974_v48 = vld [vmem:[#allocation2 + $0x488] sm:$0xff]  }
 0x2bd   :  { %8081 = vmatprep.subr.bf16.mxu1 %v8960_v34 }
 0x2c0   :  { %8082 = vmatpush3.bf16.msra.mxu1 %v8960_v34 }
 0x2c1   :  { %8083 = vmatprep.subr.bf16.mxu1 %v8961_v46 }
 0x2c3   :  { %8068 = vmatmul.mubr.bf16.gmra.mrb[24].mxu1 %v11814_v63  ;;  %v11830_v63 = vld [vmem:[#allocation12_spill] sm:$0xff] }
 0x2c4   :  { %8071 = vmatprep.mubr.bf16.mxu1 %v11815_v11  ;;  %8084 = vmatpush3.bf16.msra.mxu1 %v8961_v46 }
 0x2c5   :  { %8085 = vmatprep.subr.bf16.mxu1 %v8962_v4 }
 0x2c8   :  { %8086 = vmatpush3.bf16.msra.mxu1 %v8962_v4 }
 0x2c9   :  { %8087 = vmatprep.subr.bf16.mxu1 %v8963_v40 }
 0x2cb   :  { %8072 = vmatmul.mubr.bf16.gmra.mrb[28].mxu1 %v3770_v24 }
 0x2cc   :  { %8088 = vmatpush3.bf16.msra.mxu1 %v8963_v40  ;;  %8091 = vmatprep.mubr.msk.bf16.mxu1 %vm11790_vm2, %v11816_v53  ;;  %vm11825_vm2 = vnez %v11824_v62 }
 0x2cd   :  { %8089 = vmatprep.subr.bf16.mxu1 %v8964_v28 }
 0x2d0   :  { %8090 = vmatpush3.bf16.msra.mxu1 %v8964_v28 }
 0x2d3   :  { %8092 = vmatmul.mubr.msk.bf16.vlgmr.msra.gmra.mrb[16].mxu1 %vm9576_vm6, %v11817_v32 }
 0x2d4   :  { %8095 = vmatprep.mubr.msk.bf16.mxu1 %vm9624_vm8, %v11818_v37 }
 0x2db   :  { %8096 = vmatmul.mubr.msk.bf16.gmra.mrb[20].mxu1 %vm11820_vm5, %v6763_v23  ;;  %vm11833_vm5 = vcmp.lt.s32.totalorder %v11830_v63, 1 }
 0x2dc   :  { %8099 = vmatprep.mubr.msk.bf16.mxu1 %vm11675_vm4, %v11821_v30  ;;  %vm11835_vm4 = vmmov %vm11833_vm5 }
 0x2dd   :  { %vm11837_vm10 = vmmov %vm11835_vm4 }
 0x2e3   :  { %8100 = vmatmul.mubr.msk.bf16.gmra.mrb[24].mxu1 %vm9811_vm9, %v11822_v54 }
 0x2e4   :  { %8103 = vmatprep.mubr.msk.bf16.mxu1 %vm9849_vm1, %v11823_v17 }
 0x2eb   :  { %8104 = vmatmul.mubr.msk.bf16.gmra.mrb[28].mxu1 %vm11825_vm2, %v6775_v18  ;;  %vm11831_vm2 = vcmp.lt.s32.totalorder %v11830_v63, 7 }
 0x3a6   :  { %v8093_v9 = vpop.f32.mrb[16].mxu1 }
 0x3a7   :  { %v4161_v61 = vadd.f32 %v8093_v9, %v10733_v26  ;;  %v4072_v41 = vpop.f32.mrb[17].mxu1 }
 0x3a8   :  { %v4159_v3 = vadd.f32 %v10733_v26, %v4072_v41  ;;  %v8094_v29 = vpop.f32.mrb[18].mxu1  ;;  %v8975_v41 = vld [vmem:[#allocation2 + $0x490] sm:$0xff]  }
 0x3a9   :  { %v10737_v5 = vmax.f32 %v4161_v61, 0.0  ;;  %v4162_v36 = vadd.f32 %v8094_v29, %v10733_v26  ;;  %v4075_v2 = vpop.f32.mrb[19].mxu1 }
 0x3aa   :  { %v10740_v50 = vmax.f32 %v4159_v3, 0.0  ;;  %v4160_v14 = vadd.f32 %v10733_v26, %v4075_v2 }
 0x3ab   :  { %11826 = vst [vmem:[#allocation37_spill] sm:$0xff] %v10737_v5  ;;  %v10743_v16 = vmax.f32 %v4162_v36, 0.0  ;;  %v4193_v33 = vrot.slane %v10737_v5, 7  ;;  %v4597_v38 = vrot.slane %v10737_v5, 1 }
 0x3ac   :  { %v10747_v8 = vmax.f32 %v4160_v14, 0.0  ;;  %v4280_v43 = vpack.c.bf16 %v10740_v50, %v11802_v60  ;;  %v11476_v25 = vrot.slane %v10740_v50, 7  ;;  %v11475_v4 = vrot.slane %v10740_v50, 1 }
 0x3ad   :  { %11827 = vst [vmem:[#allocation20_spill] sm:$0xff] %v10743_v16  ;;  %v4194_v21 = vrot.slane %v10743_v16, 7  ;;  %v4598_v19 = vrot.slane %v10743_v16, 1 }
 0x3ae   :  { %11828 = vst [vmem:[#allocation23_spill] sm:$0xff] %v10747_v8  ;;  %v4192_v31 = vrot.slane %v10747_v8, 7  ;;  %v10759_v13 = vpack.c.bf16 %v10737_v5, %v10747_v8  ;;  %v4596_v15 = vrot.slane %v10747_v8, 1  ;;  %v8097_v34 = vpop.f32.mrb[20].mxu1  ;;  %8123 = vmatprep.mubr.bf16.mxu0 %v4280_v43 }
 0x3af   :  { %v10767_v11 = vsel %vm11831_vm2, %v4597_v38, %v4598_v19  ;;  %v4165_v40 = vadd.f32 %v8097_v34, %v10733_v26  ;;  %v4088_v24 = vpop.f32.mrb[21].mxu1  ;;  %v10772_v28 = vsel %vm11833_vm5, %v4193_v33, %v4194_v21 }
 0x3b0   :  { %11829 = vst [vmem:[#allocation27_spill] sm:$0xff] %v10759_v13  ;;  %11832 = vst [vmem:[#allocation33_spill] sm:$0xff] %v10767_v11  ;;  %v10776_v53 = vsel %vm11835_vm4, %v4192_v31, %v4193_v33  ;;  %v10782_v32 = vsel %vm11837_vm10, %v11476_v25, %v4192_v31  ;;  %v10786_v37 = vsel %vm11831_vm2, %v4596_v15, %v4597_v38  ;;  %v8098_v30 = vpop.f32.mrb[22].mxu1  ;;  %8124 = vmatmul.mubr.bf16.vlgmr.msra.gmra.mrb[16].mxu0 %v10759_v13 }
 0x3b1   :  { %11834 = vst [vmem:[#allocation28_spill] sm:$0xff] %v10772_v28  ;;  %11836 = vst [vmem:[#allocation32_spill] sm:$0xff] %v10776_v53  ;;  %v4163_v23 = vadd.f32 %v10733_v26, %v4088_v24  ;;  %v10792_v54 = vpack.c.bf16 %v10776_v53, %v10782_v32  ;;  %v10796_v17 = vpack.c.bf16 %v10767_v11, %v10786_v37  ;;  %v10798_v18 = vmax.f32 %v4165_v40, 0.0  ;;  %v4091_v6 = vpop.f32.mrb[23].mxu1 }
 0x3b2   :  { %11838 = vst [vmem:[#allocation44_spill] sm:$0xff] %v10786_v37  ;;  %v4166_v44 = vadd.f32 %v8098_v30, %v10733_v26  ;;  %8140 = vmatpush3.bf16.msra.mxu0 %v8973_v57  ;;  %v4164_v61 = vadd.f32 %v10733_v26, %v4091_v6  ;;  %vm11840_vm4 = vmmov %vm11831_vm2  ;;  %v8976_v6 = vld [vmem:[#allocation2 + $0x498] sm:$0xff]  }
 0x3b3   :  { %11839 = vst [vmem:[#allocation17_spill] sm:$0xff] %v10798_v18  ;;  %v10801_v9 = vmax.f32 %v4163_v23, 0.0  ;;  %8141 = vmatprep.subr.bf16.mxu0 %v8974_v48  ;;  %v10810_v29 = vsel %vm11840_vm4, %v11475_v4, %v4596_v15  ;;  %v4197_v36 = vrot.slane %v10798_v18, 7  ;;  %v4601_v2 = vrot.slane %v10798_v18, 1  ;;  %vm11843_vm10 = vmmov %vm11833_vm5 }
 0x3b4   :  { %v10814_v57 = vmax.f32 %v4166_v44, 0.0  ;;  %v10818_v38 = vmax.f32 %v4164_v61, 0.0  ;;  %vm11845_vm5 = vmmov %vm11831_vm2 }
 0x3b5   :  { %v4195_v14 = vrot.slane %v10801_v9, 7  ;;  %v4599_v33 = vrot.slane %v10801_v9, 1  ;;  %v10822_v43 = vpack.c.bf16 %v10801_v9, %v10743_v16  ;;  %vm11847_vm4 = vmmov %vm11843_vm10 }
 0x3b6   :  { %v4198_v31 = vrot.slane %v10814_v57, 7  ;;  %v11477_v15 = vrot.slane %v10814_v57, 1  ;;  %8142 = vmatpush3.bf16.msra.mxu0 %v8974_v48  ;;  %v4196_v24 = vrot.slane %v10818_v38, 7  ;;  %v4600_v23 = vrot.slane %v10818_v38, 1  ;;  %v8101_v30 = vpop.f32.mrb[24].mxu1 }
 0x3b7   :  { %11841 = vst [vmem:[#allocation25_spill] sm:$0xff] %v10822_v43  ;;  %8127 = vmatprep.mubr.bf16.mxu0 %v10822_v43  ;;  %v10835_v44 = vpack.c.bf16 %v10798_v18, %v10818_v38  ;;  %8143 = vmatprep.subr.bf16.mxu0 %v8975_v41  ;;  %v10839_v48 = vsel %vm11843_vm10, %v4194_v21, %v4195_v14  ;;  %v4104_v40 = vpop.f32.mrb[25].mxu1  ;;  %vm11849_vm10 = vmmov %vm11847_vm4 }
 0x3b8   :  { %11844 = vst [vmem:[#allocation14_spill] sm:$0xff] %v10839_v48  ;;  %v4169_v61 = vadd.f32 %v8101_v30, %v10733_v26  ;;  %v10844_v34 = vpack.c.bf16 %v10839_v48, %v10772_v28  ;;  %v10848_v45 = vsel %vm11845_vm5, %v4598_v19, %v4599_v33  ;;  %v10854_v46 = vsel %vm11831_vm2, %v4601_v2, %v11477_v15  ;;  %v8102_v3 = vpop.f32.mrb[26].mxu1  ;;  %vm11851_vm5 = vmmov %vm11831_vm2  ;;  %v8980_v28 = vld [vmem:[#allocation2 + $0x4b8] sm:$0xff]  }
 0x3b9   :  { %11842 = vst [vmem:[#allocation21_spill] sm:$0xff] %v10835_v44  ;;  %11846 = vst [vmem:[#allocation24_spill] sm:$0xff] %v10848_v45  ;;  %v4167_v21 = vadd.f32 %v10733_v26, %v4104_v40  ;;  %8128 = vmatmul.mubr.bf16.gmra.mrb[20].mxu0 %v10835_v44  ;;  %v10860_v30 = vsel %vm11847_vm4, %v4196_v24, %v4197_v36  ;;  %v10864_v4 = vsel %vm11849_vm10, %v4195_v14, %v4196_v24  ;;  %v4107_v40 = vpop.f32.mrb[27].mxu1 }
 0x3ba   :  { %11848 = vst [vmem:[#allocation15_spill] sm:$0xff] %v10860_v30  ;;  %11850 = vst [vmem:[#allocation45_spill] sm:$0xff] %v10864_v4  ;;  %v10868_v19 = vsel %vm11851_vm5, %v4599_v33, %v4600_v23  ;;  %v10870_v25 = vmax.f32 %v4169_v61, 0.0  ;;  %v4170_v15 = vadd.f32 %v8102_v3, %v10733_v26  ;;  %8144 = vmatpush3.bf16.msra.mxu0 %v8975_v41  ;;  %v8977_v33 = vld [vmem:[#allocation2 + $0x4a0] sm:$0xff]  }
 0x3bb   :  { %11852 = vst [vmem:[#allocation48_spill] sm:$0xff] %v10868_v19  ;;  %v10875_v62 = vpack.c.bf16 %v10860_v30, %v10864_v4  ;;  %v10879_v58 = vpack.c.bf16 %v10868_v19, %v10848_v45  ;;  %v10881_v14 = vmax.f32 %v4167_v21, 0.0  ;;  %v4168_v24 = vadd.f32 %v10733_v26, %v4107_v40  ;;  %8145 = vmatprep.subr.bf16.mxu0 %v8976_v6  ;;  %v8978_v45 = vld [vmem:[#allocation2 + $0x4a8] sm:$0xff]   ;;  %vm11856_vm10 = vmmov %vm11847_vm4 }
 0x3bc   :  { %v10888_v41 = vsel %vm11831_vm2, %v4600_v23, %v4601_v2  ;;  %v4201_v3 = vrot.slane %v10870_v25, 7  ;;  %v4605_v44 = vrot.slane %v10870_v25, 1  ;;  %v10892_v43 = vmax.f32 %v4170_v15, 0.0  ;;  %vm11857_vm5 = vmmov %vm11847_vm4 }
 0x3bd   :  { %v10896_v21 = vpack.c.bf16 %v10854_v46, %v10888_v41  ;;  %v4199_v40 = vrot.slane %v10881_v14, 7  ;;  %v10900_v1 = vmax.f32 %v4168_v24, 0.0  ;;  %v4284_v2 = vpack.c.bf16 %v10881_v14, %v11802_v60 }
 0x3be   :  { %v4202_v23 = vrot.slane %v10892_v43, 7  ;;  %v4606_v61 = vrot.slane %v10892_v43, 1  ;;  %8146 = vmatpush3.bf16.msra.mxu0 %v8976_v6  ;;  %v10910_v39 = vsel %vm11847_vm4, %v4197_v36, %v4198_v31  ;;  %v8105_v13 = vpop.f32.mrb[28].mxu1  ;;  %v11862_v5 = vrot.slane %v10881_v14, 1 }
 0x3bf   :  { %11853 = vst [vmem:[#allocation52_spill] sm:$0xff] %v10896_v21  ;;  %11854 = vst [vmem:[#allocation54_spill] sm:$0xff] %v10910_v39  ;;  %v4200_v55 = vrot.slane %v10900_v1, 7  ;;  %v4604_v24 = vrot.slane %v10900_v1, 1  ;;  %8131 = vmatprep.mubr.bf16.mxu0 %v4284_v2  ;;  %v10916_v11 = vpack.c.bf16 %v10870_v25, %v10900_v1  ;;  %8147 = vmatprep.subr.bf16.mxu0 %v8977_v33  ;;  %v4120_v36 = vpop.f32.mrb[29].mxu1  ;;  %v11878_v19 = vrot.slane %v10740_v50, 1 }
 0x3c0   :  { %v10920_v6 = vsel %vm11856_vm10, %v4198_v31, %v4199_v40  ;;  %v4173_v15 = vadd.f32 %v8105_v13, %v10733_v26  ;;  %v10925_v42 = vsel %vm11857_vm5, %v4201_v3, %v4202_v23  ;;  %v10929_v2 = vsel %vm11831_vm2, %v4605_v44, %v4606_v61  ;;  %v8106_v18 = vpop.f32.mrb[30].mxu1  ;;  %vm11860_vm10 = vmmov %vm11847_vm4 }
 0x3c1   :  { %11855 = vst [vmem:[#allocation26_spill] sm:$0xff] %v10916_v11  ;;  %11858 = vst [vmem:[#allocation16_spill] sm:$0xff] %v10925_v42  ;;  %v4171_v37 = vadd.f32 %v10733_v26, %v4120_v36  ;;  %8132 = vmatmul.mubr.bf16.gmra.mrb[24].mxu0 %v10916_v11  ;;  %v10935_v31 = vsel %vm11847_vm4, %v4200_v55, %v4201_v3  ;;  %v10939_v13 = vsel %vm11860_vm10, %v4199_v40, %v4200_v55  ;;  %v4123_v22 = vpop.f32.mrb[31].mxu1  ;;  %v8979_v40 = vld [vmem:[#allocation2 + $0x4b0] sm:$0xff]  }
 0x3c2   :  { %11859 = vst [vmem:[#allocation43_spill] sm:$0xff] %v10935_v31  ;;  %11861 = vst [vmem:[#allocation46_spill] sm:$0xff] %v10939_v13  ;;  %v10947_v8 = vmax.f32 %v4173_v15, 0.0  ;;  %v4174_v36 = vadd.f32 %v8106_v18, %v10733_v26  ;;  %8148 = vmatpush3.bf16.msra.mxu0 %v8977_v33  ;;  %v10952_v3 = vpack.c.bf16 %v10935_v31, %v10939_v13 }
 0x3c3   :  { %vm11863_vm5 = vmmov %vm11831_vm2  ;;  %v10954_v11 = vmax.f32 %v4171_v37, 0.0  ;;  %v4172_v55 = vadd.f32 %v10733_v26, %v4123_v22  ;;  %8149 = vmatprep.subr.bf16.mxu0 %v8978_v45  ;;  %v6807_v63 = vpack.c.bf16 %v10920_v6, %v11802_v60 }
 0x3c4   :  { %v10945_v16 = vsel %vm11863_vm5, %v11862_v5, %v4604_v24  ;;  %v10959_v5 = vsel %vm11831_vm2, %v4604_v24, %v4605_v44  ;;  %v4205_v18 = vrot.slane %v10947_v8, 7  ;;  %v4609_v33 = vrot.slane %v10947_v8, 1  ;;  %vm11868_vm10 = vmmov %vm11847_vm4 }
 0x3c5   :  { %v10965_v48 = vmax.f32 %v4174_v36, 0.0  ;;  %v10969_v37 = vpack.c.bf16 %v10929_v2, %v10959_v5  ;;  %v4203_v22 = vrot.slane %v10954_v11, 7  ;;  %v4607_v26 = vrot.slane %v10954_v11, 1  ;;  %vm11869_vm5 = vmmov %vm11831_vm2 }
 0x3c6   :  { %v10973_v4 = vmax.f32 %v4172_v55, 0.0  ;;  %v10977_v44 = vpack.c.bf16 %v10954_v11, %v10892_v43  ;;  %8150 = vmatpush3.bf16.msra.mxu0 %v8978_v45  ;;  %v11867_v36 = vrot.slane %v10740_v50, 7 }
 0x3c7   :  { %11864 = vst [vmem:[#allocation50_spill] sm:$0xff] %v10969_v37  ;;  %v4206_v24 = vrot.slane %v10965_v48, 7  ;;  %v4610_v15 = vrot.slane %v10965_v48, 1  ;;  %8151 = vmatprep.subr.bf16.mxu0 %v8979_v40  ;;  %v10994_v45 = vsel %vm11847_vm4, %v4202_v23, %v4203_v22 }
 0x3c8   :  { %11865 = vst [vmem:[#allocation51_spill] sm:$0xff] %v10977_v44  ;;  %v4204_v39 = vrot.slane %v10973_v4, 7  ;;  %v4608_v55 = vrot.slane %v10973_v4, 1  ;;  %8135 = vmatprep.mubr.bf16.mxu0 %v10977_v44  ;;  %v10990_v53 = vpack.c.bf16 %v10947_v8, %v10973_v4  ;;  %v11004_v31 = vpack.c.bf16 %v10994_v45, %v10925_v42 }
 0x3c9   :  { %v11000_v30 = vsel %vm11868_vm10, %v4206_v24, %v11867_v36  ;;  %v11008_v44 = vsel %vm11869_vm5, %v4606_v61, %v4607_v26  ;;  %v11012_v13 = vsel %vm11831_vm2, %v4609_v33, %v4610_v15  ;;  %vm11870_vm10 = vmmov %vm11847_vm4 }
 0x3ca   :  { %11866 = vst [vmem:[#allocation31_spill] sm:$0xff] %v10990_v53  ;;  %8136 = vmatmul.mubr.bf16.gmra.mrb[28].mxu0 %v10990_v53  ;;  %v6795_v23 = vpack.c.bf16 %v11000_v30, %v11802_v60  ;;  %v11019_v36 = vsel %vm11847_vm4, %v4204_v39, %v4205_v18  ;;  %v11023_v42 = vsel %vm11870_vm10, %v4203_v22, %v4204_v39  ;;  %vm11871_vm5 = vmmov %vm11831_vm2  ;;  %v8997_v39 = vld [vmem:[#allocation2 + $0x580] sm:$0xff]  }
 0x3cb   :  { %v11027_v61 = vsel %vm11871_vm5, %v4607_v26, %v4608_v55  ;;  %8152 = vmatpush3.bf16.msra.mxu0 %v8979_v40  ;;  %v11031_v12 = vpack.c.bf16 %v11019_v36, %v11023_v42  ;;  %v11039_v20 = vsel %vm11831_vm2, %v4608_v55, %v4609_v33  ;;  %v8981_v40 = vld [vmem:[#allocation2 + $0x500] sm:$0xff]   ;;  %v11876_v33 = vrot.slane %v10814_v57, 1  ;;  %vm11879_vm10 = vmmov %vm11831_vm2 }
 0x3cc   :  { %v11035_v53 = vpack.c.bf16 %v11027_v61, %v11008_v44  ;;  %8155 = vmatprep.mubr.msk.bf16.mxu0 %vm11736_vm12, %v6795_v23  ;;  %8153 = vmatprep.subr.bf16.mxu0 %v8980_v28  ;;  %v11047_v26 = vpack.c.bf16 %v11012_v13, %v11039_v20  ;;  %vm11877_vm12 = vmmov %vm11831_vm2  ;;  %v8982_v23 = vld [vmem:[#allocation2 + $0x508] sm:$0xff]   ;;  %vm11882_vm2 = vnez %v11744_v10  ;;  %v11909_v51 = vpack.c.bf16 %v11023_v42, %v10994_v45  ;;  %v9005_v42 = vld [vmem:[#allocation2 + $0x5c0] sm:$0xff]  }
 0x3cd   :  { %v11893_v22 = vld [vmem:[#allocation28_spill] sm:$0xff]  ;;  %v9007_v10 = vld [vmem:[#allocation2 + $0x5d0] sm:$0xff]   ;;  %v11936_v27 = vpack.c.bf16 %v11008_v44, %v10929_v2  ;;  %v9024_v44 = vld [vmem:[#allocation2 + $0x658] sm:$0xff]  }
 0x3ce   :  { %11872 = vst [vmem:[#allocation47_spill] sm:$0xff] %v11035_v53  ;;  %11874 = vst [vmem:[#allocation49_spill] sm:$0xff] %v11047_v26  ;;  %v11053_v53 = vsel %vm11847_vm4, %v4205_v18, %v4206_v24  ;;  %v11875_v24 = vrot.slane %v10881_v14, 1  ;;  %v8984_v18 = vld [vmem:[#allocation2 + $0x518] sm:$0xff]   ;;  %v9006_v45 = vld [vmem:[#allocation2 + $0x5c8] sm:$0xff]  }
 0x3cf   :  { %8154 = vmatpush3.bf16.msra.mxu0 %v8980_v28  ;;  %v9022_v2 = vld [vmem:[#allocation2 + $0x648] sm:$0xff]  }
 0x3d0   :  { %v11075_v55 = vsel %vm11877_vm12, %v11876_v33, %v11875_v24  ;;  %8171 = vmatprep.subr.bf16.mxu0 %v8981_v40  ;;  %v11089_v33 = vsel %vm11879_vm10, %v4610_v15, %v11878_v19  ;;  %v8983_v24 = vld [vmem:[#allocation2 + $0x510] sm:$0xff]   ;;  %v8985_v15 = vld [vmem:[#allocation2 + $0x520] sm:$0xff]  }
 0x3d1   :  { %v11880_v19 = vld [vmem:[#allocation29_spill] sm:$0xff]  ;;  %v6992_v59 = vpack.c.bf16 %v11802_v60, %v11089_v33 }
 0x3d2   :  { %8156 = vmatmul.mubr.msk.bf16.vlgmr.msra.gmra.mrb[16].mxu0 %vm9547_vm3, %v10792_v54  ;;  %vm11881_vm5 = vnez %v11880_v19  ;;  %v8989_v19 = vld [vmem:[#allocation2 + $0x540] sm:$0xff]  }
 0x3d3   :  { %8159 = vmatprep.mubr.msk.bf16.mxu0 %vm9598_vm7, %v10844_v34  ;;  %8172 = vmatpush3.bf16.msra.mxu0 %v8981_v40  ;;  %v8986_v40 = vld [vmem:[#allocation2 + $0x528] sm:$0xff]  }
 0x3d4   :  { %8173 = vmatprep.subr.bf16.mxu0 %v8982_v23 }
 0x3d5   :  { %v11954_v35 = vld [vmem:[#allocation49_spill] sm:$0xff] }
 0x3d7   :  { %8174 = vmatpush3.bf16.msra.mxu0 %v8982_v23  ;;  %v8987_v23 = vld [vmem:[#allocation2 + $0x530] sm:$0xff]  }
 0x3d8   :  { %8175 = vmatprep.subr.bf16.mxu0 %v8983_v24 }
 0x3da   :  { %8160 = vmatmul.mubr.msk.bf16.gmra.mrb[20].mxu0 %vm11659_vm11, %v10875_v62 }
 0x3db   :  { %8163 = vmatprep.mubr.msk.bf16.mxu0 %vm11881_vm5, %v6807_v63  ;;  %8176 = vmatpush3.bf16.msra.mxu0 %v8983_v24  ;;  %v8988_v63 = vld [vmem:[#allocation2 + $0x538] sm:$0xff]   ;;  %v6827_v24 = vpack.c.bf16 %v10810_v29, %v11802_v60 }
 0x3dc   :  { %8177 = vmatprep.subr.bf16.mxu0 %v8984_v18 }
 0x3df   :  { %8178 = vmatpush3.bf16.msra.mxu0 %v8984_v18  ;;  %v11883_v18 = vld [vmem:[#allocation34_spill] sm:$0xff] }
 0x3e0   :  { %8179 = vmatprep.subr.bf16.mxu0 %v8985_v15  ;;  %vm11884_vm4 = vnez %v11883_v18  ;;  %v8993_v18 = vld [vmem:[#allocation2 + $0x560] sm:$0xff]  }
 0x3e2   :  { %8164 = vmatmul.mubr.msk.bf16.gmra.mrb[24].mxu0 %vm11649_vm15, %v10952_v3 }
 0x3e3   :  { %8167 = vmatprep.mubr.msk.bf16.mxu0 %vm9823_vm0, %v11004_v31  ;;  %8180 = vmatpush3.bf16.msra.mxu0 %v8985_v15  ;;  %v8990_v15 = vld [vmem:[#allocation2 + $0x548] sm:$0xff]  }
 0x3e4   :  { %8181 = vmatprep.subr.bf16.mxu0 %v8986_v40 }
 0x3e7   :  { %8182 = vmatpush3.bf16.msra.mxu0 %v8986_v40  ;;  %v8991_v40 = vld [vmem:[#allocation2 + $0x550] sm:$0xff]  }
 0x3e8   :  { %8183 = vmatprep.subr.bf16.mxu0 %v8987_v23 }
 0x3ea   :  { %8168 = vmatmul.mubr.msk.bf16.gmra.mrb[28].mxu0 %vm11882_vm2, %v11031_v12 }
 0x3eb   :  { %8184 = vmatpush3.bf16.msra.mxu0 %v8987_v23  ;;  %8187 = vmatprep.mubr.msk.bf16.mxu0 %vm11884_vm4, %v6827_v24  ;;  %v8992_v23 = vld [vmem:[#allocation2 + $0x558] sm:$0xff]   ;;  %v6839_v24 = vpack.c.bf16 %v10945_v16, %v11802_v60 }
 0x3ec   :  { %8185 = vmatprep.subr.bf16.mxu0 %v8988_v63 }
 0x3ef   :  { %8186 = vmatpush3.bf16.msra.mxu0 %v8988_v63  ;;  %v11885_v63 = vld [vmem:[#allocation40_spill] sm:$0xff] }
 0x3f0   :  { %8203 = vmatprep.subr.bf16.mxu0 %v8989_v19  ;;  %vm11886_vm12 = vnez %v11885_v63  ;;  %v11891_v63 = vld [vmem:[#allocation35_spill] sm:$0xff] }
 0x3f1   :  { %vm11892_vm10 = vnez %v11891_v63  ;;  %v11943_v63 = vld [vmem:[#allocation27_spill] sm:$0xff] }
 0x3f2   :  { %8188 = vmatmul.mubr.msk.bf16.vlgmr.msra.gmra.mrb[16].mxu0 %vm9576_vm6, %v10796_v17 }
 0x3f3   :  { %8191 = vmatprep.mubr.msk.bf16.mxu0 %vm9624_vm8, %v10879_v58  ;;  %8204 = vmatpush3.bf16.msra.mxu0 %v8989_v19  ;;  %v8994_v19 = vld [vmem:[#allocation2 + $0x568] sm:$0xff]  }
 0x3f4   :  { %8205 = vmatprep.subr.bf16.mxu0 %v8990_v15 }
 0x3f7   :  { %8206 = vmatpush3.bf16.msra.mxu0 %v8990_v15  ;;  %v11887_v15 = vld [vmem:[#allocation47_spill] sm:$0xff] }
 0x3f8   :  { %8207 = vmatprep.subr.bf16.mxu0 %v8991_v40 }
 0x3fa   :  { %8192 = vmatmul.mubr.msk.bf16.gmra.mrb[20].mxu0 %vm11644_vm14, %v10896_v21 }
 0x3fb   :  { %8195 = vmatprep.mubr.msk.bf16.mxu0 %vm11886_vm12, %v6839_v24  ;;  %8208 = vmatpush3.bf16.msra.mxu0 %v8991_v40  ;;  %v8996_v24 = vld [vmem:[#allocation2 + $0x578] sm:$0xff]  }
 0x3fc   :  { %8209 = vmatprep.subr.bf16.mxu0 %v8992_v23  ;;  %v11941_v40 = vld [vmem:[#allocation42_spill] sm:$0xff] }
 0x3ff   :  { %8210 = vmatpush3.bf16.msra.mxu0 %v8992_v23  ;;  %v11890_v23 = vpack.c.bf16 %v10782_v32, %v11000_v30  ;;  %v8999_v32 = vld [vmem:[#allocation2 + $0x590] sm:$0xff]   ;;  %v9000_v30 = vld [vmem:[#allocation2 + $0x598] sm:$0xff]  }
 0x400   :  { %8211 = vmatprep.subr.bf16.mxu0 %v8993_v18 }
 0x402   :  { %8196 = vmatmul.mubr.msk.bf16.gmra.mrb[24].mxu0 %vm9811_vm9, %v10969_v37  ;;  %v11896_v37 = vld [vmem:[#allocation45_spill] sm:$0xff] }
 0x403   :  { %8199 = vmatprep.mubr.msk.bf16.mxu0 %vm9849_vm1, %v11887_v15  ;;  %8212 = vmatpush3.bf16.msra.mxu0 %v8993_v18  ;;  %v8998_v18 = vld [vmem:[#allocation2 + $0x588] sm:$0xff]  }
 0x404   :  { %8213 = vmatprep.subr.bf16.mxu0 %v8994_v19 }
 0x407   :  { %8214 = vmatpush3.bf16.msra.mxu0 %v8994_v19  ;;  %v11894_v19 = vld [vmem:[#allocation32_spill] sm:$0xff] }
 0x408   :  { %8215 = vmatprep.subr.bf16.mxu0 %v8995_v47  ;;  %v11895_v15 = vpack.c.bf16 %v11893_v22, %v11894_v19  ;;  %v11902_v22 = vld [vmem:[#allocation46_spill] sm:$0xff]  ;;  %v11904_v19 = vld [vmem:[#allocation41_spill] sm:$0xff] }
 0x409   :  { %vm11905_vm5 = vnez %v11904_v19  ;;  %v9032_v19 = vld [vmem:[#allocation2 + $0x698] sm:$0xff]  }
 0x40a   :  { %8200 = vmatmul.mubr.msk.bf16.gmra.mrb[28].mxu0 %vm11760_vm13, %v11047_v26  ;;  %v11897_v26 = vld [vmem:[#allocation14_spill] sm:$0xff] }
 0x40b   :  { %8216 = vmatpush3.bf16.msra.mxu0 %v8995_v47  ;;  %8219 = vmatprep.mubr.msk.bf16.mxu0 %vm11892_vm10, %v11890_v23  ;;  %v11898_v47 = vpack.c.bf16 %v11896_v37, %v11897_v26  ;;  %v11900_v23 = vld [vmem:[#allocation15_spill] sm:$0xff]  ;;  %v11906_v26 = vld [vmem:[#allocation16_spill] sm:$0xff] }
 0x40c   :  { %8217 = vmatprep.subr.bf16.mxu0 %v8996_v24  ;;  %v9001_v37 = vld [vmem:[#allocation2 + $0x5a0] sm:$0xff]  }
 0x40f   :  { %8218 = vmatpush3.bf16.msra.mxu0 %v8996_v24  ;;  %v11899_v24 = vld [vmem:[#allocation54_spill] sm:$0xff] }
 0x410   :  { %8235 = vmatprep.subr.bf16.mxu0 %v8997_v39  ;;  %v11901_v21 = vpack.c.bf16 %v11899_v24, %v11900_v23 }
 0x412   :  { %8220 = vmatmul.mubr.msk.bf16.vlgmr.msra.gmra.mrb[16].mxu0 %vm9547_vm3, %v11895_v15  ;;  %v11903_v15 = vpack.c.bf16 %v11902_v22, %v10920_v6  ;;  %v9004_v6 = vld [vmem:[#allocation2 + $0x5b8] sm:$0xff]   ;;  %v11913_v22 = vld [vmem:[#allocation20_spill] sm:$0xff] }
 0x413   :  { %8223 = vmatprep.mubr.msk.bf16.mxu0 %vm9598_vm7, %v11898_v47  ;;  %8236 = vmatpush3.bf16.msra.mxu0 %v8997_v39  ;;  %v9002_v39 = vld [vmem:[#allocation2 + $0x5a8] sm:$0xff]  }
 0x414   :  { %8237 = vmatprep.subr.bf16.mxu0 %v8998_v18 }
 0x417   :  { %8238 = vmatpush3.bf16.msra.mxu0 %v8998_v18  ;;  %v11907_v18 = vld [vmem:[#allocation43_spill] sm:$0xff] }
 0x418   :  { %8239 = vmatprep.subr.bf16.mxu0 %v8999_v32  ;;  %v11908_v47 = vpack.c.bf16 %v11906_v26, %v11907_v18  ;;  %v11919_v18 = vpack.c.bf16 %v10900_v1, %v10881_v14  ;;  %v9012_v1 = vld [vmem:[#allocation2 + $0x5f8] sm:$0xff]   ;;  %v11922_v14 = vpack.c.bf16 %v10965_v48, %v10947_v8  ;;  %v11927_v8 = vld [vmem:[#allocation24_spill] sm:$0xff] }
 0x41a   :  { %8224 = vmatmul.mubr.msk.bf16.gmra.mrb[20].mxu0 %vm11659_vm11, %v11901_v21  ;;  %v9003_v21 = vld [vmem:[#allocation2 + $0x5b0] sm:$0xff]  }
 0x41b   :  { %8227 = vmatprep.mubr.msk.bf16.mxu0 %vm11905_vm5, %v11903_v15  ;;  %8240 = vmatpush3.bf16.msra.mxu0 %v8999_v32  ;;  %v11910_v32 = vpack.c.bf16 %v11053_v53, %v11019_v36  ;;  %v11914_v15 = vld [vmem:[#allocation37_spill] sm:$0xff]  ;;  %v11916_v36 = vpack.c.bf16 %v10818_v38, %v10801_v9  ;;  %v11920_v38 = vpack.c.bf16 %v10892_v43, %v10870_v25  ;;  %v11925_v43 = vld [vmem:[#allocation19_spill] sm:$0xff] }
 0x41c   :  { %8241 = vmatprep.subr.bf16.mxu0 %v9000_v30  ;;  %v9010_v9 = vld [vmem:[#allocation2 + $0x5e8] sm:$0xff]   ;;  %vm11926_vm11 = vnez %v11925_v43  ;;  %v9044_v43 = vld [vmem:[#allocation6 + $0x38] sm:$0xff]  }
 0x41f   :  { %8242 = vmatpush3.bf16.msra.mxu0 %v9000_v30  ;;  %v11911_v30 = vld [vmem:[#allocation23_spill] sm:$0xff] }
 0x420   :  { %8243 = vmatprep.subr.bf16.mxu0 %v9001_v37  ;;  %v11912_v23 = vpack.c.bf16 %v11911_v30, %v10740_v50  ;;  %v9008_v50 = vld [vmem:[#allocation2 + $0x5d8] sm:$0xff]   ;;  %v11923_v30 = vld [vmem:[#allocation44_spill] sm:$0xff] }
 0x421   :  { %v11924_v25 = vpack.c.bf16 %v11923_v30, %v10810_v29  ;;  %v9040_v29 = vld [vmem:[#allocation6 + $0x18] sm:$0xff]   ;;  %v11949_v30 = vld [vmem:[#allocation52_spill] sm:$0xff] }
 0x422   :  { %8228 = vmatmul.mubr.msk.bf16.gmra.mrb[24].mxu0 %vm11649_vm15, %v11908_v47  ;;  %v9009_v47 = vld [vmem:[#allocation2 + $0x5e0] sm:$0xff]  }
 0x423   :  { %8231 = vmatprep.mubr.msk.bf16.mxu0 %vm9823_vm0, %v11909_v51  ;;  %8244 = vmatpush3.bf16.msra.mxu0 %v9001_v37  ;;  %v11915_v37 = vpack.c.bf16 %v11913_v22, %v11914_v15  ;;  %v11921_v51 = vpack.c.bf16 %v10973_v4, %v10954_v11  ;;  %v9013_v4 = vld [vmem:[#allocation2 + $0x600] sm:$0xff]   ;;  %v9039_v11 = vld [vmem:[#allocation6 + $0x10] sm:$0xff]  }
 0x424   :  { %8245 = vmatprep.subr.bf16.mxu0 %v9002_v39  ;;  %v11930_v22 = vld [vmem:[#allocation48_spill] sm:$0xff] }
 0x425   :  { %v11931_v15 = vpack.c.bf16 %v10888_v41, %v11930_v22  ;;  %v9042_v41 = vld [vmem:[#allocation6 + $0x28] sm:$0xff]  }
 0x427   :  { %8246 = vmatpush3.bf16.msra.mxu0 %v9002_v39  ;;  %v11917_v39 = vld [vmem:[#allocation17_spill] sm:$0xff] }
 0x428   :  { %8247 = vmatprep.subr.bf16.mxu0 %v9003_v21  ;;  %v11918_v26 = vpack.c.bf16 %v10814_v57, %v11917_v39  ;;  %v11933_v39 = vpack.c.bf16 %v10959_v5, %v10945_v16  ;;  %v11937_v16 = vpack.c.bf16 %v11039_v20, %v11027_v61  ;;  %v9020_v5 = vld [vmem:[#allocation2 + $0x638] sm:$0xff]   ;;  %v9021_v20 = vld [vmem:[#allocation2 + $0x640] sm:$0xff]  }
 0x429   :  { %v11939_v61 = vld [vmem:[#allocation39_spill] sm:$0xff] }
 0x42a   :  { %8232 = vmatmul.mubr.msk.bf16.gmra.mrb[28].mxu0 %vm11882_vm2, %v11910_v32  ;;  %v9038_v32 = vld [vmem:[#allocation6 + $0x8] sm:$0xff]  }
 0x42b   :  { %8248 = vmatpush3.bf16.msra.mxu0 %v9003_v21  ;;  %8251 = vmatprep.mubr.bf16.mxu0 %v11912_v23  ;;  %v9011_v21 = vld [vmem:[#allocation2 + $0x5f0] sm:$0xff]   ;;  %v9014_v23 = vld [vmem:[#allocation2 + $0x608] sm:$0xff]  }
 0x42c   :  { %8249 = vmatprep.subr.bf16.mxu0 %v9004_v6 }
 0x42f   :  { %8250 = vmatpush3.bf16.msra.mxu0 %v9004_v6  ;;  %v9037_v6 = vld [vmem:[#allocation6] sm:$0xff]  }
 0x430   :  { %8267 = vmatprep.subr.bf16.mxu0 %v9005_v42  ;;  %8395 = vmatprep.subr.bf16.mxu1 %v9037_v6 }
 0x431   :  { %8396 = vmatpush3.bf16.msra.mxu1 %v9037_v6  ;;  %v9035_v6 = vld [vmem:[#allocation2 + $0x6b0] sm:$0xff]  }
 0x432   :  { %8252 = vmatmul.mubr.bf16.vlgmr.msra.gmra.mrb[16].mxu0 %v11915_v37  ;;  %8397 = vmatprep.subr.bf16.mxu1 %v9038_v32  ;;  %v9015_v37 = vld [vmem:[#allocation2 + $0x610] sm:$0xff]  }
 0x433   :  { %8255 = vmatprep.mubr.bf16.mxu0 %v11916_v36  ;;  %8268 = vmatpush3.bf16.msra.mxu0 %v9005_v42  ;;  %v11928_v42 = vld [vmem:[#allocation33_spill] sm:$0xff]  ;;  %v9041_v36 = vld [vmem:[#allocation6 + $0x20] sm:$0xff]  }
 0x434   :  { %8269 = vmatprep.subr.bf16.mxu0 %v9006_v45 }
 0x435   :  { %8398 = vmatpush3.bf16.msra.mxu1 %v9038_v32  ;;  %v9036_v32 = vld [vmem:[#allocation2 + $0x6b8] sm:$0xff]  }
 0x436   :  { %8399 = vmatprep.subr.bf16.mxu1 %v9039_v11 }
 0x437   :  { %8270 = vmatpush3.bf16.msra.mxu0 %v9006_v45  ;;  %v11929_v45 = vpack.c.bf16 %v11927_v8, %v11928_v42 }
 0x438   :  { %8271 = vmatprep.subr.bf16.mxu0 %v9007_v10 }
 0x439   :  { %8400 = vmatpush3.bf16.msra.mxu1 %v9039_v11  ;;  %v6994_v11 = vld [vmem:[#allocation4 + $0x2] ss:$0 sm:$0xff] }
 0x43a   :  { %8256 = vmatmul.mubr.bf16.gmra.mrb[20].mxu0 %v11918_v26  ;;  %8401 = vmatprep.subr.bf16.mxu1 %v9040_v29  ;;  %v11934_v26 = vld [vmem:[#allocation30_spill] sm:$0xff] }
 0x43b   :  { %8259 = vmatprep.mubr.bf16.mxu0 %v11919_v18  ;;  %8272 = vmatpush3.bf16.msra.mxu0 %v9007_v10  ;;  %v9016_v10 = vld [vmem:[#allocation2 + $0x618] sm:$0xff]   ;;  %vm11935_vm2 = vnez %v11934_v26  ;;  %v9017_v18 = vld [vmem:[#allocation2 + $0x620] sm:$0xff]  }
 0x43c   :  { %8273 = vmatprep.subr.bf16.mxu0 %v9008_v50 }
 0x43d   :  { %8402 = vmatpush3.bf16.msra.mxu1 %v9040_v29 }
 0x43e   :  { %8403 = vmatprep.subr.bf16.mxu1 %v9041_v36 }
 0x43f   :  { %8274 = vmatpush3.bf16.msra.mxu0 %v9008_v50  ;;  %v11932_v50 = vpack.c.bf16 %v11075_v55, %v10854_v46  ;;  %v9019_v46 = vld [vmem:[#allocation2 + $0x630] sm:$0xff]  }
 0x440   :  { %8275 = vmatprep.subr.bf16.mxu0 %v9009_v47 }
 0x441   :  { %8404 = vmatpush3.bf16.msra.mxu1 %v9041_v36 }
 0x442   :  { %8260 = vmatmul.mubr.bf16.gmra.mrb[24].mxu0 %v11920_v38  ;;  %8405 = vmatprep.subr.bf16.mxu1 %v9042_v41  ;;  %v11946_v38 = vld [vmem:[#allocation26_spill] sm:$0xff] }
 0x443   :  { %8263 = vmatprep.mubr.bf16.mxu0 %v11921_v51  ;;  %8276 = vmatpush3.bf16.msra.mxu0 %v9009_v47  ;;  %v9018_v47 = vld [vmem:[#allocation2 + $0x628] sm:$0xff]   ;;  %v9033_v51 = vld [vmem:[#allocation2 + $0x6a0] sm:$0xff]  }
 0x444   :  { %8277 = vmatprep.subr.bf16.mxu0 %v9010_v9 }
 0x445   :  { %8406 = vmatpush3.bf16.msra.mxu1 %v9042_v41 }
 0x447   :  { %8278 = vmatpush3.bf16.msra.mxu0 %v9010_v9  ;;  %v11938_v9 = vpack.c.bf16 %v11089_v33, %v11012_v13  ;;  %v9023_v13 = vld [vmem:[#allocation2 + $0x650] sm:$0xff]  }
 0x448   :  { %8279 = vmatprep.subr.bf16.mxu0 %v9011_v21 }
 0x44a   :  { %8264 = vmatmul.mubr.bf16.gmra.mrb[28].mxu0 %v11922_v14  ;;  %v11948_v14 = vld [vmem:[#allocation31_spill] sm:$0xff] }
 0x44b   :  { %8280 = vmatpush3.bf16.msra.mxu0 %v9011_v21  ;;  %8283 = vmatprep.mubr.msk.bf16.mxu0 %vm11926_vm11, %v11924_v25  ;;  %v9034_v21 = vld [vmem:[#allocation2 + $0x6a8] sm:$0xff]   ;;  %v11950_v25 = vld [vmem:[#allocation22_spill] sm:$0xff] }
 0x44c   :  { %8281 = vmatprep.subr.bf16.mxu0 %v9012_v1 }
 0x44f   :  { %8282 = vmatpush3.bf16.msra.mxu0 %v9012_v1  ;;  %v11947_v1 = vld [vmem:[#allocation51_spill] sm:$0xff] }
 0x450   :  { %8299 = vmatprep.subr.bf16.mxu0 %v9013_v4 }
 0x452   :  { %8284 = vmatmul.mubr.msk.bf16.vlgmr.msra.gmra.mrb[16].mxu0 %vm9576_vm6, %v11929_v45 }
 0x453   :  { %8287 = vmatprep.mubr.msk.bf16.mxu0 %vm9624_vm8, %v11931_v15  ;;  %8300 = vmatpush3.bf16.msra.mxu0 %v9013_v4  ;;  %v11952_v4 = vld [vmem:[#allocation50_spill] sm:$0xff] }
 0x454   :  { %8301 = vmatprep.subr.bf16.mxu0 %v9014_v23 }
 0x457   :  { %8302 = vmatpush3.bf16.msra.mxu0 %v9014_v23 }
 0x458   :  { %8303 = vmatprep.subr.bf16.mxu0 %v9015_v37 }
 0x45a   :  { %8288 = vmatmul.mubr.msk.bf16.gmra.mrb[20].mxu0 %vm11644_vm14, %v11932_v50  ;;  %vm11940_vm14 = vnez %v11939_v61 }
 0x45b   :  { %8291 = vmatprep.mubr.msk.bf16.mxu0 %vm11935_vm2, %v11933_v39  ;;  %8304 = vmatpush3.bf16.msra.mxu0 %v9015_v37 }
 0x45c   :  { %8305 = vmatprep.subr.bf16.mxu0 %v9016_v10 }
 0x45f   :  { %8306 = vmatpush3.bf16.msra.mxu0 %v9016_v10 }
 0x460   :  { %8307 = vmatprep.subr.bf16.mxu0 %v9017_v18 }
 0x462   :  { %8292 = vmatmul.mubr.msk.bf16.gmra.mrb[24].mxu0 %vm9811_vm9, %v11936_v27 }
 0x463   :  { %8295 = vmatprep.mubr.msk.bf16.mxu0 %vm9849_vm1, %v11937_v16  ;;  %8308 = vmatpush3.bf16.msra.mxu0 %v9017_v18 }
 0x464   :  { %8309 = vmatprep.subr.bf16.mxu0 %v9018_v47 }
 0x467   :  { %8310 = vmatpush3.bf16.msra.mxu0 %v9018_v47 }
 0x468   :  { %8311 = vmatprep.subr.bf16.mxu0 %v9019_v46 }
 0x46a   :  { %8296 = vmatmul.mubr.msk.bf16.gmra.mrb[28].mxu0 %vm11760_vm13, %v11938_v9 }
 0x46b   :  { %8312 = vmatpush3.bf16.msra.mxu0 %v9019_v46  ;;  %8315 = vmatprep.mubr.msk.bf16.mxu0 %vm11892_vm10, %v10792_v54  ;;  %v6940_v54 = vpack.c.bf16 %v11802_v60, %v11899_v24  ;;  %v5640_v24 = vpack.c.bf16 %v11802_v60, %v10814_v57  ;;  %v5644_v57 = vpack.c.bf16 %v11802_v60, %v10965_v48 }
 0x46c   :  { %8313 = vmatprep.subr.bf16.mxu0 %v9020_v5  ;;  %v6980_v48 = vpack.c.bf16 %v11802_v60, %v11075_v55  ;;  %v9043_v55 = vld [vmem:[#allocation6 + $0x30] sm:$0xff]  }
 0x46d   :  { %8407 = vmatprep.subr.bf16.mxu1 %v9043_v55 }
 0x46e   :  { %8408 = vmatpush3.bf16.msra.mxu1 %v9043_v55 }
 0x46f   :  { %8314 = vmatpush3.bf16.msra.mxu0 %v9020_v5  ;;  %8409 = vmatprep.subr.bf16.mxu1 %v9044_v43 }
 0x470   :  { %8331 = vmatprep.subr.bf16.mxu0 %v9021_v20 }
 0x472   :  { %8316 = vmatmul.mubr.msk.bf16.vlgmr.msra.gmra.mrb[16].mxu0 %vm9547_vm3, %v10844_v34  ;;  %v6952_v34 = vpack.c.bf16 %v11802_v60, %v11053_v53  ;;  %vm11942_vm3 = vnez %v11941_v40  ;;  %v9031_v53 = vld [vmem:[#allocation2 + $0x690] sm:$0xff]   ;;  %8410 = vmatpush3.bf16.msra.mxu1 %v9044_v43 }
 0x473   :  { %8319 = vmatprep.mubr.msk.bf16.mxu0 %vm9598_vm7, %v10875_v62  ;;  %8332 = vmatpush3.bf16.msra.mxu0 %v9021_v20  ;;  %v9027_v62 = vld [vmem:[#allocation2 + $0x670] sm:$0xff]   ;;  %vm11951_vm7 = vnez %v11950_v25 }
 0x474   :  { %8333 = vmatprep.subr.bf16.mxu0 %v9022_v2 }
 0x477   :  { %8334 = vmatpush3.bf16.msra.mxu0 %v9022_v2 }
 0x478   :  { %8335 = vmatprep.subr.bf16.mxu0 %v9023_v13 }
 0x47a   :  { %8320 = vmatmul.mubr.msk.bf16.gmra.mrb[20].mxu0 %vm11940_vm14, %v6940_v54 }
 0x47b   :  { %8323 = vmatprep.mubr.msk.bf16.mxu0 %vm11905_vm5, %v10952_v3  ;;  %8336 = vmatpush3.bf16.msra.mxu0 %v9023_v13  ;;  %v9028_v3 = vld [vmem:[#allocation2 + $0x678] sm:$0xff]  }
 0x47c   :  { %8337 = vmatprep.subr.bf16.mxu0 %v9024_v44 }
 0x47f   :  { %8338 = vmatpush3.bf16.msra.mxu0 %v9024_v44 }
 0x480   :  { %8339 = vmatprep.subr.bf16.mxu0 %v9025_v49 }
 0x482   :  { %8324 = vmatmul.mubr.msk.bf16.gmra.mrb[24].mxu0 %vm11649_vm15, %v11004_v31  ;;  %v11945_v31 = vld [vmem:[#allocation21_spill] sm:$0xff] }
 0x483   :  { %8327 = vmatprep.mubr.msk.bf16.mxu0 %vm9823_vm0, %v11031_v12  ;;  %8340 = vmatpush3.bf16.msra.mxu0 %v9025_v49  ;;  %v11944_v12 = vld [vmem:[#allocation25_spill] sm:$0xff] }
 0x484   :  { %8341 = vmatprep.subr.bf16.mxu0 %v9026_v56 }
 0x487   :  { %8342 = vmatpush3.bf16.msra.mxu0 %v9026_v56 }
 0x488   :  { %8343 = vmatprep.subr.bf16.mxu0 %v9027_v62 }
 0x48a   :  { %8328 = vmatmul.mubr.msk.bf16.gmra.mrb[28].mxu0 %vm11942_vm3, %v6952_v34 }
 0x48b   :  { %8344 = vmatpush3.bf16.msra.mxu0 %v9027_v62  ;;  %8347 = vmatprep.mubr.bf16.mxu0 %v11943_v63 }
 0x48c   :  { %8345 = vmatprep.subr.bf16.mxu0 %v9028_v3 }
 0x48f   :  { %8346 = vmatpush3.bf16.msra.mxu0 %v9028_v3 }
 0x490   :  { %8363 = vmatprep.subr.bf16.mxu0 %v9029_v0 }
 0x492   :  { %8348 = vmatmul.mubr.bf16.vlgmr.msra.gmra.mrb[16].mxu0 %v11944_v12 }
 0x493   :  { %8351 = vmatprep.mubr.bf16.mxu0 %v11945_v31  ;;  %8364 = vmatpush3.bf16.msra.mxu0 %v9029_v0 }
 0x494   :  { %8365 = vmatprep.subr.bf16.mxu0 %v9030_v7 }
 0x497   :  { %8366 = vmatpush3.bf16.msra.mxu0 %v9030_v7 }
 0x498   :  { %8367 = vmatprep.subr.bf16.mxu0 %v9031_v53 }
 0x49a   :  { %8352 = vmatmul.mubr.bf16.gmra.mrb[20].mxu0 %v5640_v24 }
 0x49b   :  { %8355 = vmatprep.mubr.bf16.mxu0 %v11946_v38  ;;  %8368 = vmatpush3.bf16.msra.mxu0 %v9031_v53 }
 0x49c   :  { %8369 = vmatprep.subr.bf16.mxu0 %v9032_v19 }
 0x49f   :  { %8370 = vmatpush3.bf16.msra.mxu0 %v9032_v19 }
 0x4a0   :  { %8371 = vmatprep.subr.bf16.mxu0 %v9033_v51 }
 0x4a2   :  { %8356 = vmatmul.mubr.bf16.gmra.mrb[24].mxu0 %v11947_v1 }
 0x4a3   :  { %8359 = vmatprep.mubr.bf16.mxu0 %v11948_v14  ;;  %8372 = vmatpush3.bf16.msra.mxu0 %v9033_v51 }
 0x4a4   :  { %8373 = vmatprep.subr.bf16.mxu0 %v9034_v21 }
 0x4a7   :  { %8374 = vmatpush3.bf16.msra.mxu0 %v9034_v21 }
 0x4a8   :  { %8375 = vmatprep.subr.bf16.mxu0 %v9035_v6 }
 0x4aa   :  { %8360 = vmatmul.mubr.bf16.gmra.mrb[28].mxu0 %v5644_v57 }
 0x4ab   :  { %8376 = vmatpush3.bf16.msra.mxu0 %v9035_v6  ;;  %8379 = vmatprep.mubr.msk.bf16.mxu0 %vm11926_vm11, %v10796_v17  ;;  %v11953_v17 = vld [vmem:[#allocation47_spill] sm:$0xff] }
 0x4ac   :  { %8377 = vmatprep.subr.bf16.mxu0 %v9036_v32 }
 0x4af   :  { %8378 = vmatpush3.bf16.msra.mxu0 %v9036_v32 }
 0x4b2   :  { %8380 = vmatmul.mubr.msk.bf16.vlgmr.msra.gmra.mrb[16].mxu0 %vm9576_vm6, %v10879_v58  ;;  %v11955_v58 = vld [vmem:[#allocation13_spill] sm:$0xff] }
 0x4b3   :  { %8383 = vmatprep.mubr.msk.bf16.mxu0 %vm9624_vm8, %v11949_v30  ;;  %vm11956_vm6 = vnez %v11955_v58 }
 0x4ba   :  { %8384 = vmatmul.mubr.msk.bf16.gmra.mrb[20].mxu0 %vm11951_vm7, %v6980_v48 }
 0x4bb   :  { %8387 = vmatprep.mubr.msk.bf16.mxu0 %vm11935_vm2, %v11952_v4  ;;  %v6995_v4 = vld [vmem:[#allocation7] ss:$0 sm:$0xff] }
 0x4c2   :  { %8388 = vmatmul.mubr.msk.bf16.gmra.mrb[24].mxu0 %vm9811_vm9, %v11953_v17 }
 0x4c3   :  { %8391 = vmatprep.mubr.msk.bf16.mxu0 %vm9849_vm1, %v11954_v35 }
 0x4ca   :  { %8392 = vmatmul.mubr.msk.bf16.gmra.mrb[28].mxu0 %vm11956_vm6, %v6992_v59 }
 0x585   :  { %v8381_v23 = vpop.f32.mrb[16].mxu0 }
 0x586   :  { %v6035_v52 = vadd.f32 %v8381_v23, %v6994_v11  ;;  %v5946_v8 = vpop.f32.mrb[17].mxu0 }
 0x587   :  { %v6033_v42 = vadd.f32 %v6994_v11, %v5946_v8  ;;  %v8382_v45 = vpop.f32.mrb[18].mxu0 }
 0x588   :  { %v6036_v28 = vadd.f32 %v8382_v45, %v6994_v11  ;;  %v5949_v29 = vpop.f32.mrb[19].mxu0  ;;  %v6051_v15 = vmax.f32 %v6035_v52, 0.0 }
 0x589   :  { %v6034_v22 = vadd.f32 %v6994_v11, %v5949_v29  ;;  %v6049_v33 = vmax.f32 %v6033_v42, 0.0 }
 0x58a   :  { %v6052_v60 = vmax.f32 %v6036_v28, 0.0 }
 0x58b   :  { %v6050_v37 = vmax.f32 %v6034_v22, 0.0 }
 0x58c   :  { %v6066_v36 = vpack.c.bf16 %v6052_v60, %v6051_v15 }
 0x58d   :  { %v6065_v10 = vpack.c.bf16 %v6050_v37, %v6049_v33  ;;  %v8385_v50 = vpop.f32.mrb[20].mxu0 }
 0x58e   :  { %v6039_v41 = vadd.f32 %v8385_v50, %v6994_v11  ;;  %v5962_v39 = vpop.f32.mrb[21].mxu0 }
 0x58f   :  { %v6037_v26 = vadd.f32 %v6994_v11, %v5962_v39  ;;  %v8386_v18 = vpop.f32.mrb[22].mxu0  ;;  %8411 = vmatprep.mubr.bf16.mxu1 %v6065_v10 }
 0x590   :  { %v6040_v47 = vadd.f32 %v8386_v18, %v6994_v11  ;;  %v5965_v27 = vpop.f32.mrb[23].mxu0  ;;  %8412 = vmatmul.mubr.bf16.vlgmr.msra.gmra.mrb[32].mxu1 %v6066_v36  ;;  %v6055_v46 = vmax.f32 %v6039_v41, 0.0 }
 0x591   :  { %v6038_v16 = vadd.f32 %v6994_v11, %v5965_v27  ;;  %v6053_v9 = vmax.f32 %v6037_v26, 0.0 }
 0x592   :  { %v6056_v5 = vmax.f32 %v6040_v47, 0.0 }
 0x593   :  { %v6054_v20 = vmax.f32 %v6038_v16, 0.0 }
 0x594   :  { %v6068_v2 = vpack.c.bf16 %v6056_v5, %v6055_v46 }
 0x595   :  { %v6067_v13 = vpack.c.bf16 %v6054_v20, %v6053_v9  ;;  %v8389_v54 = vpop.f32.mrb[24].mxu0 }
 0x596   :  { %v6043_v44 = vadd.f32 %v8389_v54, %v6994_v11  ;;  %v5978_v61 = vpop.f32.mrb[25].mxu0 }
 0x597   :  { %v6041_v49 = vadd.f32 %v6994_v11, %v5978_v61  ;;  %v8390_v56 = vpop.f32.mrb[26].mxu0  ;;  %8415 = vmatprep.mubr.bf16.mxu1 %v6067_v13 }
 0x598   :  { %v6044_v62 = vadd.f32 %v8390_v56, %v6994_v11  ;;  %v5981_v34 = vpop.f32.mrb[27].mxu0  ;;  %8416 = vmatmul.mubr.bf16.gmra.mrb[36].mxu1 %v6068_v2  ;;  %v6059_v40 = vmax.f32 %v6043_v44, 0.0 }
 0x599   :  { %v6042_v3 = vadd.f32 %v6994_v11, %v5981_v34  ;;  %v6057_v0 = vmax.f32 %v6041_v49, 0.0 }
 0x59a   :  { %v6060_v63 = vmax.f32 %v6044_v62, 0.0 }
 0x59b   :  { %v6058_v7 = vmax.f32 %v6042_v3, 0.0 }
 0x59c   :  { %v6070_v12 = vpack.c.bf16 %v6060_v63, %v6059_v40 }
 0x59d   :  { %v6069_v31 = vpack.c.bf16 %v6058_v7, %v6057_v0  ;;  %v8393_v53 = vpop.f32.mrb[28].mxu0 }
 0x59e   :  { %v6047_v24 = vadd.f32 %v8393_v53, %v6994_v11  ;;  %v5994_v19 = vpop.f32.mrb[29].mxu0 }
 0x59f   :  { %v6045_v38 = vadd.f32 %v6994_v11, %v5994_v19  ;;  %v8394_v51 = vpop.f32.mrb[30].mxu0  ;;  %8419 = vmatprep.mubr.bf16.mxu1 %v6069_v31 }
 0x5a0   :  { %v6048_v21 = vadd.f32 %v8394_v51, %v6994_v11  ;;  %v5997_v1 = vpop.f32.mrb[31].mxu0  ;;  %8420 = vmatmul.mubr.bf16.gmra.mrb[40].mxu1 %v6070_v12  ;;  %v6063_v6 = vmax.f32 %v6047_v24, 0.0 }
 0x5a1   :  { %v6046_v14 = vadd.f32 %v6994_v11, %v5997_v1  ;;  %v6061_v32 = vmax.f32 %v6045_v38, 0.0 }
 0x5a2   :  { %v6064_v57 = vmax.f32 %v6048_v21, 0.0 }
 0x5a3   :  { %v6062_v30 = vmax.f32 %v6046_v14, 0.0 }
 0x5a4   :  { %v6072_v48 = vpack.c.bf16 %v6064_v57, %v6063_v6 }
 0x5a5   :  { %v6071_v25 = vpack.c.bf16 %v6062_v30, %v6061_v32 }
 0x5a7   :  { %8423 = vmatprep.mubr.bf16.mxu1 %v6071_v25 }
 0x5a8   :  { %8424 = vmatmul.mubr.bf16.gmra.mrb[44].mxu1 %v6072_v48 }
 0x663   :  { %v8413_v17 = vpop.f32.mrb[32].mxu1 }
 0x664   :  { %v6187_v35 = vadd.f32 %v8413_v17, %v6995_v4  ;;  %v6178_v59 = vpop.f32.mrb[33].mxu1 }
 0x665   :  { %v6179_v58 = vadd.f32 %v6995_v4, %v6178_v59  ;;  %v8414_v55 = vpop.f32.mrb[34].mxu1 }
 0x666   :  { %v6190_v43 = vadd.f32 %v8414_v55, %v6995_v4  ;;  %v6181_v23 = vpop.f32.mrb[35].mxu1  ;;  %v6243_v8 = vmax.f32 %v6187_v35, 0.0 }
 0x667   :  { %v6182_v52 = vadd.f32 %v6995_v4, %v6181_v23  ;;  %v6241_v11 = vmax.f32 %v6179_v58, 0.0 }
 0x668   :  { %v6244_v42 = vmax.f32 %v6190_v43, 0.0 }
 0x669   :  { %v6242_v45 = vmax.f32 %v6182_v52, 0.0 }
 0x66a   :  { %v7044_v28 = vpack.c.bf16 %v6244_v42, %v6243_v8 }
 0x66b   :  { %v7039_v29 = vpack.c.bf16 %v6242_v45, %v6241_v11  ;;  %v8417_v22 = vpop.f32.mrb[36].mxu1 }
 0x66c   :  { %7076 = vst [vmem:[%s11336_s5 + $0x8] sm:$0xff] %v7044_v28   ;;  %v6203_v15 = vadd.f32 %v8417_v22, %v6995_v4  ;;  %v6194_v60 = vpop.f32.mrb[37].mxu1 }
 0x66d   :  { %7040 = vst [vmem:[%s11336_s5] sm:$0xff] %v7039_v29   ;;  %v6195_v33 = vadd.f32 %v6995_v4, %v6194_v60  ;;  %v8418_v37 = vpop.f32.mrb[38].mxu1 }
 0x66e   :  { %v6206_v36 = vadd.f32 %v8418_v37, %v6995_v4  ;;  %v6197_v10 = vpop.f32.mrb[39].mxu1  ;;  %v6247_v41 = vmax.f32 %v6203_v15, 0.0 }
 0x66f   :  { %v6198_v50 = vadd.f32 %v6995_v4, %v6197_v10  ;;  %v6245_v26 = vmax.f32 %v6195_v33, 0.0 }
 0x670   :  { %v6248_v39 = vmax.f32 %v6206_v36, 0.0 }
 0x671   :  { %v6246_v18 = vmax.f32 %v6198_v50, 0.0 }
 0x672   :  { %v7054_v47 = vpack.c.bf16 %v6248_v39, %v6247_v41 }
 0x673   :  { %v7049_v27 = vpack.c.bf16 %v6246_v18, %v6245_v26  ;;  %v8421_v16 = vpop.f32.mrb[40].mxu1 }
 0x674   :  { %7078 = vst [vmem:[%s11336_s5 + $0x18] sm:$0xff] %v7054_v47   ;;  %v6219_v46 = vadd.f32 %v8421_v16, %v6995_v4  ;;  %v6210_v5 = vpop.f32.mrb[41].mxu1 }
 0x675   :  { %7077 = vst [vmem:[%s11336_s5 + $0x10] sm:$0xff] %v7049_v27   ;;  %v6211_v9 = vadd.f32 %v6995_v4, %v6210_v5  ;;  %v8422_v20 = vpop.f32.mrb[42].mxu1 }
 0x676   :  { %v6222_v2 = vadd.f32 %v8422_v20, %v6995_v4  ;;  %v6213_v13 = vpop.f32.mrb[43].mxu1  ;;  %v6251_v44 = vmax.f32 %v6219_v46, 0.0 }
 0x677   :  { %v6214_v54 = vadd.f32 %v6995_v4, %v6213_v13  ;;  %v6249_v49 = vmax.f32 %v6211_v9, 0.0 }
 0x678   :  { %v6252_v61 = vmax.f32 %v6222_v2, 0.0 }
 0x679   :  { %v6250_v56 = vmax.f32 %v6214_v54, 0.0 }
 0x67a   :  { %v7064_v62 = vpack.c.bf16 %v6252_v61, %v6251_v44 }
 0x67b   :  { %v7059_v34 = vpack.c.bf16 %v6250_v56, %v6249_v49  ;;  %v8425_v3 = vpop.f32.mrb[44].mxu1 }
 0x67c   :  { %7080 = vst [vmem:[%s11336_s5 + $0x28] sm:$0xff] %v7064_v62   ;;  %v6235_v40 = vadd.f32 %v8425_v3, %v6995_v4  ;;  %v6226_v63 = vpop.f32.mrb[45].mxu1 }
 0x67d   :  { %7079 = vst [vmem:[%s11336_s5 + $0x20] sm:$0xff] %v7059_v34   ;;  %v6227_v0 = vadd.f32 %v6995_v4, %v6226_v63  ;;  %v8426_v7 = vpop.f32.mrb[46].mxu1 }
 0x67e   :  { %v6238_v12 = vadd.f32 %v8426_v7, %v6995_v4  ;;  %v6229_v31 = vpop.f32.mrb[47].mxu1  ;;  %v6255_v24 = vmax.f32 %v6235_v40, 0.0 }
 0x67f   :  { %v6230_v53 = vadd.f32 %v6995_v4, %v6229_v31  ;;  %v6253_v38 = vmax.f32 %v6227_v0, 0.0 }
 0x680   :  { %v6256_v19 = vmax.f32 %v6238_v12, 0.0 }
 0x681   :  { %v6254_v51 = vmax.f32 %v6230_v53, 0.0 }
 0x682   :  { %v7074_v21 = vpack.c.bf16 %v6256_v19, %v6255_v24 }
 0x683   :  { %v7069_v1 = vpack.c.bf16 %v6254_v51, %v6253_v38 }
 0x684   :  { %7082 = vst [vmem:[%s11336_s5 + $0x38] sm:$0xff] %v7074_v21  }
 0x685   :  { %7081 = vst [vmem:[%s11336_s5 + $0x30] sm:$0xff] %v7069_v1  }
 0x686   :  { %6341 = vsyncpa [#allocation3], 1 }
 0x687   :  { %6342 = vsyncpa [#allocation5], 1 }
 0x688   :  { %6343 = vsyncpa [#allocation8], 1 }

</bundles_post_ra>
